<compile_context>
chip_gen: v6e
topology: v6e:2x2x1
jax: 0.10.0
libtpu: 0.0.40
codegen_flags: <defaults>
</compile_context>

<pallas_src>
import functools

import jax
import jax.numpy as jnp
from jax import lax
from jax.experimental import pallas as pl
from jax.experimental.pallas import tpu as pltpu


# ------------------------------ Pallas kernel -------------------------------

def _pos_attn_kernel(x_ref, wq_ref, wk_ref, wv_ref, gamma_ref, o_ref,
                     k_sc, v_sc, *, tq, hw_valid):
    """One (batch, query-tile) step of position attention.

    x_ref    : (1, C, HWp)  bf16 input features (NCHW flattened, HW padded)
    w*_ref   : (Cq, C) / (Cq, C) / (C, C)  bf16 1x1-conv weights
    gamma_ref: (1,) f32 scalar residual gain (SMEM)
    o_ref    : (1, C, TQ) f32 output columns [qi*TQ, (qi+1)*TQ)
    k_sc     : (Cq, HWp) bf16 scratch — key projection, computed once per batch
    v_sc     : (C,  HWp) bf16 scratch — value projection, computed once per batch
    """
    qi = pl.program_id(1)

    # --- per-batch phase: K/V projections hoisted out of the query-tile loop.
    @pl.when(qi == 0)
    def _():
        xb = x_ref[0]                                            # (C, HWp) bf16
        k_sc[...] = jnp.dot(wk_ref[...], xb,
                            preferred_element_type=jnp.float32).astype(jnp.bfloat16)
        v_sc[...] = jnp.dot(wv_ref[...], xb,
                            preferred_element_type=jnp.float32).astype(jnp.bfloat16)

    # --- per-tile phase.
    q_start = pl.multiple_of(qi * tq, tq)
    x_q = x_ref[0, :, pl.ds(q_start, tq)]                        # (C, TQ) bf16

    # Q projection for this tile only (1x1 conv == channel matmul, no im2col).
    q = jnp.dot(wq_ref[...], x_q, preferred_element_type=jnp.float32)  # (Cq, TQ)

    # energy[i, j] = sum_c q[c, i] * k[c, j]   -> (TQ, HWp), lane-dense rows.
    # Note: contraction depth is only Cq = C//8 (MXU underfilled) — the deep
    # matmuls (projections / PV) dominate, so this is accepted.
    energy = lax.dot_general(
        q.astype(jnp.bfloat16), k_sc[...],
        (((0,), (0,)), ((), ())),
        preferred_element_type=jnp.float32)

    if hw_valid is not None:   # ragged HW: mask padded key columns with -inf
        col = lax.broadcasted_iota(jnp.int32, energy.shape, 1)
        energy = jnp.where(col < hw_valid, energy, -jnp.inf)

    # Softmax numerator only; single (TQ, HWp) bf16 array stays live.
    p = jnp.exp(energy - jnp.max(energy, axis=-1, keepdims=True)).astype(jnp.bfloat16)

    # Un-normalized PV: out_un[c, i] = sum_j v[c, j] * p[i, j]   -> (C, TQ)
    out_un = lax.dot_general(
        v_sc[...], p, (((1,), (1,)), ((), ())),
        preferred_element_type=jnp.float32)

    # Row sums of p, produced lane-dense on the MXU: (8, TQ), rows identical.
    row_sum = lax.dot_general(
        jnp.ones((8, p.shape[1]), jnp.bfloat16), p,
        (((1,), (1,)), ((), ())),
        preferred_element_type=jnp.float32)
    inv = pl.reciprocal(row_sum[0:1, :], approx=False)           # exact, (1, TQ)

    # gamma * softmax(QK^T) V + x   (residual uses the bf16-rounded x).
    o_ref[0] = gamma_ref[0] * (out_un * inv) + x_q.astype(jnp.float32)


# --------------------------------- wrapper ----------------------------------

def _round_up(n, m):
    return ((n + m - 1) // m) * m


def _pick_q_tile(hw_p, c):
    """Largest lane-dense query tile dividing HWp, bounded by a VMEM estimate."""
    for t in (512, 256, 128):
        # energy f32 + p bf16 + out/q f32 temporaries for this tile
        tmp_bytes = t * hw_p * (4 + 2) + 2 * c * t * 4
        if hw_p % t == 0 and tmp_bytes <= 24 * 1024 * 1024:
            return t
    return 128


def _vmem_limit_bytes(c, cq, hw_p, tq):
    """Derive the scoped-VMEM request from the actual block sizes."""
    in_x = 2 * c * hw_p * 2                         # double-buffered bf16 x block
    wts = 2 * (2 * cq * c + c * c) * 2              # double-buffered bf16 weights
    out = 2 * c * tq * 4                            # double-buffered f32 out block
    scr = (cq + c) * hw_p * 2                       # K/V bf16 scratch
    tmp = tq * hw_p * (4 + 2) + (cq + 2 * c) * tq * 4
    need = in_x + wts + out + scr + tmp
    return int(min(100 * 1024 * 1024, max(2 * need, 32 * 1024 * 1024)))


def position_attention(x, params):
    """x: (B, C, H, W) float32 (PyTorch NCHW).  Returns (B, C, H, W) float32."""
    B, C, H, W = x.shape
    HW = H * W
    HWp = _round_up(HW, 128)
    tq = _pick_q_tile(HWp, C)
    n_q = HWp // tq
    hw_valid = HW if HWp != HW else None

    # Flatten (pure reshape, no NCHW<->NHWC transpose), pad HW, cast once.
    x_flat = x.reshape(B, C, HW)
    if HWp != HW:
        x_flat = jnp.pad(x_flat, ((0, 0), (0, 0), (0, HWp - HW)))
    x_bf16 = x_flat.astype(jnp.bfloat16)

    wq = params['wq'].astype(jnp.bfloat16)
    wk = params['wk'].astype(jnp.bfloat16)
    wv = params['wv'].astype(jnp.bfloat16)
    gamma = params['gamma'].astype(jnp.float32)
    cq = wq.shape[0]

    cost = pl.CostEstimate(
        flops=int(2 * B * ((2 * cq + C) * C * HWp + (cq + C + 8) * HWp * HWp)),
        transcendentals=int(B * HWp * HWp),
        bytes_accessed=int(B * C * HWp * 2 + (2 * cq * C + C * C) * 2
                           + B * C * HWp * 4),
    )

    out = pl.pallas_call(
        functools.partial(_pos_attn_kernel, tq=tq, hw_valid=hw_valid),
        out_shape=jax.ShapeDtypeStruct((B, C, HWp), jnp.float32),
        grid=(B, n_q),
        in_specs=[
            pl.BlockSpec((1, C, HWp), lambda b, qi: (b, 0, 0)),   # revisited over qi
            pl.BlockSpec((cq, C), lambda b, qi: (0, 0)),
            pl.BlockSpec((cq, C), lambda b, qi: (0, 0)),
            pl.BlockSpec((C, C), lambda b, qi: (0, 0)),
            pl.BlockSpec(memory_space=pltpu.MemorySpace.SMEM),    # gamma scalar
        ],
        out_specs=pl.BlockSpec((1, C, tq), lambda b, qi: (b, 0, qi)),
        scratch_shapes=[
            pltpu.VMEM((cq, HWp), jnp.bfloat16),   # K projection (per batch)
            pltpu.VMEM((C, HWp), jnp.bfloat16),    # V projection (per batch)
        ],
        compiler_params=pltpu.CompilerParams(
            # batch axis parallel (megacore on v7x); qi arbitrary so the K/V
            # scratch carry across query tiles is legal.
            dimension_semantics=("parallel", "arbitrary"),
            vmem_limit_bytes=_vmem_limit_bytes(C, cq, HWp, tq)),
        cost_estimate=cost,
    )(x_bf16, wq, wk, wv, gamma)

    return out[:, :, :HW].reshape(B, C, H, W)


# ----------------------------- pure-JAX reference ---------------------------

def position_attention_ref(x, params):
    """f32 reference matching the PyTorch forward exactly."""
    B, C, H, W = x.shape
    HW = H * W
    xf = x.reshape(B, C, HW).astype(jnp.float32)
    q = jnp.einsum('oc,bcn->bon', params['wq'], xf)     # (B, C//8, HW)
    k = jnp.einsum('oc,bcn->bon', params['wk'], xf)     # (B, C//8, HW)
    v = jnp.einsum('oc,bcn->bon', params['wv'], xf)     # (B, C,    HW)
    energy = jnp.einsum('bci,bcj->bij', q, k)           # (B, HW, HW)
    attn = jax.nn.softmax(energy, axis=-1)
    out = jnp.einsum('bcj,bij->bci', v, attn)           # (B, C, HW)
    return (params['gamma'][0] * out + xf).reshape(B, C, H, W)


# --------------------------------- params -----------------------------------

def init_params(key, ch_in):
    """1x1 conv weights stored once as (Cout, Cin); bias=False as in the module."""
    kq, kk, kv = jax.random.split(key, 3)
    cq = ch_in // 8

    def conv_w(k, cout, cin):
        bound = 1.0 / (cin ** 0.5)
        return jax.random.uniform(k, (cout, cin), jnp.float32, -bound, bound)

    return dict(
        wq=conv_w(kq, cq, ch_in),
        wk=conv_w(kk, cq, ch_in),
        wv=conv_w(kv, ch_in, ch_in),
        gamma=jnp.zeros((1,), jnp.float32),   # nn.Parameter(torch.zeros(1))
    )


# ----------------------------------- main ------------------------------------

if __name__ == "__main__":
    key = jax.random.PRNGKey(0)
    kx, kp = jax.random.split(key)

    # ch_in must be >= 8 for the module's ch_in // 8 query/key width.
    # H*W = 1024 -> tq = 512, n_q = 2: exercises the hoisted-K/V scratch path.
    B, C, H, W = 2, 32, 32, 32
    x = jax.random.normal(kx, (B, C, H, W), jnp.float32)
    params = init_params(kp, ch_in=C)
    # PyTorch initializes gamma to 0 (output == input); use a non-zero gamma so
    # the attention path actually contributes to the checked output.
    params = dict(params, gamma=jnp.full((1,), 1.5, jnp.float32))

    fwd = jax.jit(position_attention)
    out = jax.block_until_ready(fwd(x, params))

    assert out.shape == (B, C, H, W), out.shape
    assert bool(jnp.all(jnp.isfinite(out)))

    # Sanity-check against the f32 reference (bf16 MXU operands / bf16 residual
    # source -> deliberately loose tolerance).
    ref = position_attention_ref(x, params)
    err = float(jnp.max(jnp.abs(out - ref)))
    assert err < 5e-2, f"max abs err {err}"

    print("KERNEL_OK")
</pallas_src>

<mosaic_0001>
module attributes {stable_mosaic.version = 11 : i64} {
  func.func @_pos_attn_kernel(%arg0: i32, %arg1: i32, %arg2: memref<1x32x1024xbf16, #tpu.memory_space<vmem>>, %arg3: memref<4x32xbf16, #tpu.memory_space<vmem>>, %arg4: memref<4x32xbf16, #tpu.memory_space<vmem>>, %arg5: memref<32x32xbf16, #tpu.memory_space<vmem>>, %arg6: memref<1xf32, #tpu.memory_space<smem>>, %arg7: memref<1x32x512xf32, #tpu.memory_space<vmem>>, %arg8: memref<4x1024xbf16, #tpu.memory_space<vmem>>, %arg9: memref<32x1024xbf16, #tpu.memory_space<vmem>>) attributes {dimension_semantics = [#tpu.dimension_semantics<parallel>, #tpu.dimension_semantics<arbitrary>], iteration_bounds = array<i64: 2, 2>, scalar_prefetch = 0 : i64, scratch_operands = 2 : i64, tpu.core_type = #tpu.core_type<tc>, window_params = [{transform_indices = @transform_0, window_bounds = array<i64: 1, 32, 1024>}, {pipeline_mode = #tpu.pipeline_mode<synchronous>, transform_indices = @transform_1, window_bounds = array<i64: 4, 32>}, {pipeline_mode = #tpu.pipeline_mode<synchronous>, transform_indices = @transform_2, window_bounds = array<i64: 4, 32>}, {pipeline_mode = #tpu.pipeline_mode<synchronous>, transform_indices = @transform_3, window_bounds = array<i64: 32, 32>}, {transform_indices = @transform_4, window_bounds = array<i64: 1>}, {transform_indices = @transform_5, window_bounds = array<i64: 1, 32, 512>}]} {
    %c0_i32 = arith.constant 0 : i32
    %0 = arith.cmpi eq, %arg1, %c0_i32 : i32
    %1 = arith.extui %0 : i1 to i32
    %c0_i32_0 = arith.constant 0 : i32
    %2 = arith.cmpi ne, %1, %c0_i32_0 : i32
    scf.if %2 {
      %c0_17 = arith.constant 0 : index
      %c0_18 = arith.constant 0 : index
      %c0_19 = arith.constant 0 : index
      %35 = vector.load %arg2[%c0_17, %c0_18, %c0_19] : memref<1x32x1024xbf16, #tpu.memory_space<vmem>>, vector<1x32x1024xbf16>
      %36 = vector.shape_cast %35 : vector<1x32x1024xbf16> to vector<32x1024xbf16>
      %c0_20 = arith.constant 0 : index
      %c0_21 = arith.constant 0 : index
      %37 = vector.load %arg4[%c0_20, %c0_21] : memref<4x32xbf16, #tpu.memory_space<vmem>>, vector<4x32xbf16>
      %cst_22 = arith.constant dense<0.000000e+00> : vector<4x1024xf32>
      %38 = tpu.matmul %37, %36, %cst_22 {dimension_numbers = #tpu.dot_dimension_numbers<[1], [0], [0], [1], [0, 0, 1, 1], [], []>} : vector<4x32xbf16>, vector<32x1024xbf16>, vector<4x1024xf32> -> vector<4x1024xf32>
      %39 = arith.truncf %38 : vector<4x1024xf32> to vector<4x1024xbf16>
      %c0_23 = arith.constant 0 : index
      %c0_24 = arith.constant 0 : index
      %40 = vector.load %arg8[%c0_23, %c0_24] : memref<4x1024xbf16, #tpu.memory_space<vmem>>, vector<4x1024xbf16>
      tpu.vector_store %arg8[%c0_23, %c0_24], %39 {strides = array<i32>} : memref<4x1024xbf16, #tpu.memory_space<vmem>>, vector<4x1024xbf16>,
      %c0_25 = arith.constant 0 : index
      %c0_26 = arith.constant 0 : index
      %41 = vector.load %arg5[%c0_25, %c0_26] : memref<32x32xbf16, #tpu.memory_space<vmem>>, vector<32x32xbf16>
      %cst_27 = arith.constant dense<0.000000e+00> : vector<32x1024xf32>
      %42 = tpu.matmul %41, %36, %cst_27 {dimension_numbers = #tpu.dot_dimension_numbers<[1], [0], [0], [1], [0, 0, 1, 1], [], []>} : vector<32x32xbf16>, vector<32x1024xbf16>, vector<32x1024xf32> -> vector<32x1024xf32>
      %43 = arith.truncf %42 : vector<32x1024xf32> to vector<32x1024xbf16>
      %c0_28 = arith.constant 0 : index
      %c0_29 = arith.constant 0 : index
      %44 = vector.load %arg9[%c0_28, %c0_29] : memref<32x1024xbf16, #tpu.memory_space<vmem>>, vector<32x1024xbf16>
      tpu.vector_store %arg9[%c0_28, %c0_29], %43 {strides = array<i32>} : memref<32x1024xbf16, #tpu.memory_space<vmem>>, vector<32x1024xbf16>,
    } else {
    }
    %c512_i32 = arith.constant 512 : i32
    %3 = arith.muli %arg1, %c512_i32 : i32
    %4 = tpu.assume_multiple %3, 512 : i32
    %c0 = arith.constant 0 : index
    %c0_1 = arith.constant 0 : index
    %5 = arith.index_cast %4 : i32 to index
    %6 = vector.load %arg2[%c0, %c0_1, %5] : memref<1x32x1024xbf16, #tpu.memory_space<vmem>>, vector<1x32x512xbf16>
    %7 = vector.shape_cast %6 : vector<1x32x512xbf16> to vector<32x512xbf16>
    %c0_2 = arith.constant 0 : index
    %c0_3 = arith.constant 0 : index
    %8 = vector.load %arg3[%c0_2, %c0_3] : memref<4x32xbf16, #tpu.memory_space<vmem>>, vector<4x32xbf16>
    %cst = arith.constant dense<0.000000e+00> : vector<4x512xf32>
    %9 = tpu.matmul %8, %7, %cst {dimension_numbers = #tpu.dot_dimension_numbers<[1], [0], [0], [1], [0, 0, 1, 1], [], []>} : vector<4x32xbf16>, vector<32x512xbf16>, vector<4x512xf32> -> vector<4x512xf32>
    %10 = arith.truncf %9 : vector<4x512xf32> to vector<4x512xbf16>
    %c0_4 = arith.constant 0 : index
    %c0_5 = arith.constant 0 : index
    %11 = vector.load %arg8[%c0_4, %c0_5] : memref<4x1024xbf16, #tpu.memory_space<vmem>>, vector<4x1024xbf16>
    %cst_6 = arith.constant dense<0.000000e+00> : vector<512x1024xf32>
    %12 = tpu.matmul %10, %11, %cst_6 {dimension_numbers = #tpu.dot_dimension_numbers<[0], [0], [1], [1], [0, 1, 1, 1], [], []>} : vector<4x512xbf16>, vector<4x1024xbf16>, vector<512x1024xf32> -> vector<512x1024xf32>
    %cst_7 = arith.constant dense<0xFF800000> : vector<512xf32>
    %13 = vector.multi_reduction <maximumf>, %12, %cst_7 [1] : vector<512x1024xf32> to vector<512xf32>
    %14 = vector.shape_cast %13 : vector<512xf32> to vector<512x1xf32>
    %15 = vector.broadcast %14 : vector<512x1xf32> to vector<512x1024xf32>
    %16 = arith.subf %12, %15 : vector<512x1024xf32>
    %17 = math.exp %16 : vector<512x1024xf32>
    %18 = arith.truncf %17 : vector<512x1024xf32> to vector<512x1024xbf16>
    %c0_8 = arith.constant 0 : index
    %c0_9 = arith.constant 0 : index
    %19 = vector.load %arg9[%c0_8, %c0_9] : memref<32x1024xbf16, #tpu.memory_space<vmem>>, vector<32x1024xbf16>
    %cst_10 = arith.constant dense<0.000000e+00> : vector<32x512xf32>
    %20 = tpu.matmul %19, %18, %cst_10 {dimension_numbers = #tpu.dot_dimension_numbers<[1], [1], [0], [0], [0, 0, 1, 0], [], []>} : vector<32x1024xbf16>, vector<512x1024xbf16>, vector<32x512xf32> -> vector<32x512xf32>
    %cst_11 = arith.constant 1.000000e+00 : bf16
    %21 = vector.broadcast %cst_11 : bf16 to vector<8x1024xbf16>
    %cst_12 = arith.constant dense<0.000000e+00> : vector<8x512xf32>
    %22 = tpu.matmul %21, %18, %cst_12 {dimension_numbers = #tpu.dot_dimension_numbers<[1], [1], [0], [0], [0, 0, 1, 0], [], []>} : vector<8x1024xbf16>, vector<512x1024xbf16>, vector<8x512xf32> -> vector<8x512xf32>
    %23 = vector.extract_strided_slice %22 {offsets = [0, 0], sizes = [1, 512], strides = [1, 1]} : vector<8x512xf32> to vector<1x512xf32>
    %24 = tpu.reciprocal %23 : vector<1x512xf32> -> vector<1x512xf32>
    %c0_13 = arith.constant 0 : index
    %25 = memref.load %arg6[%c0_13] : memref<1xf32, #tpu.memory_space<smem>>
    %26 = vector.broadcast %24 : vector<1x512xf32> to vector<32x512xf32>
    %27 = arith.mulf %20, %26 : vector<32x512xf32>
    %28 = vector.broadcast %25 : f32 to vector<32x512xf32>
    %29 = arith.mulf %28, %27 : vector<32x512xf32>
    %30 = arith.extf %7 : vector<32x512xbf16> to vector<32x512xf32>
    %31 = arith.addf %29, %30 : vector<32x512xf32>
    %c0_14 = arith.constant 0 : index
    %c0_15 = arith.constant 0 : index
    %c0_16 = arith.constant 0 : index
    %32 = vector.load %arg7[%c0_14, %c0_15, %c0_16] : memref<1x32x512xf32, #tpu.memory_space<vmem>>, vector<1x32x512xf32>
    %33 = vector.shape_cast %32 : vector<1x32x512xf32> to vector<32x512xf32>
    %34 = vector.shape_cast %31 : vector<32x512xf32> to vector<1x32x512xf32>
    tpu.vector_store %arg7[%c0_14, %c0_15, %c0_16], %34 {strides = array<i32>} : memref<1x32x512xf32, #tpu.memory_space<vmem>>, vector<1x32x512xf32>,
    return
  }
  func.func @transform_0(%arg0: i32, %arg1: i32) -> (i32, i32, i32) {
    %c0_i32 = arith.constant 0 : i32
    %c0_i32_0 = arith.constant 0 : i32
    %c0_i32_1 = arith.constant 0 : i32
    return %arg0, %c0_i32, %c0_i32_0 : i32, i32, i32
  }
  func.func @transform_1(%arg0: i32, %arg1: i32) -> (i32, i32) {
    %c0_i32 = arith.constant 0 : i32
    %c0_i32_0 = arith.constant 0 : i32
    %c0_i32_1 = arith.constant 0 : i32
    return %c0_i32, %c0_i32_0 : i32, i32
  }
  func.func @transform_2(%arg0: i32, %arg1: i32) -> (i32, i32) {
    %c0_i32 = arith.constant 0 : i32
    %c0_i32_0 = arith.constant 0 : i32
    %c0_i32_1 = arith.constant 0 : i32
    return %c0_i32, %c0_i32_0 : i32, i32
  }
  func.func @transform_3(%arg0: i32, %arg1: i32) -> (i32, i32) {
    %c0_i32 = arith.constant 0 : i32
    %c0_i32_0 = arith.constant 0 : i32
    %c0_i32_1 = arith.constant 0 : i32
    return %c0_i32, %c0_i32_0 : i32, i32
  }
  func.func @transform_4(%arg0: i32, %arg1: i32) -> i32 {
    %c0_i32 = arith.constant 0 : i32
    %c0_i32_0 = arith.constant 0 : i32
    return %c0_i32 : i32
  }
  func.func @transform_5(%arg0: i32, %arg1: i32) -> (i32, i32, i32) {
    %c0_i32 = arith.constant 0 : i32
    %c0_i32_0 = arith.constant 0 : i32
    return %arg0, %c0_i32, %arg1 : i32, i32, i32
  }
}

</mosaic_0001>

<bundles_post_ra>
// kernel: position_attention.1
= control target key start
LH: loop header
LB: loop body
LE: loop exit
PB: predicated region body
PF: predicated region fallthrough
CT: control target
= control target key end

     0   :  { %s12394_s0 = inlined_call_operand.vmem [shape: bf16[2,32,1024], index: 0, kind: input, shape index: {}]   ;;  %s12395_s1 = inlined_call_operand.vmem [shape: bf16[4,32], index: 1, kind: input, shape index: {}]   ;;  %s12396_s2 = inlined_call_operand.vmem [shape: bf16[4,32], index: 2, kind: input, shape index: {}]   ;;  %s12397_s3 = inlined_call_operand.vmem [shape: bf16[32,32], index: 3, kind: input, shape index: {}]   ;;  %s12398_s4 = inlined_call_operand.<no memory space> [shape: f32[1], index: 4, kind: input, shape index: {}]   ;;  %s12399_s5 = inlined_call_operand.vmem [shape: f32[2,32,1024], index: 5, kind: output, shape index: {}]  }
   0x1   :  { %10 = sst [smem:[#allocation4]] %s12398_s4 }
   0x2   :  { %s7604_s20 = smov 0   ;;  %s7606_s21 = smov 0  }
   0x3   :  { %s7608_s22 = smov 0   ;;  %s7610_s23 = smov 0  }
   0x4   :  { %s7612_s24 = smov 0   ;;  %s7614_s25 = smov 0  }
   0x5   :  { %s7616_s26 = smov 0  }
   0x6 LB: > { %s25_s4 = sadd.s32 1, %s7556_s24  ;;  %s28_s27 = sadd.s32 1, %s7560_s25  ;;  %s7564_s26 = sphi %s7616_s26, %s16_s26   ;;  %s7560_s25 = sphi %s7614_s25, %s15052_s25   ;;  %s7556_s24 = sphi %s7612_s24, %s15051_s24   ;;  %s7552_s23 = sphi %s7610_s23, %s15050_s23   ;;  %s7548_s22 = sphi %s7608_s22, %s15049_s22   ;;  %s7544_s21 = sphi %s7606_s21, %s15048_s21   ;;  %s7540_s20 = sphi %s7604_s20, %s15047_s20  }
   0x7   : > { %p26_p0 = scmp.ge.s32.totalorder %s25_s4, 2  ;;  %s6128_s28 = sadd.s32 4294967295, %s7564_s26  }
   0x8   : > { %p157_p1 = scmp.ne.s32.totalorder %s7544_s21, %s7540_s20  ;;  %p158_p2 = scmp.eq.s32.totalorder %s6128_s28, 3 }
   0x9   : > { %s15054_s4 = smov (%p26_p0, %s25_s4), 0  ;;  %s15056_s27 = smov (!%p26_p0, %s28_s27), %s7560_s25 }
   0xa   : > { %s143_s29 = ssub.s32 %s7556_s24, %s15054_s4  ;;  %p30_p3 = scmp.ge.s32.totalorder %s15056_s27, 2 }
   0xb   : > { %p6132_p4 = scmp.ge.s32.totalorder %s7564_s26, 1  ;;  %p7650_p5 = por %p158_p2, %p157_p1 }
   0xc   : > { %p202_p6 = scmp.lt.s32.totalorder %s7564_s26, 5  ;;  %s15058_s27 = smov (%p30_p3, %s15056_s27), 0 }
   0xd   : > { %s142_s6 = ssub.s32 %s7560_s25, %s15058_s27  ;;  %s147_s8 = sadd.s32 1, %s7544_s21 }
   0xe   : > { %p203_p7 = pnand %p6132_p4, %p202_p6  ;;  %s144_s7 = sor.u32 %s143_s29, %s142_s6 }
   0xf   : > { %p145_p8 = scmp.eq.s32.totalorder %s144_s7, 0 }
  0x10   : > { %206 = sbr.rel (%p203_p7) target bundleno = 2633 (0xa49), region = 40 }
  0x11   : > { %s7661_s9 = scalar_select %p145_p8, %s7544_s21, %s147_s8  }
  0x15   : > { %s226_s10 = sand.u32 1, %s7540_s20   ;;  %p229_p9 = scmp.lt.s32.totalorder %s7552_s23, 1 }
  0x16   : > { %s6133_s11 = sshll.u32 %s226_s10, 7  ;;  %p6136_p10 = scmp.ne.s32.totalorder %s7548_s22, 0 }
  0x17   : > { %s230_s12 = scalar_select %p229_p9, %s7552_s23, 1 }
  0x18   : > { %s7671_s17 = scalar_lea.vmem [#allocation5], %s6133_s11  ;;  %240 = sbr.rel (%p6136_p10) target bundleno = 283 (0x11b), region = 44 }
  0x19   : > { %s6353_s13 = sshll.u32 %s230_s12, 7 }
  0x1a   : > { %s7669_s16 = scalar_lea.vmem %s12394_s0, %s6353_s13 }
  0x1d   : > { %v249_v0 = vld [vmem:[%s7669_s16 + $0x40] sm:$0xff]  ;;  %v250_v2 = vld [vmem:[%s7669_s16 + $0x48] sm:$0xff]  ;;  %v7566_v8 = vmov 0   ;;  %v251_v15 = vld [vmem:[%s7669_s16 + $0x50] sm:$0xff]  ;;  %vm338_vm0 = vcmask 261120   ;;  %v527_v38 = vlaneseq }
  0x1e   : > { %v253_v1 = vld [vmem:[%s7669_s16 + $0x60] sm:$0xff]  ;;  %v254_v4 = vld [vmem:[%s7669_s16 + $0x68] sm:$0xff]  ;;  %374 = vmatprep.mubr.bf16.mxu0 %v7566_v8  ;;  %415 = vmatprep.mubr.bf16.mxu1 %v7566_v8  ;;  %v255_v16 = vld [vmem:[%s7669_s16 + $0x70] sm:$0xff]  ;;  %v7567_v36 = vmov 1983009808  }
  0x1f   : > { %v6146_v3 = vcombine.high %v249_v0, %v253_v1  ;;  %v6145_v5 = vcombine.low %v249_v0, %v253_v1  ;;  %v241_v6 = vld [vmem:[%s7669_s16] sm:$0xff]  ;;  %v6148_v9 = vcombine.high %v250_v2, %v254_v4  ;;  %v6147_v10 = vcombine.low %v250_v2, %v254_v4  ;;  %v242_v12 = vld [vmem:[%s7669_s16 + $0x8] sm:$0xff]  ;;  %v252_v17 = vld [vmem:[%s7669_s16 + $0x58] sm:$0xff] }
  0x20   : > { %v245_v7 = vld [vmem:[%s7669_s16 + $0x20] sm:$0xff]  ;;  %v246_v13 = vld [vmem:[%s7669_s16 + $0x28] sm:$0xff]  ;;  %v256_v19 = vld [vmem:[%s7669_s16 + $0x78] sm:$0xff]  ;;  %v6150_v21 = vcombine.high %v251_v15, %v255_v16  ;;  %v6149_v28 = vcombine.low %v251_v15, %v255_v16  ;;  %v525_v37 = vunpack.c.l.s4 %v7567_v36  ;;  %v528_v40 = vshrl.u32 %v527_v38, 7 }
  0x21   : > { %v6138_v11 = vcombine.high %v241_v6, %v245_v7  ;;  %354 = vmatprep.subr.bf16.mxu0 %v6146_v3  ;;  %v6140_v14 = vcombine.high %v242_v12, %v246_v13  ;;  %395 = vmatprep.subr.bf16.mxu1 %v6148_v9  ;;  %v6137_v18 = vcombine.low %v241_v6, %v245_v7  ;;  %v243_v22 = vld [vmem:[%s7669_s16 + $0x10] sm:$0xff]  ;;  %v244_v25 = vld [vmem:[%s7669_s16 + $0x18] sm:$0xff]  ;;  %v257_v27 = vld [vmem:[%s12396_s2] sm:$0x3] }
  0x22   : > { %355 = vmatpush1.bf16.msra.mxu0 %v6145_v5  ;;  %396 = vmatpush1.bf16.msra.mxu1 %v6147_v10  ;;  %v6139_v20 = vcombine.low %v242_v12, %v246_v13  ;;  %v6152_v23 = vcombine.high %v252_v17, %v256_v19  ;;  %v247_v24 = vld [vmem:[%s7669_s16 + $0x30] sm:$0xff]  ;;  %v248_v26 = vld [vmem:[%s7669_s16 + $0x38] sm:$0xff]  ;;  %v6151_v29 = vcombine.low %v252_v17, %v256_v19  ;;  %v6431_v34 = vld [vmem:[%s12397_s3] sm:$0xff]   ;;  %v526_v39 = vunpack.c.0.s8 %v525_v37 }
  0x23   : > { %356 = vmatprep.subr.bf16.mxu0 %v6138_v11  ;;  %397 = vmatprep.subr.bf16.mxu1 %v6140_v14  ;;  %v6142_v30 = vcombine.high %v243_v22, %v247_v24  ;;  %v6144_v31 = vcombine.high %v244_v25, %v248_v26  ;;  %v6141_v32 = vcombine.low %v243_v22, %v247_v24  ;;  %v6432_v35 = vld [vmem:[%s12397_s3 + $0x8] sm:$0xff]  }
  0x24   : > { %v6143_v33 = vcombine.low %v244_v25, %v248_v26  ;;  %v529_v43 = vsub.s32 %v526_v39, %v528_v40 }
  0x26   : > { %357 = vmatpush1.bf16.msra.mxu0 %v6137_v18  ;;  %398 = vmatpush1.bf16.msra.mxu1 %v6139_v20 }
  0x27   : > { %436 = vmatprep.subr.bf16.mxu0 %v6150_v21  ;;  %477 = vmatprep.subr.bf16.mxu1 %v6152_v23 }
  0x29   : > { %6153 = vmatmul.mubr.msk.bf16.vlgmr.msra.gmra.mxu0 %vm338_vm0, %v257_v27  ;;  %6154 = vmatmul.mubr.msk.bf16.vlgmr.msra.gmra.mxu1 %vm338_vm0, %v257_v27 }
  0x2a   : > { %437 = vmatpush1.bf16.msra.mxu0 %v6149_v28  ;;  %478 = vmatpush1.bf16.msra.mxu1 %v6151_v29 }
  0x2b   : > { %438 = vmatprep.subr.bf16.mxu0 %v6142_v30  ;;  %479 = vmatprep.subr.bf16.mxu1 %v6144_v31 }
  0x2c   : > { %456 = vmatprep.mubr.bf16.mxu0 %v7566_v8  ;;  %497 = vmatprep.mubr.bf16.mxu1 %v7566_v8 }
  0x2e   : > { %439 = vmatpush1.bf16.msra.mxu0 %v6141_v32  ;;  %480 = vmatpush1.bf16.msra.mxu1 %v6143_v33 }
  0x2f   : > { %592 = vmatprep.subr.bf16.mxu0 %v6146_v3  ;;  %645 = vmatprep.subr.bf16.mxu1 %v6148_v9 }
  0x31   : > { %6155 = vmatmul.mubr.msk.bf16.vlgmr.msra.gmra.mxu0 %vm338_vm0, %v257_v27  ;;  %6156 = vmatmul.mubr.msk.bf16.vlgmr.msra.gmra.mxu1 %vm338_vm0, %v257_v27 }
  0x32   : > { %593 = vmatpush1.bf16.msra.mxu0 %v6145_v5  ;;  %646 = vmatpush1.bf16.msra.mxu1 %v6147_v10 }
  0x33   : > { %594 = vmatprep.subr.bf16.mxu0 %v6138_v11  ;;  %647 = vmatprep.subr.bf16.mxu1 %v6140_v14 }
  0x34   : > { %612 = vmatprep.mubr.bf16.mxu0 %v7566_v8  ;;  %665 = vmatprep.mubr.bf16.mxu1 %v7566_v8 }
  0x36   : > { %595 = vmatpush1.bf16.msra.mxu0 %v6137_v18  ;;  %648 = vmatpush1.bf16.msra.mxu1 %v6139_v20 }
  0x37   : > { %698 = vmatprep.subr.bf16.mxu0 %v6150_v21  ;;  %751 = vmatprep.subr.bf16.mxu1 %v6152_v23 }
  0x39   : > { %6163 = vmatmul.mubr.msk.bf16.vlgmr.msra.gmra.mxu0 %vm338_vm0, %v6431_v34  ;;  %6165 = vmatmul.mubr.msk.bf16.vlgmr.msra.gmra.mxu1 %vm338_vm0, %v6431_v34 }
  0x3a   : > { %699 = vmatpush1.bf16.msra.mxu0 %v6149_v28  ;;  %752 = vmatpush1.bf16.msra.mxu1 %v6151_v29 }
  0x3b   : > { %622 = vmatprep.mubr.bf16.mxu0 %v7566_v8  ;;  %675 = vmatprep.mubr.bf16.mxu1 %v7566_v8 }
  0x3c   : > { %700 = vmatprep.subr.bf16.mxu0 %v6142_v30  ;;  %753 = vmatprep.subr.bf16.mxu1 %v6144_v31 }
  0x3e   : > { %701 = vmatpush1.bf16.msra.mxu0 %v6141_v32  ;;  %754 = vmatpush1.bf16.msra.mxu1 %v6143_v33 }
  0x41   : > { %6164 = vmatmul.mubr.msk.bf16.gmra.mxu0 %vm338_vm0, %v6432_v35  ;;  %6166 = vmatmul.mubr.msk.bf16.gmra.mxu1 %vm338_vm0, %v6432_v35 }
  0x42   : > { %718 = vmatprep.mubr.bf16.mxu0 %v7566_v8  ;;  %771 = vmatprep.mubr.bf16.mxu1 %v7566_v8 }
  0x49   : > { %6167 = vmatmul.mubr.msk.bf16.vlgmr.msra.gmra.mxu0 %vm338_vm0, %v6431_v34  ;;  %6169 = vmatmul.mubr.msk.bf16.vlgmr.msra.gmra.mxu1 %vm338_vm0, %v6431_v34 }
  0x4a   : > { %728 = vmatprep.mubr.bf16.mxu0 %v7566_v8  ;;  %781 = vmatprep.mubr.bf16.mxu1 %v7566_v8 }
  0x51   : > { %6168 = vmatmul.mubr.msk.bf16.gmra.mxu0 %vm338_vm0, %v6432_v35  ;;  %6170 = vmatmul.mubr.msk.bf16.gmra.mxu1 %vm338_vm0, %v6432_v35 }
  0xe9   : > { %v376_v41 = vpop.f32.mrf.mxu0  ;;  %v417_v42 = vpop.f32.mrf.mxu1 }
  0xeb   : > { %v378_v44 = vpop.f32.mrf.mxu0  ;;  %v419_v46 = vpop.f32.mrf.mxu1 }
  0xec   : > { %v6157_v45 = vpack.c.bf16 %v378_v44, %v376_v41  ;;  %v6158_v47 = vpack.c.bf16 %v419_v46, %v417_v42 }
  0xed   : > { %v380_v48 = vpop.f32.mrf.mxu0  ;;  %v421_v50 = vpop.f32.mrf.mxu1 }
  0xee   : > { %v530_v49 = vrot.slane %v6157_v45, %v529_v43  ;;  %v537_v51 = vrot.slane %v6158_v47, %v529_v43 }
  0xef   : > { %v381_v52 = vpop.f32.mrf.mxu0  ;;  %v422_v53 = vpop.f32.mrf.mxu1 }
  0xf0   : > { %v538_v54 = vcombine.low %v530_v49, %v537_v51 }
  0xf1   : > { %v458_v55 = vpop.f32.mrf.mxu0  ;;  %v499_v56 = vpop.f32.mrf.mxu1 }
  0xf2   : > { %558 = vst [vmem:[#allocation2] sm:$0xff] %v538_v54 }
  0xf3   : > { %v460_v57 = vpop.f32.mrf.mxu0  ;;  %v501_v59 = vpop.f32.mrf.mxu1 }
  0xf4   : > { %v6159_v58 = vpack.c.bf16 %v460_v57, %v458_v55  ;;  %v6160_v60 = vpack.c.bf16 %v501_v59, %v499_v56 }
  0xf5   : > { %v462_v61 = vpop.f32.mrf.mxu0  ;;  %v503_v63 = vpop.f32.mrf.mxu1 }
  0xf6   : > { %v547_v62 = vrot.slane %v6159_v58, %v529_v43  ;;  %v554_v0 = vrot.slane %v6160_v60, %v529_v43 }
  0xf7   : > { %v463_v1 = vpop.f32.mrf.mxu0  ;;  %v504_v2 = vpop.f32.mrf.mxu1 }
  0xf8   : > { %v555_v3 = vcombine.low %v547_v62, %v554_v0 }
  0xf9   : > { %v614_v4 = vpop.f32.mrf.mxu0  ;;  %v667_v5 = vpop.f32.mrf.mxu1 }
  0xfa   : > { %559 = vst [vmem:[#allocation2 + $0x8] sm:$0xff] %v555_v3 }
  0xfb   : > { %v616_v6 = vpop.f32.mrf.mxu0  ;;  %v669_v8 = vpop.f32.mrf.mxu1 }
  0xfc   : > { %v6354_v7 = vpack.c.bf16 %v616_v6, %v614_v4  ;;  %v6355_v9 = vpack.c.bf16 %v669_v8, %v667_v5 }
  0xfd   : > { %v618_v10 = vpop.f32.mrf.mxu0  ;;  %v671_v11 = vpop.f32.mrf.mxu1 }
  0xfe   : > { %888 = vst [vmem:[#allocation3 + $0x28] sm:$0xff] %v6354_v7  ;;  %889 = vst [vmem:[#allocation3 + $0x50] sm:$0xff] %v6355_v9 }
  0xff   : > { %v620_v12 = vpop.f32.mrf.mxu0  ;;  %v673_v14 = vpop.f32.mrf.mxu1 }
 0x100   : > { %v6358_v13 = vpack.c.bf16 %v620_v12, %v618_v10  ;;  %v6359_v15 = vpack.c.bf16 %v673_v14, %v671_v11 }
 0x101   : > { %v624_v16 = vpop.f32.mrf.mxu0  ;;  %v677_v17 = vpop.f32.mrf.mxu1 }
 0x102   : > { %892 = vst [vmem:[#allocation3 + $0x60] sm:$0xff] %v6358_v13  ;;  %893 = vst [vmem:[#allocation3] sm:$0xff] %v6359_v15 }
 0x103   : > { %v626_v18 = vpop.f32.mrf.mxu0  ;;  %v679_v20 = vpop.f32.mrf.mxu1 }
 0x104   : > { %v6362_v19 = vpack.c.bf16 %v626_v18, %v624_v16  ;;  %v6363_v21 = vpack.c.bf16 %v679_v20, %v677_v17 }
 0x105   : > { %v628_v22 = vpop.f32.mrf.mxu0  ;;  %v681_v23 = vpop.f32.mrf.mxu1 }
 0x106   : > { %896 = vst [vmem:[#allocation3 + $0x18] sm:$0xff] %v6362_v19  ;;  %897 = vst [vmem:[#allocation3 + $0x8] sm:$0xff] %v6363_v21 }
 0x107   : > { %v630_v24 = vpop.f32.mrf.mxu0  ;;  %v683_v26 = vpop.f32.mrf.mxu1 }
 0x108   : > { %v6366_v25 = vpack.c.bf16 %v630_v24, %v628_v22  ;;  %v6367_v27 = vpack.c.bf16 %v683_v26, %v681_v23 }
 0x109   : > { %v720_v28 = vpop.f32.mrf.mxu0  ;;  %v773_v29 = vpop.f32.mrf.mxu1 }
 0x10a   : > { %900 = vst [vmem:[#allocation3 + $0x68] sm:$0xff] %v6366_v25  ;;  %901 = vst [vmem:[#allocation3 + $0x70] sm:$0xff] %v6367_v27 }
 0x10b   : > { %v722_v30 = vpop.f32.mrf.mxu0  ;;  %v775_v32 = vpop.f32.mrf.mxu1 }
 0x10c   : > { %v6356_v31 = vpack.c.bf16 %v722_v30, %v720_v28  ;;  %v6357_v33 = vpack.c.bf16 %v775_v32, %v773_v29 }
 0x10d   : > { %v724_v34 = vpop.f32.mrf.mxu0  ;;  %v777_v35 = vpop.f32.mrf.mxu1 }
 0x10e   : > { %890 = vst [vmem:[#allocation3 + $0x10] sm:$0xff] %v6356_v31  ;;  %891 = vst [vmem:[#allocation3 + $0x48] sm:$0xff] %v6357_v33 }
 0x10f   : > { %v726_v36 = vpop.f32.mrf.mxu0  ;;  %v779_v38 = vpop.f32.mrf.mxu1 }
 0x110   : > { %v6360_v37 = vpack.c.bf16 %v726_v36, %v724_v34  ;;  %v6361_v39 = vpack.c.bf16 %v779_v38, %v777_v35 }
 0x111   : > { %v730_v40 = vpop.f32.mrf.mxu0  ;;  %v783_v41 = vpop.f32.mrf.mxu1 }
 0x112   : > { %894 = vst [vmem:[#allocation3 + $0x40] sm:$0xff] %v6360_v37  ;;  %895 = vst [vmem:[#allocation3 + $0x78] sm:$0xff] %v6361_v39 }
 0x113   : > { %v732_v42 = vpop.f32.mrf.mxu0  ;;  %v785_v44 = vpop.f32.mrf.mxu1 }
 0x114   : > { %v6364_v43 = vpack.c.bf16 %v732_v42, %v730_v40  ;;  %v6365_v45 = vpack.c.bf16 %v785_v44, %v783_v41 }
 0x115   : > { %v734_v46 = vpop.f32.mrf.mxu0  ;;  %v787_v47 = vpop.f32.mrf.mxu1 }
 0x116   : > { %898 = vst [vmem:[#allocation3 + $0x30] sm:$0xff] %v6364_v43  ;;  %899 = vst [vmem:[#allocation3 + $0x58] sm:$0xff] %v6365_v45 }
 0x117   : > { %v736_v48 = vpop.f32.mrf.mxu0  ;;  %v789_v50 = vpop.f32.mrf.mxu1 }
 0x118   : > { %v6368_v49 = vpack.c.bf16 %v736_v48, %v734_v46  ;;  %v6369_v51 = vpack.c.bf16 %v789_v50, %v787_v47 }
 0x11a   : > { %902 = vst [vmem:[#allocation3 + $0x20] sm:$0xff] %v6368_v49  ;;  %903 = vst [vmem:[#allocation3 + $0x38] sm:$0xff] %v6369_v51 }
 0x11b PF: > { %s6187_s7 = sshll.u32 %s7548_s22, 9  ;;  %v12400_v52 = vmov 0   ;;  %v917_v5 = vld [vmem:[%s12395_s1] sm:$0x3]  ;;  %vm958_vm1 = vcmask 261120   ;;  %v1120_v7 = vlaneseq  ;;  %vm1247_vm2 = vcmask 1041408  }
 0x11c   : > { %s905_s8 = sshra.s32 %s6187_s7, 7  ;;  %994 = vmatprep.mubr.bf16.mxu0 %v12400_v52  ;;  %1035 = vmatprep.mubr.bf16.mxu1 %v12400_v52  ;;  %v1048_v6 = vld [vmem:[#allocation2] sm:$0xff]  ;;  %v7569_v8 = vmov 1983009808   ;;  %v1049_v32 = vld [vmem:[#allocation2 + $0x8] sm:$0xff]  ;;  %vm1150_vm3 = vcmask 31744  }
 0x11d   : > { %s6188_s10 = sshll.u32 %s905_s8, 2  ;;  %v1118_v9 = vunpack.c.l.s4 %v7569_v8  ;;  %v7742_v10 = vshrl.u32 %v1120_v7, 7  ;;  %v1116_v12 = vcombine.high %v1048_v6, %v1048_v6  ;;  %v1133_v37 = vcombine.high %v1049_v32, %v1049_v32  ;;  %s5904_s14 = sld [smem:[#allocation4]] }
 0x11e   : > { %s7727_s11 = scalar_lea.vmem %s7669_s16, %s6188_s10  ;;  %s6348_s15 = sshll.u32 (%p7650_p5), %s7548_s22, 2 }
 0x11f   : > { %v913_v53 = vld [vmem:[%s7727_s11 + $0x40] sm:$0xff]  ;;  %v914_v58 = vld [vmem:[%s7727_s11 + $0x48] sm:$0xff]  ;;  %13171 = vst [vmem:[#allocation6_spill] sm:$0xff] %v7742_v10  ;;  %v1119_v11 = vunpack.c.0.s8 %v1118_v9  ;;  %s6349_s16 = sshll.u32 (%p7650_p5), %s7552_s23, 5 }
 0x120   : > { %v915_v54 = vld [vmem:[%s7727_s11 + $0x60] sm:$0xff]  ;;  %v916_v59 = vld [vmem:[%s7727_s11 + $0x68] sm:$0xff]  ;;  %s6011_s30 = sadd.s32 (%p7650_p5), %s6349_s16, %s6348_s15 }
 0x121   : > { %v909_v55 = vld [vmem:[%s7727_s11] sm:$0xff]  ;;  %v6194_v56 = vcombine.high %v913_v53, %v915_v54  ;;  %v6193_v60 = vcombine.low %v913_v53, %v915_v54  ;;  %v910_v62 = vld [vmem:[%s7727_s11 + $0x8] sm:$0xff]  ;;  %v6196_v1 = vcombine.high %v914_v58, %v916_v59  ;;  %v6195_v2 = vcombine.low %v914_v58, %v916_v59  ;;  %s6350_s18 = sshll.u32 (%p7650_p5), %s6011_s30, 3 }
 0x122   : > { %v911_v57 = vld [vmem:[%s7727_s11 + $0x20] sm:$0xff]  ;;  %v912_v63 = vld [vmem:[%s7727_s11 + $0x28] sm:$0xff]  ;;  %v1122_v13 = vsub.s32 %v1119_v11, %v7742_v10  ;;  %v13206_v10 = vmov 0   ;;  %s6013_s28 = scalar_lea.vmem (%p7650_p5), %s12399_s5, %s6350_s18 }
 0x123   : > { %v6190_v61 = vcombine.high %v909_v55, %v911_v57  ;;  %974 = vmatprep.subr.bf16.mxu0 %v6194_v56  ;;  %v6189_v0 = vcombine.low %v909_v55, %v911_v57  ;;  %v6192_v3 = vcombine.high %v910_v62, %v912_v63  ;;  %1015 = vmatprep.subr.bf16.mxu1 %v6196_v1 }
 0x124   : > { %975 = vmatpush1.bf16.msra.mxu0 %v6193_v60  ;;  %1016 = vmatpush1.bf16.msra.mxu1 %v6195_v2  ;;  %v6191_v4 = vcombine.low %v910_v62, %v912_v63  ;;  %v1123_v14 = vrot.slane %v1048_v6, %v1122_v13  ;;  %v1130_v15 = vrot.slane %v1116_v12, %v1122_v13 }
 0x125   : > { %976 = vmatprep.subr.bf16.mxu0 %v6190_v61  ;;  %1017 = vmatprep.subr.bf16.mxu1 %v6192_v3  ;;  %v1140_v33 = vrot.slane %v1049_v32, %v1122_v13  ;;  %v1147_v38 = vrot.slane %v1133_v37, %v1122_v13 }
 0x126   : > { %v1131_v16 = vcombine.high %v1123_v14, %v1123_v14  ;;  %v1132_v17 = vcombine.high %v1130_v15, %v1130_v15  ;;  %v1249_v18 = vsel %vm1247_vm2, %v1123_v14, 0  ;;  %v1255_v19 = vsel %vm1247_vm2, %v1130_v15, 0 }
 0x127   : > { %v1148_v34 = vcombine.high %v1140_v33, %v1140_v33  ;;  %v1261_v36 = vsel %vm1247_vm2, %v1140_v33, 0  ;;  %v1149_v39 = vcombine.high %v1147_v38, %v1147_v38  ;;  %v1267_v40 = vsel %vm1247_vm2, %v1147_v38, 0 }
 0x128   : > { %977 = vmatpush1.bf16.msra.mxu0 %v6189_v0  ;;  %1018 = vmatpush1.bf16.msra.mxu1 %v6191_v4 }
 0x129   : > { %6199 = vmatprep.subr.msk.bf16.mxu0 %vm1247_vm2, %v1131_v16  ;;  %6232 = vmatprep.subr.msk.bf16.mxu1 %vm1247_vm2, %v1132_v17 }
 0x12b   : > { %6197 = vmatmul.mubr.msk.bf16.vlgmr.msra.gmra.mxu0 %vm958_vm1, %v917_v5  ;;  %6198 = vmatmul.mubr.msk.bf16.vlgmr.msra.gmra.mxu1 %vm958_vm1, %v917_v5 }
 0x12c   : > { %1304 = vmatprep.mubr.bf16.mxu0 %v12400_v52  ;;  %1657 = vmatprep.mubr.bf16.mxu1 %v12400_v52 }
 0x12d   : > { %1287 = vmatpush1.bf16.msra.mxu0 %v1249_v18  ;;  %1640 = vmatpush1.bf16.msra.mxu1 %v1255_v19 }
 0x12e   : > { %6265 = vmatprep.subr.msk.bf16.mxu0 %vm1247_vm2, %v1148_v34  ;;  %6298 = vmatprep.subr.msk.bf16.mxu1 %vm1247_vm2, %v1149_v39 }
 0x1eb   : > { %v996_v20 = vpop.f32.mrf.mxu0  ;;  %v1037_v23 = vpop.f32.mrf.mxu1 }
 0x1ec   : > { %v1044_v21 = vpack.c.bf16 %v996_v20, %v996_v20  ;;  %v1046_v25 = vpack.c.bf16 %v1037_v23, %v1037_v23 }
 0x1ed   : > { %v998_v22 = vpop.f32.mrf.mxu0  ;;  %v1039_v26 = vpop.f32.mrf.mxu1 }
 0x1ee   : > { %1050 = vxpose.xlu0.c.b16.start.end [1/1] (short) %v1044_v21, 128  ;;  %1082 = vxpose.xlu1.c.b16.start.end [1/1] (short) %v1046_v25, 128  ;;  %v1045_v30 = vpack.c.bf16 %v998_v22, %v998_v22  ;;  %v1047_v31 = vpack.c.bf16 %v1039_v26, %v1039_v26 }
 0x1ef   : > { %v1000_v24 = vpop.f32.mrf.mxu0  ;;  %v1041_v28 = vpop.f32.mrf.mxu1 }
 0x1f1   : > { %v1001_v27 = vpop.f32.mrf.mxu0  ;;  %v1042_v29 = vpop.f32.mrf.mxu1 }
 0x20b   : > { %1066 = vxpose.xlu0.c.b16.start.end [1/1] (short) %v1045_v30, 128  ;;  %1098 = vxpose.xlu1.c.b16.start.end [1/1] (short) %v1047_v31, 128 }
 0x250   : > { %v7750_v35 = vpop.trf.xlu0  ;;  %v7881_v57 = vpop.trf.xlu1 }
 0x251   : > { %6200 = vmatmul.mubr.msk.bf16.vlgmr.msra.gmra.mxu0 %vm1150_vm3, %v7750_v35  ;;  %6233 = vmatmul.mubr.msk.bf16.vlgmr.msra.gmra.mxu1 %vm1150_vm3, %v7750_v35 }
 0x252   : > { %1314 = vmatprep.mubr.bf16.mxu0 %v12400_v52  ;;  %1667 = vmatprep.mubr.bf16.mxu1 %v12400_v52 }
 0x253   : > { %1993 = vmatpush1.bf16.msra.mxu0 %v1261_v36  ;;  %2346 = vmatpush1.bf16.msra.mxu1 %v1267_v40 }
 0x254   : > { %v7760_v41 = vpop.trf.xlu0  ;;  %v7889_v58 = vpop.trf.xlu1 }
 0x258   : > { %v7769_v42 = vpop.trf.xlu0  ;;  %v7897_v59 = vpop.trf.xlu1 }
 0x259   : > { %6201 = vmatmul.mubr.msk.bf16.gmra.mxu0 %vm1150_vm3, %v7760_v41  ;;  %6234 = vmatmul.mubr.msk.bf16.gmra.mxu1 %vm1150_vm3, %v7760_v41 }
 0x25a   : > { %1324 = vmatprep.mubr.bf16.mxu0 %v12400_v52  ;;  %1677 = vmatprep.mubr.bf16.mxu1 %v12400_v52 }
 0x25c   : > { %v7777_v43 = vpop.trf.xlu0  ;;  %v7905_v60 = vpop.trf.xlu1 }
 0x260   : > { %v7785_v44 = vpop.trf.xlu0  ;;  %v7913_v61 = vpop.trf.xlu1 }
 0x261   : > { %6202 = vmatmul.mubr.msk.bf16.gmra.mxu0 %vm1150_vm3, %v7769_v42  ;;  %6235 = vmatmul.mubr.msk.bf16.gmra.mxu1 %vm1150_vm3, %v7769_v42 }
 0x262   : > { %1334 = vmatprep.mubr.bf16.mxu0 %v12400_v52  ;;  %1687 = vmatprep.mubr.bf16.mxu1 %v12400_v52 }
 0x264   : > { %v7793_v45 = vpop.trf.xlu0  ;;  %v7921_v62 = vpop.trf.xlu1 }
 0x268   : > { %v7801_v46 = vpop.trf.xlu0  ;;  %v7929_v63 = vpop.trf.xlu1 }
 0x269   : > { %6203 = vmatmul.mubr.msk.bf16.gmra.mxu0 %vm1150_vm3, %v7777_v43  ;;  %6236 = vmatmul.mubr.msk.bf16.gmra.mxu1 %vm1150_vm3, %v7777_v43 }
 0x26a   : > { %1344 = vmatprep.mubr.bf16.mxu0 %v12400_v52  ;;  %1697 = vmatprep.mubr.bf16.mxu1 %v12400_v52 }
 0x26c   : > { %v7809_v47 = vpop.trf.xlu0  ;;  %v7937_v0 = vpop.trf.xlu1 }
 0x270   : > { %v7817_v48 = vpop.trf.xlu0  ;;  %v7945_v1 = vpop.trf.xlu1 }
 0x271   : > { %6204 = vmatmul.mubr.msk.bf16.gmra.mxu0 %vm1150_vm3, %v7785_v44  ;;  %6237 = vmatmul.mubr.msk.bf16.gmra.mxu1 %vm1150_vm3, %v7785_v44 }
 0x272   : > { %1354 = vmatprep.mubr.bf16.mxu0 %v12400_v52  ;;  %1707 = vmatprep.mubr.bf16.mxu1 %v12400_v52 }
 0x274   : > { %v7825_v49 = vpop.trf.xlu0  ;;  %v7965_v8 = vpop.trf.xlu1 }
 0x278   : > { %v7833_v50 = vpop.trf.xlu0  ;;  %v7989_v18 = vpop.trf.xlu1 }
 0x279   : > { %6205 = vmatmul.mubr.msk.bf16.gmra.mxu0 %vm1150_vm3, %v7793_v45  ;;  %6238 = vmatmul.mubr.msk.bf16.gmra.mxu1 %vm1150_vm3, %v7793_v45 }
 0x27a   : > { %1364 = vmatprep.mubr.bf16.mxu0 %v12400_v52  ;;  %1717 = vmatprep.mubr.bf16.mxu1 %v12400_v52 }
 0x27c   : > { %v7841_v51 = vpop.trf.xlu0  ;;  %v8013_v27 = vpop.trf.xlu1 }
 0x280   : > { %v7849_v53 = vpop.trf.xlu0  ;;  %v8037_v37 = vpop.trf.xlu1 }
 0x281   : > { %6206 = vmatmul.mubr.msk.bf16.gmra.mxu0 %vm1150_vm3, %v7801_v46  ;;  %6239 = vmatmul.mubr.msk.bf16.gmra.mxu1 %vm1150_vm3, %v7801_v46 }
 0x282   : > { %1374 = vmatprep.mubr.bf16.mxu0 %v12400_v52  ;;  %1727 = vmatprep.mubr.bf16.mxu1 %v12400_v52 }
 0x284   : > { %v7857_v54 = vpop.trf.xlu0 }
 0x288   : > { %v7865_v55 = vpop.trf.xlu0 }
 0x289   : > { %6207 = vmatmul.mubr.msk.bf16.gmra.mxu0 %vm1150_vm3, %v7809_v47  ;;  %6240 = vmatmul.mubr.msk.bf16.gmra.mxu1 %vm1150_vm3, %v7809_v47 }
 0x28a   : > { %1384 = vmatprep.mubr.bf16.mxu0 %v12400_v52  ;;  %1737 = vmatprep.mubr.bf16.mxu1 %v12400_v52 }
 0x28c   : > { %v7873_v56 = vpop.trf.xlu0 }
 0x291   : > { %6208 = vmatmul.mubr.msk.bf16.gmra.mxu0 %vm1150_vm3, %v7817_v48  ;;  %6241 = vmatmul.mubr.msk.bf16.gmra.mxu1 %vm1150_vm3, %v7817_v48 }
 0x292   : > { %1394 = vmatprep.mubr.bf16.mxu0 %v12400_v52  ;;  %1747 = vmatprep.mubr.bf16.mxu1 %v12400_v52 }
 0x299   : > { %6209 = vmatmul.mubr.msk.bf16.gmra.mxu0 %vm1150_vm3, %v7825_v49  ;;  %6242 = vmatmul.mubr.msk.bf16.gmra.mxu1 %vm1150_vm3, %v7825_v49 }
 0x29a   : > { %1404 = vmatprep.mubr.bf16.mxu0 %v12400_v52  ;;  %1757 = vmatprep.mubr.bf16.mxu1 %v12400_v52 }
 0x2a1   : > { %6210 = vmatmul.mubr.msk.bf16.gmra.mxu0 %vm1150_vm3, %v7833_v50  ;;  %6243 = vmatmul.mubr.msk.bf16.gmra.mxu1 %vm1150_vm3, %v7833_v50 }
 0x2a2   : > { %1414 = vmatprep.mubr.bf16.mxu0 %v12400_v52  ;;  %1767 = vmatprep.mubr.bf16.mxu1 %v12400_v52 }
 0x2a9   : > { %6211 = vmatmul.mubr.msk.bf16.gmra.mxu0 %vm1150_vm3, %v7841_v51  ;;  %6244 = vmatmul.mubr.msk.bf16.gmra.mxu1 %vm1150_vm3, %v7841_v51 }
 0x2aa   : > { %1424 = vmatprep.mubr.bf16.mxu0 %v12400_v52  ;;  %1777 = vmatprep.mubr.bf16.mxu1 %v12400_v52 }
 0x2b1   : > { %6212 = vmatmul.mubr.msk.bf16.gmra.mxu0 %vm1150_vm3, %v7849_v53  ;;  %6245 = vmatmul.mubr.msk.bf16.gmra.mxu1 %vm1150_vm3, %v7849_v53 }
 0x2b2   : > { %1434 = vmatprep.mubr.bf16.mxu0 %v12400_v52  ;;  %1787 = vmatprep.mubr.bf16.mxu1 %v12400_v52 }
 0x2b9   : > { %6213 = vmatmul.mubr.msk.bf16.gmra.mxu0 %vm1150_vm3, %v7857_v54  ;;  %6246 = vmatmul.mubr.msk.bf16.gmra.mxu1 %vm1150_vm3, %v7857_v54 }
 0x2ba   : > { %1444 = vmatprep.mubr.bf16.mxu0 %v12400_v52  ;;  %1797 = vmatprep.mubr.bf16.mxu1 %v12400_v52 }
 0x2c1   : > { %6214 = vmatmul.mubr.msk.bf16.gmra.mxu0 %vm1150_vm3, %v7865_v55  ;;  %6247 = vmatmul.mubr.msk.bf16.gmra.mxu1 %vm1150_vm3, %v7865_v55 }
 0x2c2   : > { %1454 = vmatprep.mubr.bf16.mxu0 %v12400_v52  ;;  %1807 = vmatprep.mubr.bf16.mxu1 %v12400_v52 }
 0x2c9   : > { %6215 = vmatmul.mubr.msk.bf16.gmra.mxu0 %vm1150_vm3, %v7873_v56  ;;  %6248 = vmatmul.mubr.msk.bf16.gmra.mxu1 %vm1150_vm3, %v7873_v56 }
 0x2ca   : > { %1464 = vmatprep.mubr.bf16.mxu0 %v12400_v52  ;;  %1817 = vmatprep.mubr.bf16.mxu1 %v12400_v52 }
 0x2d1   : > { %6216 = vmatmul.mubr.msk.bf16.gmra.mxu0 %vm1150_vm3, %v7881_v57  ;;  %6249 = vmatmul.mubr.msk.bf16.gmra.mxu1 %vm1150_vm3, %v7881_v57 }
 0x2d2   : > { %1474 = vmatprep.mubr.bf16.mxu0 %v12400_v52  ;;  %1827 = vmatprep.mubr.bf16.mxu1 %v12400_v52 }
 0x2d9   : > { %6217 = vmatmul.mubr.msk.bf16.gmra.mxu0 %vm1150_vm3, %v7889_v58  ;;  %6250 = vmatmul.mubr.msk.bf16.gmra.mxu1 %vm1150_vm3, %v7889_v58 }
 0x2da   : > { %1484 = vmatprep.mubr.bf16.mxu0 %v12400_v52  ;;  %1837 = vmatprep.mubr.bf16.mxu1 %v12400_v52 }
 0x2e1   : > { %6218 = vmatmul.mubr.msk.bf16.gmra.mxu0 %vm1150_vm3, %v7897_v59  ;;  %6251 = vmatmul.mubr.msk.bf16.gmra.mxu1 %vm1150_vm3, %v7897_v59 }
 0x2e2   : > { %1494 = vmatprep.mubr.bf16.mxu0 %v12400_v52  ;;  %1847 = vmatprep.mubr.bf16.mxu1 %v12400_v52 }
 0x2e9   : > { %6219 = vmatmul.mubr.msk.bf16.gmra.mxu0 %vm1150_vm3, %v7905_v60  ;;  %6252 = vmatmul.mubr.msk.bf16.gmra.mxu1 %vm1150_vm3, %v7905_v60 }
 0x2ea   : > { %1504 = vmatprep.mubr.bf16.mxu0 %v12400_v52  ;;  %1857 = vmatprep.mubr.bf16.mxu1 %v12400_v52 }
 0x2f1   : > { %6220 = vmatmul.mubr.msk.bf16.gmra.mxu0 %vm1150_vm3, %v7913_v61  ;;  %6253 = vmatmul.mubr.msk.bf16.gmra.mxu1 %vm1150_vm3, %v7913_v61 }
 0x2f2   : > { %1514 = vmatprep.mubr.bf16.mxu0 %v12400_v52  ;;  %1867 = vmatprep.mubr.bf16.mxu1 %v12400_v52 }
 0x2f9   : > { %6221 = vmatmul.mubr.msk.bf16.gmra.mxu0 %vm1150_vm3, %v7921_v62  ;;  %6254 = vmatmul.mubr.msk.bf16.gmra.mxu1 %vm1150_vm3, %v7921_v62 }
 0x2fa   : > { %1524 = vmatprep.mubr.bf16.mxu0 %v12400_v52  ;;  %1877 = vmatprep.mubr.bf16.mxu1 %v12400_v52 }
 0x301   : > { %6222 = vmatmul.mubr.msk.bf16.gmra.mxu0 %vm1150_vm3, %v7929_v63  ;;  %6255 = vmatmul.mubr.msk.bf16.gmra.mxu1 %vm1150_vm3, %v7929_v63 }
 0x302   : > { %1534 = vmatprep.mubr.bf16.mxu0 %v12400_v52  ;;  %1887 = vmatprep.mubr.bf16.mxu1 %v12400_v52 }
 0x309   : > { %6223 = vmatmul.mubr.msk.bf16.gmra.mxu0 %vm1150_vm3, %v7937_v0  ;;  %6256 = vmatmul.mubr.msk.bf16.gmra.mxu1 %vm1150_vm3, %v7937_v0 }
 0x30a   : > { %1544 = vmatprep.mubr.bf16.mxu0 %v12400_v52  ;;  %1897 = vmatprep.mubr.bf16.mxu1 %v12400_v52 }
 0x311   : > { %v7947_v2 = vpop.f32.mrf.mxu0  ;;  %6224 = vmatmul.mubr.msk.bf16.gmra.mxu0 %vm1150_vm3, %v7945_v1  ;;  %v7951_v3 = vpop.f32.mrf.mxu1  ;;  %6257 = vmatmul.mubr.msk.bf16.gmra.mxu1 %vm1150_vm3, %v7945_v1 }
 0x312   : > { %13172 = vst [vmem:[#allocation7_spill] sm:$0xff] %v7947_v2  ;;  %13173 = vst [vmem:[#allocation8_spill] sm:$0xff] %v7951_v3  ;;  %1554 = vmatprep.mubr.bf16.mxu0 %v12400_v52  ;;  %1907 = vmatprep.mubr.bf16.mxu1 %v12400_v52 }
 0x313   : > { %v7957_v4 = vpop.f32.mrf.mxu0  ;;  %v7959_v5 = vpop.f32.mrf.mxu1 }
 0x314   : > { %13174 = vst [vmem:[#allocation9_spill] sm:$0xff] %v7957_v4  ;;  %13175 = vst [vmem:[#allocation10_spill] sm:$0xff] %v7959_v5 }
 0x315   : > { %v7961_v6 = vpop.f32.mrf.mxu0  ;;  %v7963_v7 = vpop.f32.mrf.mxu1 }
 0x316   : > { %13176 = vst [vmem:[#allocation11_spill] sm:$0xff] %v7961_v6  ;;  %13177 = vst [vmem:[#allocation12_spill] sm:$0xff] %v7963_v7 }
 0x317   : > { %v7967_v9 = vpop.f32.mrf.mxu0  ;;  %v7969_v11 = vpop.f32.mrf.mxu1 }
 0x318   : > { %13178 = vst [vmem:[#allocation13_spill] sm:$0xff] %v7967_v9  ;;  %13179 = vst [vmem:[#allocation14_spill] sm:$0xff] %v7969_v11 }
 0x319   : > { %v7971_v12 = vpop.f32.mrf.mxu0  ;;  %6225 = vmatmul.mubr.msk.bf16.gmra.mxu0 %vm1150_vm3, %v7965_v8  ;;  %v7975_v13 = vpop.f32.mrf.mxu1  ;;  %6258 = vmatmul.mubr.msk.bf16.gmra.mxu1 %vm1150_vm3, %v7965_v8 }
 0x31a   : > { %13180 = vst [vmem:[#allocation15_spill] sm:$0xff] %v7971_v12  ;;  %13181 = vst [vmem:[#allocation16_spill] sm:$0xff] %v7975_v13  ;;  %1564 = vmatprep.mubr.bf16.mxu0 %v12400_v52  ;;  %1917 = vmatprep.mubr.bf16.mxu1 %v12400_v52 }
 0x31b   : > { %v7981_v14 = vpop.f32.mrf.mxu0  ;;  %v7983_v15 = vpop.f32.mrf.mxu1 }
 0x31c   : > { %13182 = vst [vmem:[#allocation17_spill] sm:$0xff] %v7981_v14  ;;  %13183 = vst [vmem:[#allocation18_spill] sm:$0xff] %v7983_v15 }
 0x31d   : > { %v7985_v16 = vpop.f32.mrf.mxu0  ;;  %v7987_v17 = vpop.f32.mrf.mxu1 }
 0x31e   : > { %13184 = vst [vmem:[#allocation19_spill] sm:$0xff] %v7985_v16  ;;  %13185 = vst [vmem:[#allocation20_spill] sm:$0xff] %v7987_v17 }
 0x31f   : > { %v7991_v19 = vpop.f32.mrf.mxu0  ;;  %v7993_v20 = vpop.f32.mrf.mxu1 }
 0x320   : > { %13186 = vst [vmem:[#allocation21_spill] sm:$0xff] %v7991_v19  ;;  %13187 = vst [vmem:[#allocation22_spill] sm:$0xff] %v7993_v20 }
 0x321   : > { %v7995_v21 = vpop.f32.mrf.mxu0  ;;  %6226 = vmatmul.mubr.msk.bf16.gmra.mxu0 %vm1150_vm3, %v7989_v18  ;;  %v7999_v22 = vpop.f32.mrf.mxu1  ;;  %6259 = vmatmul.mubr.msk.bf16.gmra.mxu1 %vm1150_vm3, %v7989_v18 }
 0x322   : > { %13188 = vst [vmem:[#allocation23_spill] sm:$0xff] %v7995_v21  ;;  %13189 = vst [vmem:[#allocation24_spill] sm:$0xff] %v7999_v22  ;;  %1574 = vmatprep.mubr.bf16.mxu0 %v12400_v52  ;;  %1927 = vmatprep.mubr.bf16.mxu1 %v12400_v52 }
 0x323   : > { %v8005_v23 = vpop.f32.mrf.mxu0  ;;  %v8007_v24 = vpop.f32.mrf.mxu1 }
 0x324   : > { %13190 = vst [vmem:[#allocation25_spill] sm:$0xff] %v8005_v23  ;;  %13191 = vst [vmem:[#allocation26_spill] sm:$0xff] %v8007_v24 }
 0x325   : > { %v8009_v25 = vpop.f32.mrf.mxu0  ;;  %v8011_v26 = vpop.f32.mrf.mxu1 }
 0x326   : > { %13192 = vst [vmem:[#allocation27_spill] sm:$0xff] %v8009_v25  ;;  %13193 = vst [vmem:[#allocation28_spill] sm:$0xff] %v8011_v26 }
 0x327   : > { %v8015_v28 = vpop.f32.mrf.mxu0  ;;  %v8017_v29 = vpop.f32.mrf.mxu1 }
 0x328   : > { %13194 = vst [vmem:[#allocation29_spill] sm:$0xff] %v8015_v28  ;;  %13195 = vst [vmem:[#allocation30_spill] sm:$0xff] %v8017_v29  ;;  %v8061_v29 = vpop.trf.xlu1 }
 0x329   : > { %v8019_v30 = vpop.f32.mrf.mxu0  ;;  %6227 = vmatmul.mubr.msk.bf16.gmra.mxu0 %vm1150_vm3, %v8013_v27  ;;  %v8023_v31 = vpop.f32.mrf.mxu1  ;;  %6260 = vmatmul.mubr.msk.bf16.gmra.mxu1 %vm1150_vm3, %v8013_v27 }
 0x32a   : > { %13196 = vst [vmem:[#allocation31_spill] sm:$0xff] %v8019_v30  ;;  %13197 = vst [vmem:[#allocation32_spill] sm:$0xff] %v8023_v31  ;;  %1584 = vmatprep.mubr.bf16.mxu0 %v12400_v52  ;;  %1937 = vmatprep.mubr.bf16.mxu1 %v12400_v52 }
 0x32b   : > { %v8029_v32 = vpop.f32.mrf.mxu0  ;;  %v8031_v33 = vpop.f32.mrf.mxu1 }
 0x32c   : > { %13198 = vst [vmem:[#allocation33_spill] sm:$0xff] %v8029_v32  ;;  %13199 = vst [vmem:[#allocation34_spill] sm:$0xff] %v8031_v33  ;;  %v8085_v16 = vpop.trf.xlu1 }
 0x32d   : > { %v8033_v34 = vpop.f32.mrf.mxu0  ;;  %v8035_v36 = vpop.f32.mrf.mxu1 }
 0x32e   : > { %13200 = vst [vmem:[#allocation35_spill] sm:$0xff] %v8033_v34  ;;  %13201 = vst [vmem:[#allocation36_spill] sm:$0xff] %v8035_v36 }
 0x32f   : > { %v8039_v38 = vpop.f32.mrf.mxu0  ;;  %v8041_v39 = vpop.f32.mrf.mxu1 }
 0x330   : > { %13202 = vst [vmem:[#allocation37_spill] sm:$0xff] %v8039_v38  ;;  %13203 = vst [vmem:[#allocation38_spill] sm:$0xff] %v8041_v39  ;;  %v8109_v28 = vpop.trf.xlu1 }
 0x331   : > { %v8043_v40 = vpop.f32.mrf.mxu0  ;;  %6228 = vmatmul.mubr.msk.bf16.gmra.mxu0 %vm1150_vm3, %v8037_v37  ;;  %v8047_v52 = vpop.f32.mrf.mxu1  ;;  %6261 = vmatmul.mubr.msk.bf16.gmra.mxu1 %vm1150_vm3, %v8037_v37  ;;  %13227 = vst [vmem:[#allocation61_spill] sm:$0xff] %v8109_v28 }
 0x332   : > { %13204 = vst [vmem:[#allocation39_spill] sm:$0xff] %v8043_v40  ;;  %13205 = vst [vmem:[#allocation40_spill] sm:$0xff] %v8047_v52  ;;  %1594 = vmatprep.mubr.bf16.mxu0 %v13206_v10  ;;  %1947 = vmatprep.mubr.bf16.mxu1 %v13206_v10 }
 0x333   : > { %v8053_v11 = vpop.f32.mrf.mxu0  ;;  %v8055_v20 = vpop.f32.mrf.mxu1 }
 0x334   : > { %13207 = vst [vmem:[#allocation41_spill] sm:$0xff] %v8053_v11  ;;  %13208 = vst [vmem:[#allocation42_spill] sm:$0xff] %v8055_v20 }
 0x335   : > { %v8057_v7 = vpop.f32.mrf.mxu0  ;;  %v8059_v5 = vpop.f32.mrf.mxu1 }
 0x336   : > { %13209 = vst [vmem:[#allocation43_spill] sm:$0xff] %v8057_v7  ;;  %13210 = vst [vmem:[#allocation44_spill] sm:$0xff] %v8059_v5 }
 0x337   : > { %v8063_v17 = vpop.f32.mrf.mxu0  ;;  %v8065_v15 = vpop.f32.mrf.mxu1 }
 0x338   : > { %13211 = vst [vmem:[#allocation45_spill] sm:$0xff] %v8063_v17  ;;  %13212 = vst [vmem:[#allocation46_spill] sm:$0xff] %v8065_v15 }
 0x339   : > { %v8067_v6 = vpop.f32.mrf.mxu0  ;;  %6229 = vmatmul.mubr.msk.bf16.gmra.mxu0 %vm1150_vm3, %v8061_v29  ;;  %v8071_v9 = vpop.f32.mrf.mxu1  ;;  %6262 = vmatmul.mubr.msk.bf16.gmra.mxu1 %vm1150_vm3, %v8061_v29 }
 0x33a   : > { %13213 = vst [vmem:[#allocation47_spill] sm:$0xff] %v8067_v6  ;;  %13214 = vst [vmem:[#allocation48_spill] sm:$0xff] %v8071_v9  ;;  %1604 = vmatprep.mubr.bf16.mxu0 %v13206_v10  ;;  %1957 = vmatprep.mubr.bf16.mxu1 %v13206_v10 }
 0x33b   : > { %v8077_v3 = vpop.f32.mrf.mxu0  ;;  %v8079_v39 = vpop.f32.mrf.mxu1 }
 0x33c   : > { %13215 = vst [vmem:[#allocation49_spill] sm:$0xff] %v8077_v3  ;;  %13216 = vst [vmem:[#allocation50_spill] sm:$0xff] %v8079_v39 }
 0x33d   : > { %v8081_v26 = vpop.f32.mrf.mxu0  ;;  %v8083_v24 = vpop.f32.mrf.mxu1 }
 0x33e   : > { %13217 = vst [vmem:[#allocation51_spill] sm:$0xff] %v8081_v26  ;;  %13218 = vst [vmem:[#allocation52_spill] sm:$0xff] %v8083_v24 }
 0x33f   : > { %v8087_v19 = vpop.f32.mrf.mxu0  ;;  %v8089_v13 = vpop.f32.mrf.mxu1 }
 0x340   : > { %13219 = vst [vmem:[#allocation53_spill] sm:$0xff] %v8087_v19  ;;  %13220 = vst [vmem:[#allocation54_spill] sm:$0xff] %v8089_v13 }
 0x341   : > { %v8091_v2 = vpop.f32.mrf.mxu0  ;;  %6230 = vmatmul.mubr.msk.bf16.gmra.mxu0 %vm1150_vm3, %v8085_v16  ;;  %v8095_v4 = vpop.f32.mrf.mxu1  ;;  %6263 = vmatmul.mubr.msk.bf16.gmra.mxu1 %vm1150_vm3, %v8085_v16 }
 0x342   : > { %13221 = vst [vmem:[#allocation55_spill] sm:$0xff] %v8091_v2  ;;  %13222 = vst [vmem:[#allocation56_spill] sm:$0xff] %v8095_v4  ;;  %1614 = vmatprep.mubr.bf16.mxu0 %v13206_v10  ;;  %1967 = vmatprep.mubr.bf16.mxu1 %v13206_v10 }
 0x343   : > { %v8101_v15 = vpop.f32.mrf.mxu0  ;;  %v8103_v36 = vpop.f32.mrf.mxu1 }
 0x344   : > { %13223 = vst [vmem:[#allocation57_spill] sm:$0xff] %v8101_v15  ;;  %13224 = vst [vmem:[#allocation58_spill] sm:$0xff] %v8103_v36 }
 0x345   : > { %v8105_v33 = vpop.f32.mrf.mxu0  ;;  %v8107_v25 = vpop.f32.mrf.mxu1 }
 0x346   : > { %13225 = vst [vmem:[#allocation59_spill] sm:$0xff] %v8105_v33  ;;  %13226 = vst [vmem:[#allocation60_spill] sm:$0xff] %v8107_v25 }
 0x347   : > { %v8111_v22 = vpop.f32.mrf.mxu0  ;;  %v8113_v12 = vpop.f32.mrf.mxu1 }
 0x348   : > { %13228 = vst [vmem:[#allocation62_spill] sm:$0xff] %v8111_v22  ;;  %13229 = vst [vmem:[#allocation63_spill] sm:$0xff] %v8113_v12 }
 0x349   : > { %v8115_v14 = vpop.f32.mrf.mxu0  ;;  %6231 = vmatmul.mubr.msk.bf16.gmra.mxu0 %vm1150_vm3, %v8109_v28  ;;  %v8119_v13 = vpop.f32.mrf.mxu1  ;;  %6264 = vmatmul.mubr.msk.bf16.gmra.mxu1 %vm1150_vm3, %v8109_v28 }
 0x34a   : > { %13230 = vst [vmem:[#allocation64_spill] sm:$0xff] %v8115_v14  ;;  %13231 = vst [vmem:[#allocation65_spill] sm:$0xff] %v8119_v13  ;;  %2010 = vmatprep.mubr.bf16.mxu0 %v13206_v10  ;;  %2363 = vmatprep.mubr.bf16.mxu1 %v13206_v10 }
 0x34b   : > { %v8125_v5 = vpop.f32.mrf.mxu0  ;;  %v8127_v20 = vpop.f32.mrf.mxu1 }
 0x34c   : > { %13232 = vst [vmem:[#allocation66_spill] sm:$0xff] %v8125_v5  ;;  %13233 = vst [vmem:[#allocation67_spill] sm:$0xff] %v8127_v20 }
 0x34d   : > { %v8129_v34 = vpop.f32.mrf.mxu0  ;;  %v8131_v38 = vpop.f32.mrf.mxu1 }
 0x34e   : > { %13234 = vst [vmem:[#allocation68_spill] sm:$0xff] %v8129_v34  ;;  %13235 = vst [vmem:[#allocation69_spill] sm:$0xff] %v8131_v38 }
 0x34f   : > { %v8133_v31 = vpop.f32.mrf.mxu0  ;;  %v8135_v21 = vpop.f32.mrf.mxu1 }
 0x350   : > { %13236 = vst [vmem:[#allocation70_spill] sm:$0xff] %v8133_v31  ;;  %13237 = vst [vmem:[#allocation71_spill] sm:$0xff] %v8135_v21 }
 0x351   : > { %v8137_v23 = vpop.f32.mrf.mxu0  ;;  %v8139_v12 = vpop.f32.mrf.mxu1  ;;  %6266 = vmatmul.mubr.msk.bf16.vlgmr.msra.gmra.mxu0 %vm1150_vm3, %v7750_v35  ;;  %6299 = vmatmul.mubr.msk.bf16.vlgmr.msra.gmra.mxu1 %vm1150_vm3, %v7750_v35 }
 0x352   : > { %13238 = vst [vmem:[#allocation72_spill] sm:$0xff] %v8137_v23  ;;  %13239 = vst [vmem:[#allocation73_spill] sm:$0xff] %v8139_v12  ;;  %2020 = vmatprep.mubr.bf16.mxu0 %v13206_v10  ;;  %2373 = vmatprep.mubr.bf16.mxu1 %v13206_v10 }
 0x353   : > { %v8147_v28 = vpop.f32.mrf.mxu0  ;;  %v8149_v24 = vpop.f32.mrf.mxu1 }
 0x354   : > { %13240 = vst [vmem:[#allocation74_spill] sm:$0xff] %v8147_v28  ;;  %13241 = vst [vmem:[#allocation75_spill] sm:$0xff] %v8149_v24 }
 0x355   : > { %v8151_v39 = vpop.f32.mrf.mxu0  ;;  %v8153_v21 = vpop.f32.mrf.mxu1 }
 0x356   : > { %13242 = vst [vmem:[#allocation76_spill] sm:$0xff] %v8151_v39  ;;  %13243 = vst [vmem:[#allocation77_spill] sm:$0xff] %v8153_v21 }
 0x357   : > { %v8155_v23 = vpop.f32.mrf.mxu0  ;;  %v8157_v12 = vpop.f32.mrf.mxu1 }
 0x358   : > { %13244 = vst [vmem:[#allocation78_spill] sm:$0xff] %v8155_v23  ;;  %13245 = vst [vmem:[#allocation79_spill] sm:$0xff] %v8157_v12 }
 0x359   : > { %v8159_v7 = vpop.f32.mrf.mxu0  ;;  %v8161_v17 = vpop.f32.mrf.mxu1  ;;  %6267 = vmatmul.mubr.msk.bf16.gmra.mxu0 %vm1150_vm3, %v7760_v41  ;;  %6300 = vmatmul.mubr.msk.bf16.gmra.mxu1 %vm1150_vm3, %v7760_v41 }
 0x35a   : > { %13246 = vst [vmem:[#allocation80_spill] sm:$0xff] %v8159_v7  ;;  %13247 = vst [vmem:[#allocation81_spill] sm:$0xff] %v8161_v17  ;;  %2030 = vmatprep.mubr.bf16.mxu0 %v13206_v10  ;;  %2383 = vmatprep.mubr.bf16.mxu1 %v13206_v10 }
 0x35b   : > { %v8169_v35 = vpop.f32.mrf.mxu0  ;;  %v8171_v21 = vpop.f32.mrf.mxu1 }
 0x35c   : > { %13248 = vst [vmem:[#allocation82_spill] sm:$0xff] %v8169_v35  ;;  %13249 = vst [vmem:[#allocation83_spill] sm:$0xff] %v8171_v21 }
 0x35d   : > { %v8173_v24 = vpop.f32.mrf.mxu0  ;;  %v8175_v12 = vpop.f32.mrf.mxu1 }
 0x35e   : > { %13250 = vst [vmem:[#allocation84_spill] sm:$0xff] %v8173_v24  ;;  %13251 = vst [vmem:[#allocation85_spill] sm:$0xff] %v8175_v12 }
 0x35f   : > { %v8177_v39 = vpop.f32.mrf.mxu0  ;;  %v8179_v23 = vpop.f32.mrf.mxu1 }
 0x360   : > { %13252 = vst [vmem:[#allocation86_spill] sm:$0xff] %v8177_v39  ;;  %13253 = vst [vmem:[#allocation87_spill] sm:$0xff] %v8179_v23 }
 0x361   : > { %v8181_v17 = vpop.f32.mrf.mxu0  ;;  %v8183_v28 = vpop.f32.mrf.mxu1  ;;  %6268 = vmatmul.mubr.msk.bf16.gmra.mxu0 %vm1150_vm3, %v7769_v42  ;;  %6301 = vmatmul.mubr.msk.bf16.gmra.mxu1 %vm1150_vm3, %v7769_v42 }
 0x362   : > { %13254 = vst [vmem:[#allocation88_spill] sm:$0xff] %v8181_v17  ;;  %13255 = vst [vmem:[#allocation89_spill] sm:$0xff] %v8183_v28  ;;  %2040 = vmatprep.mubr.bf16.mxu0 %v13206_v10  ;;  %2393 = vmatprep.mubr.bf16.mxu1 %v13206_v10 }
 0x363   : > { %v8191_v41 = vpop.f32.mrf.mxu0  ;;  %v8193_v12 = vpop.f32.mrf.mxu1 }
 0x364   : > { %13256 = vst [vmem:[#allocation90_spill] sm:$0xff] %v8191_v41  ;;  %13257 = vst [vmem:[#allocation91_spill] sm:$0xff] %v8193_v12 }
 0x365   : > { %v8195_v21 = vpop.f32.mrf.mxu0  ;;  %v8197_v23 = vpop.f32.mrf.mxu1 }
 0x366   : > { %13258 = vst [vmem:[#allocation92_spill] sm:$0xff] %v8195_v21  ;;  %13259 = vst [vmem:[#allocation93_spill] sm:$0xff] %v8197_v23 }
 0x367   : > { %v8199_v24 = vpop.f32.mrf.mxu0  ;;  %v8201_v39 = vpop.f32.mrf.mxu1 }
 0x368   : > { %13260 = vst [vmem:[#allocation94_spill] sm:$0xff] %v8199_v24  ;;  %13261 = vst [vmem:[#allocation95_spill] sm:$0xff] %v8201_v39 }
 0x369   : > { %v8203_v28 = vpop.f32.mrf.mxu0  ;;  %v8205_v7 = vpop.f32.mrf.mxu1  ;;  %6269 = vmatmul.mubr.msk.bf16.gmra.mxu0 %vm1150_vm3, %v7777_v43  ;;  %6302 = vmatmul.mubr.msk.bf16.gmra.mxu1 %vm1150_vm3, %v7777_v43 }
 0x36a   : > { %13262 = vst [vmem:[#allocation96_spill] sm:$0xff] %v8203_v28  ;;  %13263 = vst [vmem:[#allocation97_spill] sm:$0xff] %v8205_v7  ;;  %2050 = vmatprep.mubr.bf16.mxu0 %v13206_v10  ;;  %2403 = vmatprep.mubr.bf16.mxu1 %v13206_v10 }
 0x36b   : > { %v8213_v42 = vpop.f32.mrf.mxu0  ;;  %v8215_v23 = vpop.f32.mrf.mxu1 }
 0x36c   : > { %13264 = vst [vmem:[#allocation98_spill] sm:$0xff] %v8213_v42  ;;  %13265 = vst [vmem:[#allocation99_spill] sm:$0xff] %v8215_v23 }
 0x36d   : > { %v8217_v12 = vpop.f32.mrf.mxu0  ;;  %v8219_v39 = vpop.f32.mrf.mxu1 }
 0x36e   : > { %13266 = vst [vmem:[#allocation100_spill] sm:$0xff] %v8217_v12  ;;  %13267 = vst [vmem:[#allocation101_spill] sm:$0xff] %v8219_v39 }
 0x36f   : > { %v8221_v21 = vpop.f32.mrf.mxu0  ;;  %v8223_v24 = vpop.f32.mrf.mxu1 }
 0x370   : > { %13268 = vst [vmem:[#allocation102_spill] sm:$0xff] %v8221_v21  ;;  %13269 = vst [vmem:[#allocation103_spill] sm:$0xff] %v8223_v24 }
 0x371   : > { %v8225_v35 = vpop.f32.mrf.mxu0  ;;  %v8227_v7 = vpop.f32.mrf.mxu1  ;;  %6270 = vmatmul.mubr.msk.bf16.gmra.mxu0 %vm1150_vm3, %v7785_v44  ;;  %6303 = vmatmul.mubr.msk.bf16.gmra.mxu1 %vm1150_vm3, %v7785_v44 }
 0x372   : > { %13270 = vst [vmem:[#allocation104_spill] sm:$0xff] %v8225_v35  ;;  %13271 = vst [vmem:[#allocation105_spill] sm:$0xff] %v8227_v7  ;;  %2060 = vmatprep.mubr.bf16.mxu0 %v13206_v10  ;;  %2413 = vmatprep.mubr.bf16.mxu1 %v13206_v10 }
 0x373   : > { %v8235_v43 = vpop.f32.mrf.mxu0  ;;  %v8237_v39 = vpop.f32.mrf.mxu1 }
 0x374   : > { %13272 = vst [vmem:[#allocation106_spill] sm:$0xff] %v8235_v43  ;;  %13273 = vst [vmem:[#allocation107_spill] sm:$0xff] %v8237_v39 }
 0x375   : > { %v8239_v23 = vpop.f32.mrf.mxu0  ;;  %v8241_v24 = vpop.f32.mrf.mxu1 }
 0x376   : > { %13274 = vst [vmem:[#allocation108_spill] sm:$0xff] %v8239_v23  ;;  %13275 = vst [vmem:[#allocation109_spill] sm:$0xff] %v8241_v24 }
 0x377   : > { %v8243_v12 = vpop.f32.mrf.mxu0  ;;  %v8245_v21 = vpop.f32.mrf.mxu1 }
 0x378   : > { %13276 = vst [vmem:[#allocation110_spill] sm:$0xff] %v8243_v12  ;;  %13277 = vst [vmem:[#allocation111_spill] sm:$0xff] %v8245_v21 }
 0x379   : > { %v8247_v17 = vpop.f32.mrf.mxu0  ;;  %v8249_v41 = vpop.f32.mrf.mxu1  ;;  %6271 = vmatmul.mubr.msk.bf16.gmra.mxu0 %vm1150_vm3, %v7793_v45  ;;  %6304 = vmatmul.mubr.msk.bf16.gmra.mxu1 %vm1150_vm3, %v7793_v45 }
 0x37a   : > { %13278 = vst [vmem:[#allocation112_spill] sm:$0xff] %v8247_v17  ;;  %13279 = vst [vmem:[#allocation113_spill] sm:$0xff] %v8249_v41  ;;  %2070 = vmatprep.mubr.bf16.mxu0 %v13206_v10  ;;  %2423 = vmatprep.mubr.bf16.mxu1 %v13206_v10 }
 0x37b   : > { %v8257_v44 = vpop.f32.mrf.mxu0  ;;  %v8259_v24 = vpop.f32.mrf.mxu1 }
 0x37c   : > { %13280 = vst [vmem:[#allocation114_spill] sm:$0xff] %v8257_v44  ;;  %13281 = vst [vmem:[#allocation115_spill] sm:$0xff] %v8259_v24 }
 0x37d   : > { %v8261_v39 = vpop.f32.mrf.mxu0  ;;  %v8263_v21 = vpop.f32.mrf.mxu1 }
 0x37e   : > { %13282 = vst [vmem:[#allocation116_spill] sm:$0xff] %v8261_v39  ;;  %13283 = vst [vmem:[#allocation117_spill] sm:$0xff] %v8263_v21 }
 0x37f   : > { %v8265_v23 = vpop.f32.mrf.mxu0  ;;  %v8267_v12 = vpop.f32.mrf.mxu1 }
 0x380   : > { %13284 = vst [vmem:[#allocation118_spill] sm:$0xff] %v8265_v23  ;;  %13285 = vst [vmem:[#allocation119_spill] sm:$0xff] %v8267_v12 }
 0x381   : > { %v8269_v7 = vpop.f32.mrf.mxu0  ;;  %v8271_v28 = vpop.f32.mrf.mxu1  ;;  %6272 = vmatmul.mubr.msk.bf16.gmra.mxu0 %vm1150_vm3, %v7801_v46  ;;  %6305 = vmatmul.mubr.msk.bf16.gmra.mxu1 %vm1150_vm3, %v7801_v46 }
 0x382   : > { %13286 = vst [vmem:[#allocation120_spill] sm:$0xff] %v8269_v7  ;;  %13287 = vst [vmem:[#allocation121_spill] sm:$0xff] %v8271_v28  ;;  %2080 = vmatprep.mubr.bf16.mxu0 %v13206_v10  ;;  %2433 = vmatprep.mubr.bf16.mxu1 %v13206_v10 }
 0x383   : > { %v8279_v45 = vpop.f32.mrf.mxu0  ;;  %v8281_v21 = vpop.f32.mrf.mxu1 }
 0x384   : > { %13288 = vst [vmem:[#allocation122_spill] sm:$0xff] %v8279_v45  ;;  %13289 = vst [vmem:[#allocation123_spill] sm:$0xff] %v8281_v21 }
 0x385   : > { %v8283_v24 = vpop.f32.mrf.mxu0  ;;  %v8285_v12 = vpop.f32.mrf.mxu1 }
 0x386   : > { %13290 = vst [vmem:[#allocation124_spill] sm:$0xff] %v8283_v24  ;;  %13291 = vst [vmem:[#allocation125_spill] sm:$0xff] %v8285_v12 }
 0x387   : > { %v8287_v42 = vpop.f32.mrf.mxu0  ;;  %v8289_v39 = vpop.f32.mrf.mxu1 }
 0x388   : > { %13292 = vst [vmem:[#allocation126_spill] sm:$0xff] %v8287_v42  ;;  %13293 = vst [vmem:[#allocation127_spill] sm:$0xff] %v8289_v39 }
 0x389   : > { %v8291_v23 = vpop.f32.mrf.mxu0  ;;  %v8293_v41 = vpop.f32.mrf.mxu1  ;;  %6273 = vmatmul.mubr.msk.bf16.gmra.mxu0 %vm1150_vm3, %v7809_v47  ;;  %6306 = vmatmul.mubr.msk.bf16.gmra.mxu1 %vm1150_vm3, %v7809_v47 }
 0x38a   : > { %13294 = vst [vmem:[#allocation128_spill] sm:$0xff] %v8291_v23  ;;  %13295 = vst [vmem:[#allocation129_spill] sm:$0xff] %v8293_v41  ;;  %2090 = vmatprep.mubr.bf16.mxu0 %v13206_v10  ;;  %2443 = vmatprep.mubr.bf16.mxu1 %v13206_v10 }
 0x38b   : > { %v8301_v46 = vpop.f32.mrf.mxu0  ;;  %v8303_v12 = vpop.f32.mrf.mxu1 }
 0x38c   : > { %13296 = vst [vmem:[#allocation130_spill] sm:$0xff] %v8301_v46  ;;  %13297 = vst [vmem:[#allocation131_spill] sm:$0xff] %v8303_v12 }
 0x38d   : > { %v8305_v21 = vpop.f32.mrf.mxu0  ;;  %v8307_v39 = vpop.f32.mrf.mxu1 }
 0x38e   : > { %13298 = vst [vmem:[#allocation132_spill] sm:$0xff] %v8305_v21  ;;  %13299 = vst [vmem:[#allocation133_spill] sm:$0xff] %v8307_v39 }
 0x38f   : > { %v8309_v35 = vpop.f32.mrf.mxu0  ;;  %v8311_v43 = vpop.f32.mrf.mxu1 }
 0x390   : > { %13300 = vst [vmem:[#allocation134_spill] sm:$0xff] %v8309_v35  ;;  %13301 = vst [vmem:[#allocation135_spill] sm:$0xff] %v8311_v43 }
 0x391   : > { %v8313_v41 = vpop.f32.mrf.mxu0  ;;  %v8315_v24 = vpop.f32.mrf.mxu1  ;;  %6274 = vmatmul.mubr.msk.bf16.gmra.mxu0 %vm1150_vm3, %v7817_v48  ;;  %6307 = vmatmul.mubr.msk.bf16.gmra.mxu1 %vm1150_vm3, %v7817_v48 }
 0x392   : > { %13302 = vst [vmem:[#allocation136_spill] sm:$0xff] %v8313_v41  ;;  %13303 = vst [vmem:[#allocation137_spill] sm:$0xff] %v8315_v24  ;;  %2100 = vmatprep.mubr.bf16.mxu0 %v13206_v10  ;;  %2453 = vmatprep.mubr.bf16.mxu1 %v13206_v10 }
 0x393   : > { %v8323_v47 = vpop.f32.mrf.mxu0  ;;  %v8325_v39 = vpop.f32.mrf.mxu1 }
 0x394   : > { %13304 = vst [vmem:[#allocation138_spill] sm:$0xff] %v8323_v47  ;;  %13305 = vst [vmem:[#allocation139_spill] sm:$0xff] %v8325_v39 }
 0x395   : > { %v8327_v12 = vpop.f32.mrf.mxu0  ;;  %v8329_v43 = vpop.f32.mrf.mxu1 }
 0x396   : > { %13306 = vst [vmem:[#allocation140_spill] sm:$0xff] %v8327_v12  ;;  %13307 = vst [vmem:[#allocation141_spill] sm:$0xff] %v8329_v43 }
 0x397   : > { %v8331_v41 = vpop.f32.mrf.mxu0  ;;  %v8333_v24 = vpop.f32.mrf.mxu1 }
 0x398   : > { %13308 = vst [vmem:[#allocation142_spill] sm:$0xff] %v8331_v41  ;;  %13309 = vst [vmem:[#allocation143_spill] sm:$0xff] %v8333_v24 }
 0x399   : > { %v8335_v21 = vpop.f32.mrf.mxu0  ;;  %v8337_v35 = vpop.f32.mrf.mxu1  ;;  %6275 = vmatmul.mubr.msk.bf16.gmra.mxu0 %vm1150_vm3, %v7825_v49  ;;  %6308 = vmatmul.mubr.msk.bf16.gmra.mxu1 %vm1150_vm3, %v7825_v49 }
 0x39a   : > { %13310 = vst [vmem:[#allocation144_spill] sm:$0xff] %v8335_v21  ;;  %13311 = vst [vmem:[#allocation145_spill] sm:$0xff] %v8337_v35  ;;  %2110 = vmatprep.mubr.bf16.mxu0 %v13206_v10  ;;  %2463 = vmatprep.mubr.bf16.mxu1 %v13206_v10 }
 0x39b   : > { %v8345_v48 = vpop.f32.mrf.mxu0  ;;  %v8347_v43 = vpop.f32.mrf.mxu1 }
 0x39c   : > { %13312 = vst [vmem:[#allocation146_spill] sm:$0xff] %v8345_v48  ;;  %13313 = vst [vmem:[#allocation147_spill] sm:$0xff] %v8347_v43 }
 0x39d   : > { %v8349_v39 = vpop.f32.mrf.mxu0  ;;  %v8351_v24 = vpop.f32.mrf.mxu1 }
 0x39e   : > { %13314 = vst [vmem:[#allocation148_spill] sm:$0xff] %v8349_v39  ;;  %13315 = vst [vmem:[#allocation149_spill] sm:$0xff] %v8351_v24 }
 0x39f   : > { %v8353_v12 = vpop.f32.mrf.mxu0  ;;  %v8355_v41 = vpop.f32.mrf.mxu1 }
 0x3a0   : > { %13316 = vst [vmem:[#allocation150_spill] sm:$0xff] %v8353_v12  ;;  %13317 = vst [vmem:[#allocation151_spill] sm:$0xff] %v8355_v41 }
 0x3a1   : > { %v8357_v35 = vpop.f32.mrf.mxu0  ;;  %v8359_v47 = vpop.f32.mrf.mxu1  ;;  %6276 = vmatmul.mubr.msk.bf16.gmra.mxu0 %vm1150_vm3, %v7833_v50  ;;  %6309 = vmatmul.mubr.msk.bf16.gmra.mxu1 %vm1150_vm3, %v7833_v50 }
 0x3a2   : > { %13318 = vst [vmem:[#allocation152_spill] sm:$0xff] %v8357_v35  ;;  %13319 = vst [vmem:[#allocation153_spill] sm:$0xff] %v8359_v47  ;;  %2120 = vmatprep.mubr.bf16.mxu0 %v13206_v10  ;;  %2473 = vmatprep.mubr.bf16.mxu1 %v13206_v10 }
 0x3a3   : > { %v8367_v49 = vpop.f32.mrf.mxu0  ;;  %v8369_v24 = vpop.f32.mrf.mxu1 }
 0x3a4   : > { %13320 = vst [vmem:[#allocation154_spill] sm:$0xff] %v8367_v49  ;;  %13321 = vst [vmem:[#allocation155_spill] sm:$0xff] %v8369_v24 }
 0x3a5   : > { %v8371_v43 = vpop.f32.mrf.mxu0  ;;  %v8373_v41 = vpop.f32.mrf.mxu1 }
 0x3a6   : > { %13322 = vst [vmem:[#allocation156_spill] sm:$0xff] %v8371_v43  ;;  %13323 = vst [vmem:[#allocation157_spill] sm:$0xff] %v8373_v41 }
 0x3a7   : > { %v8375_v39 = vpop.f32.mrf.mxu0  ;;  %v8377_v12 = vpop.f32.mrf.mxu1 }
 0x3a8   : > { %13324 = vst [vmem:[#allocation158_spill] sm:$0xff] %v8375_v39  ;;  %13325 = vst [vmem:[#allocation159_spill] sm:$0xff] %v8377_v12 }
 0x3a9   : > { %v8379_v47 = vpop.f32.mrf.mxu0  ;;  %v8381_v21 = vpop.f32.mrf.mxu1  ;;  %6277 = vmatmul.mubr.msk.bf16.gmra.mxu0 %vm1150_vm3, %v7841_v51  ;;  %6310 = vmatmul.mubr.msk.bf16.gmra.mxu1 %vm1150_vm3, %v7841_v51 }
 0x3aa   : > { %13326 = vst [vmem:[#allocation160_spill] sm:$0xff] %v8379_v47  ;;  %13327 = vst [vmem:[#allocation161_spill] sm:$0xff] %v8381_v21  ;;  %2130 = vmatprep.mubr.bf16.mxu0 %v13206_v10  ;;  %2483 = vmatprep.mubr.bf16.mxu1 %v13206_v10 }
 0x3ab   : > { %v8389_v50 = vpop.f32.mrf.mxu0  ;;  %v8391_v41 = vpop.f32.mrf.mxu1 }
 0x3ac   : > { %13328 = vst [vmem:[#allocation162_spill] sm:$0xff] %v8389_v50  ;;  %13329 = vst [vmem:[#allocation163_spill] sm:$0xff] %v8391_v41 }
 0x3ad   : > { %v8393_v24 = vpop.f32.mrf.mxu0  ;;  %v8395_v12 = vpop.f32.mrf.mxu1 }
 0x3ae   : > { %13330 = vst [vmem:[#allocation164_spill] sm:$0xff] %v8393_v24  ;;  %13331 = vst [vmem:[#allocation165_spill] sm:$0xff] %v8395_v12 }
 0x3af   : > { %v8397_v43 = vpop.f32.mrf.mxu0  ;;  %v8399_v39 = vpop.f32.mrf.mxu1 }
 0x3b0   : > { %13332 = vst [vmem:[#allocation166_spill] sm:$0xff] %v8397_v43  ;;  %13333 = vst [vmem:[#allocation167_spill] sm:$0xff] %v8399_v39 }
 0x3b1   : > { %v8401_v48 = vpop.f32.mrf.mxu0  ;;  %v8403_v21 = vpop.f32.mrf.mxu1  ;;  %6278 = vmatmul.mubr.msk.bf16.gmra.mxu0 %vm1150_vm3, %v7849_v53  ;;  %6311 = vmatmul.mubr.msk.bf16.gmra.mxu1 %vm1150_vm3, %v7849_v53 }
 0x3b2   : > { %13334 = vst [vmem:[#allocation168_spill] sm:$0xff] %v8401_v48  ;;  %13335 = vst [vmem:[#allocation169_spill] sm:$0xff] %v8403_v21  ;;  %2140 = vmatprep.mubr.bf16.mxu0 %v13206_v10  ;;  %2493 = vmatprep.mubr.bf16.mxu1 %v13206_v10 }
 0x3b3   : > { %v8411_v51 = vpop.f32.mrf.mxu0  ;;  %v8413_v12 = vpop.f32.mrf.mxu1 }
 0x3b4   : > { %13336 = vst [vmem:[#allocation170_spill] sm:$0xff] %v8411_v51  ;;  %13337 = vst [vmem:[#allocation171_spill] sm:$0xff] %v8413_v12 }
 0x3b5   : > { %v8415_v41 = vpop.f32.mrf.mxu0  ;;  %v8417_v39 = vpop.f32.mrf.mxu1 }
 0x3b6   : > { %13338 = vst [vmem:[#allocation172_spill] sm:$0xff] %v8415_v41  ;;  %13339 = vst [vmem:[#allocation173_spill] sm:$0xff] %v8417_v39 }
 0x3b7   : > { %v8419_v24 = vpop.f32.mrf.mxu0  ;;  %v8421_v43 = vpop.f32.mrf.mxu1 }
 0x3b8   : > { %13340 = vst [vmem:[#allocation174_spill] sm:$0xff] %v8419_v24  ;;  %13341 = vst [vmem:[#allocation175_spill] sm:$0xff] %v8421_v43 }
 0x3b9   : > { %v8423_v35 = vpop.f32.mrf.mxu0  ;;  %v8425_v49 = vpop.f32.mrf.mxu1  ;;  %6279 = vmatmul.mubr.msk.bf16.gmra.mxu0 %vm1150_vm3, %v7857_v54  ;;  %6312 = vmatmul.mubr.msk.bf16.gmra.mxu1 %vm1150_vm3, %v7857_v54 }
 0x3ba   : > { %13342 = vst [vmem:[#allocation176_spill] sm:$0xff] %v8423_v35  ;;  %13343 = vst [vmem:[#allocation177_spill] sm:$0xff] %v8425_v49  ;;  %2150 = vmatprep.mubr.bf16.mxu0 %v13206_v10  ;;  %2503 = vmatprep.mubr.bf16.mxu1 %v13206_v10 }
 0x3bb   : > { %v8433_v53 = vpop.f32.mrf.mxu0  ;;  %v8435_v39 = vpop.f32.mrf.mxu1 }
 0x3bc   : > { %13344 = vst [vmem:[#allocation178_spill] sm:$0xff] %v8433_v53  ;;  %13345 = vst [vmem:[#allocation179_spill] sm:$0xff] %v8435_v39 }
 0x3bd   : > { %v8437_v12 = vpop.f32.mrf.mxu0  ;;  %v8439_v43 = vpop.f32.mrf.mxu1 }
 0x3be   : > { %13346 = vst [vmem:[#allocation180_spill] sm:$0xff] %v8437_v12  ;;  %13347 = vst [vmem:[#allocation181_spill] sm:$0xff] %v8439_v43 }
 0x3bf   : > { %v8441_v41 = vpop.f32.mrf.mxu0  ;;  %v8443_v24 = vpop.f32.mrf.mxu1 }
 0x3c0   : > { %13348 = vst [vmem:[#allocation182_spill] sm:$0xff] %v8441_v41  ;;  %13349 = vst [vmem:[#allocation183_spill] sm:$0xff] %v8443_v24 }
 0x3c1   : > { %v8445_v21 = vpop.f32.mrf.mxu0  ;;  %v8447_v47 = vpop.f32.mrf.mxu1  ;;  %6280 = vmatmul.mubr.msk.bf16.gmra.mxu0 %vm1150_vm3, %v7865_v55  ;;  %6313 = vmatmul.mubr.msk.bf16.gmra.mxu1 %vm1150_vm3, %v7865_v55 }
 0x3c2   : > { %13350 = vst [vmem:[#allocation184_spill] sm:$0xff] %v8445_v21  ;;  %13351 = vst [vmem:[#allocation185_spill] sm:$0xff] %v8447_v47  ;;  %2160 = vmatprep.mubr.bf16.mxu0 %v13206_v10  ;;  %2513 = vmatprep.mubr.bf16.mxu1 %v13206_v10 }
 0x3c3   : > { %v8455_v54 = vpop.f32.mrf.mxu0  ;;  %v8457_v43 = vpop.f32.mrf.mxu1 }
 0x3c4   : > { %13352 = vst [vmem:[#allocation186_spill] sm:$0xff] %v8455_v54  ;;  %13353 = vst [vmem:[#allocation187_spill] sm:$0xff] %v8457_v43 }
 0x3c5   : > { %v8459_v39 = vpop.f32.mrf.mxu0  ;;  %v8461_v24 = vpop.f32.mrf.mxu1 }
 0x3c6   : > { %13354 = vst [vmem:[#allocation188_spill] sm:$0xff] %v8459_v39  ;;  %13355 = vst [vmem:[#allocation189_spill] sm:$0xff] %v8461_v24 }
 0x3c7   : > { %v8463_v50 = vpop.f32.mrf.mxu0  ;;  %v8465_v12 = vpop.f32.mrf.mxu1 }
 0x3c8   : > { %13356 = vst [vmem:[#allocation190_spill] sm:$0xff] %v8463_v50  ;;  %13357 = vst [vmem:[#allocation191_spill] sm:$0xff] %v8465_v12 }
 0x3c9   : > { %v8467_v41 = vpop.f32.mrf.mxu0  ;;  %v8469_v49 = vpop.f32.mrf.mxu1  ;;  %6281 = vmatmul.mubr.msk.bf16.gmra.mxu0 %vm1150_vm3, %v7873_v56  ;;  %6314 = vmatmul.mubr.msk.bf16.gmra.mxu1 %vm1150_vm3, %v7873_v56 }
 0x3ca   : > { %13358 = vst [vmem:[#allocation192_spill] sm:$0xff] %v8467_v41  ;;  %13359 = vst [vmem:[#allocation193_spill] sm:$0xff] %v8469_v49  ;;  %2170 = vmatprep.mubr.bf16.mxu0 %v13206_v10  ;;  %2523 = vmatprep.mubr.bf16.mxu1 %v13206_v10 }
 0x3cb   : > { %v8477_v55 = vpop.f32.mrf.mxu0  ;;  %v8479_v24 = vpop.f32.mrf.mxu1 }
 0x3cc   : > { %13360 = vst [vmem:[#allocation194_spill] sm:$0xff] %v8477_v55  ;;  %13361 = vst [vmem:[#allocation195_spill] sm:$0xff] %v8479_v24 }
 0x3cd   : > { %v8481_v43 = vpop.f32.mrf.mxu0  ;;  %v8483_v12 = vpop.f32.mrf.mxu1 }
 0x3ce   : > { %13362 = vst [vmem:[#allocation196_spill] sm:$0xff] %v8481_v43  ;;  %13363 = vst [vmem:[#allocation197_spill] sm:$0xff] %v8483_v12 }
 0x3cf   : > { %v8485_v48 = vpop.f32.mrf.mxu0  ;;  %v8487_v51 = vpop.f32.mrf.mxu1 }
 0x3d0   : > { %13364 = vst [vmem:[#allocation198_spill] sm:$0xff] %v8485_v48  ;;  %13365 = vst [vmem:[#allocation199_spill] sm:$0xff] %v8487_v51 }
 0x3d1   : > { %v8489_v49 = vpop.f32.mrf.mxu0  ;;  %v8491_v39 = vpop.f32.mrf.mxu1  ;;  %6282 = vmatmul.mubr.msk.bf16.gmra.mxu0 %vm1150_vm3, %v7881_v57  ;;  %6315 = vmatmul.mubr.msk.bf16.gmra.mxu1 %vm1150_vm3, %v7881_v57 }
 0x3d2   : > { %13366 = vst [vmem:[#allocation200_spill] sm:$0xff] %v8489_v49  ;;  %13367 = vst [vmem:[#allocation201_spill] sm:$0xff] %v8491_v39  ;;  %2180 = vmatprep.mubr.bf16.mxu0 %v13206_v10  ;;  %2533 = vmatprep.mubr.bf16.mxu1 %v13206_v10 }
 0x3d3   : > { %v8499_v56 = vpop.f32.mrf.mxu0  ;;  %v8501_v12 = vpop.f32.mrf.mxu1 }
 0x3d4   : > { %13368 = vst [vmem:[#allocation202_spill] sm:$0xff] %v8499_v56  ;;  %13369 = vst [vmem:[#allocation203_spill] sm:$0xff] %v8501_v12 }
 0x3d5   : > { %v8503_v24 = vpop.f32.mrf.mxu0  ;;  %v8505_v51 = vpop.f32.mrf.mxu1 }
 0x3d6   : > { %13370 = vst [vmem:[#allocation204_spill] sm:$0xff] %v8503_v24  ;;  %13371 = vst [vmem:[#allocation205_spill] sm:$0xff] %v8505_v51 }
 0x3d7   : > { %v8507_v49 = vpop.f32.mrf.mxu0  ;;  %v8509_v39 = vpop.f32.mrf.mxu1 }
 0x3d8   : > { %13372 = vst [vmem:[#allocation206_spill] sm:$0xff] %v8507_v49  ;;  %13373 = vst [vmem:[#allocation207_spill] sm:$0xff] %v8509_v39 }
 0x3d9   : > { %v8511_v43 = vpop.f32.mrf.mxu0  ;;  %v8513_v48 = vpop.f32.mrf.mxu1  ;;  %6283 = vmatmul.mubr.msk.bf16.gmra.mxu0 %vm1150_vm3, %v7889_v58  ;;  %6316 = vmatmul.mubr.msk.bf16.gmra.mxu1 %vm1150_vm3, %v7889_v58 }
 0x3da   : > { %13374 = vst [vmem:[#allocation208_spill] sm:$0xff] %v8511_v43  ;;  %13375 = vst [vmem:[#allocation209_spill] sm:$0xff] %v8513_v48  ;;  %2190 = vmatprep.mubr.bf16.mxu0 %v13206_v10  ;;  %2543 = vmatprep.mubr.bf16.mxu1 %v13206_v10 }
 0x3db   : > { %v8521_v57 = vpop.f32.mrf.mxu0  ;;  %v8523_v12 = vpop.f32.mrf.mxu1 }
 0x3dc   : > { %13376 = vst [vmem:[#allocation210_spill] sm:$0xff] %v8521_v57  ;;  %13377 = vst [vmem:[#allocation211_spill] sm:$0xff] %v8523_v12 }
 0x3dd   : > { %v8525_v51 = vpop.f32.mrf.mxu0  ;;  %v8527_v39 = vpop.f32.mrf.mxu1 }
 0x3de   : > { %13378 = vst [vmem:[#allocation212_spill] sm:$0xff] %v8525_v51  ;;  %13379 = vst [vmem:[#allocation213_spill] sm:$0xff] %v8527_v39 }
 0x3df   : > { %v8529_v43 = vpop.f32.mrf.mxu0  ;;  %v8531_v48 = vpop.f32.mrf.mxu1 }
 0x3e0   : > { %13380 = vst [vmem:[#allocation214_spill] sm:$0xff] %v8529_v43  ;;  %13381 = vst [vmem:[#allocation215_spill] sm:$0xff] %v8531_v48 }
 0x3e1   : > { %v8533_v24 = vpop.f32.mrf.mxu0  ;;  %v8535_v49 = vpop.f32.mrf.mxu1  ;;  %6284 = vmatmul.mubr.msk.bf16.gmra.mxu0 %vm1150_vm3, %v7897_v59  ;;  %6317 = vmatmul.mubr.msk.bf16.gmra.mxu1 %vm1150_vm3, %v7897_v59 }
 0x3e2   : > { %13382 = vst [vmem:[#allocation216_spill] sm:$0xff] %v8533_v24  ;;  %13383 = vst [vmem:[#allocation217_spill] sm:$0xff] %v8535_v49  ;;  %2200 = vmatprep.mubr.bf16.mxu0 %v13206_v10  ;;  %2553 = vmatprep.mubr.bf16.mxu1 %v13206_v10 }
 0x3e3   : > { %v8543_v58 = vpop.f32.mrf.mxu0  ;;  %v8545_v39 = vpop.f32.mrf.mxu1 }
 0x3e4   : > { %13384 = vst [vmem:[#allocation218_spill] sm:$0xff] %v8543_v58  ;;  %13385 = vst [vmem:[#allocation219_spill] sm:$0xff] %v8545_v39 }
 0x3e5   : > { %v8547_v12 = vpop.f32.mrf.mxu0  ;;  %v8549_v48 = vpop.f32.mrf.mxu1 }
 0x3e6   : > { %13386 = vst [vmem:[#allocation220_spill] sm:$0xff] %v8547_v12  ;;  %13387 = vst [vmem:[#allocation221_spill] sm:$0xff] %v8549_v48 }
 0x3e7   : > { %v8551_v51 = vpop.f32.mrf.mxu0  ;;  %v8553_v49 = vpop.f32.mrf.mxu1 }
 0x3e8   : > { %13388 = vst [vmem:[#allocation222_spill] sm:$0xff] %v8551_v51  ;;  %13389 = vst [vmem:[#allocation223_spill] sm:$0xff] %v8553_v49 }
 0x3e9   : > { %v8555_v43 = vpop.f32.mrf.mxu0  ;;  %v8557_v24 = vpop.f32.mrf.mxu1  ;;  %6285 = vmatmul.mubr.msk.bf16.gmra.mxu0 %vm1150_vm3, %v7905_v60  ;;  %6318 = vmatmul.mubr.msk.bf16.gmra.mxu1 %vm1150_vm3, %v7905_v60 }
 0x3ea   : > { %13390 = vst [vmem:[#allocation224_spill] sm:$0xff] %v8555_v43  ;;  %13391 = vst [vmem:[#allocation225_spill] sm:$0xff] %v8557_v24  ;;  %2210 = vmatprep.mubr.bf16.mxu0 %v13206_v10  ;;  %2563 = vmatprep.mubr.bf16.mxu1 %v13206_v10 }
 0x3eb   : > { %v8565_v59 = vpop.f32.mrf.mxu0  ;;  %v8567_v39 = vpop.f32.mrf.mxu1 }
 0x3ec   : > { %13392 = vst [vmem:[#allocation226_spill] sm:$0xff] %v8565_v59  ;;  %13393 = vst [vmem:[#allocation227_spill] sm:$0xff] %v8567_v39 }
 0x3ed   : > { %v8569_v48 = vpop.f32.mrf.mxu0  ;;  %v8571_v49 = vpop.f32.mrf.mxu1 }
 0x3ee   : > { %13394 = vst [vmem:[#allocation228_spill] sm:$0xff] %v8569_v48  ;;  %13395 = vst [vmem:[#allocation229_spill] sm:$0xff] %v8571_v49 }
 0x3ef   : > { %v8573_v43 = vpop.f32.mrf.mxu0  ;;  %v8575_v24 = vpop.f32.mrf.mxu1 }
 0x3f0   : > { %13396 = vst [vmem:[#allocation230_spill] sm:$0xff] %v8573_v43  ;;  %13397 = vst [vmem:[#allocation231_spill] sm:$0xff] %v8575_v24 }
 0x3f1   : > { %v8577_v12 = vpop.f32.mrf.mxu0  ;;  %v8579_v51 = vpop.f32.mrf.mxu1  ;;  %6286 = vmatmul.mubr.msk.bf16.gmra.mxu0 %vm1150_vm3, %v7913_v61  ;;  %6319 = vmatmul.mubr.msk.bf16.gmra.mxu1 %vm1150_vm3, %v7913_v61 }
 0x3f2   : > { %13398 = vst [vmem:[#allocation232_spill] sm:$0xff] %v8577_v12  ;;  %13399 = vst [vmem:[#allocation233_spill] sm:$0xff] %v8579_v51  ;;  %2220 = vmatprep.mubr.bf16.mxu0 %v13206_v10  ;;  %2573 = vmatprep.mubr.bf16.mxu1 %v13206_v10 }
 0x3f3   : > { %v8587_v60 = vpop.f32.mrf.mxu0  ;;  %v8589_v39 = vpop.f32.mrf.mxu1 }
 0x3f4   : > { %13400 = vst [vmem:[#allocation234_spill] sm:$0xff] %v8587_v60  ;;  %13401 = vst [vmem:[#allocation235_spill] sm:$0xff] %v8589_v39 }
 0x3f5   : > { %v8591_v49 = vpop.f32.mrf.mxu0  ;;  %v8593_v24 = vpop.f32.mrf.mxu1 }
 0x3f6   : > { %13402 = vst [vmem:[#allocation236_spill] sm:$0xff] %v8591_v49  ;;  %13403 = vst [vmem:[#allocation237_spill] sm:$0xff] %v8593_v24 }
 0x3f7   : > { %v8595_v12 = vpop.f32.mrf.mxu0  ;;  %v8597_v51 = vpop.f32.mrf.mxu1 }
 0x3f8   : > { %13404 = vst [vmem:[#allocation238_spill] sm:$0xff] %v8595_v12  ;;  %13405 = vst [vmem:[#allocation239_spill] sm:$0xff] %v8597_v51 }
 0x3f9   : > { %v8599_v48 = vpop.f32.mrf.mxu0  ;;  %v8601_v43 = vpop.f32.mrf.mxu1  ;;  %6287 = vmatmul.mubr.msk.bf16.gmra.mxu0 %vm1150_vm3, %v7921_v62  ;;  %6320 = vmatmul.mubr.msk.bf16.gmra.mxu1 %vm1150_vm3, %v7921_v62 }
 0x3fa   : > { %13406 = vst [vmem:[#allocation240_spill] sm:$0xff] %v8599_v48  ;;  %13407 = vst [vmem:[#allocation241_spill] sm:$0xff] %v8601_v43  ;;  %2230 = vmatprep.mubr.bf16.mxu0 %v13206_v10  ;;  %2583 = vmatprep.mubr.bf16.mxu1 %v13206_v10 }
 0x3fb   : > { %v8609_v61 = vpop.f32.mrf.mxu0  ;;  %v8611_v39 = vpop.f32.mrf.mxu1 }
 0x3fc   : > { %13408 = vst [vmem:[#allocation242_spill] sm:$0xff] %v8609_v61  ;;  %13409 = vst [vmem:[#allocation243_spill] sm:$0xff] %v8611_v39 }
 0x3fd   : > { %v8613_v24 = vpop.f32.mrf.mxu0  ;;  %v8615_v51 = vpop.f32.mrf.mxu1 }
 0x3fe   : > { %13410 = vst [vmem:[#allocation244_spill] sm:$0xff] %v8613_v24  ;;  %13411 = vst [vmem:[#allocation245_spill] sm:$0xff] %v8615_v51 }
 0x3ff   : > { %v8617_v48 = vpop.f32.mrf.mxu0  ;;  %v8619_v43 = vpop.f32.mrf.mxu1 }
 0x400   : > { %13412 = vst [vmem:[#allocation246_spill] sm:$0xff] %v8617_v48  ;;  %13413 = vst [vmem:[#allocation247_spill] sm:$0xff] %v8619_v43 }
 0x401   : > { %v8621_v49 = vpop.f32.mrf.mxu0  ;;  %v8623_v12 = vpop.f32.mrf.mxu1  ;;  %6288 = vmatmul.mubr.msk.bf16.gmra.mxu0 %vm1150_vm3, %v7929_v63  ;;  %6321 = vmatmul.mubr.msk.bf16.gmra.mxu1 %vm1150_vm3, %v7929_v63 }
 0x402   : > { %13414 = vst [vmem:[#allocation248_spill] sm:$0xff] %v8621_v49  ;;  %13415 = vst [vmem:[#allocation249_spill] sm:$0xff] %v8623_v12  ;;  %2240 = vmatprep.mubr.bf16.mxu0 %v13206_v10  ;;  %2593 = vmatprep.mubr.bf16.mxu1 %v13206_v10 }
 0x403   : > { %v8631_v62 = vpop.f32.mrf.mxu0  ;;  %v8633_v39 = vpop.f32.mrf.mxu1 }
 0x404   : > { %13416 = vst [vmem:[#allocation250_spill] sm:$0xff] %v8631_v62  ;;  %13417 = vst [vmem:[#allocation251_spill] sm:$0xff] %v8633_v39 }
 0x405   : > { %v8635_v51 = vpop.f32.mrf.mxu0  ;;  %v8637_v43 = vpop.f32.mrf.mxu1 }
 0x406   : > { %13418 = vst [vmem:[#allocation252_spill] sm:$0xff] %v8635_v51  ;;  %13419 = vst [vmem:[#allocation253_spill] sm:$0xff] %v8637_v43 }
 0x407   : > { %v8639_v49 = vpop.f32.mrf.mxu0  ;;  %v8641_v12 = vpop.f32.mrf.mxu1 }
 0x408   : > { %13420 = vst [vmem:[#allocation254_spill] sm:$0xff] %v8639_v49  ;;  %13421 = vst [vmem:[#allocation255_spill] sm:$0xff] %v8641_v12 }
 0x409   : > { %v8643_v24 = vpop.f32.mrf.mxu0  ;;  %v8645_v48 = vpop.f32.mrf.mxu1  ;;  %6289 = vmatmul.mubr.msk.bf16.gmra.mxu0 %vm1150_vm3, %v7937_v0  ;;  %6322 = vmatmul.mubr.msk.bf16.gmra.mxu1 %vm1150_vm3, %v7937_v0 }
 0x40a   : > { %13422 = vst [vmem:[#allocation256_spill] sm:$0xff] %v8643_v24  ;;  %13423 = vst [vmem:[#allocation257_spill] sm:$0xff] %v8645_v48  ;;  %2250 = vmatprep.mubr.bf16.mxu0 %v13206_v10  ;;  %2603 = vmatprep.mubr.bf16.mxu1 %v13206_v10 }
 0x40b   : > { %v8653_v63 = vpop.f32.mrf.mxu0  ;;  %v8655_v43 = vpop.f32.mrf.mxu1 }
 0x40c   : > { %13424 = vst [vmem:[#allocation258_spill] sm:$0xff] %v8653_v63  ;;  %13425 = vst [vmem:[#allocation259_spill] sm:$0xff] %v8655_v43 }
 0x40d   : > { %v8657_v39 = vpop.f32.mrf.mxu0  ;;  %v8659_v12 = vpop.f32.mrf.mxu1 }
 0x40e   : > { %13426 = vst [vmem:[#allocation260_spill] sm:$0xff] %v8657_v39  ;;  %13427 = vst [vmem:[#allocation261_spill] sm:$0xff] %v8659_v12 }
 0x40f   : > { %v8661_v24 = vpop.f32.mrf.mxu0  ;;  %v8663_v48 = vpop.f32.mrf.mxu1 }
 0x410   : > { %13428 = vst [vmem:[#allocation262_spill] sm:$0xff] %v8661_v24  ;;  %13429 = vst [vmem:[#allocation263_spill] sm:$0xff] %v8663_v48 }
 0x411   : > { %v8665_v51 = vpop.f32.mrf.mxu0  ;;  %6290 = vmatmul.mubr.msk.bf16.gmra.mxu0 %vm1150_vm3, %v7945_v1  ;;  %v8669_v0 = vpop.f32.mrf.mxu1  ;;  %6323 = vmatmul.mubr.msk.bf16.gmra.mxu1 %vm1150_vm3, %v7945_v1 }
 0x412   : > { %13430 = vst [vmem:[#allocation264_spill] sm:$0xff] %v8665_v51  ;;  %13431 = vst [vmem:[#allocation265_spill] sm:$0xff] %v8669_v0  ;;  %2260 = vmatprep.mubr.bf16.mxu0 %v13206_v10  ;;  %2613 = vmatprep.mubr.bf16.mxu1 %v13206_v10 }
 0x413   : > { %v8675_v43 = vpop.f32.mrf.mxu0  ;;  %v8677_v12 = vpop.f32.mrf.mxu1 }
 0x414   : > { %13432 = vst [vmem:[#allocation266_spill] sm:$0xff] %v8675_v43  ;;  %13433 = vst [vmem:[#allocation267_spill] sm:$0xff] %v8677_v12 }
 0x415   : > { %v8679_v39 = vpop.f32.mrf.mxu0  ;;  %v8681_v48 = vpop.f32.mrf.mxu1 }
 0x416   : > { %13434 = vst [vmem:[#allocation268_spill] sm:$0xff] %v8679_v39  ;;  %13435 = vst [vmem:[#allocation269_spill] sm:$0xff] %v8681_v48 }
 0x417   : > { %v8683_v24 = vpop.f32.mrf.mxu0  ;;  %v8685_v63 = vpop.f32.mrf.mxu1 }
 0x418   : > { %13436 = vst [vmem:[#allocation270_spill] sm:$0xff] %v8683_v24  ;;  %13437 = vst [vmem:[#allocation271_spill] sm:$0xff] %v8685_v63 }
 0x419   : > { %v8687_v49 = vpop.f32.mrf.mxu0  ;;  %6291 = vmatmul.mubr.msk.bf16.gmra.mxu0 %vm1150_vm3, %v7965_v8  ;;  %v8691_v1 = vpop.f32.mrf.mxu1  ;;  %6324 = vmatmul.mubr.msk.bf16.gmra.mxu1 %vm1150_vm3, %v7965_v8 }
 0x41a   : > { %13438 = vst [vmem:[#allocation272_spill] sm:$0xff] %v8687_v49  ;;  %13439 = vst [vmem:[#allocation273_spill] sm:$0xff] %v8691_v1  ;;  %2270 = vmatprep.mubr.bf16.mxu0 %v13206_v10  ;;  %2623 = vmatprep.mubr.bf16.mxu1 %v13206_v10 }
 0x41b   : > { %v8697_v62 = vpop.f32.mrf.mxu0  ;;  %v8699_v61 = vpop.f32.mrf.mxu1 }
 0x41c   : > { %13440 = vst [vmem:[#allocation274_spill] sm:$0xff] %v8697_v62  ;;  %13441 = vst [vmem:[#allocation275_spill] sm:$0xff] %v8699_v61 }
 0x41d   : > { %v8701_v60 = vpop.f32.mrf.mxu0  ;;  %v8703_v59 = vpop.f32.mrf.mxu1 }
 0x41e   : > { %13442 = vst [vmem:[#allocation276_spill] sm:$0xff] %v8701_v60  ;;  %13443 = vst [vmem:[#allocation277_spill] sm:$0xff] %v8703_v59 }
 0x41f   : > { %v8705_v58 = vpop.f32.mrf.mxu0  ;;  %v8707_v57 = vpop.f32.mrf.mxu1 }
 0x420   : > { %13444 = vst [vmem:[#allocation278_spill] sm:$0xff] %v8705_v58  ;;  %13445 = vst [vmem:[#allocation279_spill] sm:$0xff] %v8707_v57  ;;  %v2774_v58 = vmax.f32 %v8067_v6, %v8077_v3  ;;  %v2756_v6 = vmax.f32 %v8043_v40, %v8053_v11  ;;  %v2738_v11 = vmax.f32 %v8019_v30, %v8029_v32  ;;  %v13491_v30 = vld [vmem:[#allocation61_spill] sm:$0xff] }
 0x421   : > { %v8709_v56 = vpop.f32.mrf.mxu0  ;;  %6292 = vmatmul.mubr.msk.bf16.gmra.mxu0 %vm1150_vm3, %v7989_v18  ;;  %v8713_v8 = vpop.f32.mrf.mxu1  ;;  %6325 = vmatmul.mubr.msk.bf16.gmra.mxu1 %vm1150_vm3, %v7989_v18 }
 0x422   : > { %13446 = vst [vmem:[#allocation280_spill] sm:$0xff] %v8709_v56  ;;  %13447 = vst [vmem:[#allocation281_spill] sm:$0xff] %v8713_v8  ;;  %2280 = vmatprep.mubr.bf16.mxu0 %v13206_v10  ;;  %2633 = vmatprep.mubr.bf16.mxu1 %v13206_v10 }
 0x423   : > { %v8719_v50 = vpop.f32.mrf.mxu0  ;;  %v8721_v47 = vpop.f32.mrf.mxu1 }
 0x424   : > { %13448 = vst [vmem:[#allocation282_spill] sm:$0xff] %v8719_v50  ;;  %13449 = vst [vmem:[#allocation283_spill] sm:$0xff] %v8721_v47 }
 0x425   : > { %v8723_v35 = vpop.f32.mrf.mxu0  ;;  %v8725_v53 = vpop.f32.mrf.mxu1 }
 0x426   : > { %13450 = vst [vmem:[#allocation284_spill] sm:$0xff] %v8723_v35  ;;  %13451 = vst [vmem:[#allocation285_spill] sm:$0xff] %v8725_v53  ;;  %v2792_v53 = vmax.f32 %v8091_v2, %v8101_v15  ;;  %v2801_v2 = vmax.f32 %v8105_v33, %v8111_v22  ;;  %v2783_v22 = vmax.f32 %v8081_v26, %v8087_v19 }
 0x427   : > { %v8727_v41 = vpop.f32.mrf.mxu0  ;;  %v8729_v55 = vpop.f32.mrf.mxu1 }
 0x428   : > { %13452 = vst [vmem:[#allocation286_spill] sm:$0xff] %v8727_v41  ;;  %13453 = vst [vmem:[#allocation287_spill] sm:$0xff] %v8729_v55  ;;  %v2793_v15 = vmax.f32 %v2792_v53, %v8095_v4  ;;  %v2775_v53 = vmax.f32 %v2774_v58, %v8071_v9  ;;  %v2802_v43 = vmax.f32 %v2801_v2, %v8107_v25  ;;  %v13486_v9 = vld [vmem:[#allocation45_spill] sm:$0xff]  ;;  %v13489_v25 = vld [vmem:[#allocation52_spill] sm:$0xff] }
 0x429   : > { %v8731_v21 = vpop.f32.mrf.mxu0  ;;  %6293 = vmatmul.mubr.msk.bf16.gmra.mxu0 %vm1150_vm3, %v8013_v27  ;;  %v8735_v18 = vpop.f32.mrf.mxu1  ;;  %6326 = vmatmul.mubr.msk.bf16.gmra.mxu1 %vm1150_vm3, %v8013_v27  ;;  %v2757_v58 = vmax.f32 %v2756_v6, %v8047_v52  ;;  %v13493_v6 = vld [vmem:[#allocation63_spill] sm:$0xff] }
 0x42a   : > { %13454 = vst [vmem:[#allocation288_spill] sm:$0xff] %v8731_v21  ;;  %13455 = vst [vmem:[#allocation289_spill] sm:$0xff] %v8735_v18  ;;  %2290 = vmatprep.mubr.bf16.mxu0 %v13206_v10  ;;  %2643 = vmatprep.mubr.bf16.mxu1 %v13206_v10  ;;  %v2794_v4 = vmax.f32 %v2793_v15, %v8103_v36  ;;  %v13488_v36 = vld [vmem:[#allocation50_spill] sm:$0xff]  ;;  %v13499_v52 = vld [vmem:[#allocation71_spill] sm:$0xff] }
 0x42b   : > { %v8741_v54 = vpop.f32.mrf.mxu0  ;;  %v8743_v42 = vpop.f32.mrf.mxu1  ;;  %v2776_v2 = vmax.f32 %v2775_v53, %v13488_v36  ;;  %v13496_v53 = vld [vmem:[#allocation32_spill] sm:$0xff] }
 0x42c   : > { %13456 = vst [vmem:[#allocation290_spill] sm:$0xff] %v8741_v54  ;;  %13457 = vst [vmem:[#allocation291_spill] sm:$0xff] %v8743_v42  ;;  %v2739_v36 = vmax.f32 %v2738_v11, %v13496_v53  ;;  %v13503_v11 = vld [vmem:[#allocation44_spill] sm:$0xff] }
 0x42d   : > { %v8745_v28 = vpop.f32.mrf.mxu0  ;;  %v8747_v17 = vpop.f32.mrf.mxu1 }
 0x42e   : > { %13458 = vst [vmem:[#allocation292_spill] sm:$0xff] %v8745_v28  ;;  %13459 = vst [vmem:[#allocation293_spill] sm:$0xff] %v8747_v17 }
 0x42f   : > { %v8749_v44 = vpop.f32.mrf.mxu0  ;;  %v8751_v23 = vpop.f32.mrf.mxu1 }
 0x430   : > { %13460 = vst [vmem:[#allocation294_spill] sm:$0xff] %v8749_v44  ;;  %13461 = vst [vmem:[#allocation295_spill] sm:$0xff] %v8751_v23 }
 0x431   : > { %v8753_v46 = vpop.f32.mrf.mxu0  ;;  %6294 = vmatmul.mubr.msk.bf16.gmra.mxu0 %vm1150_vm3, %v8037_v37  ;;  %v8757_v27 = vpop.f32.mrf.mxu1  ;;  %6327 = vmatmul.mubr.msk.bf16.gmra.mxu1 %vm1150_vm3, %v8037_v37 }
 0x432   : > { %13462 = vst [vmem:[#allocation296_spill] sm:$0xff] %v8753_v46  ;;  %13463 = vst [vmem:[#allocation297_spill] sm:$0xff] %v8757_v27  ;;  %2300 = vmatprep.mubr.bf16.mxu0 %v13206_v10  ;;  %2653 = vmatprep.mubr.bf16.mxu1 %v13206_v10 }
 0x433   : > { %v8763_v7 = vpop.f32.mrf.mxu0  ;;  %v8765_v45 = vpop.f32.mrf.mxu1 }
 0x434   : > { %13464 = vst [vmem:[#allocation298_spill] sm:$0xff] %v8763_v7  ;;  %13465 = vst [vmem:[#allocation299_spill] sm:$0xff] %v8765_v45 }
 0x435   : > { %v8767_v63 = vpop.f32.mrf.mxu0  ;;  %v8769_v48 = vpop.f32.mrf.mxu1 }
 0x436   : > { %13466 = vst [vmem:[#allocation300_spill] sm:$0xff] %v8767_v63  ;;  %13467 = vst [vmem:[#allocation301_spill] sm:$0xff] %v8769_v48 }
 0x437   : > { %v8771_v57 = vpop.f32.mrf.mxu0  ;;  %v8773_v12 = vpop.f32.mrf.mxu1 }
 0x438   : > { %13468 = vst [vmem:[#allocation302_spill] sm:$0xff] %v8771_v57  ;;  %13469 = vst [vmem:[#allocation303_spill] sm:$0xff] %v8773_v12 }
 0x439   : > { %v8775_v59 = vpop.f32.mrf.mxu0  ;;  %6295 = vmatmul.mubr.msk.bf16.gmra.mxu0 %vm1150_vm3, %v8061_v29  ;;  %v8779_v37 = vpop.f32.mrf.mxu1  ;;  %6328 = vmatmul.mubr.msk.bf16.gmra.mxu1 %vm1150_vm3, %v8061_v29  ;;  %v2810_v29 = vmax.f32 %v8115_v14, %v8125_v5 }
 0x43a   : > { %13470 = vst [vmem:[#allocation304_spill] sm:$0xff] %v8775_v59  ;;  %13471 = vst [vmem:[#allocation305_spill] sm:$0xff] %v8779_v37  ;;  %2310 = vmatprep.mubr.bf16.mxu0 %v13206_v10  ;;  %2663 = vmatprep.mubr.bf16.mxu1 %v13206_v10 }
 0x43b   : > { %v8785_v55 = vpop.f32.mrf.mxu0  ;;  %v8787_v61 = vpop.f32.mrf.mxu1  ;;  %v2811_v14 = vmax.f32 %v2810_v29, %v8119_v13  ;;  %v2784_v13 = vmax.f32 %v2783_v22, %v13489_v25  ;;  %v2777_v22 = vmax.f32 %v2776_v2, %v8775_v59  ;;  %v13504_v2 = vld [vmem:[#allocation54_spill] sm:$0xff] }
 0x43c   : > { %13472 = vst [vmem:[#allocation306_spill] sm:$0xff] %v8785_v55  ;;  %13473 = vst [vmem:[#allocation307_spill] sm:$0xff] %v8787_v61 }
 0x43d   : > { %v8789_v24 = vpop.f32.mrf.mxu0  ;;  %v8791_v0 = vpop.f32.mrf.mxu1  ;;  %v2785_v59 = vmax.f32 %v2784_v13, %v13504_v2  ;;  %v13612_v2 = vld [vmem:[#allocation124_spill] sm:$0xff] }
 0x43e   : > { %13474 = vst [vmem:[#allocation308_spill] sm:$0xff] %v8789_v24  ;;  %13475 = vst [vmem:[#allocation309_spill] sm:$0xff] %v8791_v0 }
 0x43f   : > { %v8795_v23 = vpop.f32.mrf.mxu0  ;;  %v8797_v47 = vpop.f32.mrf.mxu1 }
 0x440   : > { %13476 = vst [vmem:[#allocation310_spill] sm:$0xff] %v8795_v23  ;;  %13477 = vst [vmem:[#allocation311_spill] sm:$0xff] %v8797_v47 }
 0x441   : > { %v8803_v1 = vpop.f32.mrf.mxu0  ;;  %6296 = vmatmul.mubr.msk.bf16.gmra.mxu0 %vm1150_vm3, %v8085_v16  ;;  %v8807_v39 = vpop.f32.mrf.mxu1  ;;  %6329 = vmatmul.mubr.msk.bf16.gmra.mxu1 %vm1150_vm3, %v8085_v16  ;;  %v2819_v16 = vmax.f32 %v8129_v34, %v8133_v31  ;;  %v2812_v31 = vmax.f32 %v2811_v14, %v8127_v20  ;;  %v13487_v34 = vld [vmem:[#allocation43_spill] sm:$0xff]  ;;  %v2803_v14 = vmax.f32 %v2802_v43, %v13493_v6 }
 0x442   : > { %13478 = vst [vmem:[#allocation312_spill] sm:$0xff] %v8803_v1  ;;  %13479 = vst [vmem:[#allocation313_spill] sm:$0xff] %v8807_v39  ;;  %2320 = vmatprep.mubr.bf16.mxu0 %v13206_v10  ;;  %2673 = vmatprep.mubr.bf16.mxu1 %v13206_v10  ;;  %v2795_v26 = vmax.f32 %v2794_v4, %v8803_v1  ;;  %v2765_v15 = vmax.f32 %v13487_v34, %v13486_v9  ;;  %v13495_v1 = vld [vmem:[#allocation23_spill] sm:$0xff] }
 0x443   : > { %v8816_v3 = vpop.f32.mrf.mxu0  ;;  %v8818_v5 = vpop.f32.mrf.mxu1  ;;  %v2820_v19 = vmax.f32 %v2819_v16, %v8131_v38  ;;  %v13494_v16 = vld [vmem:[#allocation25_spill] sm:$0xff] }
 0x444   : > { %13480 = vst [vmem:[#allocation314_spill] sm:$0xff] %v8816_v3  ;;  %13481 = vst [vmem:[#allocation315_spill] sm:$0xff] %v8818_v5  ;;  %v2720_v9 = vmax.f32 %v13495_v1, %v13494_v16  ;;  %v2796_v38 = vmax.f32 %v2795_v26, %v8816_v3  ;;  %v13502_v1 = vld [vmem:[#allocation42_spill] sm:$0xff]  ;;  %v2766_v53 = vmax.f32 %v2765_v15, %v13503_v11  ;;  %v13509_v3 = vld [vmem:[#allocation24_spill] sm:$0xff] }
 0x445   : > { %v8828_v33 = vpop.f32.mrf.mxu0  ;;  %v8830_v10 = vpop.f32.mrf.mxu1  ;;  %v2821_v20 = vmax.f32 %v2820_v19, %v13499_v52  ;;  %v2758_v16 = vmax.f32 %v2757_v58, %v13502_v1  ;;  %v13507_v19 = vld [vmem:[#allocation17_spill] sm:$0xff]  ;;  %v13508_v52 = vld [vmem:[#allocation15_spill] sm:$0xff]  ;;  %v2778_v58 = vmax.f32 %v2777_v22, %v8785_v55  ;;  %v2786_v15 = vmax.f32 %v2785_v59, %v8789_v24  ;;  %v13515_v22 = vld [vmem:[#allocation36_spill] sm:$0xff] }
 0x446   : > { %13482 = vst [vmem:[#allocation316_spill] sm:$0xff] %v8828_v33  ;;  %13483 = vst [vmem:[#allocation317_spill] sm:$0xff] %v8830_v10  ;;  %v2702_v26 = vmax.f32 %v13508_v52, %v13507_v19  ;;  %v13516_v59 = vld [vmem:[#allocation46_spill] sm:$0xff] }
 0x447   : > { %v8836_v29 = vpop.f32.mrf.mxu0  ;;  %v8838_v40 = vpop.f32.mrf.mxu1  ;;  %v2767_v24 = vmax.f32 %v2766_v53, %v13516_v59  ;;  %v13611_v1 = vld [vmem:[#allocation126_spill] sm:$0xff] }
 0x448   : > { %13484 = vst [vmem:[#allocation318_spill] sm:$0xff] %v8836_v29  ;;  %13485 = vst [vmem:[#allocation319_spill] sm:$0xff] %v8838_v40  ;;  %v2945_v11 = vmax.f32 %v13612_v2, %v13611_v1  ;;  %v13625_v2 = vld [vmem:[#allocation123_spill] sm:$0xff] }
 0x449   : > { %v8848_v32 = vpop.f32.mrf.mxu0  ;;  %6297 = vmatmul.mubr.msk.bf16.gmra.mxu0 %vm1150_vm3, %v13491_v30  ;;  %v8852_v17 = vpop.f32.mrf.mxu1  ;;  %6330 = vmatmul.mubr.msk.bf16.gmra.mxu1 %vm1150_vm3, %v13491_v30  ;;  %v2804_v30 = vmax.f32 %v2803_v14, %v8828_v33  ;;  %v2721_v33 = vmax.f32 %v2720_v9, %v13509_v3  ;;  %v13513_v9 = vld [vmem:[#allocation27_spill] sm:$0xff] }
 0x44a   : > { %13490 = vst [vmem:[#allocation320_spill] sm:$0xff] %v8848_v32  ;;  %13492 = vst [vmem:[#allocation61_spill] sm:$0xff] %v8852_v17  ;;  %v2813_v4 = vmax.f32 %v2812_v31, %v8848_v32  ;;  %v13500_v31 = vld [vmem:[#allocation37_spill] sm:$0xff]  ;;  %v13501_v32 = vld [vmem:[#allocation35_spill] sm:$0xff] }
 0x44b   : > { %v8862_v34 = vpop.f32.mrf.mxu0  ;;  %v8864_v25 = vpop.f32.mrf.mxu1  ;;  %v2747_v6 = vmax.f32 %v13501_v32, %v13500_v31  ;;  %v2805_v31 = vmax.f32 %v2804_v30, %v8836_v29  ;;  %v13519_v30 = vld [vmem:[#allocation9_spill] sm:$0xff]  ;;  %v13520_v29 = vld [vmem:[#allocation7_spill] sm:$0xff] }
 0x44c   : > { %13497 = vst [vmem:[#allocation321_spill] sm:$0xff] %v8862_v34  ;;  %13498 = vst [vmem:[#allocation322_spill] sm:$0xff] %v8864_v25  ;;  %v2814_v43 = vmax.f32 %v2813_v4, %v8862_v34  ;;  %v2759_v34 = vmax.f32 %v2758_v16, %v8753_v46  ;;  %v13514_v16 = vld [vmem:[#allocation34_spill] sm:$0xff] }
 0x44d   : > { %v8875_v12 = vpop.f32.mrf.mxu0  ;;  %v8877_v42 = vpop.f32.mrf.mxu1  ;;  %v2740_v46 = vmax.f32 %v2739_v36, %v13514_v16  ;;  %v2748_v55 = vmax.f32 %v2747_v6, %v13515_v22  ;;  %v2768_v6 = vmax.f32 %v2767_v24, %v8767_v63  ;;  %v13527_v24 = vld [vmem:[#allocation28_spill] sm:$0xff] }
 0x44e   : > { %13505 = vst [vmem:[#allocation323_spill] sm:$0xff] %v8875_v12  ;;  %13506 = vst [vmem:[#allocation324_spill] sm:$0xff] %v8877_v42  ;;  %v2822_v14 = vmax.f32 %v2821_v20, %v8875_v12  ;;  %v2815_v4 = vmax.f32 %v2814_v43, %v8852_v17  ;;  %v2797_v43 = vmax.f32 %v2796_v38, %v8807_v39  ;;  %v13512_v17 = vld [vmem:[#allocation29_spill] sm:$0xff] }
 0x44f   : > { %v8887_v13 = vpop.f32.mrf.mxu0  ;;  %v8889_v32 = vpop.f32.mrf.mxu1  ;;  %v2729_v12 = vmax.f32 %v13513_v9, %v13512_v17  ;;  %v2741_v39 = vmax.f32 %v2740_v46, %v8731_v21  ;;  %v2760_v36 = vmax.f32 %v2759_v34, %v8763_v7  ;;  %v2779_v9 = vmax.f32 %v2778_v58, %v8779_v37  ;;  %v13525_v46 = vld [vmem:[#allocation19_spill] sm:$0xff]  ;;  %v13526_v34 = vld [vmem:[#allocation26_spill] sm:$0xff] }
 0x450   : > { %13510 = vst [vmem:[#allocation325_spill] sm:$0xff] %v8887_v13  ;;  %13511 = vst [vmem:[#allocation326_spill] sm:$0xff] %v8889_v32  ;;  %v2823_v52 = vmax.f32 %v2822_v14, %v8887_v13  ;;  %v2816_v20 = vmax.f32 %v2815_v4, %v8864_v25  ;;  %v2684_v14 = vmax.f32 %v13520_v29, %v13519_v30  ;;  %v13521_v13 = vld [vmem:[#allocation16_spill] sm:$0xff] }
 0x451   : > { %v8900_v19 = vpop.f32.mrf.mxu0  ;;  %v8902_v3 = vpop.f32.mrf.mxu1  ;;  %v2703_v4 = vmax.f32 %v2702_v26, %v13521_v13  ;;  %v2787_v17 = vmax.f32 %v2786_v15, %v8795_v23  ;;  %v2798_v30 = vmax.f32 %v2797_v43, %v8818_v5  ;;  %v2722_v7 = vmax.f32 %v2721_v33, %v13526_v34  ;;  %v13531_v15 = vld [vmem:[#allocation8_spill] sm:$0xff] }
 0x452   : > { %13517 = vst [vmem:[#allocation327_spill] sm:$0xff] %v8900_v19  ;;  %13518 = vst [vmem:[#allocation328_spill] sm:$0xff] %v8902_v3  ;;  %2817 = vmax.xlane.f32.xlu0 %v2816_v20  ;;  %v2824_v38 = vmax.f32 %v2823_v52, %v8877_v42  ;;  %v2806_v52 = vmax.f32 %v2805_v31, %v8830_v10  ;;  %v13524_v20 = vld [vmem:[#allocation21_spill] sm:$0xff]  ;;  %v2730_v63 = vmax.f32 %v2729_v12, %v13527_v24  ;;  %v13528_v42 = vld [vmem:[#allocation38_spill] sm:$0xff] }
 0x453   : > { %v8911_v25 = vpop.f32.mrf.mxu0  ;;  %v8913_v53 = vpop.f32.mrf.mxu1  ;;  %v2711_v21 = vmax.f32 %v13525_v46, %v13524_v20  ;;  %v2749_v29 = vmax.f32 %v2748_v55, %v13528_v42  ;;  %v2685_v23 = vmax.f32 %v2684_v14, %v13531_v15  ;;  %v2723_v43 = vmax.f32 %v2722_v7, %v8709_v56  ;;  %v13535_v7 = vld [vmem:[#allocation11_spill] sm:$0xff]  ;;  %v13538_v10 = vld [vmem:[#allocation30_spill] sm:$0xff]  ;;  %v13607_v34 = vld [vmem:[#allocation112_spill] sm:$0xff] }
 0x454   : > { %13522 = vst [vmem:[#allocation329_spill] sm:$0xff] %v8911_v25  ;;  %13523 = vst [vmem:[#allocation330_spill] sm:$0xff] %v8913_v53  ;;  %v2825_v26 = vmax.f32 %v2824_v38, %v8889_v32  ;;  %v2742_v31 = vmax.f32 %v2741_v39, %v8741_v54  ;;  %v2761_v12 = vmax.f32 %v2760_v36, %v8757_v27  ;;  %v13536_v39 = vld [vmem:[#allocation18_spill] sm:$0xff]  ;;  %v13610_v42 = vld [vmem:[#allocation121_spill] sm:$0xff] }
 0x455   : > { %v8925_v13 = vpop.f32.mrf.mxu0  ;;  %v8927_v58 = vpop.f32.mrf.mxu1  ;;  %v2750_v38 = vmax.f32 %v2749_v29, %v8745_v28  ;;  %v2769_v55 = vmax.f32 %v2768_v6, %v8771_v57  ;;  %v2780_v5 = vmax.f32 %v2779_v9, %v8787_v61  ;;  %v2807_v14 = vmax.f32 %v2806_v52, %v8838_v40  ;;  %v13537_v29 = vld [vmem:[#allocation20_spill] sm:$0xff]  ;;  %v13578_v40 = vld [vmem:[#allocation267_spill] sm:$0xff]  ;;  %v13606_v24 = vld [vmem:[#allocation114_spill] sm:$0xff] }
 0x456   : > { %13529 = vst [vmem:[#allocation331_spill] sm:$0xff] %v8925_v13  ;;  %13530 = vst [vmem:[#allocation332_spill] sm:$0xff] %v8927_v58  ;;  %2799 = vmax.xlane.f32.xlu0 %v2798_v30  ;;  %2826 = vmax.xlane.f32.xlu1 %v2825_v26  ;;  %v2788_v30 = vmax.f32 %v2787_v17, %v8791_v0  ;;  %v13534_v26 = vld [vmem:[#allocation13_spill] sm:$0xff]  ;;  %v2704_v54 = vmax.f32 %v2703_v4, %v13536_v39  ;;  %v13604_v39 = vld [vmem:[#allocation130_spill] sm:$0xff] }
 0x457   : > { %v8933_v37 = vpop.f32.mrf.mxu0  ;;  %v8935_v33 = vpop.f32.mrf.mxu1  ;;  %v2693_v56 = vmax.f32 %v13535_v7, %v13534_v26  ;;  %v2712_v28 = vmax.f32 %v2711_v21, %v13537_v29  ;;  %v2731_v32 = vmax.f32 %v2730_v63, %v13538_v10  ;;  %v2724_v6 = vmax.f32 %v2723_v43, %v8719_v50  ;;  %v13545_v50 = vld [vmem:[#allocation22_spill] sm:$0xff]  ;;  %v13635_v13 = vld [vmem:[#allocation108_spill] sm:$0xff] }
 0x458   : > { %13532 = vst [vmem:[#allocation333_spill] sm:$0xff] %v8933_v37  ;;  %13533 = vst [vmem:[#allocation334_spill] sm:$0xff] %v8935_v33  ;;  %v2705_v9 = vmax.f32 %v2704_v54, %v8687_v49  ;;  %v2743_v21 = vmax.f32 %v2742_v31, %v8735_v18  ;;  %v2751_v63 = vmax.f32 %v2750_v38, %v8749_v44  ;;  %v13544_v49 = vld [vmem:[#allocation12_spill] sm:$0xff]  ;;  %v13551_v44 = vld [vmem:[#allocation303_spill] sm:$0xff] }
 0x459   : > { %v8947_v15 = vpop.f32.mrf.mxu0  ;;  %v8949_v36 = vpop.f32.mrf.mxu1  ;;  %v2732_v17 = vmax.f32 %v2731_v32, %v8723_v35  ;;  %v2762_v4 = vmax.f32 %v2761_v12, %v8765_v45  ;;  %v2789_v57 = vmax.f32 %v2788_v30, %v8797_v47  ;;  %v2694_v43 = vmax.f32 %v2693_v56, %v13544_v49  ;;  %v13550_v56 = vld [vmem:[#allocation291_spill] sm:$0xff]  ;;  %v13553_v45 = vld [vmem:[#allocation14_spill] sm:$0xff]  ;;  %v13564_v47 = vld [vmem:[#allocation285_spill] sm:$0xff] }
 0x45a   : > { %13539 = vst [vmem:[#allocation335_spill] sm:$0xff] %v8947_v15  ;;  %13540 = vst [vmem:[#allocation336_spill] sm:$0xff] %v8949_v36  ;;  %2781 = vmax.xlane.f32.xlu0 %v2780_v5  ;;  %2808 = vmax.xlane.f32.xlu1 %v2807_v14  ;;  %v2770_v5 = vmax.f32 %v2769_v55, %v8769_v48  ;;  %v13543_v14 = vld [vmem:[#allocation10_spill] sm:$0xff]  ;;  %v2713_v32 = vmax.f32 %v2712_v28, %v13545_v50  ;;  %v13601_v49 = vld [vmem:[#allocation120_spill] sm:$0xff] }
 0x45b   : > { %v8954_v52 = vpop.f32.mrf.mxu0  ;;  %v8956_v27 = vpop.f32.mrf.mxu1  ;;  %v2686_v54 = vmax.f32 %v2685_v23, %v13543_v14  ;;  %v2706_v38 = vmax.f32 %v2705_v9, %v8697_v62  ;;  %v2725_v23 = vmax.f32 %v2724_v6, %v8713_v8  ;;  %v2733_v28 = vmax.f32 %v2732_v17, %v8727_v41  ;;  %v13557_v62 = vld [vmem:[#allocation268_spill] sm:$0xff]  ;;  %v13561_v41 = vld [vmem:[#allocation278_spill] sm:$0xff]  ;;  %v13615_v33 = vld [vmem:[#allocation129_spill] sm:$0xff] }
 0x45c   : > { %13541 = vst [vmem:[#allocation337_spill] sm:$0xff] %v8954_v52  ;;  %13542 = vst [vmem:[#allocation338_spill] sm:$0xff] %v8956_v27  ;;  %v2714_v12 = vmax.f32 %v2713_v32, %v8701_v60  ;;  %v2744_v18 = vmax.f32 %v2743_v21, %v13550_v56  ;;  %v2771_v48 = vmax.f32 %v2770_v5, %v13551_v44  ;;  %v13556_v32 = vld [vmem:[#allocation266_spill] sm:$0xff]  ;;  %v13560_v21 = vld [vmem:[#allocation273_spill] sm:$0xff] }
 0x45d   : > { %v8966_v35 = vpop.f32.mrf.mxu0  ;;  %v8968_v61 = vpop.f32.mrf.mxu1  ;;  %v2687_v31 = vmax.f32 %v2686_v54, %v8665_v51  ;;  %v2695_v54 = vmax.f32 %v2694_v43, %v13553_v45  ;;  %v2707_v5 = vmax.f32 %v2706_v38, %v13560_v21  ;;  %v13563_v56 = vld [vmem:[#allocation295_spill] sm:$0xff]  ;;  %v2734_v0 = vmax.f32 %v2733_v28, %v13564_v47  ;;  %v13600_v26 = vld [vmem:[#allocation122_spill] sm:$0xff]  ;;  %v13605_v50 = vld [vmem:[#allocation128_spill] sm:$0xff] }
 0x45e   : > { %13546 = vst [vmem:[#allocation339_spill] sm:$0xff] %v8966_v35  ;;  %13547 = vst [vmem:[#allocation340_spill] sm:$0xff] %v8968_v61  ;;  %2763 = vmax.xlane.f32.xlu0 %v2762_v4  ;;  %2790 = vmax.xlane.f32.xlu1 %v2789_v57  ;;  %v13552_v4 = vld [vmem:[#allocation293_spill] sm:$0xff]  ;;  %v13571_v21 = vld [vmem:[#allocation275_spill] sm:$0xff]  ;;  %v2936_v7 = vmax.f32 %v13601_v49, %v13600_v26  ;;  %v2954_v20 = vmax.f32 %v13605_v50, %v13604_v39 }
 0x45f   : > { %v8973_v30 = vpop.f32.mrf.mxu0  ;;  %v8975_v55 = vpop.f32.mrf.mxu1  ;;  %v2752_v57 = vmax.f32 %v2751_v63, %v13552_v4  ;;  %v2688_v60 = vmax.f32 %v2687_v31, %v13556_v32  ;;  %v2696_v6 = vmax.f32 %v2695_v54, %v13557_v62  ;;  %v2715_v63 = vmax.f32 %v2714_v12, %v13561_v41  ;;  %v13562_v4 = vld [vmem:[#allocation283_spill] sm:$0xff]  ;;  %v13569_v32 = vld [vmem:[#allocation265_spill] sm:$0xff]  ;;  %v13570_v62 = vld [vmem:[#allocation270_spill] sm:$0xff] }
 0x460   : > { %13548 = vst [vmem:[#allocation341_spill] sm:$0xff] %v8973_v30  ;;  %13549 = vst [vmem:[#allocation342_spill] sm:$0xff] %v8975_v55  ;;  %v2726_v43 = vmax.f32 %v2725_v23, %v13562_v4  ;;  %v2708_v23 = vmax.f32 %v2707_v5, %v13571_v21  ;;  %v13572_v41 = vld [vmem:[#allocation287_spill] sm:$0xff]  ;;  %v13573_v4 = vld [vmem:[#allocation277_spill] sm:$0xff]  ;;  %v2918_v10 = vmax.f32 %v13607_v34, %v13606_v24 }
 0x461   : > { %v8983_v51 = vpop.f32.mrf.mxu0  ;;  %v8985_v9 = vpop.f32.mrf.mxu1  ;;  %v2753_v44 = vmax.f32 %v2752_v57, %v13563_v56  ;;  %v2689_v38 = vmax.f32 %v2688_v60, %v13569_v32  ;;  %v2697_v12 = vmax.f32 %v2696_v6, %v13570_v62  ;;  %v2735_v57 = vmax.f32 %v2734_v0, %v13572_v41  ;;  %v13579_v32 = vld [vmem:[#allocation279_spill] sm:$0xff]  ;;  %v13580_v62 = vld [vmem:[#allocation269_spill] sm:$0xff]  ;;  %v13616_v55 = vld [vmem:[#allocation134_spill] sm:$0xff] }
 0x462   : > { %13554 = vst [vmem:[#allocation343_spill] sm:$0xff] %v8983_v51  ;;  %13555 = vst [vmem:[#allocation344_spill] sm:$0xff] %v8985_v9  ;;  %2745 = vmax.xlane.f32.xlu0 %v2744_v18  ;;  %2772 = vmax.xlane.f32.xlu1 %v2771_v48  ;;  %v2716_v28 = vmax.f32 %v2715_v63, %v13573_v4  ;;  %v2937_v59 = vmax.f32 %v2936_v7, %v13610_v42  ;;  %v13617_v39 = vld [vmem:[#allocation132_spill] sm:$0xff]  ;;  %v13618_v53 = vld [vmem:[#allocation106_spill] sm:$0xff] }
 0x463   : > { %v8989_v8 = vpop.f32.mrf.mxu0  ;;  %v8991_v17 = vpop.f32.mrf.mxu1  ;;  %v2690_v60 = vmax.f32 %v2689_v38, %v13578_v40  ;;  %v2698_v5 = vmax.f32 %v2697_v12, %v13580_v62  ;;  %v2955_v58 = vmax.f32 %v2954_v20, %v13615_v33  ;;  %v2963_v50 = vmax.f32 %v13617_v39, %v13616_v55  ;;  %v13619_v24 = vld [vmem:[#allocation104_spill] sm:$0xff]  ;;  %v13620_v61 = vld [vmem:[#allocation113_spill] sm:$0xff]  ;;  %v13621_v27 = vld [vmem:[#allocation118_spill] sm:$0xff] }
 0x464   : > { %13558 = vst [vmem:[#allocation345_spill] sm:$0xff] %v8989_v8  ;;  %13559 = vst [vmem:[#allocation346_spill] sm:$0xff] %v8991_v17  ;;  %v2717_v6 = vmax.f32 %v2716_v28, %v13579_v32  ;;  %v2900_v34 = vmax.f32 %v13619_v24, %v13618_v53  ;;  %v13622_v37 = vld [vmem:[#allocation116_spill] sm:$0xff]  ;;  %v2938_v3 = vmax.f32 %v2937_v59, %v13625_v2  ;;  %v13627_v20 = vld [vmem:[#allocation98_spill] sm:$0xff] }
 0x465   : > { %v8998_v18 = vpop.f32.mrf.mxu0  ;;  %v9000_v48 = vpop.f32.mrf.mxu1  ;;  %v2927_v7 = vmax.f32 %v13622_v37, %v13621_v27  ;;  %v13628_v33 = vld [vmem:[#allocation96_spill] sm:$0xff]  ;;  %v13631_v53 = vld [vmem:[#allocation131_spill] sm:$0xff]  ;;  %v13632_v24 = vld [vmem:[#allocation133_spill] sm:$0xff] }
 0x466   : > { %13565 = vst [vmem:[#allocation347_spill] sm:$0xff] %v8998_v18  ;;  %13566 = vst [vmem:[#allocation348_spill] sm:$0xff] %v9000_v48  ;;  %2727 = vmax.xlane.f32.xlu0 %v2726_v43  ;;  %2754 = vmax.xlane.f32.xlu1 %v2753_v44  ;;  %v13626_v48 = vld [vmem:[#allocation125_spill] sm:$0xff]  ;;  %v2882_v17 = vmax.f32 %v13628_v33, %v13627_v20  ;;  %v13634_v36 = vld [vmem:[#allocation110_spill] sm:$0xff] }
 0x467   : > { %v9002_v31 = vpop.f32.mrf.mxu0  ;;  %v9004_v54 = vpop.f32.mrf.mxu1  ;;  %v13633_v37 = vld [vmem:[#allocation105_spill] sm:$0xff]  ;;  %v2909_v59 = vmax.f32 %v13635_v13, %v13634_v36  ;;  %v13636_v2 = vld [vmem:[#allocation115_spill] sm:$0xff] }
 0x468   : > { %13567 = vst [vmem:[#allocation349_spill] sm:$0xff] %v9002_v31  ;;  %13568 = vst [vmem:[#allocation350_spill] sm:$0xff] %v9004_v54  ;;  %v2919_v54 = vmax.f32 %v2918_v10, %v13620_v61  ;;  %v2956_v10 = vmax.f32 %v2955_v58, %v13631_v53  ;;  %v2964_v61 = vmax.f32 %v2963_v50, %v13632_v24  ;;  %v13641_v50 = vld [vmem:[#allocation90_spill] sm:$0xff]  ;;  %v13642_v53 = vld [vmem:[#allocation88_spill] sm:$0xff] }
 0x469   : > { %v9011_v47 = vpop.f32.mrf.mxu0  ;;  %v9013_v56 = vpop.f32.mrf.mxu1  ;;  %v2901_v30 = vmax.f32 %v2900_v34, %v13633_v37 }
 0x46a   : > { %13574 = vst [vmem:[#allocation351_spill] sm:$0xff] %v9011_v47  ;;  %13575 = vst [vmem:[#allocation352_spill] sm:$0xff] %v9013_v56  ;;  %2709 = vmax.xlane.f32.xlu0 %v2708_v23  ;;  %2736 = vmax.xlane.f32.xlu1 %v2735_v57  ;;  %v13585_v57 = vld [vmem:[#allocation271_spill] sm:$0xff] }
 0x46b   : > { %v9015_v44 = vpop.f32.mrf.mxu0  ;;  %v9017_v43 = vpop.f32.mrf.mxu1  ;;  %v2699_v4 = vmax.f32 %v2698_v5, %v13585_v57 }
 0x46c   : > { %13576 = vst [vmem:[#allocation353_spill] sm:$0xff] %v9015_v44  ;;  %13577 = vst [vmem:[#allocation354_spill] sm:$0xff] %v9017_v43 }
 0x46d   : > { %v9022_v21 = vpop.f32.mrf.mxu0  ;;  %v9024_v0 = vpop.f32.mrf.mxu1 }
 0x46e   : > { %13581 = vst [vmem:[#allocation355_spill] sm:$0xff] %v9022_v21  ;;  %13582 = vst [vmem:[#allocation356_spill] sm:$0xff] %v9024_v0  ;;  %2691 = vmax.xlane.f32.xlu0 %v2690_v60  ;;  %2718 = vmax.xlane.f32.xlu1 %v2717_v6  ;;  %v13640_v0 = vld [vmem:[#allocation127_spill] sm:$0xff] }
 0x46f   : > { %v9026_v63 = vpop.f32.mrf.mxu0  ;;  %v9028_v23 = vpop.f32.mrf.mxu1 }
 0x470   : > { %13583 = vst [vmem:[#allocation357_spill] sm:$0xff] %v9026_v63  ;;  %13584 = vst [vmem:[#allocation358_spill] sm:$0xff] %v9028_v23  ;;  %v2946_v23 = vmax.f32 %v2945_v11, %v13626_v48  ;;  %v2920_v11 = vmax.f32 %v2919_v54, %v13636_v2  ;;  %v13637_v48 = vld [vmem:[#allocation117_spill] sm:$0xff] }
 0x471   : > { %v9031_v41 = vpop.f32.mrf.mxu0  ;;  %v9033_v45 = vpop.f32.mrf.mxu1  ;;  %v2928_v25 = vmax.f32 %v2927_v7, %v13637_v48  ;;  %v13646_v7 = vld [vmem:[#allocation135_spill] sm:$0xff] }
 0x472   : > { %13586 = vst [vmem:[#allocation359_spill] sm:$0xff] %v9031_v41  ;;  %13587 = vst [vmem:[#allocation360_spill] sm:$0xff] %v9033_v45  ;;  %2700 = vmax.xlane.f32.xlu1 %v2699_v4  ;;  %v2965_v2 = vmax.f32 %v2964_v61, %v13646_v7  ;;  %v13654_v61 = vld [vmem:[#allocation82_spill] sm:$0xff]  ;;  %v13655_v7 = vld [vmem:[#allocation80_spill] sm:$0xff] }
 0x473   : > { %v9035_v38 = vpop.f32.mrf.mxu0  ;;  %v9037_v12 = vpop.f32.mrf.mxu1 }
 0x474   : > { %13588 = vst [vmem:[#allocation361_spill] sm:$0xff] %v9035_v38  ;;  %13589 = vst [vmem:[#allocation362_spill] sm:$0xff] %v9037_v12 }
 0x475   : > { %v9039_v28 = vpop.f32.mrf.mxu0  ;;  %v9041_v40 = vpop.f32.mrf.mxu1 }
 0x476   : > { %13590 = vst [vmem:[#allocation363_spill] sm:$0xff] %v9039_v28  ;;  %13591 = vst [vmem:[#allocation364_spill] sm:$0xff] %v9041_v40 }
 0x477   : > { %v9043_v60 = vpop.f32.mrf.mxu0  ;;  %v9045_v6 = vpop.f32.mrf.mxu1 }
 0x478   : > { %13592 = vst [vmem:[#allocation365_spill] sm:$0xff] %v9043_v60  ;;  %13593 = vst [vmem:[#allocation366_spill] sm:$0xff] %v9045_v6  ;;  %v2947_v6 = vmax.f32 %v2946_v23, %v13640_v0 }
 0x479   : > { %v9047_v62 = vpop.f32.mrf.mxu0  ;;  %v9049_v5 = vpop.f32.mrf.mxu1 }
 0x47a   : > { %13594 = vst [vmem:[#allocation367_spill] sm:$0xff] %v9047_v62  ;;  %13595 = vst [vmem:[#allocation368_spill] sm:$0xff] %v9049_v5  ;;  %v2921_v37 = vmax.f32 %v2920_v11, %v9047_v62  ;;  %v13651_v11 = vld [vmem:[#allocation119_spill] sm:$0xff] }
 0x47b   : > { %v9051_v57 = vpop.f32.mrf.mxu0  ;;  %v9053_v32 = vpop.f32.mrf.mxu1  ;;  %v2929_v62 = vmax.f32 %v2928_v25, %v13651_v11 }
 0x47c   : > { %13596 = vst [vmem:[#allocation369_spill] sm:$0xff] %v9051_v57  ;;  %13597 = vst [vmem:[#allocation370_spill] sm:$0xff] %v9053_v32 }
 0x47d   : > { %v9055_v4 = vpop.f32.mrf.mxu0  ;;  %v9057_v14 = vpop.f32.mrf.mxu1 }
 0x47e   : > { %13598 = vst [vmem:[#allocation371_spill] sm:$0xff] %v9055_v4  ;;  %13599 = vst [vmem:[#allocation372_spill] sm:$0xff] %v9057_v14 }
 0x47f   : > { %v9061_v29 = vpop.f32.mrf.mxu0  ;;  %v9063_v46 = vpop.f32.mrf.mxu1 }
 0x480   : > { %13602 = vst [vmem:[#allocation373_spill] sm:$0xff] %v9061_v29  ;;  %13603 = vst [vmem:[#allocation374_spill] sm:$0xff] %v9063_v46 }
 0x481   : > { %v9069_v22 = vpop.f32.mrf.mxu0  ;;  %v9071_v16 = vpop.f32.mrf.mxu1 }
 0x482   : > { %13608 = vst [vmem:[#allocation375_spill] sm:$0xff] %v9069_v22  ;;  %13609 = vst [vmem:[#allocation376_spill] sm:$0xff] %v9071_v16  ;;  %v2939_v27 = vmax.f32 %v2938_v3, %v9069_v22  ;;  %v2864_v3 = vmax.f32 %v13642_v53, %v13641_v50  ;;  %v13643_v22 = vld [vmem:[#allocation97_spill] sm:$0xff]  ;;  %v13649_v53 = vld [vmem:[#allocation107_spill] sm:$0xff] }
 0x483   : > { %v9076_v26 = vpop.f32.mrf.mxu0  ;;  %v9078_v49 = vpop.f32.mrf.mxu1  ;;  %v2883_v34 = vmax.f32 %v2882_v17, %v13643_v22  ;;  %v2902_v50 = vmax.f32 %v2901_v30, %v13649_v53  ;;  %v13650_v17 = vld [vmem:[#allocation109_spill] sm:$0xff]  ;;  %v2922_v30 = vmax.f32 %v2921_v37, %v9051_v57  ;;  %v13759_v53 = vld [vmem:[#allocation188_spill] sm:$0xff] }
 0x484   : > { %13613 = vst [vmem:[#allocation377_spill] sm:$0xff] %v9076_v26  ;;  %13614 = vst [vmem:[#allocation378_spill] sm:$0xff] %v9078_v49  ;;  %v2940_v13 = vmax.f32 %v2939_v27, %v9076_v26  ;;  %v2910_v22 = vmax.f32 %v2909_v59, %v13650_v17  ;;  %v2846_v27 = vmax.f32 %v13655_v7, %v13654_v61  ;;  %v13656_v26 = vld [vmem:[#allocation89_spill] sm:$0xff] }
 0x485   : > { %v9088_v42 = vpop.f32.mrf.mxu0  ;;  %v9090_v1 = vpop.f32.mrf.mxu1  ;;  %v2930_v59 = vmax.f32 %v2929_v62, %v9055_v4  ;;  %v13662_v37 = vld [vmem:[#allocation101_spill] sm:$0xff]  ;;  %v13663_v62 = vld [vmem:[#allocation111_spill] sm:$0xff] }
 0x486   : > { %13623 = vst [vmem:[#allocation379_spill] sm:$0xff] %v9088_v42  ;;  %13624 = vst [vmem:[#allocation380_spill] sm:$0xff] %v9090_v1  ;;  %v2948_v48 = vmax.f32 %v2947_v6, %v9088_v42  ;;  %v2865_v42 = vmax.f32 %v2864_v3, %v13656_v26  ;;  %v13660_v3 = vld [vmem:[#allocation92_spill] sm:$0xff]  ;;  %v2911_v4 = vmax.f32 %v2910_v22, %v13663_v62  ;;  %v13758_v62 = vld [vmem:[#allocation190_spill] sm:$0xff] }
 0x487   : > { %v9096_v55 = vpop.f32.mrf.mxu0  ;;  %v9098_v39 = vpop.f32.mrf.mxu1  ;;  %v3089_v11 = vmax.f32 %v13759_v53, %v13758_v62  ;;  %v13772_v53 = vld [vmem:[#allocation187_spill] sm:$0xff] }
 0x488   : > { %13629 = vst [vmem:[#allocation381_spill] sm:$0xff] %v9096_v55  ;;  %13630 = vst [vmem:[#allocation382_spill] sm:$0xff] %v9098_v39 }
 0x489   : > { %v9108_v33 = vpop.f32.mrf.mxu0  ;;  %v9110_v20 = vpop.f32.mrf.mxu1 }
 0x48a   : > { %13638 = vst [vmem:[#allocation383_spill] sm:$0xff] %v9108_v33  ;;  %13639 = vst [vmem:[#allocation384_spill] sm:$0xff] %v9110_v20  ;;  %v2957_v58 = vmax.f32 %v2956_v10, %v9108_v33  ;;  %v13647_v10 = vld [vmem:[#allocation102_spill] sm:$0xff]  ;;  %v13648_v33 = vld [vmem:[#allocation100_spill] sm:$0xff] }
 0x48b   : > { %v9118_v36 = vpop.f32.mrf.mxu0  ;;  %v9120_v54 = vpop.f32.mrf.mxu1  ;;  %v2891_v0 = vmax.f32 %v13648_v33, %v13647_v10  ;;  %v2949_v10 = vmax.f32 %v2948_v48, %v9096_v55  ;;  %v13666_v48 = vld [vmem:[#allocation74_spill] sm:$0xff]  ;;  %v13667_v55 = vld [vmem:[#allocation72_spill] sm:$0xff] }
 0x48c   : > { %13644 = vst [vmem:[#allocation385_spill] sm:$0xff] %v9118_v36  ;;  %13645 = vst [vmem:[#allocation386_spill] sm:$0xff] %v9120_v54  ;;  %v2958_v23 = vmax.f32 %v2957_v58, %v9118_v36  ;;  %v2903_v36 = vmax.f32 %v2902_v50, %v9031_v41  ;;  %v13661_v50 = vld [vmem:[#allocation99_spill] sm:$0xff] }
 0x48d   : > { %v9131_v24 = vpop.f32.mrf.mxu0  ;;  %v9133_v43 = vpop.f32.mrf.mxu1  ;;  %v2884_v41 = vmax.f32 %v2883_v34, %v13661_v50  ;;  %v2892_v57 = vmax.f32 %v2891_v0, %v13662_v37  ;;  %v2912_v0 = vmax.f32 %v2911_v4, %v9039_v28  ;;  %v13674_v4 = vld [vmem:[#allocation93_spill] sm:$0xff] }
 0x48e   : > { %13652 = vst [vmem:[#allocation387_spill] sm:$0xff] %v9131_v24  ;;  %13653 = vst [vmem:[#allocation388_spill] sm:$0xff] %v9133_v43  ;;  %v2966_v6 = vmax.f32 %v2965_v2, %v9131_v24  ;;  %v2959_v58 = vmax.f32 %v2958_v23, %v9110_v20  ;;  %v2941_v23 = vmax.f32 %v2940_v13, %v9071_v16  ;;  %v13659_v20 = vld [vmem:[#allocation94_spill] sm:$0xff] }
 0x48f   : > { %v9143_v25 = vpop.f32.mrf.mxu0  ;;  %v9145_v33 = vpop.f32.mrf.mxu1  ;;  %v2873_v24 = vmax.f32 %v13660_v3, %v13659_v20  ;;  %v2885_v16 = vmax.f32 %v2884_v41, %v9011_v47  ;;  %v2904_v34 = vmax.f32 %v2903_v36, %v9035_v38  ;;  %v2923_v3 = vmax.f32 %v2922_v30, %v9049_v5  ;;  %v13672_v41 = vld [vmem:[#allocation84_spill] sm:$0xff]  ;;  %v13673_v36 = vld [vmem:[#allocation91_spill] sm:$0xff] }
 0x490   : > { %13657 = vst [vmem:[#allocation389_spill] sm:$0xff] %v9143_v25  ;;  %13658 = vst [vmem:[#allocation390_spill] sm:$0xff] %v9145_v33  ;;  %v2967_v7 = vmax.f32 %v2966_v6, %v9143_v25  ;;  %v2960_v2 = vmax.f32 %v2959_v58, %v9120_v54  ;;  %v2828_v6 = vmax.f32 %v13667_v55, %v13666_v48  ;;  %v13668_v25 = vld [vmem:[#allocation81_spill] sm:$0xff] }
 0x491   : > { %v9156_v26 = vpop.f32.mrf.mxu0  ;;  %v9158_v61 = vpop.f32.mrf.mxu1  ;;  %v2847_v58 = vmax.f32 %v2846_v27, %v13668_v25  ;;  %v2931_v20 = vmax.f32 %v2930_v59, %v9061_v29  ;;  %v2942_v48 = vmax.f32 %v2941_v23, %v9078_v49  ;;  %v2866_v38 = vmax.f32 %v2865_v42, %v13673_v36  ;;  %v13678_v59 = vld [vmem:[#allocation73_spill] sm:$0xff]  ;;  %v13754_v36 = vld [vmem:[#allocation176_spill] sm:$0xff] }
 0x492   : > { %13664 = vst [vmem:[#allocation391_spill] sm:$0xff] %v9156_v26  ;;  %13665 = vst [vmem:[#allocation392_spill] sm:$0xff] %v9158_v61  ;;  %2961 = vmax.xlane.f32.xlu0 %v2960_v2  ;;  %v2968_v13 = vmax.f32 %v2967_v7, %v9133_v43  ;;  %v2950_v7 = vmax.f32 %v2949_v10, %v9090_v1  ;;  %v13671_v2 = vld [vmem:[#allocation86_spill] sm:$0xff]  ;;  %v2874_v28 = vmax.f32 %v2873_v24, %v13674_v4  ;;  %v13675_v43 = vld [vmem:[#allocation103_spill] sm:$0xff] }
 0x493   : > { %v9167_v54 = vpop.f32.mrf.mxu0  ;;  %v9169_v22 = vpop.f32.mrf.mxu1  ;;  %v2855_v47 = vmax.f32 %v13672_v41, %v13671_v2  ;;  %v2893_v55 = vmax.f32 %v2892_v57, %v13675_v43  ;;  %v2829_v29 = vmax.f32 %v2828_v6, %v13678_v59  ;;  %v2867_v23 = vmax.f32 %v2866_v38, %v8983_v51  ;;  %v13682_v38 = vld [vmem:[#allocation76_spill] sm:$0xff]  ;;  %v13685_v1 = vld [vmem:[#allocation95_spill] sm:$0xff]  ;;  %v13753_v4 = vld [vmem:[#allocation178_spill] sm:$0xff] }
 0x494   : > { %13669 = vst [vmem:[#allocation393_spill] sm:$0xff] %v9167_v54  ;;  %13670 = vst [vmem:[#allocation394_spill] sm:$0xff] %v9169_v22  ;;  %v2969_v27 = vmax.f32 %v2968_v13, %v9145_v33  ;;  %v2886_v10 = vmax.f32 %v2885_v16, %v9015_v44  ;;  %v2905_v24 = vmax.f32 %v2904_v34, %v9033_v45  ;;  %v13683_v16 = vld [vmem:[#allocation83_spill] sm:$0xff]  ;;  %v13757_v43 = vld [vmem:[#allocation185_spill] sm:$0xff] }
 0x495   : > { %v9181_v25 = vpop.f32.mrf.mxu0  ;;  %v9183_v30 = vpop.f32.mrf.mxu1  ;;  %v2894_v13 = vmax.f32 %v2893_v55, %v9022_v21  ;;  %v2913_v57 = vmax.f32 %v2912_v0, %v9043_v60  ;;  %v2924_v49 = vmax.f32 %v2923_v3, %v9053_v32  ;;  %v2951_v6 = vmax.f32 %v2950_v7, %v9098_v39  ;;  %v13684_v55 = vld [vmem:[#allocation85_spill] sm:$0xff]  ;;  %v13725_v39 = vld [vmem:[#allocation330_spill] sm:$0xff] }
 0x496   : > { %13676 = vst [vmem:[#allocation395_spill] sm:$0xff] %v9181_v25  ;;  %13677 = vst [vmem:[#allocation396_spill] sm:$0xff] %v9183_v30  ;;  %2943 = vmax.xlane.f32.xlu0 %v2942_v48  ;;  %2970 = vmax.xlane.f32.xlu1 %v2969_v27  ;;  %v2932_v48 = vmax.f32 %v2931_v20, %v9057_v14  ;;  %v13681_v27 = vld [vmem:[#allocation78_spill] sm:$0xff]  ;;  %v2848_v44 = vmax.f32 %v2847_v58, %v13683_v16  ;;  %v13782_v25 = vld [vmem:[#allocation172_spill] sm:$0xff] }
 0x497   : > { %v9189_v5 = vpop.f32.mrf.mxu0  ;;  %v9191_v42 = vpop.f32.mrf.mxu1  ;;  %v2837_v51 = vmax.f32 %v13682_v38, %v13681_v27  ;;  %v2856_v21 = vmax.f32 %v2855_v47, %v13684_v55  ;;  %v2875_v33 = vmax.f32 %v2874_v28, %v13685_v1  ;;  %v2868_v0 = vmax.f32 %v2867_v23, %v8989_v8  ;;  %v13692_v8 = vld [vmem:[#allocation87_spill] sm:$0xff]  ;;  %v13747_v27 = vld [vmem:[#allocation186_spill] sm:$0xff] }
 0x498   : > { %13679 = vst [vmem:[#allocation397_spill] sm:$0xff] %v9189_v5  ;;  %13680 = vst [vmem:[#allocation398_spill] sm:$0xff] %v9191_v42  ;;  %v2849_v3 = vmax.f32 %v2848_v44, %v8947_v15  ;;  %v2887_v47 = vmax.f32 %v2886_v10, %v9013_v56  ;;  %v2895_v28 = vmax.f32 %v2894_v13, %v9026_v63  ;;  %v13691_v15 = vld [vmem:[#allocation77_spill] sm:$0xff]  ;;  %v13711_v56 = vld [vmem:[#allocation348_spill] sm:$0xff] }
 0x499   : > { %v9203_v59 = vpop.f32.mrf.mxu0  ;;  %v9205_v34 = vpop.f32.mrf.mxu1  ;;  %v2876_v20 = vmax.f32 %v2875_v33, %v8998_v18  ;;  %v2906_v58 = vmax.f32 %v2905_v24, %v9037_v12  ;;  %v2933_v32 = vmax.f32 %v2932_v48, %v9063_v46  ;;  %v2838_v23 = vmax.f32 %v2837_v51, %v13691_v15  ;;  %v13698_v12 = vld [vmem:[#allocation366_spill] sm:$0xff]  ;;  %v13748_v15 = vld [vmem:[#allocation184_spill] sm:$0xff]  ;;  %v13762_v42 = vld [vmem:[#allocation193_spill] sm:$0xff] }
 0x49a   : > { %13686 = vst [vmem:[#allocation399_spill] sm:$0xff] %v9203_v59  ;;  %13687 = vst [vmem:[#allocation400_spill] sm:$0xff] %v9205_v34  ;;  %2925 = vmax.xlane.f32.xlu0 %v2924_v49  ;;  %2952 = vmax.xlane.f32.xlu1 %v2951_v6  ;;  %v2914_v49 = vmax.f32 %v2913_v57, %v9041_v40  ;;  %v13690_v6 = vld [vmem:[#allocation75_spill] sm:$0xff]  ;;  %v2857_v33 = vmax.f32 %v2856_v21, %v13692_v8  ;;  %v13697_v21 = vld [vmem:[#allocation354_spill] sm:$0xff] }
 0x49b   : > { %v9210_v7 = vpop.f32.mrf.mxu0  ;;  %v9212_v60 = vpop.f32.mrf.mxu1  ;;  %v2830_v44 = vmax.f32 %v2829_v29, %v13690_v6  ;;  %v2850_v13 = vmax.f32 %v2849_v3, %v8954_v52  ;;  %v2869_v51 = vmax.f32 %v2868_v0, %v8985_v9  ;;  %v2877_v29 = vmax.f32 %v2876_v20, %v9002_v31  ;;  %v13700_v40 = vld [vmem:[#allocation79_spill] sm:$0xff]  ;;  %v13708_v31 = vld [vmem:[#allocation341_spill] sm:$0xff]  ;;  %v13751_v16 = vld [vmem:[#allocation194_spill] sm:$0xff] }
 0x49c   : > { %13688 = vst [vmem:[#allocation401_spill] sm:$0xff] %v9210_v7  ;;  %13689 = vst [vmem:[#allocation402_spill] sm:$0xff] %v9212_v60  ;;  %v2858_v24 = vmax.f32 %v2857_v33, %v8966_v35  ;;  %v2888_v63 = vmax.f32 %v2887_v47, %v13697_v21  ;;  %v2915_v46 = vmax.f32 %v2914_v49, %v13698_v12  ;;  %v13703_v33 = vld [vmem:[#allocation329_spill] sm:$0xff]  ;;  %v13704_v35 = vld [vmem:[#allocation331_spill] sm:$0xff] }
 0x49d   : > { %v9222_v18 = vpop.f32.mrf.mxu0  ;;  %v9224_v14 = vpop.f32.mrf.mxu1  ;;  %v2831_v10 = vmax.f32 %v2830_v44, %v8900_v19  ;;  %v2839_v44 = vmax.f32 %v2838_v23, %v13700_v40  ;;  %v13707_v47 = vld [vmem:[#allocation336_spill] sm:$0xff]  ;;  %v13709_v21 = vld [vmem:[#allocation346_spill] sm:$0xff]  ;;  %v2878_v45 = vmax.f32 %v2877_v29, %v13711_v56  ;;  %v3080_v38 = vmax.f32 %v13748_v15, %v13747_v27 }
 0x49e   : > { %13693 = vst [vmem:[#allocation403_spill] sm:$0xff] %v9222_v18  ;;  %13694 = vst [vmem:[#allocation404_spill] sm:$0xff] %v9224_v14  ;;  %2907 = vmax.xlane.f32.xlu0 %v2906_v58  ;;  %2934 = vmax.xlane.f32.xlu1 %v2933_v32  ;;  %v13699_v58 = vld [vmem:[#allocation356_spill] sm:$0xff]  ;;  %v2851_v49 = vmax.f32 %v2850_v13, %v13707_v47  ;;  %v2870_v23 = vmax.f32 %v2869_v51, %v13709_v21  ;;  %v13710_v12 = vld [vmem:[#allocation358_spill] sm:$0xff] }
 0x49f   : > { %v9229_v48 = vpop.f32.mrf.mxu0  ;;  %v9231_v57 = vpop.f32.mrf.mxu1  ;;  %v2896_v32 = vmax.f32 %v2895_v28, %v13699_v58  ;;  %v2832_v52 = vmax.f32 %v2831_v10, %v13703_v33  ;;  %v2840_v0 = vmax.f32 %v2839_v44, %v13704_v35  ;;  %v2859_v28 = vmax.f32 %v2858_v24, %v13708_v31  ;;  %v13716_v33 = vld [vmem:[#allocation328_spill] sm:$0xff]  ;;  %v13717_v35 = vld [vmem:[#allocation333_spill] sm:$0xff]  ;;  %v13718_v31 = vld [vmem:[#allocation338_spill] sm:$0xff] }
 0x4a0   : > { %13695 = vst [vmem:[#allocation405_spill] sm:$0xff] %v9229_v48  ;;  %13696 = vst [vmem:[#allocation406_spill] sm:$0xff] %v9231_v57  ;;  %v2852_v51 = vmax.f32 %v2851_v49, %v13718_v31  ;;  %v13719_v21 = vld [vmem:[#allocation350_spill] sm:$0xff]  ;;  %v13752_v8 = vld [vmem:[#allocation192_spill] sm:$0xff]  ;;  %v3062_v1 = vmax.f32 %v13754_v36, %v13753_v4  ;;  %v3081_v17 = vmax.f32 %v3080_v38, %v13757_v43 }
 0x4a1   : > { %v9239_v19 = vpop.f32.mrf.mxu0  ;;  %v9241_v3 = vpop.f32.mrf.mxu1  ;;  %v2897_v58 = vmax.f32 %v2896_v32, %v13710_v12  ;;  %v2833_v13 = vmax.f32 %v2832_v52, %v13716_v33  ;;  %v2841_v24 = vmax.f32 %v2840_v0, %v13717_v35  ;;  %v2879_v32 = vmax.f32 %v2878_v45, %v13719_v21  ;;  %v13720_v12 = vld [vmem:[#allocation340_spill] sm:$0xff]  ;;  %v13726_v33 = vld [vmem:[#allocation342_spill] sm:$0xff]  ;;  %v13767_v14 = vld [vmem:[#allocation177_spill] sm:$0xff] }
 0x4a2   : > { %13701 = vst [vmem:[#allocation407_spill] sm:$0xff] %v9239_v19  ;;  %13702 = vst [vmem:[#allocation408_spill] sm:$0xff] %v9241_v3  ;;  %2889 = vmax.xlane.f32.xlu0 %v2888_v63  ;;  %2916 = vmax.xlane.f32.xlu1 %v2915_v46  ;;  %v2860_v29 = vmax.f32 %v2859_v28, %v13720_v12  ;;  %v13727_v35 = vld [vmem:[#allocation332_spill] sm:$0xff]  ;;  %v3098_v2 = vmax.f32 %v13752_v8, %v13751_v16  ;;  %v13763_v57 = vld [vmem:[#allocation198_spill] sm:$0xff] }
 0x4a3   : > { %v9245_v9 = vpop.f32.mrf.mxu0  ;;  %v9247_v20 = vpop.f32.mrf.mxu1  ;;  %v2834_v52 = vmax.f32 %v2833_v13, %v13725_v39  ;;  %v2842_v49 = vmax.f32 %v2841_v24, %v13727_v35  ;;  %v13764_v16 = vld [vmem:[#allocation196_spill] sm:$0xff]  ;;  %v13765_v22 = vld [vmem:[#allocation170_spill] sm:$0xff]  ;;  %v3082_v61 = vmax.f32 %v3081_v17, %v13772_v53  ;;  %v13783_v53 = vld [vmem:[#allocation179_spill] sm:$0xff] }
 0x4a4   : > { %13705 = vst [vmem:[#allocation409_spill] sm:$0xff] %v9245_v9  ;;  %13706 = vst [vmem:[#allocation410_spill] sm:$0xff] %v9247_v20  ;;  %v2861_v0 = vmax.f32 %v2860_v29, %v13726_v33  ;;  %v3099_v30 = vmax.f32 %v3098_v2, %v13762_v42  ;;  %v3107_v8 = vmax.f32 %v13764_v16, %v13763_v57  ;;  %v13766_v36 = vld [vmem:[#allocation168_spill] sm:$0xff]  ;;  %v13768_v60 = vld [vmem:[#allocation182_spill] sm:$0xff] }
 0x4a5   : > { %v9254_v63 = vpop.f32.mrf.mxu0  ;;  %v9256_v46 = vpop.f32.mrf.mxu1  ;;  %v3044_v4 = vmax.f32 %v13766_v36, %v13765_v22  ;;  %v13769_v5 = vld [vmem:[#allocation180_spill] sm:$0xff]  ;;  %v13774_v2 = vld [vmem:[#allocation162_spill] sm:$0xff]  ;;  %v13778_v36 = vld [vmem:[#allocation195_spill] sm:$0xff] }
 0x4a6   : > { %13712 = vst [vmem:[#allocation411_spill] sm:$0xff] %v9254_v63  ;;  %13713 = vst [vmem:[#allocation412_spill] sm:$0xff] %v9256_v46  ;;  %2871 = vmax.xlane.f32.xlu0 %v2870_v23  ;;  %2898 = vmax.xlane.f32.xlu1 %v2897_v58  ;;  %v3071_v38 = vmax.f32 %v13769_v5, %v13768_v60  ;;  %v13773_v46 = vld [vmem:[#allocation189_spill] sm:$0xff]  ;;  %v13775_v42 = vld [vmem:[#allocation160_spill] sm:$0xff] }
 0x4a7   : > { %v9258_v10 = vpop.f32.mrf.mxu0  ;;  %v9260_v44 = vpop.f32.mrf.mxu1  ;;  %v3026_v20 = vmax.f32 %v13775_v42, %v13774_v2  ;;  %v13779_v22 = vld [vmem:[#allocation197_spill] sm:$0xff]  ;;  %v13781_v34 = vld [vmem:[#allocation174_spill] sm:$0xff] }
 0x4a8   : > { %13714 = vst [vmem:[#allocation413_spill] sm:$0xff] %v9258_v10  ;;  %13715 = vst [vmem:[#allocation414_spill] sm:$0xff] %v9260_v44  ;;  %v3063_v44 = vmax.f32 %v3062_v1, %v13767_v14  ;;  %v3100_v1 = vmax.f32 %v3099_v30, %v13778_v36  ;;  %v3108_v14 = vmax.f32 %v3107_v8, %v13779_v22  ;;  %v13780_v60 = vld [vmem:[#allocation169_spill] sm:$0xff]  ;;  %v13788_v8 = vld [vmem:[#allocation154_spill] sm:$0xff] }
 0x4a9   : > { %v9267_v56 = vpop.f32.mrf.mxu0  ;;  %v9269_v47 = vpop.f32.mrf.mxu1  ;;  %v3045_v48 = vmax.f32 %v3044_v4, %v13780_v60  ;;  %v3053_v17 = vmax.f32 %v13782_v25, %v13781_v34  ;;  %v13789_v36 = vld [vmem:[#allocation152_spill] sm:$0xff] }
 0x4aa   : > { %13721 = vst [vmem:[#allocation415_spill] sm:$0xff] %v9267_v56  ;;  %13722 = vst [vmem:[#allocation416_spill] sm:$0xff] %v9269_v47  ;;  %2853 = vmax.xlane.f32.xlu0 %v2852_v51  ;;  %2880 = vmax.xlane.f32.xlu1 %v2879_v32  ;;  %v13732_v32 = vld [vmem:[#allocation334_spill] sm:$0xff] }
 0x4ab   : > { %v9271_v58 = vpop.f32.mrf.mxu0  ;;  %v9273_v23 = vpop.f32.mrf.mxu1  ;;  %v2843_v12 = vmax.f32 %v2842_v49, %v13732_v32 }
 0x4ac   : > { %13723 = vst [vmem:[#allocation417_spill] sm:$0xff] %v9271_v58  ;;  %13724 = vst [vmem:[#allocation418_spill] sm:$0xff] %v9273_v23 }
 0x4ad   : > { %v9278_v31 = vpop.f32.mrf.mxu0  ;;  %v9280_v45 = vpop.f32.mrf.mxu1 }
 0x4ae   : > { %13728 = vst [vmem:[#allocation419_spill] sm:$0xff] %v9278_v31  ;;  %13729 = vst [vmem:[#allocation420_spill] sm:$0xff] %v9280_v45  ;;  %2835 = vmax.xlane.f32.xlu0 %v2834_v52  ;;  %2862 = vmax.xlane.f32.xlu1 %v2861_v0  ;;  %v13787_v45 = vld [vmem:[#allocation191_spill] sm:$0xff] }
 0x4af   : > { %v9282_v28 = vpop.f32.mrf.mxu0  ;;  %v9284_v51 = vpop.f32.mrf.mxu1 }
 0x4b0   : > { %13730 = vst [vmem:[#allocation421_spill] sm:$0xff] %v9282_v28  ;;  %13731 = vst [vmem:[#allocation422_spill] sm:$0xff] %v9284_v51  ;;  %v3090_v51 = vmax.f32 %v3089_v11, %v13773_v46  ;;  %v3064_v11 = vmax.f32 %v3063_v44, %v13783_v53  ;;  %v13784_v46 = vld [vmem:[#allocation181_spill] sm:$0xff] }
 0x4b1   : > { %v9287_v21 = vpop.f32.mrf.mxu0  ;;  %v9289_v40 = vpop.f32.mrf.mxu1  ;;  %v3072_v54 = vmax.f32 %v3071_v38, %v13784_v46  ;;  %v13793_v38 = vld [vmem:[#allocation199_spill] sm:$0xff] }
 0x4b2   : > { %13733 = vst [vmem:[#allocation423_spill] sm:$0xff] %v9287_v21  ;;  %13734 = vst [vmem:[#allocation424_spill] sm:$0xff] %v9289_v40  ;;  %2844 = vmax.xlane.f32.xlu1 %v2843_v12  ;;  %v3109_v34 = vmax.f32 %v3108_v14, %v13793_v38  ;;  %v13801_v14 = vld [vmem:[#allocation146_spill] sm:$0xff]  ;;  %v13802_v38 = vld [vmem:[#allocation144_spill] sm:$0xff] }
 0x4b3   : > { %v9291_v13 = vpop.f32.mrf.mxu0  ;;  %v9293_v24 = vpop.f32.mrf.mxu1 }
 0x4b4   : > { %13735 = vst [vmem:[#allocation425_spill] sm:$0xff] %v9291_v13  ;;  %13736 = vst [vmem:[#allocation426_spill] sm:$0xff] %v9293_v24 }
 0x4b5   : > { %v9295_v29 = vpop.f32.mrf.mxu0  ;;  %v9297_v39 = vpop.f32.mrf.mxu1 }
 0x4b6   : > { %13737 = vst [vmem:[#allocation427_spill] sm:$0xff] %v9295_v29  ;;  %13738 = vst [vmem:[#allocation428_spill] sm:$0xff] %v9297_v39 }
 0x4b7   : > { %v9299_v52 = vpop.f32.mrf.mxu0  ;;  %v9301_v0 = vpop.f32.mrf.mxu1 }
 0x4b8   : > { %13739 = vst [vmem:[#allocation429_spill] sm:$0xff] %v9299_v52  ;;  %13740 = vst [vmem:[#allocation430_spill] sm:$0xff] %v9301_v0  ;;  %v3091_v0 = vmax.f32 %v3090_v51, %v13787_v45  ;;  %v13795_v45 = vld [vmem:[#allocation164_spill] sm:$0xff] }
 0x4b9   : > { %v9303_v33 = vpop.f32.mrf.mxu0  ;;  %v9305_v49 = vpop.f32.mrf.mxu1 }
 0x4ba   : > { %13741 = vst [vmem:[#allocation431_spill] sm:$0xff] %v9303_v33  ;;  %13742 = vst [vmem:[#allocation432_spill] sm:$0xff] %v9305_v49  ;;  %v3065_v60 = vmax.f32 %v3064_v11, %v9303_v33  ;;  %v13798_v11 = vld [vmem:[#allocation183_spill] sm:$0xff] }
 0x4bb   : > { %v9307_v32 = vpop.f32.mrf.mxu0  ;;  %v9309_v35 = vpop.f32.mrf.mxu1  ;;  %v3073_v33 = vmax.f32 %v3072_v54, %v13798_v11  ;;  %v13909_v11 = vld [vmem:[#allocation224_spill] sm:$0xff] }
 0x4bc   : > { %13743 = vst [vmem:[#allocation433_spill] sm:$0xff] %v9307_v32  ;;  %13744 = vst [vmem:[#allocation434_spill] sm:$0xff] %v9309_v35 }
 0x4bd   : > { %v9311_v12 = vpop.f32.mrf.mxu0  ;;  %v9313_v6 = vpop.f32.mrf.mxu1 }
 0x4be   : > { %13745 = vst [vmem:[#allocation435_spill] sm:$0xff] %v9311_v12  ;;  %13746 = vst [vmem:[#allocation436_spill] sm:$0xff] %v9313_v6 }
 0x4bf   : > { %v9317_v55 = vpop.f32.mrf.mxu0  ;;  %v9319_v41 = vpop.f32.mrf.mxu1 }
 0x4c0   : > { %13749 = vst [vmem:[#allocation437_spill] sm:$0xff] %v9317_v55  ;;  %13750 = vst [vmem:[#allocation438_spill] sm:$0xff] %v9319_v41 }
 0x4c1   : > { %v9325_v37 = vpop.f32.mrf.mxu0  ;;  %v9327_v50 = vpop.f32.mrf.mxu1 }
 0x4c2   : > { %13755 = vst [vmem:[#allocation439_spill] sm:$0xff] %v9325_v37  ;;  %13756 = vst [vmem:[#allocation440_spill] sm:$0xff] %v9327_v50  ;;  %v3083_v5 = vmax.f32 %v3082_v61, %v9325_v37  ;;  %v3008_v61 = vmax.f32 %v13789_v36, %v13788_v8  ;;  %v13790_v37 = vld [vmem:[#allocation161_spill] sm:$0xff]  ;;  %v13796_v36 = vld [vmem:[#allocation171_spill] sm:$0xff] }
 0x4c3   : > { %v9332_v27 = vpop.f32.mrf.mxu0  ;;  %v9334_v15 = vpop.f32.mrf.mxu1  ;;  %v3027_v4 = vmax.f32 %v3026_v20, %v13790_v37  ;;  %v3046_v8 = vmax.f32 %v3045_v48, %v13796_v36  ;;  %v13797_v20 = vld [vmem:[#allocation173_spill] sm:$0xff]  ;;  %v3066_v48 = vmax.f32 %v3065_v60, %v9307_v32 }
 0x4c4   : > { %13760 = vst [vmem:[#allocation441_spill] sm:$0xff] %v9332_v27  ;;  %13761 = vst [vmem:[#allocation442_spill] sm:$0xff] %v9334_v15  ;;  %v3084_v46 = vmax.f32 %v3083_v5, %v9332_v27  ;;  %v3054_v37 = vmax.f32 %v3053_v17, %v13797_v20  ;;  %v2990_v5 = vmax.f32 %v13802_v38, %v13801_v14  ;;  %v13809_v60 = vld [vmem:[#allocation165_spill] sm:$0xff]  ;;  %v13903_v20 = vld [vmem:[#allocation222_spill] sm:$0xff] }
 0x4c5   : > { %v9344_v43 = vpop.f32.mrf.mxu0  ;;  %v9346_v62 = vpop.f32.mrf.mxu1  ;;  %v3074_v17 = vmax.f32 %v3073_v33, %v9311_v12  ;;  %v13810_v33 = vld [vmem:[#allocation175_spill] sm:$0xff] }
 0x4c6   : > { %13770 = vst [vmem:[#allocation443_spill] sm:$0xff] %v9344_v43  ;;  %13771 = vst [vmem:[#allocation444_spill] sm:$0xff] %v9346_v62  ;;  %v3092_v53 = vmax.f32 %v3091_v0, %v9344_v43  ;;  %v13803_v43 = vld [vmem:[#allocation153_spill] sm:$0xff]  ;;  %v3055_v12 = vmax.f32 %v3054_v37, %v13810_v33 }
 0x4c7   : > { %v9352_v57 = vpop.f32.mrf.mxu0  ;;  %v9354_v16 = vpop.f32.mrf.mxu1  ;;  %v3009_v27 = vmax.f32 %v3008_v61, %v13803_v43  ;;  %v13807_v61 = vld [vmem:[#allocation156_spill] sm:$0xff]  ;;  %v13906_v33 = vld [vmem:[#allocation205_spill] sm:$0xff] }
 0x4c8   : > { %13776 = vst [vmem:[#allocation445_spill] sm:$0xff] %v9352_v57  ;;  %13777 = vst [vmem:[#allocation446_spill] sm:$0xff] %v9354_v16 }
 0x4c9   : > { %v9364_v42 = vpop.f32.mrf.mxu0  ;;  %v9366_v2 = vpop.f32.mrf.mxu1 }
 0x4ca   : > { %13785 = vst [vmem:[#allocation447_spill] sm:$0xff] %v9364_v42  ;;  %13786 = vst [vmem:[#allocation448_spill] sm:$0xff] %v9366_v2  ;;  %v3101_v30 = vmax.f32 %v3100_v1, %v9364_v42  ;;  %v13794_v1 = vld [vmem:[#allocation166_spill] sm:$0xff] }
 0x4cb   : > { %v9374_v25 = vpop.f32.mrf.mxu0  ;;  %v9376_v44 = vpop.f32.mrf.mxu1  ;;  %v3035_v22 = vmax.f32 %v13795_v45, %v13794_v1  ;;  %v3093_v1 = vmax.f32 %v3092_v53, %v9352_v57  ;;  %v13813_v53 = vld [vmem:[#allocation138_spill] sm:$0xff]  ;;  %v13814_v57 = vld [vmem:[#allocation136_spill] sm:$0xff] }
 0x4cc   : > { %13791 = vst [vmem:[#allocation449_spill] sm:$0xff] %v9374_v25  ;;  %13792 = vst [vmem:[#allocation450_spill] sm:$0xff] %v9376_v44  ;;  %v3102_v51 = vmax.f32 %v3101_v30, %v9374_v25  ;;  %v3047_v25 = vmax.f32 %v3046_v8, %v9287_v21  ;;  %v13808_v8 = vld [vmem:[#allocation163_spill] sm:$0xff] }
 0x4cd   : > { %v9387_v42 = vpop.f32.mrf.mxu0  ;;  %v9389_v23 = vpop.f32.mrf.mxu1  ;;  %v3028_v21 = vmax.f32 %v3027_v4, %v13808_v8  ;;  %v3036_v32 = vmax.f32 %v3035_v22, %v13809_v60  ;;  %v3056_v22 = vmax.f32 %v3055_v12, %v9295_v29  ;;  %v13821_v12 = vld [vmem:[#allocation157_spill] sm:$0xff]  ;;  %v13901_v60 = vld [vmem:[#allocation218_spill] sm:$0xff]  ;;  %v13902_v8 = vld [vmem:[#allocation216_spill] sm:$0xff] }
 0x4ce   : > { %13799 = vst [vmem:[#allocation451_spill] sm:$0xff] %v9387_v42  ;;  %13800 = vst [vmem:[#allocation452_spill] sm:$0xff] %v9389_v23  ;;  %v3110_v0 = vmax.f32 %v3109_v34, %v9387_v42  ;;  %v3103_v30 = vmax.f32 %v3102_v51, %v9366_v2  ;;  %v3085_v51 = vmax.f32 %v3084_v46, %v9327_v50  ;;  %v13806_v42 = vld [vmem:[#allocation158_spill] sm:$0xff] }
 0x4cf   : > { %v9399_v54 = vpop.f32.mrf.mxu0  ;;  %v9401_v45 = vpop.f32.mrf.mxu1  ;;  %v3017_v2 = vmax.f32 %v13807_v61, %v13806_v42  ;;  %v3029_v50 = vmax.f32 %v3028_v21, %v9267_v56  ;;  %v3048_v4 = vmax.f32 %v3047_v25, %v9291_v13  ;;  %v3067_v61 = vmax.f32 %v3066_v48, %v9305_v49  ;;  %v13819_v21 = vld [vmem:[#allocation148_spill] sm:$0xff]  ;;  %v13820_v25 = vld [vmem:[#allocation155_spill] sm:$0xff] }
 0x4d0   : > { %13804 = vst [vmem:[#allocation453_spill] sm:$0xff] %v9399_v54  ;;  %13805 = vst [vmem:[#allocation454_spill] sm:$0xff] %v9401_v45  ;;  %v3111_v38 = vmax.f32 %v3110_v0, %v9399_v54  ;;  %v3104_v34 = vmax.f32 %v3103_v30, %v9376_v44  ;;  %v2972_v0 = vmax.f32 %v13814_v57, %v13813_v53  ;;  %v13815_v54 = vld [vmem:[#allocation145_spill] sm:$0xff] }
 0x4d1   : > { %v9412_v14 = vpop.f32.mrf.mxu0  ;;  %v9414_v43 = vpop.f32.mrf.mxu1  ;;  %v2991_v30 = vmax.f32 %v2990_v5, %v13815_v54  ;;  %v3075_v42 = vmax.f32 %v3074_v17, %v9317_v55  ;;  %v3086_v57 = vmax.f32 %v3085_v51, %v9334_v15  ;;  %v3010_v13 = vmax.f32 %v3009_v27, %v13820_v25  ;;  %v13825_v17 = vld [vmem:[#allocation137_spill] sm:$0xff]  ;;  %v13832_v15 = vld [vmem:[#allocation159_spill] sm:$0xff] }
 0x4d2   : > { %13811 = vst [vmem:[#allocation455_spill] sm:$0xff] %v9412_v14  ;;  %13812 = vst [vmem:[#allocation456_spill] sm:$0xff] %v9414_v43  ;;  %3105 = vmax.xlane.f32.xlu0 %v3104_v34  ;;  %v3112_v46 = vmax.f32 %v3111_v38, %v9389_v23  ;;  %v3094_v38 = vmax.f32 %v3093_v1, %v9346_v62  ;;  %v13818_v34 = vld [vmem:[#allocation150_spill] sm:$0xff]  ;;  %v3018_v29 = vmax.f32 %v3017_v2, %v13821_v12  ;;  %v13822_v23 = vld [vmem:[#allocation167_spill] sm:$0xff] }
 0x4d3   : > { %v9423_v44 = vpop.f32.mrf.mxu0  ;;  %v9425_v37 = vpop.f32.mrf.mxu1  ;;  %v2999_v56 = vmax.f32 %v13819_v21, %v13818_v34  ;;  %v3037_v53 = vmax.f32 %v3036_v32, %v13822_v23  ;;  %v2973_v49 = vmax.f32 %v2972_v0, %v13825_v17  ;;  %v3011_v51 = vmax.f32 %v3010_v13, %v9239_v19  ;;  %v13829_v13 = vld [vmem:[#allocation140_spill] sm:$0xff]  ;;  %v13900_v25 = vld [vmem:[#allocation201_spill] sm:$0xff] }
 0x4d4   : > { %13816 = vst [vmem:[#allocation457_spill] sm:$0xff] %v9423_v44  ;;  %13817 = vst [vmem:[#allocation458_spill] sm:$0xff] %v9425_v37  ;;  %v3113_v5 = vmax.f32 %v3112_v46, %v9401_v45  ;;  %v3030_v1 = vmax.f32 %v3029_v50, %v9271_v58  ;;  %v3049_v32 = vmax.f32 %v3048_v4, %v9289_v40  ;;  %v13830_v50 = vld [vmem:[#allocation147_spill] sm:$0xff] }
 0x4d5   : > { %v9437_v54 = vpop.f32.mrf.mxu0  ;;  %v9439_v48 = vpop.f32.mrf.mxu1  ;;  %v3038_v46 = vmax.f32 %v3037_v53, %v9278_v31  ;;  %v3057_v2 = vmax.f32 %v3056_v22, %v9299_v52  ;;  %v3068_v62 = vmax.f32 %v3067_v61, %v9309_v35  ;;  %v3095_v0 = vmax.f32 %v3094_v38, %v9354_v16  ;;  %v13831_v53 = vld [vmem:[#allocation149_spill] sm:$0xff]  ;;  %v13858_v35 = vld [vmem:[#allocation412_spill] sm:$0xff] }
 0x4d6   : > { %13823 = vst [vmem:[#allocation459_spill] sm:$0xff] %v9437_v54  ;;  %13824 = vst [vmem:[#allocation460_spill] sm:$0xff] %v9439_v48  ;;  %3087 = vmax.xlane.f32.xlu0 %v3086_v57  ;;  %3114 = vmax.xlane.f32.xlu1 %v3113_v5  ;;  %v3076_v57 = vmax.f32 %v3075_v42, %v9313_v6  ;;  %v13828_v5 = vld [vmem:[#allocation142_spill] sm:$0xff]  ;;  %v2992_v58 = vmax.f32 %v2991_v30, %v13830_v50  ;;  %v13874_v16 = vld [vmem:[#allocation396_spill] sm:$0xff] }
 0x4d7   : > { %v9445_v55 = vpop.f32.mrf.mxu0  ;;  %v9447_v27 = vpop.f32.mrf.mxu1  ;;  %v2981_v19 = vmax.f32 %v13829_v13, %v13828_v5  ;;  %v3000_v31 = vmax.f32 %v2999_v56, %v13831_v53  ;;  %v3019_v45 = vmax.f32 %v3018_v29, %v13832_v15  ;;  %v3012_v22 = vmax.f32 %v3011_v51, %v9245_v9  ;;  %v13839_v9 = vld [vmem:[#allocation151_spill] sm:$0xff]  ;;  %v13895_v5 = vld [vmem:[#allocation204_spill] sm:$0xff]  ;;  %v13897_v50 = vld [vmem:[#allocation210_spill] sm:$0xff] }
 0x4d8   : > { %13826 = vst [vmem:[#allocation461_spill] sm:$0xff] %v9445_v55  ;;  %13827 = vst [vmem:[#allocation462_spill] sm:$0xff] %v9447_v27  ;;  %v2993_v61 = vmax.f32 %v2992_v58, %v9203_v59  ;;  %v3031_v30 = vmax.f32 %v3030_v1, %v9269_v47  ;;  %v3039_v56 = vmax.f32 %v3038_v46, %v9282_v28  ;;  %v13838_v59 = vld [vmem:[#allocation141_spill] sm:$0xff]  ;;  %v13845_v28 = vld [vmem:[#allocation430_spill] sm:$0xff] }
 0x4d9   : > { %v9459_v17 = vpop.f32.mrf.mxu0  ;;  %v9461_v4 = vpop.f32.mrf.mxu1  ;;  %v3020_v42 = vmax.f32 %v3019_v45, %v9254_v63  ;;  %v3050_v29 = vmax.f32 %v3049_v32, %v9293_v24  ;;  %v3077_v52 = vmax.f32 %v3076_v57, %v9319_v41  ;;  %v2982_v51 = vmax.f32 %v2981_v19, %v13838_v59  ;;  %v13847_v24 = vld [vmem:[#allocation143_spill] sm:$0xff]  ;;  %v13918_v55 = vld [vmem:[#allocation236_spill] sm:$0xff] }
 0x4da   : > { %13833 = vst [vmem:[#allocation463_spill] sm:$0xff] %v9459_v17  ;;  %13834 = vst [vmem:[#allocation464_spill] sm:$0xff] %v9461_v4  ;;  %3069 = vmax.xlane.f32.xlu0 %v3068_v62  ;;  %3096 = vmax.xlane.f32.xlu1 %v3095_v0  ;;  %v3058_v62 = vmax.f32 %v3057_v2, %v9297_v39  ;;  %v13837_v0 = vld [vmem:[#allocation139_spill] sm:$0xff]  ;;  %v3001_v45 = vmax.f32 %v3000_v31, %v13839_v9  ;;  %v13844_v31 = vld [vmem:[#allocation418_spill] sm:$0xff] }
 0x4db   : > { %v9466_v38 = vpop.f32.mrf.mxu1  ;;  %v9470_v40 = vpop.f32.mrf.mxu0  ;;  %v2974_v58 = vmax.f32 %v2973_v49, %v13837_v0  ;;  %v2994_v46 = vmax.f32 %v2993_v61, %v9210_v7  ;;  %v3013_v49 = vmax.f32 %v3012_v22, %v9241_v3  ;;  %v3021_v19 = vmax.f32 %v3020_v42, %v9258_v10  ;;  %v13853_v3 = vld [vmem:[#allocation400_spill] sm:$0xff]  ;;  %v13854_v10 = vld [vmem:[#allocation405_spill] sm:$0xff] }
 0x4dc   : > { %13835 = vst [vmem:[#allocation465_spill] sm:$0xff] %v9466_v38  ;;  %13836 = vst [vmem:[#allocation466_spill] sm:$0xff] %v9470_v40  ;;  %v3002_v32 = vmax.f32 %v3001_v45, %v9222_v18  ;;  %v3032_v47 = vmax.f32 %v3031_v30, %v13844_v31  ;;  %v3059_v39 = vmax.f32 %v3058_v62, %v13845_v28  ;;  %v13850_v45 = vld [vmem:[#allocation393_spill] sm:$0xff]  ;;  %v13851_v18 = vld [vmem:[#allocation395_spill] sm:$0xff] }
 0x4dd   : > { %v9478_v63 = vpop.f32.mrf.mxu1  ;;  %v9480_v6 = vpop.f32.mrf.mxu0  ;;  %v2975_v1 = vmax.f32 %v2974_v58, %v9156_v26  ;;  %v2983_v58 = vmax.f32 %v2982_v51, %v13847_v24  ;;  %v2995_v30 = vmax.f32 %v2994_v46, %v13853_v3  ;;  %v3022_v41 = vmax.f32 %v3021_v19, %v13858_v35  ;;  %v13865_v3 = vld [vmem:[#allocation402_spill] sm:$0xff]  ;;  %v13898_v9 = vld [vmem:[#allocation208_spill] sm:$0xff] }
 0x4de   : > { %13840 = vst [vmem:[#allocation467_spill] sm:$0xff] %v9478_v63  ;;  %13841 = vst [vmem:[#allocation468_spill] sm:$0xff] %v9480_v6  ;;  %3051 = vmax.xlane.f32.xlu0 %v3050_v29  ;;  %3078 = vmax.xlane.f32.xlu1 %v3077_v52  ;;  %v13846_v29 = vld [vmem:[#allocation420_spill] sm:$0xff]  ;;  %v3003_v62 = vmax.f32 %v3002_v32, %v13854_v10  ;;  %v13866_v10 = vld [vmem:[#allocation414_spill] sm:$0xff]  ;;  %v3134_v34 = vmax.f32 %v13898_v9, %v13897_v50 }
 0x4df   : > { %v9485_v57 = vpop.f32.mrf.mxu1  ;;  %v9489_v2 = vpop.f32.mrf.mxu0  ;;  %v3040_v52 = vmax.f32 %v3039_v56, %v13846_v29  ;;  %v2976_v22 = vmax.f32 %v2975_v1, %v13850_v45  ;;  %v2984_v42 = vmax.f32 %v2983_v58, %v13851_v18  ;;  %v13856_v56 = vld [vmem:[#allocation410_spill] sm:$0xff]  ;;  %v13862_v58 = vld [vmem:[#allocation392_spill] sm:$0xff]  ;;  %v13863_v18 = vld [vmem:[#allocation397_spill] sm:$0xff]  ;;  %v3152_v23 = vmax.f32 %v13902_v8, %v13901_v60 }
 0x4e0   : > { %13842 = vst [vmem:[#allocation469_spill] sm:$0xff] %v9485_v57  ;;  %13843 = vst [vmem:[#allocation470_spill] sm:$0xff] %v9489_v2  ;;  %v3014_v51 = vmax.f32 %v3013_v49, %v13856_v56  ;;  %v13857_v29 = vld [vmem:[#allocation422_spill] sm:$0xff]  ;;  %v2996_v49 = vmax.f32 %v2995_v30, %v13865_v3  ;;  %v13867_v56 = vld [vmem:[#allocation404_spill] sm:$0xff] }
 0x4e1   : > { %v9495_v26 = vpop.f32.mrf.mxu1  ;;  %v9497_v61 = vpop.f32.mrf.mxu0  ;;  %v3041_v28 = vmax.f32 %v3040_v52, %v13857_v29  ;;  %v2977_v46 = vmax.f32 %v2976_v22, %v13862_v58  ;;  %v2985_v32 = vmax.f32 %v2984_v42, %v13863_v18  ;;  %v3023_v52 = vmax.f32 %v3022_v41, %v13866_v10  ;;  %v13872_v22 = vld [vmem:[#allocation394_spill] sm:$0xff]  ;;  %v13911_v50 = vld [vmem:[#allocation228_spill] sm:$0xff]  ;;  %v13926_v6 = vld [vmem:[#allocation203_spill] sm:$0xff] }
 0x4e2   : > { %13848 = vst [vmem:[#allocation471_spill] sm:$0xff] %v9495_v26  ;;  %13849 = vst [vmem:[#allocation472_spill] sm:$0xff] %v9497_v61  ;;  %3033 = vmax.xlane.f32.xlu0 %v3032_v47  ;;  %3060 = vmax.xlane.f32.xlu1 %v3059_v39  ;;  %v3004_v19 = vmax.f32 %v3003_v62, %v13867_v56  ;;  %v13873_v58 = vld [vmem:[#allocation406_spill] sm:$0xff]  ;;  %v13920_v2 = vld [vmem:[#allocation212_spill] sm:$0xff] }
 0x4e3   : > { %v9501_v7 = vpop.f32.mrf.mxu1  ;;  %v9505_v31 = vpop.f32.mrf.mxu0  ;;  %v2978_v42 = vmax.f32 %v2977_v46, %v13872_v22  ;;  %v2986_v30 = vmax.f32 %v2985_v32, %v13874_v16  ;;  %v13894_v24 = vld [vmem:[#allocation206_spill] sm:$0xff]  ;;  %v13960_v26 = vld [vmem:[#allocation56_spill] sm:$0xff] }
 0x4e4   : > { %13852 = vst [vmem:[#allocation473_spill] sm:$0xff] %v9501_v7  ;;  %13855 = vst [vmem:[#allocation474_spill] sm:$0xff] %v9505_v31  ;;  %v3005_v18 = vmax.f32 %v3004_v19, %v13873_v58  ;;  %v13891_v58 = vld [vmem:[#allocation202_spill] sm:$0xff]  ;;  %v3125_v53 = vmax.f32 %v13895_v5, %v13894_v24  ;;  %v13972_v40 = vld [vmem:[#allocation256_spill] sm:$0xff] }
 0x4e5   : > { %v9510_v47 = vpop.f32.mrf.mxu1  ;;  %v9512_v39 = vpop.f32.mrf.mxu0  ;;  %v13908_v24 = vld [vmem:[#allocation226_spill] sm:$0xff] }
 0x4e6   : > { %13859 = vst [vmem:[#allocation475_spill] sm:$0xff] %v9510_v47  ;;  %13860 = vst [vmem:[#allocation476_spill] sm:$0xff] %v9512_v39  ;;  %3015 = vmax.xlane.f32.xlu0 %v3014_v51  ;;  %3042 = vmax.xlane.f32.xlu1 %v3041_v28  ;;  %v9587_v5 = vmax.f32 %v3125_v53, %v13906_v33  ;;  %v3170_v27 = vmax.f32 %v13909_v11, %v13908_v24  ;;  %v13910_v9 = vld [vmem:[#allocation230_spill] sm:$0xff]  ;;  %v13922_v24 = vld [vmem:[#allocation240_spill] sm:$0xff] }
 0x4e7   : > { %v9514_v1 = vpop.f32.mrf.mxu1  ;;  %v9518_v45 = vpop.f32.mrf.mxu0  ;;  %v3179_v48 = vmax.f32 %v13911_v50, %v13910_v9  ;;  %v13915_v60 = vld [vmem:[#allocation234_spill] sm:$0xff]  ;;  %v13924_v9 = vld [vmem:[#allocation244_spill] sm:$0xff]  ;;  %v13963_v39 = vld [vmem:[#allocation47_spill] sm:$0xff] }
 0x4e8   : > { %13861 = vst [vmem:[#allocation477_spill] sm:$0xff] %v9514_v1  ;;  %13864 = vst [vmem:[#allocation478_spill] sm:$0xff] %v9518_v45  ;;  %v13917_v63 = vld [vmem:[#allocation238_spill] sm:$0xff]  ;;  %v13946_v45 = vld [vmem:[#allocation245_spill] sm:$0xff] }
 0x4e9   : > { %v9523_v35 = vpop.f32.mrf.mxu1  ;;  %v9525_v29 = vpop.f32.mrf.mxu0  ;;  %13907 = vst [vmem:[#allocation502_spill] sm:$0xff] %v9587_v5  ;;  %v3197_v53 = vmax.f32 %v13918_v55, %v13917_v63  ;;  %v13919_v33 = vld [vmem:[#allocation214_spill] sm:$0xff]  ;;  %v13932_v63 = vld [vmem:[#allocation225_spill] sm:$0xff] }
 0x4ea   : > { %13868 = vst [vmem:[#allocation479_spill] sm:$0xff] %v9523_v35  ;;  %13869 = vst [vmem:[#allocation480_spill] sm:$0xff] %v9525_v29  ;;  %2997 = vmax.xlane.f32.xlu0 %v2996_v49  ;;  %3024 = vmax.xlane.f32.xlu1 %v3023_v52  ;;  %v13879_v52 = vld [vmem:[#allocation398_spill] sm:$0xff]  ;;  %v3143_v1 = vmax.f32 %v13920_v2, %v13919_v33  ;;  %v13940_v33 = vld [vmem:[#allocation237_spill] sm:$0xff] }
 0x4eb   : > { %v9527_v28 = vpop.f32.mrf.mxu1  ;;  %v9529_v51 = vpop.f32.mrf.mxu0  ;;  %v2987_v56 = vmax.f32 %v2986_v30, %v13879_v52  ;;  %v13921_v11 = vld [vmem:[#allocation242_spill] sm:$0xff]  ;;  %v9642_v2 = vmax.f32 %v3197_v53, %v13940_v33  ;;  %v13958_v33 = vld [vmem:[#allocation235_spill] sm:$0xff] }
 0x4ec   : > { %13870 = vst [vmem:[#allocation481_spill] sm:$0xff] %v9527_v28  ;;  %13871 = vst [vmem:[#allocation482_spill] sm:$0xff] %v9529_v51  ;;  %v9561_v30 = vpop.xlane.xlu0 %2817  ;;  %v3206_v47 = vmax.f32 %v13922_v24, %v13921_v11  ;;  %v13923_v50 = vld [vmem:[#allocation246_spill] sm:$0xff]  ;;  %v9625_v11 = vmax.f32 %v3170_v27, %v13932_v63  ;;  %v13942_v27 = vld [vmem:[#allocation65_spill] sm:$0xff] }
 0x4ed   : > { %v9534_v3 = vpop.f32.mrf.mxu1  ;;  %v9536_v41 = vpop.f32.mrf.mxu0  ;;  %13889 = vst [vmem:[#allocation496_spill] sm:$0xff] %v9561_v30  ;;  %v3215_v38 = vmax.f32 %v13924_v9, %v13923_v50  ;;  %v13933_v9 = vld [vmem:[#allocation229_spill] sm:$0xff]  ;;  %v13935_v50 = vld [vmem:[#allocation64_spill] sm:$0xff]  ;;  %13941 = vst [vmem:[#allocation510_spill] sm:$0xff] %v9642_v2 }
 0x4ee   : > { %13875 = vst [vmem:[#allocation483_spill] sm:$0xff] %v9534_v3  ;;  %13876 = vst [vmem:[#allocation484_spill] sm:$0xff] %v9536_v41  ;;  %2979 = vmax.xlane.f32.xlu0 %v2978_v42  ;;  %3006 = vmax.xlane.f32.xlu1 %v3005_v18  ;;  %v9628_v24 = vmax.f32 %v3179_v48, %v13933_v9  ;;  %v3374_v48 = vsub.f32 %v13942_v27, %v9561_v30  ;;  %v13943_v63 = vld [vmem:[#allocation213_spill] sm:$0xff]  ;;  %v13950_v7 = vld [vmem:[#allocation250_spill] sm:$0xff] }
 0x4ef   : > { %v9538_v62 = vpop.f32.mrf.mxu1  ;;  %v9540_v49 = vpop.f32.mrf.mxu0  ;;  %v9647_v9 = vmax.f32 %v3143_v1, %v13943_v63  ;;  %v13951_v1 = vld [vmem:[#allocation248_spill] sm:$0xff]  ;;  %v13961_v41 = vld [vmem:[#allocation243_spill] sm:$0xff] }
 0x4f0   : > { %13877 = vst [vmem:[#allocation485_spill] sm:$0xff] %v9538_v62  ;;  %13878 = vst [vmem:[#allocation486_spill] sm:$0xff] %v9540_v49  ;;  %v9593_v57 = vpop.xlane.xlu0 %2799  ;;  %v9653_v62 = vmax.f32 %v3215_v38, %v13946_v45  ;;  %v3224_v63 = vmax.f32 %v13951_v1, %v13950_v7  ;;  %v13955_v45 = vld [vmem:[#allocation227_spill] sm:$0xff]  ;;  %v13965_v1 = vld [vmem:[#allocation249_spill] sm:$0xff] }
 0x4f1   : > { %v9543_v10 = vpop.f32.mrf.mxu1  ;;  %v9545_v59 = vpop.f32.mrf.mxu0  ;;  %13912 = vst [vmem:[#allocation503_spill] sm:$0xff] %v9593_v57  ;;  %13934 = vst [vmem:[#allocation508_spill] sm:$0xff] %v9628_v24  ;;  %v3358_v49 = vsub.f32 %v13960_v26, %v9593_v57  ;;  %v13968_v26 = vld [vmem:[#allocation48_spill] sm:$0xff]  ;;  %v13977_v7 = vld [vmem:[#allocation67_spill] sm:$0xff] }
 0x4f2   : > { %13880 = vst [vmem:[#allocation487_spill] sm:$0xff] %v9543_v10  ;;  %13881 = vst [vmem:[#allocation488_spill] sm:$0xff] %v9545_v59  ;;  %2988 = vmax.xlane.f32.xlu1 %v2987_v56  ;;  %v13892_v56 = vld [vmem:[#allocation200_spill] sm:$0xff]  ;;  %v9692_v28 = vmax.f32 %v3224_v63, %v13965_v1  ;;  %v13974_v1 = vld [vmem:[#allocation262_spill] sm:$0xff] }
 0x4f3   : > { %v9547_v46 = vpop.f32.mrf.mxu1  ;;  %v9549_v32 = vpop.f32.mrf.mxu0  ;;  %v3116_v13 = vmax.f32 %v13892_v56, %v13891_v58  ;;  %v13904_v56 = vld [vmem:[#allocation220_spill] sm:$0xff]  ;;  %13944 = vst [vmem:[#allocation65_spill] sm:$0xff] %v9647_v9 }
 0x4f4   : > { %13882 = vst [vmem:[#allocation489_spill] sm:$0xff] %v9547_v46  ;;  %13883 = vst [vmem:[#allocation490_spill] sm:$0xff] %v9549_v32  ;;  %v3161_v58 = vmax.f32 %v13904_v56, %v13903_v20  ;;  %v13916_v56 = vld [vmem:[#allocation232_spill] sm:$0xff]  ;;  %v13973_v46 = vld [vmem:[#allocation66_spill] sm:$0xff] }
 0x4f5   : > { %v9551_v19 = vpop.f32.mrf.mxu1  ;;  %v9553_v16 = vpop.f32.mrf.mxu0  ;;  %v9578_v15 = vmax.f32 %v3116_v13, %v13900_v25  ;;  %v13914_v25 = vld [vmem:[#allocation209_spill] sm:$0xff]  ;;  %v3188_v20 = vmax.f32 %v13916_v56, %v13915_v60  ;;  %v3373_v63 = vsub.f32 %v13973_v46, %v9561_v30 }
 0x4f6   : > { %13884 = vst [vmem:[#allocation491_spill] sm:$0xff] %v9551_v19  ;;  %13885 = vst [vmem:[#allocation492_spill] sm:$0xff] %v9553_v16  ;;  %v9598_v8 = vmax.f32 %v3134_v34, %v13914_v25  ;;  %v13927_v25 = vld [vmem:[#allocation217_spill] sm:$0xff] }
 0x4f7   : > { %v9555_v18 = vpop.f32.mrf.mxu1  ;;  %v9557_v42 = vpop.f32.mrf.mxu0  ;;  %v3118_v34 = vmax.f32 %v9578_v15, %v13926_v6  ;;  %v9615_v4 = vmax.f32 %v3152_v23, %v13927_v25  ;;  %v13928_v56 = vld [vmem:[#allocation221_spill] sm:$0xff]  ;;  %v3372_v15 = vsub.f32 %v13935_v50, %v9561_v30  ;;  %v13947_v25 = vld [vmem:[#allocation55_spill] sm:$0xff] }
 0x4f8   : > { %13886 = vst [vmem:[#allocation493_spill] sm:$0xff] %v9555_v18  ;;  %13887 = vst [vmem:[#allocation494_spill] sm:$0xff] %v9557_v42  ;;  %v9618_v60 = vmax.f32 %v3161_v58, %v13928_v56  ;;  %v9632_v6 = vpop.xlane.xlu1 %2826  ;;  %v13938_v58 = vld [vmem:[#allocation211_spill] sm:$0xff]  ;;  %v13939_v56 = vld [vmem:[#allocation233_spill] sm:$0xff]  ;;  %v3356_v3 = vsub.f32 %v13947_v25, %v9593_v57 }
 0x4f9   : > { %v9559_v22 = vpop.f32.mrf.mxu1  ;;  %v9563_v52 = vpop.f32.mrf.mxu0  ;;  %13936 = vst [vmem:[#allocation64_spill] sm:$0xff] %v9632_v6  ;;  %v9639_v54 = vmax.f32 %v3188_v20, %v13939_v56  ;;  %v13945_v50 = vld [vmem:[#allocation241_spill] sm:$0xff]  ;;  %v13948_v56 = vld [vmem:[#allocation219_spill] sm:$0xff] }
 0x4fa   : > { %13888 = vst [vmem:[#allocation495_spill] sm:$0xff] %v9559_v22  ;;  %13890 = vst [vmem:[#allocation497_spill] sm:$0xff] %v9563_v52  ;;  %v9650_v5 = vmax.f32 %v3206_v47, %v13945_v50  ;;  %v9657_v20 = vpop.xlane.xlu0 %2781  ;;  %v3154_v53 = vmax.f32 %v9615_v4, %v13948_v56  ;;  %v13952_v47 = vld [vmem:[#allocation68_spill] sm:$0xff]  ;;  %v3996_v4 = vmul.f32 1.442695, %v3372_v15  ;;  %v13957_v56 = vld [vmem:[#allocation69_spill] sm:$0xff] }
 0x4fb   : > { %v9567_v0 = vpop.f32.mrf.mxu1  ;;  %v9571_v21 = vpop.f32.mrf.mxu0  ;;  %13929 = vst [vmem:[#allocation506_spill] sm:$0xff] %v9618_v60  ;;  %v3380_v50 = vsub.f32 %v13952_v47, %v9632_v6  ;;  %v3382_v27 = vsub.f32 %v13957_v56, %v9632_v6  ;;  %v4000_v60 = vmul.f32 1.442695, %v3374_v48  ;;  %v13962_v18 = vld [vmem:[#allocation247_spill] sm:$0xff]  ;;  %v3964_v15 = vmul.f32 1.442695, %v3356_v3 }
 0x4fc   : > { %13893 = vst [vmem:[#allocation498_spill] sm:$0xff] %v9567_v0  ;;  %13896 = vst [vmem:[#allocation499_spill] sm:$0xff] %v9571_v21  ;;  %v3340_v56 = vsub.f32 %v13963_v39, %v9657_v20  ;;  %v9689_v24 = vpop.xlane.xlu1 %2808  ;;  %v13966_v47 = vld [vmem:[#allocation254_spill] sm:$0xff]  ;;  %v13967_v48 = vld [vmem:[#allocation252_spill] sm:$0xff]  ;;  %v3342_v42 = vsub.f32 %v13968_v26, %v9657_v20  ;;  %6456 = vpow2.f32 %v3996_v4 }
 0x4fd   : > { %v9575_v12 = vpop.f32.mrf.mxu0  ;;  %v9584_v36 = vpop.f32.mrf.mxu1  ;;  %13964 = vst [vmem:[#allocation69_spill] sm:$0xff] %v9689_v24  ;;  %v3233_v19 = vmax.f32 %v13967_v48, %v13966_v47  ;;  %v4012_v35 = vmul.f32 1.442695, %v3380_v50  ;;  %v13971_v3 = vld [vmem:[#allocation258_spill] sm:$0xff]  ;;  %v4016_v39 = vmul.f32 1.442695, %v3382_v27  ;;  %6458 = vpow2.f32 %v4000_v60 }
 0x4fe   : > { %13899 = vst [vmem:[#allocation500_spill] sm:$0xff] %v9575_v12  ;;  %13905 = vst [vmem:[#allocation501_spill] sm:$0xff] %v9584_v36  ;;  %v13975_v36 = vld [vmem:[#allocation260_spill] sm:$0xff]  ;;  %v3968_v50 = vmul.f32 1.442695, %v3358_v49  ;;  %v13976_v48 = vld [vmem:[#allocation70_spill] sm:$0xff]  ;;  %v3119_v47 = vmax.f32 %v3118_v34, %v9412_v14  ;;  %6460 = vpow2.f32 %v3964_v15 }
 0x4ff   : > { %v9595_v13 = vpop.f32.mrf.mxu0  ;;  %v9620_v55 = vpop.f32.mrf.mxu1  ;;  %v3251_v10 = vmax.f32 %v13975_v36, %v13974_v1  ;;  %v3381_v26 = vsub.f32 %v13976_v48, %v9632_v6  ;;  %v3932_v0 = vmul.f32 1.442695, %v3340_v56  ;;  %v13978_v4 = vld [vmem:[#allocation251_spill] sm:$0xff]  ;;  %6462 = vpow2.f32 %v4012_v35  ;;  %v13982_v48 = vld [vmem:[#allocation253_spill] sm:$0xff] }
 0x500   : > { %13913 = vst [vmem:[#allocation504_spill] sm:$0xff] %v9595_v13  ;;  %13930 = vst [vmem:[#allocation507_spill] sm:$0xff] %v9620_v55  ;;  %v3242_v55 = vmax.f32 %v13972_v40, %v13971_v3  ;;  %v3375_v40 = vsub.f32 %v13977_v7, %v9561_v30  ;;  %v3226_v27 = vmax.f32 %v9692_v28, %v13978_v4  ;;  %v3936_v46 = vmul.f32 1.442695, %v3342_v42  ;;  %v13979_v3 = vld [vmem:[#allocation71_spill] sm:$0xff]  ;;  %v9726_v7 = vpop.xlane.xlu0 %2763  ;;  %v9728_v56 = vpop.xlane.xlu1 %2790  ;;  %v13984_v28 = vld [vmem:[#allocation257_spill] sm:$0xff] }
 0x501   : > { %v9610_v37 = vpop.f32.mrf.mxu0  ;;  %v9667_v9 = vpop.f32.mrf.mxu1  ;;  %v3383_v36 = vsub.f32 %v13979_v3, %v9632_v6  ;;  %v9722_v1 = vmax.f32 %v3233_v19, %v13982_v48  ;;  %6464 = vpow2.f32 %v4016_v39  ;;  %v13983_v34 = vld [vmem:[#allocation59_spill] sm:$0xff]  ;;  %v3998_v35 = vmul.f32 1.442695, %v3373_v63  ;;  %v13985_v4 = vld [vmem:[#allocation261_spill] sm:$0xff]  ;;  %v13986_v19 = vld [vmem:[#allocation60_spill] sm:$0xff] }
 0x502   : > { %13925 = vst [vmem:[#allocation505_spill] sm:$0xff] %v9610_v37  ;;  %13953 = vst [vmem:[#allocation55_spill] sm:$0xff] %v9667_v9  ;;  %v3364_v15 = vsub.f32 %v13983_v34, %v9689_v24  ;;  %v3243_v42 = vmax.f32 %v3242_v55, %v13984_v28  ;;  %v3252_v3 = vmax.f32 %v3251_v10, %v13985_v4  ;;  %6466 = vpow2.f32 %v3968_v50  ;;  %v13987_v30 = vld [vmem:[#allocation39_spill] sm:$0xff] }
 0x503   : > { %v9634_v23 = vpop.f32.mrf.mxu0  ;;  %v9698_v25 = vpop.f32.mrf.mxu1  ;;  %v4014_v14 = vmul.f32 1.442695, %v3381_v26  ;;  %v3120_v6 = vmax.f32 %v3119_v47, %v9423_v44  ;;  %6468 = vpow2.f32 %v3932_v0  ;;  %v3366_v39 = vsub.f32 %v13986_v19, %v9689_v24  ;;  %v13990_v47 = vld [vmem:[#allocation40_spill] sm:$0xff]  ;;  %v13991_v26 = vld [vmem:[#allocation51_spill] sm:$0xff] }
 0x504   : > { %13937 = vst [vmem:[#allocation509_spill] sm:$0xff] %v9634_v23  ;;  %13969 = vst [vmem:[#allocation56_spill] sm:$0xff] %v9698_v25  ;;  %v4002_v48 = vmul.f32 1.442695, %v3375_v40  ;;  %v9736_v34 = vmax.f32 %v3154_v53, %v9497_v61  ;;  %6470 = vpow2.f32 %v3936_v46  ;;  %v3324_v63 = vsub.f32 %v13987_v30, %v9726_v7  ;;  %v13992_v40 = vld [vmem:[#allocation255_spill] sm:$0xff]  ;;  %v13994_v30 = vld [vmem:[#allocation52_spill] sm:$0xff] }
 0x505   : > { %v9669_v38 = vpop.f32.mrf.mxu0  ;;  %v9717_v60 = vpop.f32.mrf.mxu1  ;;  %v4018_v2 = vmul.f32 1.442695, %v3383_v36  ;;  %v3980_v50 = vmul.f32 1.442695, %v3364_v15  ;;  %v3326_v0 = vsub.f32 %v13990_v47, %v9726_v7  ;;  %v3348_v19 = vsub.f32 %v13991_v26, %v9728_v56  ;;  %v13993_v46 = vld [vmem:[#allocation259_spill] sm:$0xff] }
 0x506   : > { %13954 = vst [vmem:[#allocation68_spill] sm:$0xff] %v9669_v38  ;;  %13980 = vst [vmem:[#allocation48_spill] sm:$0xff] %v9717_v60  ;;  %6472 = vpow2.f32 %v3998_v35  ;;  %v3235_v53 = vmax.f32 %v9722_v1, %v13992_v40  ;;  %v3244_v61 = vmax.f32 %v3243_v42, %v13993_v46  ;;  %v3350_v36 = vsub.f32 %v13994_v30, %v9728_v56  ;;  %v13995_v4 = vld [vmem:[#allocation263_spill] sm:$0xff]  ;;  %v9754_v15 = vpop.xlane.xlu1 %2772  ;;  %v13999_v30 = vld [vmem:[#allocation57_spill] sm:$0xff] }
 0x507   : > { %v9700_v51 = vpop.f32.mrf.mxu0  ;;  %v9740_v55 = vpop.f32.mrf.mxu1  ;;  %6474 = vpow2.f32 %v4014_v14  ;;  %v3253_v28 = vmax.f32 %v3252_v3, %v13995_v4  ;;  %v3984_v44 = vmul.f32 1.442695, %v3366_v39  ;;  %v9757_v47 = vmax.f32 %v3120_v6, %v9414_v43  ;;  %v14000_v42 = vld [vmem:[#allocation62_spill] sm:$0xff] }
 0x508   : > { %13970 = vst [vmem:[#allocation47_spill] sm:$0xff] %v9700_v51  ;;  %13988 = vst [vmem:[#allocation70_spill] sm:$0xff] %v9740_v55  ;;  %6476 = vpow2.f32 %v4002_v48  ;;  %v13996_v35 = vmax.f32 %v9598_v8, %v13938_v58  ;;  %v3900_v26 = vmul.f32 1.442695, %v3324_v63  ;;  %v9771_v48 = vmul.f32 1.442695, %v3326_v0  ;;  %v9773_v39 = vpop.xlane.xlu0 %2745 }
 0x509   : > { %v9719_v49 = vpop.f32.mrf.mxu0  ;;  %6478 = vpow2.f32 %v4018_v2  ;;  %v9767_v14 = vpop.f32.mrf.mxu1  ;;  %v3948_v6 = vmul.f32 1.442695, %v3348_v19  ;;  %v3357_v8 = vsub.f32 %v13999_v30, %v9593_v57  ;;  %v3365_v63 = vsub.f32 %v14000_v42, %v9689_v24  ;;  %v14002_v19 = vld [vmem:[#allocation58_spill] sm:$0xff] }
 0x50a   : > { %13981 = vst [vmem:[#allocation66_spill] sm:$0xff] %v9719_v49  ;;  %v9763_v1 = vmax.f32 %v13996_v35, %v9459_v17  ;;  %13997 = vst [vmem:[#allocation71_spill] sm:$0xff] %v9767_v14  ;;  %6480 = vpow2.f32 %v3980_v50  ;;  %v6457_v35 = vpop.eup %6456  ;;  %v9777_v17 = vmul.f32 1.442695, %v3350_v36  ;;  %v3227_v2 = vmax.f32 %v3226_v27, %v9610_v37  ;;  %v14001_v50 = vld [vmem:[#allocation43_spill] sm:$0xff] }
 0x50b   : > { %v9742_v10 = vpop.f32.mrf.mxu0  ;;  %v3245_v58 = vmax.f32 %v3244_v61, %v9719_v49  ;;  %v6459_v40 = vpop.eup %6458  ;;  %6482 = vpow2.f32 %v3984_v44  ;;  %v3332_v0 = vsub.f32 %v14001_v50, %v9754_v15  ;;  %v3359_v46 = vsub.f32 %v14002_v19, %v9593_v57  ;;  %v14004_v61 = vld [vmem:[#allocation31_spill] sm:$0xff] }
 0x50c   : > { %13989 = vst [vmem:[#allocation67_spill] sm:$0xff] %v9742_v10  ;;  %v9788_v4 = vpop.eup %6460  ;;  %v14003_v36 = vmax.f32 %v9625_v11, %v13955_v45  ;;  %v14005_v44 = vld [vmem:[#allocation63_spill] sm:$0xff]  ;;  %v9801_v49 = vpop.f32.mrf.mxu1  ;;  %6484 = vpow2.f32 %v3900_v26  ;;  %v3966_v11 = vmul.f32 1.442695, %v3357_v8  ;;  %v3982_v45 = vmul.f32 1.442695, %v3365_v63 }
 0x50d   : > { %v9769_v3 = vpop.f32.mrf.mxu0  ;;  %v3367_v37 = vsub.f32 %v14005_v44, %v9689_v24  ;;  %v3246_v50 = vmax.f32 %v3245_v58, %v9742_v10  ;;  %14006 = vst [vmem:[#allocation60_spill] sm:$0xff] %v9801_v49  ;;  %v3228_v44 = vmax.f32 %v3227_v2, %v9634_v23  ;;  %v3236_v58 = vmax.f32 %v3235_v53, %v9669_v38  ;;  %v14011_v53 = vld [vmem:[#allocation49_spill] sm:$0xff] }
 0x50e   : > { %13998 = vst [vmem:[#allocation59_spill] sm:$0xff] %v9769_v3  ;;  %v3254_v30 = vmax.f32 %v3253_v28, %v9769_v3  ;;  %v9794_v42 = vmax.f32 %v14003_v36, %v9525_v29  ;;  %v6463_v28 = vpop.eup %6462  ;;  %v14008_v3 = vld [vmem:[#allocation44_spill] sm:$0xff]  ;;  %v14009_v36 = vmax.f32 %v9650_v5, %v13961_v41  ;;  %6486 = vpow2.f32 %v3948_v6 }
 0x50f   : > { %v9803_v19 = vpop.f32.mrf.mxu0  ;;  %v6465_v29 = vpop.eup %6464  ;;  %v3247_v10 = vmax.f32 %v3246_v50, %v9767_v14  ;;  %v3916_v26 = vmul.f32 1.442695, %v3332_v0  ;;  %v3970_v57 = vmul.f32 1.442695, %v3359_v46  ;;  %v14010_v5 = vmax.f32 %v9639_v54, %v13958_v33 }
 0x510   : > { %14007 = vst [vmem:[#allocation39_spill] sm:$0xff] %v9803_v19  ;;  %v3209_v27 = vmax.f32 %v14009_v36, %v9563_v52  ;;  %v9814_v24 = vpop.eup %6466  ;;  %v3255_v8 = vmax.f32 %v3254_v30, %v9803_v19  ;;  %v3986_v2 = vmul.f32 1.442695, %v3367_v37  ;;  %v3341_v36 = vsub.f32 %v14011_v53, %v9657_v20  ;;  %v9827_v50 = vpop.f32.mrf.mxu1  ;;  %v14015_v37 = vld [vmem:[#allocation53_spill] sm:$0xff] }
 0x511   : > { %v9817_v43 = vpop.eup %6468  ;;  %v9823_v63 = vmax.f32 %v14010_v5, %v9545_v59  ;;  %14012 = vst [vmem:[#allocation40_spill] sm:$0xff] %v9827_v50  ;;  %v3248_v6 = vmax.f32 %v3247_v10, %v9801_v49  ;;  %v9832_v46 = vpack.c.bf16 %v6463_v28, %v6457_v35  ;;  %v9834_v30 = vpack.c.bf16 %v6465_v29, %v6459_v40  ;;  %v14017_v35 = vld [vmem:[#allocation50_spill] sm:$0xff]  ;;  %v14178_v19 = vld [vmem:[#allocation101_spill] sm:$0xff] }
 0x512   : > { %v9830_v0 = vpop.eup %6470  ;;  %6488 = vpow2.f32 %v3966_v11  ;;  %v3210_v52 = vmax.f32 %v3209_v27, %v9571_v21  ;;  %v3349_v5 = vsub.f32 %v14015_v37, %v9728_v56  ;;  %v3237_v53 = vmax.f32 %v3236_v58, %v9700_v51  ;;  %v9852_v37 = vpop.f32.mrf.mxu1  ;;  %v14021_v21 = vld [vmem:[#allocation41_spill] sm:$0xff] }
 0x513   : > { %14013 = vst [vmem:[#allocation51_spill] sm:$0xff] %v9832_v46  ;;  %14014 = vst [vmem:[#allocation52_spill] sm:$0xff] %v9834_v30  ;;  %v6473_v54 = vpop.eup %6472  ;;  %6490 = vpow2.f32 %v3982_v45  ;;  %3249 = vmax.xlane.f32.xlu0 %v3248_v6  ;;  %v3229_v59 = vmax.f32 %v3228_v44, %v9667_v9  ;;  %v14016_v29 = vmax.f32 %v9653_v62, %v13962_v18  ;;  %v3934_v58 = vmul.f32 1.442695, %v3341_v36  ;;  %v14019_v6 = vld [vmem:[#allocation54_spill] sm:$0xff] }
 0x514   : > { %v6475_v10 = vpop.eup %6474  ;;  %6492 = vpow2.f32 %v3970_v57  ;;  %v3343_v27 = vsub.f32 %v14017_v35, %v9657_v20  ;;  %v3256_v45 = vmax.f32 %v3255_v8, %v9827_v50  ;;  %v3351_v44 = vsub.f32 %v14019_v6, %v9728_v56  ;;  %14020 = vst [vmem:[#allocation62_spill] sm:$0xff] %v9852_v37 }
 0x515   : > { %v3218_v40 = vmax.f32 %v14016_v29, %v9575_v12  ;;  %v6477_v28 = vpop.eup %6476  ;;  %v9848_v11 = vpack.c.bf16 %v6475_v10, %v6473_v54  ;;  %6494 = vpow2.f32 %v3986_v2  ;;  %v3325_v62 = vsub.f32 %v14021_v21, %v9726_v7  ;;  %v14023_v54 = vld [vmem:[#allocation45_spill] sm:$0xff]  ;;  %v9868_v21 = vpop.xlane.xlu1 %2754 }
 0x516   : > { %v6479_v57 = vpop.eup %6478  ;;  %v3230_v29 = vmax.f32 %v3229_v59, %v9698_v25  ;;  %v3257_v35 = vmax.f32 %v3256_v45, %v9852_v37  ;;  %v3211_v8 = vmax.f32 %v3210_v52, %v9559_v22  ;;  %v3950_v36 = vmul.f32 1.442695, %v3349_v5  ;;  %v14024_v52 = vld [vmem:[#allocation42_spill] sm:$0xff] }
 0x517   : > { %14018 = vst [vmem:[#allocation57_spill] sm:$0xff] %v9848_v11  ;;  %v9859_v12 = vpop.eup %6480  ;;  %5148 = vmatprep.subr.bf16.mxu0 %v9848_v11  ;;  %v9862_v2 = vpack.c.bf16 %v6479_v57, %v6477_v28  ;;  %v3333_v10 = vsub.f32 %v14023_v54, %v9754_v15  ;;  %v3238_v6 = vmax.f32 %v3237_v53, %v9717_v60  ;;  %6496 = vpow2.f32 %v9777_v17  ;;  %v14025_v11 = vld [vmem:[#allocation46_spill] sm:$0xff]  ;;  %v14027_v54 = vld [vmem:[#allocation239_spill] sm:$0xff] }
 0x518   : > { %5149 = vmatpush1.bf16.xpose.msra.mxu0 %v9832_v46  ;;  %v3938_v59 = vmul.f32 1.442695, %v3343_v27  ;;  %v3327_v45 = vsub.f32 %v14024_v52, %v9726_v7  ;;  %v3335_v28 = vsub.f32 %v14025_v11, %v9754_v15  ;;  %3231 = vmax.xlane.f32.xlu0 %v3230_v29  ;;  %v6483_v5 = vpop.eup %6482  ;;  %6498 = vpow2.f32 %v3916_v26  ;;  %v14026_v27 = vld [vmem:[#allocation510_spill] sm:$0xff] }
 0x519   : > { %14022 = vst [vmem:[#allocation43_spill] sm:$0xff] %v9862_v2  ;;  %v3192_v57 = vmax.f32 %v9823_v63, %v9549_v32  ;;  %5201 = vmatprep.subr.bf16.mxu1 %v9862_v2  ;;  %v3954_v17 = vmul.f32 1.442695, %v3351_v44  ;;  %v3219_v53 = vmax.f32 %v3218_v40, %v9595_v13  ;;  %3258 = vmax.xlane.f32.xlu1 %v3257_v35  ;;  %6500 = vpow2.f32 %v3934_v58  ;;  %v14029_v26 = vld [vmem:[#allocation498_spill] sm:$0xff]  ;;  %v9887_v22 = vpop.eup %6484  ;;  %v14030_v44 = vld [vmem:[#allocation37_spill] sm:$0xff] }
 0x51a   : > { %v14028_v46 = vmax.f32 %v14026_v27, %v14027_v54  ;;  %5202 = vmatpush1.bf16.xpose.msra.mxu1 %v9834_v30  ;;  %v3902_v11 = vmul.f32 1.442695, %v3325_v62  ;;  %v3212_v29 = vmax.f32 %v3211_v8, %v14029_v26  ;;  %6502 = vpow2.f32 %v3950_v36  ;;  %v14032_v62 = vld [vmem:[#allocation38_spill] sm:$0xff]  ;;  %v14033_v36 = vld [vmem:[#allocation487_spill] sm:$0xff]  ;;  %v14034_v30 = vld [vmem:[#allocation501_spill] sm:$0xff] }
 0x51b   : > { %v3918_v63 = vmul.f32 1.442695, %v3333_v10  ;;  %v3317_v40 = vsub.f32 %v14030_v44, %v9868_v21  ;;  %v3239_v35 = vmax.f32 %v3238_v6, %v9740_v55  ;;  %6504 = vpow2.f32 %v3938_v59  ;;  %v9894_v58 = vpop.eup %6486  ;;  %v14035_v6 = vld [vmem:[#allocation32_spill] sm:$0xff]  ;;  %v14039_v26 = vld [vmem:[#allocation507_spill] sm:$0xff] }
 0x51c   : > { %v9883_v52 = vmax.f32 %v14028_v46, %v9553_v16  ;;  %v3906_v2 = vmul.f32 1.442695, %v3327_v45  ;;  %v3922_v27 = vmul.f32 1.442695, %v3335_v28  ;;  %v14031_v46 = vld [vmem:[#allocation33_spill] sm:$0xff]  ;;  %3213 = vmax.xlane.f32.xlu0 %v3212_v29  ;;  %6506 = vpow2.f32 %v3954_v17  ;;  %v14037_v29 = vld [vmem:[#allocation34_spill] sm:$0xff] }
 0x51d   : > { %v3309_v16 = vsub.f32 %v14031_v46, %v9773_v39  ;;  %v3319_v8 = vsub.f32 %v14032_v62, %v9868_v21  ;;  %3240 = vmax.xlane.f32.xlu1 %v3239_v35  ;;  %v3193_v10 = vmax.f32 %v3192_v57, %v14033_v36  ;;  %v3220_v44 = vmax.f32 %v3219_v53, %v14034_v30  ;;  %v14038_v62 = vld [vmem:[#allocation489_spill] sm:$0xff]  ;;  %v14040_v53 = vld [vmem:[#allocation482_spill] sm:$0xff] }
 0x51e   : > { %v3310_v59 = vsub.f32 %v14035_v6, %v9773_v39  ;;  %v14036_v45 = vsub.f32 %v14008_v3, %v9754_v15  ;;  %6508 = vpow2.f32 %v3902_v11  ;;  %v3311_v46 = vsub.f32 %v14037_v29, %v9773_v39  ;;  %v14041_v6 = vld [vmem:[#allocation35_spill] sm:$0xff]  ;;  %v9913_v3 = vpop.xlane.xlu1 %2736  ;;  %v9915_v29 = vpop.xlane.xlu0 %2727 }
 0x51f   : > { %v6489_v17 = vpop.eup %6488  ;;  %6510 = vpow2.f32 %v3918_v63  ;;  %v3886_v32 = vmul.f32 1.442695, %v3317_v40  ;;  %v3194_v35 = vmax.f32 %v3193_v10, %v14038_v62  ;;  %v3221_v57 = vmax.f32 %v3220_v44, %v14039_v26  ;;  %v14042_v63 = vld [vmem:[#allocation494_spill] sm:$0xff] }
 0x520   : > { %v3920_v28 = vmul.f32 1.442695, %v14036_v45  ;;  %v6491_v36 = vpop.eup %6490  ;;  %v3174_v30 = vmax.f32 %v9794_v42, %v14040_v53  ;;  %v3316_v13 = vsub.f32 %v14041_v6, %v9868_v21  ;;  %6512 = vpow2.f32 %v3906_v2 }
 0x521   : > { %v3870_v11 = vmul.f32 1.442695, %v3309_v16  ;;  %v6493_v45 = vpop.eup %6492  ;;  %v3201_v40 = vmax.f32 %v9883_v52, %v14042_v63  ;;  %v9919_v10 = vpack.c.bf16 %v6491_v36, %v6489_v17  ;;  %6514 = vpow2.f32 %v3922_v27  ;;  %3195 = vmax.xlane.f32.xlu0 %v3194_v35  ;;  %3222 = vmax.xlane.f32.xlu1 %v3221_v57  ;;  %v14045_v16 = vld [vmem:[#allocation36_spill] sm:$0xff]  ;;  %v14107_v63 = vld [vmem:[#allocation465_spill] sm:$0xff] }
 0x522   : > { %v3890_v44 = vmul.f32 1.442695, %v3319_v8  ;;  %v6495_v42 = vpop.eup %6494  ;;  %v14044_v6 = vsub.f32 %v14004_v61, %v9773_v39  ;;  %6516 = vpow2.f32 %v3920_v28  ;;  %v3318_v2 = vsub.f32 %v14045_v16, %v9868_v21  ;;  %v14048_v8 = vld [vmem:[#allocation29_spill] sm:$0xff] }
 0x523   : > { %14043 = vst [vmem:[#allocation58_spill] sm:$0xff] %v9919_v10  ;;  %v9928_v62 = vpack.c.bf16 %v9859_v12, %v9788_v4  ;;  %5150 = vmatprep.subr.bf16.mxu0 %v9919_v10  ;;  %v9931_v52 = vpack.c.bf16 %v6495_v42, %v6493_v45  ;;  %6518 = vpow2.f32 %v3886_v32  ;;  %v3874_v27 = vmul.f32 1.442695, %v3311_v46  ;;  %v14050_v28 = vld [vmem:[#allocation25_spill] sm:$0xff]  ;;  %v14051_v12 = vld [vmem:[#allocation479_spill] sm:$0xff]  ;;  %v14052_v32 = vld [vmem:[#allocation30_spill] sm:$0xff] }
 0x524   : > { %v3868_v53 = vmul.f32 1.442695, %v14044_v6  ;;  %v3301_v36 = vsub.f32 %v14048_v8, %v9913_v3  ;;  %v9937_v61 = vpack.c.bf16 %v6483_v5, %v9814_v24  ;;  %6520 = vpow2.f32 %v3870_v11  ;;  %v6497_v35 = vpop.eup %6496  ;;  %v14053_v45 = vld [vmem:[#allocation491_spill] sm:$0xff]  ;;  %v14054_v11 = vld [vmem:[#allocation481_spill] sm:$0xff] }
 0x525   : > { %14046 = vst [vmem:[#allocation31_spill] sm:$0xff] %v9928_v62  ;;  %14047 = vst [vmem:[#allocation63_spill] sm:$0xff] %v9931_v52  ;;  %5151 = vmatpush1.bf16.xpose.msra.mxu0 %v9928_v62  ;;  %v3293_v17 = vsub.f32 %v14050_v28, %v9915_v29  ;;  %v3175_v4 = vmax.f32 %v3174_v30, %v14051_v12  ;;  %v3884_v57 = vmul.f32 1.442695, %v3316_v13  ;;  %5203 = vmatprep.subr.bf16.mxu1 %v9931_v52  ;;  %v9946_v6 = vpop.eup %6498  ;;  %v14056_v28 = vld [vmem:[#allocation493_spill] sm:$0xff]  ;;  %v14058_v52 = vld [vmem:[#allocation508_spill] sm:$0xff] }
 0x526   : > { %14049 = vst [vmem:[#allocation44_spill] sm:$0xff] %v9937_v61  ;;  %6522 = vpow2.f32 %v3890_v44  ;;  %v3303_v46 = vsub.f32 %v14052_v32, %v9913_v3  ;;  %v3202_v42 = vmax.f32 %v3201_v40, %v14053_v45  ;;  %v3872_v24 = vmul.f32 1.442695, %v3310_v59  ;;  %5204 = vmatpush1.bf16.xpose.msra.mxu1 %v9937_v61  ;;  %v6501_v16 = vpop.eup %6500  ;;  %v14055_v44 = vld [vmem:[#allocation26_spill] sm:$0xff]  ;;  %v14057_v40 = vld [vmem:[#allocation484_spill] sm:$0xff]  ;;  %v14059_v10 = vld [vmem:[#allocation231_spill] sm:$0xff] }
 0x527   : > { %6524 = vpow2.f32 %v9771_v48  ;;  %v3888_v5 = vmul.f32 1.442695, %v3318_v2  ;;  %v3176_v30 = vmax.f32 %v3175_v4, %v14054_v11  ;;  %v3854_v13 = vmul.f32 1.442695, %v3301_v36  ;;  %v6503_v62 = vpop.eup %6502  ;;  %v14061_v2 = vld [vmem:[#allocation23_spill] sm:$0xff]  ;;  %v9962_v4 = vpop.xlane.xlu1 %2718 }
 0x528   : > { %6526 = vpow2.f32 %v3874_v27  ;;  %v3295_v8 = vsub.f32 %v14055_v44, %v9915_v29  ;;  %v3203_v32 = vmax.f32 %v3202_v42, %v14056_v28  ;;  %v14060_v48 = vmax.f32 %v14058_v52, %v14059_v10  ;;  %v6505_v36 = vpop.eup %6504  ;;  %v9964_v44 = vpop.xlane.xlu0 %2709  ;;  %v14062_v42 = vld [vmem:[#allocation27_spill] sm:$0xff] }
 0x529   : > { %6528 = vpow2.f32 %v3868_v53  ;;  %v3292_v61 = vsub.f32 %v14061_v2, %v9915_v29  ;;  %v3838_v27 = vmul.f32 1.442695, %v3293_v17  ;;  %3177 = vmax.xlane.f32.xlu0 %v3176_v30  ;;  %v3300_v53 = vsub.f32 %v14062_v42, %v9913_v3  ;;  %v6507_v52 = vpop.eup %6506  ;;  %v14065_v2 = vld [vmem:[#allocation28_spill] sm:$0xff] }
 0x52a   : > { %v9958_v59 = vmax.f32 %v14060_v48, %v14057_v40  ;;  %6530 = vpow2.f32 %v3884_v57  ;;  %v9968_v12 = vpack.c.bf16 %v6503_v62, %v6501_v16  ;;  %v3858_v11 = vmul.f32 1.442695, %v3303_v46  ;;  %3204 = vmax.xlane.f32.xlu1 %v3203_v32  ;;  %v14064_v48 = vld [vmem:[#allocation24_spill] sm:$0xff]  ;;  %v14068_v46 = vld [vmem:[#allocation21_spill] sm:$0xff] }
 0x52b   : > { %v3294_v40 = vsub.f32 %v14064_v48, %v9915_v29  ;;  %6532 = vpow2.f32 %v3888_v5  ;;  %v3302_v17 = vsub.f32 %v14065_v2, %v9913_v3  ;;  %v9976_v57 = vpack.c.bf16 %v9894_v58, %v9817_v43  ;;  %v6509_v30 = vpop.eup %6508  ;;  %v14070_v43 = vld [vmem:[#allocation17_spill] sm:$0xff] }
 0x52c   : > { %14063 = vst [vmem:[#allocation49_spill] sm:$0xff] %v9968_v12  ;;  %5152 = vmatprep.subr.bf16.mxu0 %v9968_v12  ;;  %v9979_v42 = vpack.c.bf16 %v6507_v52, %v6505_v36  ;;  %6534 = vpow2.f32 %v3854_v13  ;;  %v3842_v62 = vmul.f32 1.442695, %v3295_v8  ;;  %v3285_v16 = vsub.f32 %v14068_v46, %v9962_v4  ;;  %v6511_v32 = vpop.eup %6510  ;;  %v14072_v8 = vld [vmem:[#allocation22_spill] sm:$0xff] }
 0x52d   : > { %14066 = vst [vmem:[#allocation53_spill] sm:$0xff] %v9976_v57  ;;  %v3836_v48 = vmul.f32 1.442695, %v3292_v61  ;;  %5153 = vmatpush1.bf16.xpose.msra.mxu0 %v9976_v57  ;;  %v9985_v5 = vpack.c.bf16 %v6497_v35, %v9830_v0  ;;  %6536 = vpow2.f32 %v3838_v27  ;;  %v3277_v58 = vsub.f32 %v14070_v43, %v9964_v44  ;;  %v6513_v2 = vpop.eup %6512  ;;  %v14073_v52 = vld [vmem:[#allocation486_spill] sm:$0xff] }
 0x52e   : > { %14067 = vst [vmem:[#allocation50_spill] sm:$0xff] %v9979_v42  ;;  %v3852_v12 = vmul.f32 1.442695, %v3300_v53  ;;  %5205 = vmatprep.subr.bf16.mxu1 %v9979_v42  ;;  %v9990_v13 = vpack.c.bf16 %v6511_v32, %v6509_v30  ;;  %6538 = vpow2.f32 %v3858_v11  ;;  %v3287_v36 = vsub.f32 %v14072_v8, %v9962_v4  ;;  %v6515_v61 = vpop.eup %6514  ;;  %v14074_v27 = vld [vmem:[#allocation18_spill] sm:$0xff]  ;;  %v14076_v32 = vld [vmem:[#allocation471_spill] sm:$0xff] }
 0x52f   : > { %14069 = vst [vmem:[#allocation54_spill] sm:$0xff] %v9985_v5  ;;  %6540 = vpow2.f32 %v3872_v24  ;;  %v3183_v0 = vmax.f32 %v9958_v59, %v14073_v52  ;;  %v3856_v35 = vmul.f32 1.442695, %v3302_v17  ;;  %5206 = vmatpush1.bf16.xpose.msra.mxu1 %v9985_v5  ;;  %v3279_v46 = vsub.f32 %v14074_v27, %v9964_v44  ;;  %v6517_v53 = vpop.eup %6516  ;;  %v14078_v59 = vld [vmem:[#allocation466_spill] sm:$0xff]  ;;  %v14079_v5 = vld [vmem:[#allocation476_spill] sm:$0xff]  ;;  %v14081_v42 = vld [vmem:[#allocation223_spill] sm:$0xff] }
 0x530   : > { %14071 = vst [vmem:[#allocation41_spill] sm:$0xff] %v9990_v13  ;;  %5154 = vmatprep.subr.bf16.mxu0 %v9990_v13  ;;  %v10000_v30 = vpack.c.bf16 %v6515_v61, %v6513_v2  ;;  %6542 = vpow2.f32 %v3842_v62  ;;  %v3822_v11 = vmul.f32 1.442695, %v3285_v16  ;;  %v14077_v24 = vmax.f32 %v9736_v34, %v9505_v31  ;;  %v6519_v8 = vpop.eup %6518  ;;  %v14080_v57 = vld [vmem:[#allocation506_spill] sm:$0xff]  ;;  %v14083_v16 = vld [vmem:[#allocation473_spill] sm:$0xff]  ;;  %v14100_v31 = vld [vmem:[#allocation207_spill] sm:$0xff] }
 0x531   : > { %v3138_v17 = vmax.f32 %v9763_v1, %v14078_v59  ;;  %v14082_v27 = vmax.f32 %v14080_v57, %v14081_v42  ;;  %6544 = vpow2.f32 %v3836_v48  ;;  %v3806_v13 = vmul.f32 1.442695, %v3277_v58  ;;  %v6521_v2 = vpop.eup %6520  ;;  %v14086_v57 = vld [vmem:[#allocation483_spill] sm:$0xff] }
 0x532   : > { %14075 = vst [vmem:[#allocation45_spill] sm:$0xff] %v10000_v30  ;;  %v3157_v43 = vmax.f32 %v14077_v24, %v14076_v32  ;;  %v3840_v61 = vmul.f32 1.442695, %v3294_v40  ;;  %6546 = vpow2.f32 %v3852_v12  ;;  %5207 = vmatprep.subr.bf16.mxu1 %v10000_v30  ;;  %v3826_v62 = vmul.f32 1.442695, %v3287_v36  ;;  %v14084_v32 = vld [vmem:[#allocation19_spill] sm:$0xff] }
 0x533   : > { %v3164_v52 = vmax.f32 %v14082_v27, %v14079_v5  ;;  %v6523_v24 = vpop.eup %6522  ;;  %6548 = vpow2.f32 %v3856_v35  ;;  %v3284_v1 = vsub.f32 %v14084_v32, %v9962_v4  ;;  %v10018_v59 = vpack.c.bf16 %v9946_v6, %v9887_v22  ;;  %v14087_v40 = vld [vmem:[#allocation15_spill] sm:$0xff]  ;;  %v10023_v27 = vpop.xlane.xlu0 %2691  ;;  %v14089_v32 = vld [vmem:[#allocation20_spill] sm:$0xff]  ;;  %v14091_v6 = vld [vmem:[#allocation485_spill] sm:$0xff] }
 0x534   : > { %v3158_v34 = vmax.f32 %v3157_v43, %v14083_v16  ;;  %v3184_v48 = vmax.f32 %v3183_v0, %v14086_v57  ;;  %v6525_v58 = vpop.eup %6524  ;;  %v3276_v12 = vsub.f32 %v14087_v40, %v9964_v44  ;;  %v10025_v36 = vpack.c.bf16 %v6519_v8, %v6521_v2  ;;  %v14092_v40 = vld [vmem:[#allocation478_spill] sm:$0xff]  ;;  %v14093_v8 = vld [vmem:[#allocation16_spill] sm:$0xff] }
 0x535   : > { %14085 = vst [vmem:[#allocation42_spill] sm:$0xff] %v10018_v59  ;;  %6550 = vpow2.f32 %v3822_v11  ;;  %v3810_v43 = vmul.f32 1.442695, %v3279_v46  ;;  %v6527_v35 = vpop.eup %6526  ;;  %v3286_v30 = vsub.f32 %v14089_v32, %v9962_v4  ;;  %5155 = vmatpush1.bf16.xpose.msra.mxu0 %v10018_v59  ;;  %v10030_v22 = vpack.c.bf16 %v6517_v53, %v6525_v58  ;;  %v10036_v11 = vpop.xlane.xlu1 %2700  ;;  %v14095_v32 = vld [vmem:[#allocation215_spill] sm:$0xff]  ;;  %v14096_v53 = vld [vmem:[#allocation65_spill] sm:$0xff]  ;;  %v14103_v57 = vld [vmem:[#allocation468_spill] sm:$0xff] }
 0x536   : > { %14088 = vst [vmem:[#allocation46_spill] sm:$0xff] %v10025_v36  ;;  %3159 = vmax.xlane.f32.xlu0 %v3158_v34  ;;  %6552 = vpow2.f32 %v3806_v13  ;;  %v3185_v0 = vmax.f32 %v3184_v48, %v14091_v6  ;;  %v6529_v5 = vpop.eup %6528  ;;  %v3165_v16 = vmax.f32 %v3164_v52, %v14092_v40  ;;  %v3278_v2 = vsub.f32 %v14093_v8, %v9964_v44  ;;  %v14097_v13 = vld [vmem:[#allocation7_spill] sm:$0xff]  ;;  %v14099_v40 = vld [vmem:[#allocation502_spill] sm:$0xff] }
 0x537   : > { %14090 = vst [vmem:[#allocation510_spill] sm:$0xff] %v10030_v22  ;;  %5156 = vmatprep.subr.bf16.mxu0 %v10025_v36  ;;  %v10039_v46 = vpack.c.bf16 %v6523_v24, %v6527_v35  ;;  %6554 = vpow2.f32 %v3826_v62  ;;  %v6531_v34 = vpop.eup %6530  ;;  %v3145_v58 = vmax.f32 %v14096_v53, %v14095_v32  ;;  %v3260_v48 = vsub.f32 %v14097_v13, %v10023_v27  ;;  %v14098_v8 = vld [vmem:[#allocation459_spill] sm:$0xff]  ;;  %v14102_v35 = vld [vmem:[#allocation464_spill] sm:$0xff]  ;;  %v14105_v6 = vld [vmem:[#allocation458_spill] sm:$0xff] }
 0x538   : > { %6556 = vpow2.f32 %v3840_v61  ;;  %v3820_v59 = vmul.f32 1.442695, %v3284_v1  ;;  %5208 = vmatpush1.bf16.xpose.msra.mxu1 %v10030_v22  ;;  %3186 = vmax.xlane.f32.xlu1 %v3185_v0  ;;  %v6533_v52 = vpop.eup %6532  ;;  %v14101_v36 = vmax.f32 %v14099_v40, %v14100_v31  ;;  %v3804_v62 = vmul.f32 1.442695, %v3276_v12  ;;  %v14104_v22 = vld [vmem:[#allocation11_spill] sm:$0xff] }
 0x539   : > { %14094 = vst [vmem:[#allocation37_spill] sm:$0xff] %v10039_v46  ;;  %5209 = vmatprep.subr.bf16.mxu1 %v10039_v46  ;;  %6558 = vpow2.f32 %v3810_v43  ;;  %v3139_v61 = vmax.f32 %v3138_v17, %v14102_v35  ;;  %v6535_v53 = vpop.eup %6534  ;;  %v3146_v13 = vmax.f32 %v3145_v58, %v14103_v57  ;;  %v3824_v1 = vmul.f32 1.442695, %v3286_v30  ;;  %v14108_v43 = vld [vmem:[#allocation475_spill] sm:$0xff]  ;;  %v14110_v30 = vld [vmem:[#allocation9_spill] sm:$0xff] }
 0x53a   : > { %v10050_v24 = vmax.f32 %v14101_v36, %v14098_v8  ;;  %v3268_v0 = vsub.f32 %v14104_v22, %v10036_v11  ;;  %v3122_v45 = vmax.f32 %v9757_v47, %v14105_v6  ;;  %v6537_v28 = vpop.eup %6536  ;;  %v3808_v40 = vmul.f32 1.442695, %v3278_v2  ;;  %v14106_v36 = vld [vmem:[#allocation12_spill] sm:$0xff]  ;;  %v14112_v2 = vld [vmem:[#allocation13_spill] sm:$0xff] }
 0x53b   : > { %v3270_v12 = vsub.f32 %v14106_v36, %v10036_v11  ;;  %v3140_v46 = vmax.f32 %v3139_v61, %v14107_v63  ;;  %v3166_v26 = vmax.f32 %v3165_v16, %v14108_v43  ;;  %v6539_v17 = vpop.eup %6538  ;;  %v3772_v35 = vmul.f32 1.442695, %v3260_v48  ;;  %v14113_v36 = vld [vmem:[#allocation477_spill] sm:$0xff] }
 0x53c   : > { %6560 = vpow2.f32 %v3820_v59  ;;  %v10063_v58 = vpack.c.bf16 %v6531_v34, %v6529_v5  ;;  %v3261_v22 = vsub.f32 %v14110_v30, %v10023_v27  ;;  %v6541_v57 = vpop.eup %6540  ;;  %v10067_v47 = vpack.c.bf16 %v6535_v53, %v6537_v28  ;;  %v14115_v59 = vld [vmem:[#allocation10_spill] sm:$0xff] }
 0x53d   : > { %6562 = vpow2.f32 %v3804_v62  ;;  %v3269_v60 = vsub.f32 %v14112_v2, %v10036_v11  ;;  %3141 = vmax.xlane.f32.xlu0 %v3140_v46  ;;  %v3167_v61 = vmax.f32 %v3166_v26, %v14113_v36  ;;  %v6543_v63 = vpop.eup %6542  ;;  %v3788_v16 = vmul.f32 1.442695, %v3268_v0  ;;  %v14116_v62 = vld [vmem:[#allocation470_spill] sm:$0xff] }
 0x53e   : > { %14109 = vst [vmem:[#allocation33_spill] sm:$0xff] %v10063_v58  ;;  %14111 = vst [vmem:[#allocation38_spill] sm:$0xff] %v10067_v47  ;;  %6564 = vpow2.f32 %v3824_v1  ;;  %5157 = vmatpush1.bf16.xpose.msra.mxu0 %v10063_v58  ;;  %v10073_v5 = vpack.c.bf16 %v6533_v52, %v6541_v57  ;;  %v3263_v34 = vsub.f32 %v14115_v59, %v10023_v27  ;;  %v6545_v48 = vpop.eup %6544  ;;  %v3792_v53 = vmul.f32 1.442695, %v3270_v12  ;;  %v14118_v26 = vld [vmem:[#allocation14_spill] sm:$0xff]  ;;  %v14119_v57 = vld [vmem:[#allocation8_spill] sm:$0xff] }
 0x53f   : > { %v3147_v28 = vmax.f32 %v3146_v13, %v14116_v62  ;;  %5158 = vmatprep.subr.bf16.mxu0 %v10067_v47  ;;  %v10079_v30 = vpack.c.bf16 %v6539_v17, %v6543_v63  ;;  %v3271_v46 = vsub.f32 %v14118_v26, %v10036_v11  ;;  %3168 = vmax.xlane.f32.xlu1 %v3167_v61  ;;  %v6547_v1 = vpop.eup %6546  ;;  %6566 = vpow2.f32 %v3808_v40  ;;  %v14120_v59 = vld [vmem:[#allocation461_spill] sm:$0xff]  ;;  %v14121_v26 = vld [vmem:[#allocation467_spill] sm:$0xff] }
 0x540   : > { %14114 = vst [vmem:[#allocation32_spill] sm:$0xff] %v10073_v5  ;;  %v3262_v52 = vsub.f32 %v14119_v57, %v10023_v27  ;;  %5210 = vmatpush1.bf16.xpose.msra.mxu1 %v10073_v5  ;;  %v3774_v0 = vmul.f32 1.442695, %v3261_v22  ;;  %v6549_v2 = vpop.eup %6548  ;;  %v3129_v13 = vmax.f32 %v10050_v24, %v14120_v59  ;;  %6568 = vpow2.f32 %v3772_v35  ;;  %v14124_v35 = vld [vmem:[#allocation469_spill] sm:$0xff] }
 0x541   : > { %14117 = vst [vmem:[#allocation34_spill] sm:$0xff] %v10079_v30  ;;  %5211 = vmatprep.subr.bf16.mxu1 %v10079_v30  ;;  %v3790_v63 = vmul.f32 1.442695, %v3269_v60  ;;  %3123 = vmax.xlane.f32.xlu0 %v3122_v45  ;;  %6570 = vpow2.f32 %v3788_v16  ;;  %v3778_v17 = vmul.f32 1.442695, %v3263_v34  ;;  %v3148_v57 = vmax.f32 %v3147_v28, %v14121_v26  ;;  %v14125_v45 = vld [vmem:[#allocation460_spill] sm:$0xff] }
 0x542   : > { %v6551_v12 = vpop.eup %6550  ;;  %6572 = vpow2.f32 %v3792_v53  ;;  %v3794_v40 = vmul.f32 1.442695, %v3271_v46  ;;  %v3776_v5 = vmul.f32 1.442695, %v3262_v52  ;;  %v10090_v22 = vpack.c.bf16 %v6547_v1, %v6545_v48  ;;  %v14128_v53 = vld [vmem:[#allocation462_spill] sm:$0xff] }
 0x543   : > { %v6553_v61 = vpop.eup %6552  ;;  %6574 = vpow2.f32 %v3774_v0  ;;  %v3149_v60 = vmax.f32 %v3148_v57, %v14124_v35  ;;  %v3130_v30 = vmax.f32 %v3129_v13, %v14125_v45 }
 0x544   : > { %v6555_v47 = vpop.eup %6554  ;;  %14122 = vst [vmem:[#allocation35_spill] sm:$0xff] %v10090_v22  ;;  %v10092_v24 = vpack.c.bf16 %v6551_v12, %v6553_v61  ;;  %6576 = vpow2.f32 %v3790_v63 }
 0x545   : > { %v6557_v58 = vpop.eup %6556  ;;  %6578 = vpow2.f32 %v3778_v17  ;;  %3150 = vmax.xlane.f32.xlu1 %v3149_v60  ;;  %v3131_v46 = vmax.f32 %v3130_v30, %v14128_v53 }
 0x546   : > { %14123 = vst [vmem:[#allocation36_spill] sm:$0xff] %v10092_v24  ;;  %v6559_v16 = vpop.eup %6558  ;;  %5159 = vmatpush1.bf16.xpose.msra.mxu0 %v10090_v22  ;;  %v10097_v34 = vpack.c.bf16 %v6549_v2, %v6557_v58  ;;  %6580 = vpow2.f32 %v3794_v40  ;;  %v6437_v58 = vld [vmem:[#allocation3 + $0x2c] ss:$56 sps:$4 sm:$0xff]  }
 0x547   : > { %5160 = vmatprep.subr.bf16.mxu0 %v10092_v24  ;;  %v10100_v28 = vpack.c.bf16 %v6555_v47, %v6559_v16  ;;  %6582 = vpow2.f32 %v3776_v5  ;;  %v6440_v2 = vld [vmem:[#allocation3 + $0x54] ss:$-80 sps:$4 sm:$0xff]   ;;  %5180 = vmatprep.mubr.bf16.mxu0 %v6437_v58 }
 0x548   : > { %14126 = vst [vmem:[#allocation29_spill] sm:$0xff] %v10097_v34  ;;  %5212 = vmatpush1.bf16.xpose.msra.mxu1 %v10097_v34  ;;  %5233 = vmatprep.mubr.bf16.mxu1 %v6440_v2  ;;  %v14135_v58 = vld [vmem:[#allocation128_spill] sm:$0xff] }
 0x549   : > { %14127 = vst [vmem:[#allocation25_spill] sm:$0xff] %v10100_v28  ;;  %v6561_v48 = vpop.eup %6560  ;;  %5213 = vmatprep.subr.bf16.mxu1 %v10100_v28  ;;  %3132 = vmax.xlane.f32.xlu1 %v3131_v46 }
 0x54a   : > { %v6563_v1 = vpop.eup %6562 }
 0x54b   : > { %v6565_v52 = vpop.eup %6564  ;;  %v10105_v0 = vpack.c.bf16 %v6561_v48, %v6563_v1  ;;  %v10123_v1 = vpop.xlane.xlu0 %2961 }
 0x54c   : > { %v6567_v13 = vpop.eup %6566  ;;  %v3500_v2 = vsub.f32 %v14135_v58, %v10123_v1 }
 0x54d   : > { %14129 = vst [vmem:[#allocation30_spill] sm:$0xff] %v10105_v0  ;;  %v6569_v47 = vpop.eup %6568  ;;  %v10108_v5 = vpack.c.bf16 %v6565_v52, %v6567_v13  ;;  %v10125_v52 = vpop.xlane.xlu1 %2970  ;;  %v14136_v13 = vld [vmem:[#allocation129_spill] sm:$0xff] }
 0x54e   : > { %5161 = vmatpush1.bf16.xpose.msra.mxu0 %v10105_v0  ;;  %v6571_v63 = vpop.eup %6570 }
 0x54f   : > { %14130 = vst [vmem:[#allocation26_spill] sm:$0xff] %v10108_v5  ;;  %v6573_v12 = vpop.eup %6572  ;;  %v10113_v60 = vpack.c.bf16 %v6571_v63, %v6569_v47  ;;  %v3502_v47 = vsub.f32 %v14136_v13, %v10123_v1  ;;  %v14137_v63 = vld [vmem:[#allocation132_spill] sm:$0xff] }
 0x550   : > { %5214 = vmatpush1.bf16.xpose.msra.mxu1 %v10108_v5  ;;  %v6575_v30 = vpop.eup %6574 }
 0x551   : > { %v6577_v17 = vpop.eup %6576  ;;  %14132 = vst [vmem:[#allocation23_spill] sm:$0xff] %v10113_v60  ;;  %v10145_v34 = vpop.xlane.xlu1 %2952 }
 0x552   : > { %v6579_v61 = vpop.eup %6578  ;;  %v10111_v40 = vpack.c.bf16 %v6577_v17, %v6575_v30  ;;  %v3508_v30 = vsub.f32 %v14137_v63, %v10125_v52  ;;  %v10133_v17 = vpop.xlane.xlu0 %2943  ;;  %v14142_v63 = vld [vmem:[#allocation135_spill] sm:$0xff] }
 0x553   : > { %v6581_v57 = vpop.eup %6580  ;;  %v3511_v28 = vsub.f32 %v14142_v63, %v10125_v52  ;;  %v14145_v63 = vld [vmem:[#allocation112_spill] sm:$0xff] }
 0x554   : > { %14131 = vst [vmem:[#allocation508_spill] sm:$0xff] %v10111_v40  ;;  %v6583_v16 = vpop.eup %6582  ;;  %5162 = vmatprep.subr.bf16.mxu0 %v10111_v40  ;;  %v10116_v48 = vpack.c.bf16 %v6581_v57, %v6579_v61  ;;  %v4252_v57 = vmul.f32 1.442695, %v3500_v2  ;;  %v4268_v58 = vmul.f32 1.442695, %v3508_v30  ;;  %v14141_v40 = vld [vmem:[#allocation131_spill] sm:$0xff] }
 0x555   : > { %v10119_v46 = vpack.c.bf16 %v6573_v12, %v6583_v16  ;;  %v14138_v12 = vld [vmem:[#allocation133_spill] sm:$0xff]  ;;  %v14139_v16 = vld [vmem:[#allocation130_spill] sm:$0xff]  ;;  %v3503_v13 = vsub.f32 %v14141_v40, %v10123_v1 }
 0x556   : > { %14133 = vst [vmem:[#allocation27_spill] sm:$0xff] %v10116_v48  ;;  %5163 = vmatpush1.bf16.xpose.msra.mxu0 %v10113_v60  ;;  %5215 = vmatprep.subr.bf16.mxu1 %v10116_v48  ;;  %v3510_v61 = vsub.f32 %v14138_v12, %v10125_v52  ;;  %v4256_v60 = vmul.f32 1.442695, %v3502_v47  ;;  %v14140_v48 = vld [vmem:[#allocation134_spill] sm:$0xff]  ;;  %6584 = vpow2.f32 %v4252_v57  ;;  %v10147_v2 = vpop.xlane.xlu0 %2925  ;;  %v14143_v47 = vld [vmem:[#allocation120_spill] sm:$0xff]  ;;  %v14144_v30 = vld [vmem:[#allocation121_spill] sm:$0xff] }
 0x557   : > { %14134 = vst [vmem:[#allocation24_spill] sm:$0xff] %v10119_v46  ;;  %v3509_v5 = vsub.f32 %v14140_v48, %v10125_v52  ;;  %v3484_v24 = vsub.f32 %v14143_v47, %v10133_v17  ;;  %v4258_v48 = vmul.f32 1.442695, %v3503_v13  ;;  %v3486_v40 = vsub.f32 %v14144_v30, %v10133_v17  ;;  %v10159_v47 = vpop.xlane.xlu1 %2934  ;;  %v14148_v13 = vld [vmem:[#allocation125_spill] sm:$0xff]  ;;  %v14149_v30 = vld [vmem:[#allocation122_spill] sm:$0xff] }
 0x558   : > { %5216 = vmatpush1.bf16.xpose.msra.mxu1 %v10119_v46  ;;  %v3501_v46 = vsub.f32 %v14139_v16, %v10123_v1  ;;  %v4272_v0 = vmul.f32 1.442695, %v3510_v61  ;;  %6586 = vpow2.f32 %v4256_v60  ;;  %v4274_v61 = vmul.f32 1.442695, %v3511_v28 }
 0x559   : > { %v4270_v16 = vmul.f32 1.442695, %v3509_v5  ;;  %6588 = vpow2.f32 %v4268_v58  ;;  %v3468_v57 = vsub.f32 %v14145_v63, %v10147_v2  ;;  %v4220_v22 = vmul.f32 1.442695, %v3484_v24  ;;  %v14147_v5 = vld [vmem:[#allocation124_spill] sm:$0xff]  ;;  %v14150_v24 = vld [vmem:[#allocation126_spill] sm:$0xff] }
 0x55a   : > { %v4254_v12 = vmul.f32 1.442695, %v3501_v46  ;;  %6590 = vpow2.f32 %v4272_v0  ;;  %v14146_v46 = vld [vmem:[#allocation113_spill] sm:$0xff]  ;;  %v3492_v26 = vsub.f32 %v14147_v5, %v10145_v34  ;;  %v4224_v58 = vmul.f32 1.442695, %v3486_v40  ;;  %v10165_v35 = vpop.xlane.xlu0 %2907  ;;  %v14151_v5 = vld [vmem:[#allocation123_spill] sm:$0xff] }
 0x55b   : > { %v3470_v60 = vsub.f32 %v14146_v46, %v10147_v2  ;;  %v3494_v0 = vsub.f32 %v14148_v13, %v10145_v34  ;;  %v4188_v28 = vmul.f32 1.442695, %v3468_v57  ;;  %v14152_v13 = vld [vmem:[#allocation127_spill] sm:$0xff]  ;;  %v14153_v57 = vld [vmem:[#allocation104_spill] sm:$0xff] }
 0x55c   : > { %6592 = vpow2.f32 %v4254_v12  ;;  %v3485_v12 = vsub.f32 %v14149_v30, %v10133_v17  ;;  %v4236_v46 = vmul.f32 1.442695, %v3492_v26  ;;  %v3452_v30 = vsub.f32 %v14153_v57, %v10165_v35 }
 0x55d   : > { %6594 = vpow2.f32 %v4270_v16  ;;  %v4192_v63 = vmul.f32 1.442695, %v3470_v60  ;;  %v3493_v16 = vsub.f32 %v14150_v24, %v10145_v34  ;;  %v4240_v40 = vmul.f32 1.442695, %v3494_v0  ;;  %v10175_v60 = vpop.xlane.xlu1 %2916 }
 0x55e   : > { %6596 = vpow2.f32 %v4258_v48  ;;  %v3487_v48 = vsub.f32 %v14151_v5, %v10133_v17  ;;  %v4222_v62 = vmul.f32 1.442695, %v3485_v12  ;;  %v4156_v12 = vmul.f32 1.442695, %v3452_v30 }
 0x55f   : > { %6598 = vpow2.f32 %v4274_v61  ;;  %v3495_v61 = vsub.f32 %v14152_v13, %v10145_v34  ;;  %v4238_v24 = vmul.f32 1.442695, %v3493_v16 }
 0x560   : > { %6600 = vpow2.f32 %v4220_v22  ;;  %v14154_v22 = vld [vmem:[#allocation116_spill] sm:$0xff]  ;;  %v4226_v5 = vmul.f32 1.442695, %v3487_v48 }
 0x561   : > { %6602 = vpow2.f32 %v4224_v58  ;;  %v3476_v26 = vsub.f32 %v14154_v22, %v10159_v47  ;;  %v14155_v58 = vld [vmem:[#allocation117_spill] sm:$0xff]  ;;  %v4242_v38 = vmul.f32 1.442695, %v3495_v61 }
 0x562   : > { %6604 = vpow2.f32 %v4188_v28  ;;  %v3478_v0 = vsub.f32 %v14155_v58, %v10159_v47  ;;  %v14156_v28 = vld [vmem:[#allocation108_spill] sm:$0xff] }
 0x563   : > { %v6585_v43 = vpop.eup %6584  ;;  %6606 = vpow2.f32 %v4192_v63  ;;  %v3460_v57 = vsub.f32 %v14156_v28, %v10175_v60  ;;  %v14157_v63 = vld [vmem:[#allocation114_spill] sm:$0xff]  ;;  %v4204_v16 = vmul.f32 1.442695, %v3476_v26 }
 0x564   : > { %6608 = vpow2.f32 %v4236_v46  ;;  %v3469_v55 = vsub.f32 %v14157_v63, %v10147_v2  ;;  %v14158_v46 = vld [vmem:[#allocation118_spill] sm:$0xff]  ;;  %v4208_v48 = vmul.f32 1.442695, %v3478_v0  ;;  %v14162_v63 = vld [vmem:[#allocation119_spill] sm:$0xff] }
 0x565   : > { %v6587_v36 = vpop.eup %6586  ;;  %6610 = vpow2.f32 %v4240_v40  ;;  %v3477_v23 = vsub.f32 %v14158_v46, %v10159_v47  ;;  %v14160_v40 = vld [vmem:[#allocation115_spill] sm:$0xff]  ;;  %v4172_v30 = vmul.f32 1.442695, %v3460_v57  ;;  %v3479_v26 = vsub.f32 %v14162_v63, %v10159_v47  ;;  %v14166_v57 = vld [vmem:[#allocation110_spill] sm:$0xff] }
 0x566   : > { %v6589_v13 = vpop.eup %6588  ;;  %6612 = vpow2.f32 %v4222_v62  ;;  %v3471_v61 = vsub.f32 %v14160_v40, %v10147_v2  ;;  %v4190_v46 = vmul.f32 1.442695, %v3469_v55  ;;  %v14167_v55 = vld [vmem:[#allocation107_spill] sm:$0xff] }
 0x567   : > { %v6591_v25 = vpop.eup %6590  ;;  %6614 = vpow2.f32 %v4238_v24  ;;  %v10187_v9 = vpack.c.bf16 %v6589_v13, %v6585_v43  ;;  %v14164_v43 = vld [vmem:[#allocation106_spill] sm:$0xff]  ;;  %v4206_v13 = vmul.f32 1.442695, %v3477_v23  ;;  %v14168_v23 = vld [vmem:[#allocation111_spill] sm:$0xff] }
 0x568   : > { %6616 = vpow2.f32 %v4226_v5  ;;  %v10195_v51 = vpack.c.bf16 %v6591_v25, %v6587_v36  ;;  %v3453_v0 = vsub.f32 %v14164_v43, %v10165_v35  ;;  %v4194_v25 = vmul.f32 1.442695, %v3471_v61 }
 0x569   : > { %v6593_v22 = vpop.eup %6592  ;;  %14159 = vst [vmem:[#allocation28_spill] sm:$0xff] %v10187_v9  ;;  %6618 = vpow2.f32 %v4242_v38  ;;  %v3461_v38 = vsub.f32 %v14166_v57, %v10175_v60  ;;  %v3455_v36 = vsub.f32 %v14167_v55, %v10165_v35  ;;  %v3463_v40 = vsub.f32 %v14168_v23, %v10175_v60  ;;  %v14171_v23 = vld [vmem:[#allocation98_spill] sm:$0xff] }
 0x56a   : > { %v6595_v58 = vpop.eup %6594  ;;  %6620 = vpow2.f32 %v4156_v12  ;;  %14163 = vst [vmem:[#allocation17_spill] sm:$0xff] %v10195_v51  ;;  %v4158_v61 = vmul.f32 1.442695, %v3453_v0 }
 0x56b   : > { %v6597_v28 = vpop.eup %6596  ;;  %v10191_v62 = vpack.c.bf16 %v6595_v58, %v6593_v22  ;;  %6622 = vpow2.f32 %v4204_v16  ;;  %v10204_v22 = vpop.xlane.xlu1 %2898  ;;  %v4210_v16 = vmul.f32 1.442695, %v3479_v26  ;;  %v4174_v43 = vmul.f32 1.442695, %v3461_v38 }
 0x56c   : > { %v6599_v24 = vpop.eup %6598  ;;  %6624 = vpow2.f32 %v4208_v48  ;;  %v10209_v58 = vpop.xlane.xlu0 %2889  ;;  %v14169_v48 = vld [vmem:[#allocation109_spill] sm:$0xff]  ;;  %v4162_v26 = vmul.f32 1.442695, %v3455_v36 }
 0x56d   : > { %14161 = vst [vmem:[#allocation21_spill] sm:$0xff] %v10191_v62  ;;  %5164 = vmatprep.subr.bf16.mxu0 %v10191_v62  ;;  %v10200_v5 = vpack.c.bf16 %v6599_v24, %v6597_v28  ;;  %v6601_v12 = vpop.eup %6600  ;;  %6626 = vpow2.f32 %v4172_v30  ;;  %v3462_v63 = vsub.f32 %v14169_v48, %v10175_v60  ;;  %v14170_v30 = vld [vmem:[#allocation102_spill] sm:$0xff]  ;;  %v4178_v48 = vmul.f32 1.442695, %v3463_v40 }
 0x56e   : > { %5165 = vmatpush2.bf16.xpose.msra.mxu0 %v10187_v9  ;;  %v6603_v28 = vpop.eup %6602  ;;  %6628 = vpow2.f32 %v4190_v46  ;;  %v3445_v57 = vsub.f32 %v14170_v30, %v10204_v22  ;;  %v3437_v9 = vsub.f32 %v14171_v23, %v10209_v58  ;;  %v14172_v46 = vld [vmem:[#allocation103_spill] sm:$0xff]  ;;  %v14175_v23 = vld [vmem:[#allocation96_spill] sm:$0xff] }
 0x56f   : > { %14165 = vst [vmem:[#allocation22_spill] sm:$0xff] %v10200_v5  ;;  %5217 = vmatprep.subr.bf16.mxu1 %v10200_v5  ;;  %v10217_v24 = vpop.eup %6604  ;;  %6630 = vpow2.f32 %v4206_v13  ;;  %v3447_v0 = vsub.f32 %v14172_v46, %v10204_v22  ;;  %v14173_v13 = vld [vmem:[#allocation105_spill] sm:$0xff]  ;;  %v4176_v62 = vmul.f32 1.442695, %v3462_v63  ;;  %v10233_v40 = vpop.xlane.xlu1 %2880  ;;  %v14176_v63 = vld [vmem:[#allocation100_spill] sm:$0xff] }
 0x570   : > { %5218 = vmatpush2.bf16.xpose.msra.mxu1 %v10195_v51  ;;  %v10221_v55 = vpop.eup %6606  ;;  %6632 = vpow2.f32 %v4194_v25  ;;  %v3454_v38 = vsub.f32 %v14173_v13, %v10165_v35  ;;  %v4142_v50 = vmul.f32 1.442695, %v3445_v57  ;;  %v14174_v25 = vld [vmem:[#allocation99_spill] sm:$0xff]  ;;  %v4126_v46 = vmul.f32 1.442695, %v3437_v9  ;;  %v10235_v14 = vpop.xlane.xlu0 %2871 }
 0x571   : > { %v6609_v5 = vpop.eup %6608  ;;  %6634 = vpow2.f32 %v4210_v16  ;;  %v3439_v36 = vsub.f32 %v14174_v25, %v10209_v58  ;;  %v3436_v16 = vsub.f32 %v14175_v23, %v10209_v58  ;;  %v3446_v23 = vsub.f32 %v14178_v19, %v10204_v22  ;;  %v14183_v19 = vld [vmem:[#allocation90_spill] sm:$0xff] }
 0x572   : > { %v6611_v51 = vpop.eup %6610  ;;  %6636 = vpow2.f32 %v4158_v61  ;;  %v3444_v61 = vsub.f32 %v14176_v63, %v10204_v22  ;;  %v4160_v25 = vmul.f32 1.442695, %v3454_v38  ;;  %v10243_v31 = vpack.c.bf16 %v6609_v5, %v6601_v12 }
 0x573   : > { %v6613_v30 = vpop.eup %6612  ;;  %6638 = vpow2.f32 %v4174_v43  ;;  %v4146_v43 = vmul.f32 1.442695, %v3447_v0  ;;  %v4130_v63 = vmul.f32 1.442695, %v3439_v36  ;;  %v3421_v5 = vsub.f32 %v14183_v19, %v10235_v14 }
 0x574   : > { %v6615_v49 = vpop.eup %6614  ;;  %6640 = vpow2.f32 %v4162_v26  ;;  %14179 = vst [vmem:[#allocation506_spill] sm:$0xff] %v10243_v31  ;;  %v4140_v38 = vmul.f32 1.442695, %v3444_v61  ;;  %v14186_v61 = vld [vmem:[#allocation91_spill] sm:$0xff] }
 0x575   : > { %v6617_v37 = vpop.eup %6616  ;;  %v10239_v13 = vpack.c.bf16 %v6615_v49, %v6613_v30  ;;  %6642 = vpow2.f32 %v4178_v48  ;;  %v14181_v49 = vld [vmem:[#allocation94_spill] sm:$0xff]  ;;  %v4124_v30 = vmul.f32 1.442695, %v3436_v16  ;;  %v14185_v16 = vld [vmem:[#allocation97_spill] sm:$0xff] }
 0x576   : > { %v6619_v57 = vpop.eup %6618  ;;  %6644 = vpow2.f32 %v4176_v62  ;;  %v3429_v48 = vsub.f32 %v14181_v49, %v10233_v40  ;;  %v10253_v62 = vpack.c.bf16 %v6611_v51, %v6603_v28  ;;  %v4144_v51 = vmul.f32 1.442695, %v3446_v23  ;;  %v14188_v23 = vld [vmem:[#allocation92_spill] sm:$0xff] }
 0x577   : > { %14177 = vst [vmem:[#allocation18_spill] sm:$0xff] %v10239_v13  ;;  %v10245_v26 = vpop.eup %6620  ;;  %5166 = vmatprep.subr.bf16.mxu0 %v10239_v13  ;;  %v10248_v9 = vpack.c.bf16 %v6619_v57, %v6617_v37  ;;  %6646 = vpow2.f32 %v4142_v50  ;;  %v14184_v50 = vld [vmem:[#allocation95_spill] sm:$0xff]  ;;  %v3438_v57 = vsub.f32 %v14185_v16, %v10209_v58  ;;  %v3423_v49 = vsub.f32 %v14186_v61, %v10235_v14  ;;  %v10271_v16 = vpop.xlane.xlu0 %2853 }
 0x578   : > { %v6623_v0 = vpop.eup %6622  ;;  %5167 = vmatpush2.bf16.xpose.msra.mxu0 %v10243_v31  ;;  %14182 = vst [vmem:[#allocation15_spill] sm:$0xff] %v10253_v62  ;;  %6648 = vpow2.f32 %v4126_v46  ;;  %v3431_v37 = vsub.f32 %v14184_v50, %v10233_v40  ;;  %v4110_v46 = vmul.f32 1.442695, %v3429_v48  ;;  %v10269_v31 = vpop.xlane.xlu1 %2862 }
 0x579   : > { %14180 = vst [vmem:[#allocation19_spill] sm:$0xff] %v10248_v9  ;;  %v6625_v12 = vpop.eup %6624  ;;  %5219 = vmatprep.subr.bf16.mxu1 %v10248_v9  ;;  %6650 = vpow2.f32 %v4146_v43  ;;  %v14187_v43 = vld [vmem:[#allocation88_spill] sm:$0xff]  ;;  %v4128_v61 = vmul.f32 1.442695, %v3438_v57  ;;  %v4098_v42 = vmul.f32 1.442695, %v3423_v49 }
 0x57a   : > { %v10260_v36 = vpop.eup %6626  ;;  %6652 = vpow2.f32 %v4160_v25  ;;  %5220 = vmatpush2.bf16.xpose.msra.mxu1 %v10253_v62  ;;  %v3420_v50 = vsub.f32 %v14187_v43, %v10235_v14  ;;  %v4094_v25 = vmul.f32 1.442695, %v3421_v5  ;;  %v3428_v62 = vsub.f32 %v14188_v23, %v10233_v40 }
 0x57b   : > { %v6629_v28 = vpop.eup %6628  ;;  %6654 = vpow2.f32 %v4130_v63  ;;  %v4114_v48 = vmul.f32 1.442695, %v3431_v37  ;;  %v10280_v43 = vpack.c.bf16 %v6623_v0, %v10217_v24  ;;  %v10289_v57 = vpack.c.bf16 %v6625_v12, %v10221_v55  ;;  %v14195_v24 = vld [vmem:[#allocation82_spill] sm:$0xff] }
 0x57c   : > { %v6631_v19 = vpop.eup %6630  ;;  %6656 = vpow2.f32 %v4124_v30  ;;  %v14190_v30 = vld [vmem:[#allocation93_spill] sm:$0xff]  ;;  %v4092_v23 = vmul.f32 1.442695, %v3420_v50  ;;  %v3405_v0 = vsub.f32 %v14195_v24, %v10271_v16 }
 0x57d   : > { %v6633_v9 = vpop.eup %6632  ;;  %6658 = vpow2.f32 %v4140_v38  ;;  %v10275_v63 = vpack.c.bf16 %v6631_v19, %v6629_v28  ;;  %v3430_v32 = vsub.f32 %v14190_v30, %v10233_v40  ;;  %14191 = vst [vmem:[#allocation16_spill] sm:$0xff] %v10280_v43  ;;  %v14193_v28 = vld [vmem:[#allocation86_spill] sm:$0xff]  ;;  %14194 = vst [vmem:[#allocation7_spill] sm:$0xff] %v10289_v57  ;;  %v4108_v30 = vmul.f32 1.442695, %v3428_v62  ;;  %v14198_v50 = vld [vmem:[#allocation89_spill] sm:$0xff] }
 0x57e   : > { %v6635_v13 = vpop.eup %6634  ;;  %6660 = vpow2.f32 %v4144_v51  ;;  %v3413_v19 = vsub.f32 %v14193_v28, %v10269_v31  ;;  %v3422_v55 = vsub.f32 %v14198_v50, %v10235_v14  ;;  %v4062_v24 = vmul.f32 1.442695, %v3405_v0 }
 0x57f   : > { %14189 = vst [vmem:[#allocation20_spill] sm:$0xff] %v10275_v63  ;;  %v6637_v5 = vpop.eup %6636  ;;  %5168 = vmatprep.subr.bf16.mxu0 %v10275_v63  ;;  %v10283_v38 = vpack.c.bf16 %v6635_v13, %v6633_v9  ;;  %6662 = vpow2.f32 %v4110_v46  ;;  %v14197_v9 = vld [vmem:[#allocation87_spill] sm:$0xff]  ;;  %v4112_v12 = vmul.f32 1.442695, %v3430_v32 }
 0x580   : > { %v6639_v37 = vpop.eup %6638  ;;  %5169 = vmatpush2.bf16.xpose.msra.mxu0 %v10280_v43  ;;  %6664 = vpow2.f32 %v4094_v25  ;;  %v3415_v46 = vsub.f32 %v14197_v9, %v10269_v31  ;;  %v4096_v50 = vmul.f32 1.442695, %v3422_v55  ;;  %v14205_v55 = vld [vmem:[#allocation85_spill] sm:$0xff] }
 0x581   : > { %14192 = vst [vmem:[#allocation65_spill] sm:$0xff] %v10283_v38  ;;  %v6641_v51 = vpop.eup %6640  ;;  %5221 = vmatprep.subr.bf16.mxu1 %v10283_v38  ;;  %v10294_v13 = vpack.c.bf16 %v6639_v37, %v6637_v5  ;;  %6666 = vpow2.f32 %v4114_v48  ;;  %v4078_v5 = vmul.f32 1.442695, %v3413_v19  ;;  %v14200_v48 = vld [vmem:[#allocation83_spill] sm:$0xff] }
 0x582   : > { %v6643_v49 = vpop.eup %6642  ;;  %6668 = vpow2.f32 %v4128_v61  ;;  %5222 = vmatpush2.bf16.xpose.msra.mxu1 %v10289_v57  ;;  %v3407_v28 = vsub.f32 %v14200_v48, %v10271_v16  ;;  %v4082_v32 = vmul.f32 1.442695, %v3415_v46  ;;  %v14201_v57 = vld [vmem:[#allocation84_spill] sm:$0xff]  ;;  %v10317_v46 = vpop.xlane.xlu0 %2835 }
 0x583   : > { %14196 = vst [vmem:[#allocation459_spill] sm:$0xff] %v10294_v13  ;;  %v6645_v25 = vpop.eup %6644  ;;  %5170 = vmatprep.subr.bf16.mxu0 %v10294_v13  ;;  %v10302_v62 = vpack.c.bf16 %v6643_v49, %v6641_v51  ;;  %6670 = vpow2.f32 %v4098_v42  ;;  %v3412_v51 = vsub.f32 %v14201_v57, %v10269_v31  ;;  %v10311_v42 = vpack.c.bf16 %v10260_v36, %v10245_v26  ;;  %v14203_v49 = vld [vmem:[#allocation80_spill] sm:$0xff]  ;;  %v10324_v36 = vpop.xlane.xlu1 %2844 }
 0x584   : > { %v6647_v37 = vpop.eup %6646  ;;  %6672 = vpow2.f32 %v4092_v23  ;;  %v3404_v23 = vsub.f32 %v14203_v49, %v10271_v16 }
 0x585   : > { %14199 = vst [vmem:[#allocation502_spill] sm:$0xff] %v10302_v62  ;;  %v6649_v61 = vpop.eup %6648  ;;  %6674 = vpow2.f32 %v4108_v30  ;;  %5223 = vmatprep.subr.bf16.mxu1 %v10302_v62  ;;  %14202 = vst [vmem:[#allocation11_spill] sm:$0xff] %v10311_v42  ;;  %v4066_v30 = vmul.f32 1.442695, %v3407_v28  ;;  %v14208_v28 = vld [vmem:[#allocation81_spill] sm:$0xff] }
 0x586   : > { %v6651_v9 = vpop.eup %6650  ;;  %6676 = vpow2.f32 %v4112_v12  ;;  %v10315_v0 = vpack.c.bf16 %v6647_v37, %v6649_v61  ;;  %v3414_v12 = vsub.f32 %v14205_v55, %v10269_v31  ;;  %v3406_v61 = vsub.f32 %v14208_v28, %v10271_v16 }
 0x587   : > { %v6653_v19 = vpop.eup %6652  ;;  %6678 = vpow2.f32 %v4078_v5  ;;  %v4076_v49 = vmul.f32 1.442695, %v3412_v51 }
 0x588   : > { %14204 = vst [vmem:[#allocation458_spill] sm:$0xff] %v10315_v0  ;;  %v6655_v48 = vpop.eup %6654  ;;  %5171 = vmatpush2.bf16.xpose.msra.mxu0 %v10311_v42  ;;  %v10322_v57 = vpack.c.bf16 %v6645_v25, %v6653_v19  ;;  %6680 = vpow2.f32 %v4062_v24  ;;  %v4060_v25 = vmul.f32 1.442695, %v3404_v23  ;;  %v14209_v24 = vld [vmem:[#allocation72_spill] sm:$0xff]  ;;  %v14211_v42 = vld [vmem:[#allocation77_spill] sm:$0xff]  ;;  %v14213_v23 = vld [vmem:[#allocation74_spill] sm:$0xff] }
 0x589   : > { %v6657_v26 = vpop.eup %6656  ;;  %5172 = vmatprep.subr.bf16.mxu0 %v10315_v0  ;;  %v10327_v37 = vpack.c.bf16 %v6651_v9, %v6655_v48  ;;  %6682 = vpow2.f32 %v4082_v32  ;;  %v3388_v19 = vsub.f32 %v14209_v24, %v10317_v46  ;;  %v4080_v9 = vmul.f32 1.442695, %v3414_v12  ;;  %v14210_v32 = vld [vmem:[#allocation76_spill] sm:$0xff]  ;;  %v14215_v12 = vld [vmem:[#allocation78_spill] sm:$0xff] }
 0x58a   : > { %14206 = vst [vmem:[#allocation12_spill] sm:$0xff] %v10322_v57  ;;  %v6659_v5 = vpop.eup %6658  ;;  %6684 = vpow2.f32 %v4096_v50  ;;  %5224 = vmatpush2.bf16.xpose.msra.mxu1 %v10322_v57  ;;  %v3396_v48 = vsub.f32 %v14210_v32, %v10324_v36  ;;  %v3398_v28 = vsub.f32 %v14211_v42, %v10324_v36  ;;  %v4064_v62 = vmul.f32 1.442695, %v3406_v61 }
 0x58b   : > { %14207 = vst [vmem:[#allocation9_spill] sm:$0xff] %v10327_v37  ;;  %v6661_v55 = vpop.eup %6660  ;;  %5225 = vmatprep.subr.bf16.mxu1 %v10327_v37  ;;  %6686 = vpow2.f32 %v4066_v30  ;;  %v10339_v57 = vpack.c.bf16 %v6659_v5, %v6657_v26  ;;  %v3389_v24 = vsub.f32 %v14213_v23, %v10317_v46  ;;  %v4028_v30 = vmul.f32 1.442695, %v3388_v19  ;;  %v14217_v26 = vld [vmem:[#allocation75_spill] sm:$0xff] }
 0x58c   : > { %v6663_v0 = vpop.eup %6662  ;;  %6688 = vpow2.f32 %v4076_v49  ;;  %v3397_v32 = vsub.f32 %v14215_v12, %v10324_v36  ;;  %v4044_v38 = vmul.f32 1.442695, %v3396_v48  ;;  %v3391_v5 = vsub.f32 %v14217_v26, %v10317_v46 }
 0x58d   : > { %v6665_v50 = vpop.eup %6664  ;;  %14212 = vst [vmem:[#allocation13_spill] sm:$0xff] %v10339_v57  ;;  %6690 = vpow2.f32 %v4060_v25  ;;  %v4048_v49 = vmul.f32 1.442695, %v3398_v28 }
 0x58e   : > { %v6667_v51 = vpop.eup %6666  ;;  %v10343_v37 = vpack.c.bf16 %v6663_v0, %v6665_v50  ;;  %6692 = vpow2.f32 %v4080_v9  ;;  %v14219_v0 = vld [vmem:[#allocation79_spill] sm:$0xff]  ;;  %v14220_v9 = vld [vmem:[#allocation73_spill] sm:$0xff]  ;;  %v4046_v28 = vmul.f32 1.442695, %v3397_v32 }
 0x58f   : > { %v6669_v13 = vpop.eup %6668  ;;  %v3399_v19 = vsub.f32 %v14219_v0, %v10324_v36  ;;  %6694 = vpow2.f32 %v4064_v62  ;;  %v3390_v48 = vsub.f32 %v14220_v9, %v10317_v46 }
 0x590   : > { %14214 = vst [vmem:[#allocation10_spill] sm:$0xff] %v10343_v37  ;;  %v6671_v43 = vpop.eup %6670  ;;  %5173 = vmatpush2.bf16.xpose.msra.mxu0 %v10339_v57  ;;  %v10348_v42 = vpack.c.bf16 %v6661_v55, %v6669_v13  ;;  %v4030_v13 = vmul.f32 1.442695, %v3389_v24  ;;  %6696 = vpow2.f32 %v4028_v30 }
 0x591   : > { %v6673_v61 = vpop.eup %6672  ;;  %5174 = vmatprep.subr.bf16.mxu0 %v10343_v37  ;;  %v10353_v25 = vpack.c.bf16 %v6667_v51, %v6671_v43  ;;  %6698 = vpow2.f32 %v4044_v38  ;;  %v4034_v43 = vmul.f32 1.442695, %v3391_v5  ;;  %v4050_v12 = vmul.f32 1.442695, %v3399_v19 }
 0x592   : > { %14216 = vst [vmem:[#allocation14_spill] sm:$0xff] %v10348_v42  ;;  %v6675_v50 = vpop.eup %6674  ;;  %5226 = vmatpush2.bf16.xpose.msra.mxu1 %v10348_v42  ;;  %6700 = vpow2.f32 %v4048_v49  ;;  %v4032_v0 = vmul.f32 1.442695, %v3390_v48  ;;  %v14227_v48 = vld [vmem:[#allocation320_spill] sm:$0xff] }
 0x593   : > { %14218 = vst [vmem:[#allocation8_spill] sm:$0xff] %v10353_v25  ;;  %v6677_v55 = vpop.eup %6676  ;;  %5227 = vmatprep.subr.bf16.mxu1 %v10353_v25  ;;  %v10361_v62 = vpack.c.bf16 %v6675_v50, %v6673_v61  ;;  %6702 = vpow2.f32 %v4030_v13  ;;  %v14226_v50 = vld [vmem:[#allocation496_spill] sm:$0xff] }
 0x594   : > { %v6679_v23 = vpop.eup %6678  ;;  %6704 = vpow2.f32 %v4046_v28  ;;  %v3376_v13 = vsub.f32 %v14227_v48, %v14226_v50  ;;  %v14228_v28 = vld [vmem:[#allocation64_spill] sm:$0xff] }
 0x595   : > { %v6681_v51 = vpop.eup %6680  ;;  %14221 = vst [vmem:[#allocation461_spill] sm:$0xff] %v10361_v62  ;;  %6706 = vpow2.f32 %v4034_v43 }
 0x596   : > { %v6683_v26 = vpop.eup %6682  ;;  %v10363_v37 = vpack.c.bf16 %v6679_v23, %v6681_v51  ;;  %6708 = vpow2.f32 %v4050_v12  ;;  %v14229_v23 = vld [vmem:[#allocation323_spill] sm:$0xff]  ;;  %v4004_v48 = vmul.f32 1.442695, %v3376_v13 }
 0x597   : > { %v6685_v9 = vpop.eup %6684  ;;  %6710 = vpow2.f32 %v4032_v0  ;;  %v3384_v43 = vsub.f32 %v14229_v23, %v14228_v28 }
 0x598   : > { %14222 = vst [vmem:[#allocation460_spill] sm:$0xff] %v10363_v37  ;;  %v6687_v24 = vpop.eup %6686  ;;  %5175 = vmatpush2.bf16.xpose.msra.mxu0 %v10361_v62  ;;  %v10366_v30 = vpack.c.bf16 %v6677_v55, %v6685_v9  ;;  %6712 = vpow2.f32 %v4004_v48 }
 0x599   : > { %5176 = vmatprep.subr.bf16.mxu0 %v10363_v37  ;;  %v10369_v38 = vpack.c.bf16 %v6683_v26, %v6687_v24  ;;  %v6689_v32 = vpop.eup %6688  ;;  %v14231_v26 = vld [vmem:[#allocation324_spill] sm:$0xff]  ;;  %v14232_v24 = vld [vmem:[#allocation321_spill] sm:$0xff]  ;;  %v4020_v37 = vmul.f32 1.442695, %v3384_v43 }
 0x59a   : > { %14223 = vst [vmem:[#allocation462_spill] sm:$0xff] %v10366_v30  ;;  %5228 = vmatpush2.bf16.xpose.msra.mxu1 %v10366_v30  ;;  %v6691_v5 = vpop.eup %6690  ;;  %v3386_v0 = vsub.f32 %v14231_v26, %v14228_v28  ;;  %v14236_v26 = vld [vmem:[#allocation326_spill] sm:$0xff] }
 0x59b   : > { %14224 = vst [vmem:[#allocation128_spill] sm:$0xff] %v10369_v38  ;;  %5229 = vmatprep.subr.bf16.mxu1 %v10369_v38  ;;  %v6693_v61 = vpop.eup %6692  ;;  %v10373_v49 = vpack.c.bf16 %v6689_v32, %v6691_v5  ;;  %v3377_v32 = vsub.f32 %v14232_v24, %v14226_v50  ;;  %v14233_v38 = vld [vmem:[#allocation325_spill] sm:$0xff]  ;;  %6714 = vpow2.f32 %v4020_v37  ;;  %v14241_v37 = vld [vmem:[#allocation503_spill] sm:$0xff] }
 0x59c   : > { %v6695_v19 = vpop.eup %6694  ;;  %v3385_v30 = vsub.f32 %v14233_v38, %v14228_v28  ;;  %v4024_v62 = vmul.f32 1.442695, %v3386_v0  ;;  %v14237_v24 = vld [vmem:[#allocation61_spill] sm:$0xff] }
 0x59d   : > { %14225 = vst [vmem:[#allocation129_spill] sm:$0xff] %v10373_v49  ;;  %v6697_v55 = vpop.eup %6696  ;;  %v10380_v51 = vpack.c.bf16 %v6693_v61, %v6695_v19  ;;  %v14234_v61 = vld [vmem:[#allocation322_spill] sm:$0xff]  ;;  %v3378_v57 = vsub.f32 %v14237_v24, %v14226_v50  ;;  %v4006_v63 = vmul.f32 1.442695, %v3377_v32  ;;  %v14244_v32 = vld [vmem:[#allocation316_spill] sm:$0xff] }
 0x59e   : > { %v6699_v12 = vpop.eup %6698  ;;  %v3379_v19 = vsub.f32 %v14234_v61, %v14226_v50  ;;  %v4022_v61 = vmul.f32 1.442695, %v3385_v30  ;;  %6716 = vpow2.f32 %v4024_v62  ;;  %v14242_v30 = vld [vmem:[#allocation312_spill] sm:$0xff]  ;;  %v14243_v62 = vld [vmem:[#allocation69_spill] sm:$0xff] }
 0x59f   : > { %14230 = vst [vmem:[#allocation132_spill] sm:$0xff] %v10380_v51  ;;  %v6701_v9 = vpop.eup %6700  ;;  %v10397_v13 = vpack.c.bf16 %v6699_v12, %v6697_v55  ;;  %v4008_v55 = vmul.f32 1.442695, %v3378_v57  ;;  %6718 = vpow2.f32 %v4006_v63  ;;  %v6435_v12 = vld [vmem:[#allocation3 + $0x28] ss:$56 sps:$4 sm:$0xff]   ;;  %v14245_v57 = vld [vmem:[#allocation317_spill] sm:$0xff] }
 0x5a0   : > { %5177 = vmatpush2.bf16.xpose.msra.mxu0 %v10373_v49  ;;  %v6703_v5 = vpop.eup %6702  ;;  %6720 = vpow2.f32 %v4022_v61  ;;  %v3370_v48 = vsub.f32 %v14245_v57, %v14243_v62  ;;  %v14250_v57 = vld [vmem:[#allocation319_spill] sm:$0xff] }
 0x5a1   : > { %v6705_v23 = vpop.eup %6704  ;;  %14238 = vst [vmem:[#allocation130_spill] sm:$0xff] %v10397_v13 }
 0x5a2   : > { %5230 = vmatpush2.bf16.xpose.msra.mxu1 %v10380_v51  ;;  %v6707_v49 = vpop.eup %6706  ;;  %v10391_v25 = vpack.c.bf16 %v6705_v23, %v6703_v5  ;;  %v3387_v51 = vsub.f32 %v14236_v26, %v14228_v28  ;;  %v4010_v28 = vmul.f32 1.442695, %v3379_v19  ;;  %v3368_v5 = vsub.f32 %v14244_v32, %v14243_v62  ;;  %v14246_v23 = vld [vmem:[#allocation314_spill] sm:$0xff] }
 0x5a3   : > { %v6709_v42 = vpop.eup %6708  ;;  %v3361_v19 = vsub.f32 %v14246_v23, %v14241_v37  ;;  %v14251_v23 = vld [vmem:[#allocation313_spill] sm:$0xff] }
 0x5a4   : > { %14235 = vst [vmem:[#allocation133_spill] sm:$0xff] %v10391_v25  ;;  %v6711_v38 = vpop.eup %6710  ;;  %5178 = vmatprep.subr.bf16.mxu0 %v10391_v25  ;;  %v10400_v43 = vpack.c.bf16 %v6709_v42, %v6707_v49  ;;  %v4026_v50 = vmul.f32 1.442695, %v3387_v51  ;;  %6722 = vpow2.f32 %v4010_v28  ;;  %v6438_v42 = vld [vmem:[#allocation3 + $0x50] ss:$-80 sps:$4 sm:$0xff]   ;;  %v3360_v49 = vsub.f32 %v14242_v30, %v14241_v37 }
 0x5a5   : > { %v10403_v0 = vpack.c.bf16 %v6701_v9, %v6711_v38  ;;  %v6713_v9 = vpop.eup %6712  ;;  %v14247_v38 = vld [vmem:[#allocation318_spill] sm:$0xff]  ;;  %v3992_v30 = vmul.f32 1.442695, %v3370_v48  ;;  %v3974_v25 = vmul.f32 1.442695, %v3361_v19  ;;  %v14256_v19 = vld [vmem:[#allocation305_spill] sm:$0xff] }
 0x5a6   : > { %14239 = vst [vmem:[#allocation134_spill] sm:$0xff] %v10400_v43  ;;  %5231 = vmatprep.subr.bf16.mxu1 %v10400_v43  ;;  %6724 = vpow2.f32 %v4026_v50  ;;  %v3972_v24 = vmul.f32 1.442695, %v3360_v49  ;;  %v3369_v61 = vsub.f32 %v14247_v38, %v14243_v62  ;;  %v3988_v50 = vmul.f32 1.442695, %v3368_v5 }
 0x5a7   : > { %14240 = vst [vmem:[#allocation131_spill] sm:$0xff] %v10403_v0  ;;  %6726 = vpow2.f32 %v4008_v55  ;;  %v14248_v55 = vld [vmem:[#allocation315_spill] sm:$0xff]  ;;  %v3362_v43 = vsub.f32 %v14251_v23, %v14241_v37 }
 0x5a8   : > { %5179 = vmatpush2.bf16.xpose.msra.mxu0 %v10397_v13  ;;  %v6715_v51 = vpop.eup %6714  ;;  %6728 = vpow2.f32 %v3972_v24 }
 0x5a9   : > { %v10425_v49 = vpack.c.bf16 %v6715_v51, %v6713_v9  ;;  %6730 = vpow2.f32 %v3988_v50  ;;  %v3976_v9 = vmul.f32 1.442695, %v3362_v43  ;;  %v14255_v51 = vld [vmem:[#allocation304_spill] sm:$0xff] }
 0x5aa   : > { %5232 = vmatpush2.bf16.xpose.msra.mxu1 %v10403_v0  ;;  %v3371_v0 = vsub.f32 %v14250_v57, %v14243_v62  ;;  %6732 = vpow2.f32 %v3992_v30  ;;  %v14261_v57 = vld [vmem:[#allocation306_spill] sm:$0xff] }
 0x5ab   : > { %v6717_v63 = vpop.eup %6716  ;;  %14252 = vst [vmem:[#allocation120_spill] sm:$0xff] %v10425_v49  ;;  %6734 = vpow2.f32 %v3974_v25  ;;  %v3345_v23 = vsub.f32 %v14261_v57, %v9657_v20 }
 0x5ac   : > { %v6719_v26 = vpop.eup %6718 }
 0x5ad   : > { %v6721_v28 = vpop.eup %6720 }
 0x5ae   : > { %v10419_v32 = vpack.c.bf16 %v6721_v28, %v6719_v26  ;;  %v3346_v26 = vsub.f32 %v14256_v19, %v9657_v20  ;;  %v14259_v28 = vld [vmem:[#allocation309_spill] sm:$0xff] }
 0x5af   : > { %5181 = vmatmul.mubr.bf16.vlgmr.msra.gmra.mxu0 %v6435_v12  ;;  %v3363_v12 = vsub.f32 %v14248_v55, %v14241_v37  ;;  %v3990_v55 = vmul.f32 1.442695, %v3369_v61  ;;  %v3994_v37 = vmul.f32 1.442695, %v3371_v0  ;;  %v14258_v61 = vld [vmem:[#allocation308_spill] sm:$0xff]  ;;  %v3354_v25 = vsub.f32 %v14259_v28, %v9728_v56 }
 0x5b0   : > { %14249 = vst [vmem:[#allocation135_spill] sm:$0xff] %v10419_v32  ;;  %5254 = vmatprep.subr.bf16.mxu0 %v10419_v32  ;;  %v3352_v0 = vsub.f32 %v14258_v61, %v9728_v56  ;;  %v3944_v50 = vmul.f32 1.442695, %v3346_v26  ;;  %v3942_v28 = vmul.f32 1.442695, %v3345_v23  ;;  %v14269_v23 = vld [vmem:[#allocation303_spill] sm:$0xff] }
 0x5b1   : > { %5234 = vmatmul.mubr.bf16.vlgmr.msra.gmra.mxu1 %v6438_v42  ;;  %v6723_v42 = vpop.eup %6722  ;;  %5255 = vmatpush1.bf16.xpose.msra.mxu0 %v10425_v49  ;;  %v3978_v62 = vmul.f32 1.442695, %v3363_v12  ;;  %6736 = vpow2.f32 %v3990_v55  ;;  %v14260_v12 = vld [vmem:[#allocation300_spill] sm:$0xff]  ;;  %v14262_v55 = vld [vmem:[#allocation310_spill] sm:$0xff]  ;;  %v14369_v32 = vld [vmem:[#allocation369_spill] sm:$0xff] }
 0x5b3   : > { %v6725_v13 = vpop.eup %6724  ;;  %6738 = vpow2.f32 %v3978_v62  ;;  %v3353_v62 = vsub.f32 %v14262_v55, %v9728_v56 }
 0x5b4   : > { %v6727_v38 = vpop.eup %6726  ;;  %v10428_v5 = vpack.c.bf16 %v6725_v13, %v6723_v42  ;;  %v3344_v13 = vsub.f32 %v14255_v51, %v9657_v20  ;;  %6740 = vpow2.f32 %v3994_v37  ;;  %v3336_v42 = vsub.f32 %v14260_v12, %v9754_v15  ;;  %v14263_v51 = vld [vmem:[#allocation307_spill] sm:$0xff] }
 0x5b5   : > { %v10431_v48 = vpack.c.bf16 %v6717_v63, %v6727_v38  ;;  %6742 = vpow2.f32 %v3976_v9  ;;  %v14257_v63 = vld [vmem:[#allocation296_spill] sm:$0xff]  ;;  %v3956_v38 = vmul.f32 1.442695, %v3352_v0  ;;  %v6729_v37 = vpop.eup %6728  ;;  %v3960_v9 = vmul.f32 1.442695, %v3354_v25  ;;  %v14265_v0 = vld [vmem:[#allocation298_spill] sm:$0xff] }
 0x5b6   : > { %14253 = vst [vmem:[#allocation121_spill] sm:$0xff] %v10428_v5  ;;  %5307 = vmatprep.subr.bf16.mxu1 %v10428_v5  ;;  %v3328_v24 = vsub.f32 %v14257_v63, %v9726_v7  ;;  %v3940_v43 = vmul.f32 1.442695, %v3344_v13  ;;  %v3347_v13 = vsub.f32 %v14263_v51, %v9657_v20  ;;  %v6731_v19 = vpop.eup %6730  ;;  %v3924_v26 = vmul.f32 1.442695, %v3336_v42  ;;  %v14264_v63 = vld [vmem:[#allocation311_spill] sm:$0xff] }
 0x5b7   : > { %14254 = vst [vmem:[#allocation112_spill] sm:$0xff] %v10431_v48  ;;  %5308 = vmatpush1.bf16.xpose.msra.mxu1 %v10431_v48  ;;  %v3355_v61 = vsub.f32 %v14264_v63, %v9728_v56  ;;  %v3329_v12 = vsub.f32 %v14265_v0, %v9726_v7  ;;  %v3958_v55 = vmul.f32 1.442695, %v3353_v62  ;;  %v3339_v63 = vsub.f32 %v14269_v23, %v9754_v15  ;;  %v14279_v23 = vld [vmem:[#allocation288_spill] sm:$0xff] }
 0x5b8   : > { %v3908_v30 = vmul.f32 1.442695, %v3328_v24  ;;  %6744 = vpow2.f32 %v3940_v43  ;;  %v6733_v24 = vpop.eup %6732  ;;  %v14266_v43 = vld [vmem:[#allocation302_spill] sm:$0xff]  ;;  %v3946_v20 = vmul.f32 1.442695, %v3347_v13  ;;  %v10467_v49 = vpack.c.bf16 %v6731_v19, %v6729_v37 }
 0x5b9   : > { %6746 = vpow2.f32 %v3944_v50  ;;  %v6735_v57 = vpop.eup %6734  ;;  %v3337_v25 = vsub.f32 %v14266_v43, %v9754_v15  ;;  %v14267_v50 = vld [vmem:[#allocation299_spill] sm:$0xff]  ;;  %v14275_v37 = vld [vmem:[#allocation290_spill] sm:$0xff] }
 0x5ba   : > { %6748 = vpow2.f32 %v3908_v30  ;;  %v3331_v42 = vsub.f32 %v14267_v50, %v9726_v7  ;;  %v3962_v30 = vmul.f32 1.442695, %v3355_v61  ;;  %14271 = vst [vmem:[#allocation124_spill] sm:$0xff] %v10467_v49  ;;  %v3313_v19 = vsub.f32 %v14275_v37, %v9773_v39 }
 0x5bb   : > { %6750 = vpow2.f32 %v3956_v38  ;;  %v14270_v38 = vld [vmem:[#allocation301_spill] sm:$0xff] }
 0x5bc   : > { %6752 = vpow2.f32 %v3960_v9  ;;  %v3338_v62 = vsub.f32 %v14270_v38, %v9754_v15  ;;  %v3910_v9 = vmul.f32 1.442695, %v3329_v12  ;;  %v3914_v15 = vmul.f32 1.442695, %v3331_v42  ;;  %v14276_v12 = vld [vmem:[#allocation295_spill] sm:$0xff]  ;;  %v14280_v38 = vld [vmem:[#allocation292_spill] sm:$0xff] }
 0x5bd   : > { %6754 = vpow2.f32 %v3924_v26  ;;  %v14273_v26 = vld [vmem:[#allocation294_spill] sm:$0xff] }
 0x5be   : > { %v6737_v48 = vpop.eup %6736  ;;  %6756 = vpow2.f32 %v3942_v28  ;;  %v3321_v61 = vsub.f32 %v14273_v26, %v9868_v21  ;;  %v3930_v28 = vmul.f32 1.442695, %v3339_v63 }
 0x5bf   : > { %v10461_v56 = vpack.c.bf16 %v6737_v48, %v6735_v57  ;;  %6758 = vpow2.f32 %v3958_v55  ;;  %v3926_v48 = vmul.f32 1.442695, %v3337_v25  ;;  %v3323_v55 = vsub.f32 %v14276_v12, %v9868_v21  ;;  %v14277_v25 = vld [vmem:[#allocation297_spill] sm:$0xff]  ;;  %v14282_v12 = vld [vmem:[#allocation286_spill] sm:$0xff] }
 0x5c0   : > { %v6739_v51 = vpop.eup %6738  ;;  %6760 = vpow2.f32 %v3946_v20  ;;  %v3330_v50 = vsub.f32 %v14277_v25, %v9726_v7  ;;  %v14278_v20 = vld [vmem:[#allocation291_spill] sm:$0xff] }
 0x5c1   : > { %14268 = vst [vmem:[#allocation113_spill] sm:$0xff] %v10461_v56  ;;  %v6741_v0 = vpop.eup %6740  ;;  %5256 = vmatprep.subr.bf16.mxu0 %v10461_v56  ;;  %6762 = vpow2.f32 %v3962_v30  ;;  %v3315_v42 = vsub.f32 %v14278_v20, %v9773_v39  ;;  %v3878_v30 = vmul.f32 1.442695, %v3313_v19  ;;  %v3898_v7 = vmul.f32 1.442695, %v3323_v55  ;;  %v14283_v20 = vld [vmem:[#allocation282_spill] sm:$0xff] }
 0x5c2   : > { %v6743_v13 = vpop.eup %6742  ;;  %v10470_v43 = vpack.c.bf16 %v6741_v0, %v6739_v51  ;;  %5257 = vmatpush1.bf16.xpose.msra.mxu0 %v10467_v49  ;;  %v3928_v51 = vmul.f32 1.442695, %v3338_v62  ;;  %6764 = vpow2.f32 %v3910_v9  ;;  %v3312_v0 = vsub.f32 %v14279_v23, %v9773_v39  ;;  %v14281_v9 = vld [vmem:[#allocation293_spill] sm:$0xff] }
 0x5c3   : > { %v10475_v57 = vpack.c.bf16 %v6733_v24, %v6743_v13  ;;  %6766 = vpow2.f32 %v3926_v48  ;;  %v3894_v24 = vmul.f32 1.442695, %v3321_v61  ;;  %v3320_v13 = vsub.f32 %v14280_v38, %v9868_v21 }
 0x5c4   : > { %14272 = vst [vmem:[#allocation125_spill] sm:$0xff] %v10470_v43  ;;  %5309 = vmatprep.subr.bf16.mxu1 %v10470_v43  ;;  %6768 = vpow2.f32 %v3914_v15  ;;  %v3912_v26 = vmul.f32 1.442695, %v3330_v50  ;;  %v3322_v48 = vsub.f32 %v14281_v9, %v9868_v21  ;;  %v3882_v37 = vmul.f32 1.442695, %v3315_v42  ;;  %v14284_v50 = vld [vmem:[#allocation287_spill] sm:$0xff] }
 0x5c5   : > { %14274 = vst [vmem:[#allocation122_spill] sm:$0xff] %v10475_v57  ;;  %5310 = vmatpush1.bf16.xpose.msra.mxu1 %v10475_v57  ;;  %v6745_v63 = vpop.eup %6744  ;;  %6770 = vpow2.f32 %v3930_v28  ;;  %v3305_v15 = vsub.f32 %v14282_v12, %v9913_v3  ;;  %v3876_v25 = vmul.f32 1.442695, %v3312_v0  ;;  %v3297_v28 = vsub.f32 %v14283_v20, %v9915_v29  ;;  %v14286_v0 = vld [vmem:[#allocation283_spill] sm:$0xff] }
 0x5c6   : > { %v6747_v62 = vpop.eup %6746  ;;  %6772 = vpow2.f32 %v3928_v51  ;;  %v3892_v23 = vmul.f32 1.442695, %v3320_v13  ;;  %v3307_v51 = vsub.f32 %v14284_v50, %v9913_v3  ;;  %v3896_v38 = vmul.f32 1.442695, %v3322_v48  ;;  %v14287_v13 = vld [vmem:[#allocation280_spill] sm:$0xff] }
 0x5c7   : > { %v10493_v61 = vpop.eup %6748  ;;  %6774 = vpow2.f32 %v3894_v24  ;;  %v14285_v24 = vld [vmem:[#allocation289_spill] sm:$0xff]  ;;  %v3862_v12 = vmul.f32 1.442695, %v3305_v15  ;;  %v3846_v20 = vmul.f32 1.442695, %v3297_v28 }
 0x5c8   : > { %v6751_v19 = vpop.eup %6750  ;;  %6776 = vpow2.f32 %v3878_v30  ;;  %v3314_v42 = vsub.f32 %v14285_v24, %v9773_v39  ;;  %v3299_v30 = vsub.f32 %v14286_v0, %v9915_v29  ;;  %v3866_v39 = vmul.f32 1.442695, %v3307_v51  ;;  %v14290_v15 = vld [vmem:[#allocation285_spill] sm:$0xff] }
 0x5c9   : > { %v6753_v55 = vpop.eup %6752  ;;  %6778 = vpow2.f32 %v3898_v7  ;;  %v3296_v7 = vsub.f32 %v14287_v13, %v9915_v29  ;;  %v3306_v24 = vsub.f32 %v14290_v15, %v9913_v3  ;;  %v10513_v0 = vpack.c.bf16 %v6751_v19, %v6745_v63  ;;  %v14293_v13 = vld [vmem:[#allocation278_spill] sm:$0xff] }
 0x5ca   : > { %v6755_v21 = vpop.eup %6754  ;;  %6780 = vpow2.f32 %v3912_v26  ;;  %v14288_v26 = vld [vmem:[#allocation284_spill] sm:$0xff] }
 0x5cb   : > { %v6757_v9 = vpop.eup %6756  ;;  %6782 = vpow2.f32 %v3882_v37  ;;  %v3304_v50 = vsub.f32 %v14288_v26, %v9913_v3  ;;  %v3880_v37 = vmul.f32 1.442695, %v3314_v42  ;;  %14291 = vst [vmem:[#allocation123_spill] sm:$0xff] %v10513_v0  ;;  %v3844_v51 = vmul.f32 1.442695, %v3296_v7  ;;  %v14295_v3 = vld [vmem:[#allocation274_spill] sm:$0xff] }
 0x5cc   : > { %v6759_v57 = vpop.eup %6758  ;;  %6784 = vpow2.f32 %v3876_v25  ;;  %v10521_v42 = vpack.c.bf16 %v6753_v55, %v6747_v62  ;;  %v3281_v63 = vsub.f32 %v14295_v3, %v9964_v44  ;;  %v14298_v7 = vld [vmem:[#allocation281_spill] sm:$0xff]  ;;  %v3864_v55 = vmul.f32 1.442695, %v3306_v24  ;;  %v14301_v3 = vld [vmem:[#allocation276_spill] sm:$0xff] }
 0x5cd   : > { %v6761_v49 = vpop.eup %6760  ;;  %6786 = vpow2.f32 %v3892_v23  ;;  %v10509_v43 = vpack.c.bf16 %v6759_v57, %v6757_v9  ;;  %v3850_v23 = vmul.f32 1.442695, %v3299_v30  ;;  %v3289_v57 = vsub.f32 %v14293_v13, %v9962_v4 }
 0x5ce   : > { %v6763_v48 = vpop.eup %6762  ;;  %6788 = vpow2.f32 %v3896_v38  ;;  %14294 = vst [vmem:[#allocation104_spill] sm:$0xff] %v10521_v42  ;;  %v3860_v38 = vmul.f32 1.442695, %v3304_v50  ;;  %v3298_v62 = vsub.f32 %v14298_v7, %v9915_v29  ;;  %v3814_v13 = vmul.f32 1.442695, %v3281_v63 }
 0x5cf   : > { %14289 = vst [vmem:[#allocation126_spill] sm:$0xff] %v10509_v43  ;;  %v6765_v25 = vpop.eup %6764  ;;  %5258 = vmatprep.subr.bf16.mxu0 %v10509_v43  ;;  %v10516_v28 = vpack.c.bf16 %v6763_v48, %v6761_v49  ;;  %6790 = vpow2.f32 %v3862_v12  ;;  %v14297_v12 = vld [vmem:[#allocation279_spill] sm:$0xff]  ;;  %v3830_v48 = vmul.f32 1.442695, %v3289_v57 }
 0x5d0   : > { %v6767_v9 = vpop.eup %6766  ;;  %5259 = vmatpush1.bf16.xpose.msra.mxu0 %v10513_v0  ;;  %6792 = vpow2.f32 %v3846_v20  ;;  %v3291_v30 = vsub.f32 %v14297_v12, %v9962_v4  ;;  %v14303_v12 = vld [vmem:[#allocation272_spill] sm:$0xff] }
 0x5d1   : > { %14292 = vst [vmem:[#allocation127_spill] sm:$0xff] %v10516_v28  ;;  %v6769_v19 = vpop.eup %6768  ;;  %5311 = vmatprep.subr.bf16.mxu1 %v10516_v28  ;;  %v10526_v49 = vpack.c.bf16 %v6767_v9, %v6765_v25  ;;  %6794 = vpow2.f32 %v3866_v39  ;;  %v14300_v39 = vld [vmem:[#allocation275_spill] sm:$0xff]  ;;  %v3848_v9 = vmul.f32 1.442695, %v3298_v62 }
 0x5d2   : > { %v6771_v26 = vpop.eup %6770  ;;  %6796 = vpow2.f32 %v3880_v37  ;;  %5312 = vmatpush1.bf16.xpose.msra.mxu1 %v10521_v42  ;;  %v3283_v15 = vsub.f32 %v14300_v39, %v9964_v44  ;;  %v3834_v29 = vmul.f32 1.442695, %v3291_v30  ;;  %v14305_v30 = vld [vmem:[#allocation277_spill] sm:$0xff] }
 0x5d3   : > { %14296 = vst [vmem:[#allocation116_spill] sm:$0xff] %v10526_v49  ;;  %v6773_v20 = vpop.eup %6772  ;;  %5260 = vmatprep.subr.bf16.mxu0 %v10526_v49  ;;  %v10534_v50 = vpack.c.bf16 %v6771_v26, %v6769_v19  ;;  %6798 = vpow2.f32 %v3850_v23  ;;  %v3288_v19 = vsub.f32 %v14301_v3, %v9962_v4  ;;  %v10542_v23 = vpack.c.bf16 %v6755_v21, %v10493_v61 }
 0x5d4   : > { %v6775_v25 = vpop.eup %6774  ;;  %6800 = vpow2.f32 %v3844_v51  ;;  %v3280_v26 = vsub.f32 %v14303_v12, %v9964_v44  ;;  %v3818_v63 = vmul.f32 1.442695, %v3283_v15  ;;  %v3290_v7 = vsub.f32 %v14305_v30, %v9962_v4  ;;  %v6444_v12 = vld [vmem:[#allocation3 + $0x8] ss:$104 sps:$4 sm:$0xff]  }
 0x5d5   : > { %14299 = vst [vmem:[#allocation117_spill] sm:$0xff] %v10534_v50  ;;  %v6777_v37 = vpop.eup %6776  ;;  %6802 = vpow2.f32 %v3860_v38  ;;  %5313 = vmatprep.subr.bf16.mxu1 %v10534_v50  ;;  %14302 = vst [vmem:[#allocation108_spill] sm:$0xff] %v10542_v23  ;;  %v3828_v15 = vmul.f32 1.442695, %v3288_v19  ;;  %v14347_v50 = vld [vmem:[#allocation376_spill] sm:$0xff] }
 0x5d6   : > { %v6779_v24 = vpop.eup %6778  ;;  %6804 = vpow2.f32 %v3864_v55  ;;  %v10546_v51 = vpack.c.bf16 %v6775_v25, %v6777_v37  ;;  %v3812_v25 = vmul.f32 1.442695, %v3280_v26 }
 0x5d7   : > { %v6781_v57 = vpop.eup %6780  ;;  %6806 = vpow2.f32 %v3830_v48  ;;  %v14308_v48 = vld [vmem:[#allocation273_spill] sm:$0xff] }
 0x5d8   : > { %14304 = vst [vmem:[#allocation114_spill] sm:$0xff] %v10546_v51  ;;  %v6783_v38 = vpop.eup %6782  ;;  %5261 = vmatpush1.bf16.xpose.msra.mxu0 %v10542_v23  ;;  %v10551_v62 = vpack.c.bf16 %v6773_v20, %v6781_v57  ;;  %6808 = vpow2.f32 %v3814_v13  ;;  %v3282_v39 = vsub.f32 %v14308_v48, %v9964_v44  ;;  %v14309_v20 = vld [vmem:[#allocation264_spill] sm:$0xff]  ;;  %v6441_v13 = vld [vmem:[#allocation3 + $0x18] ss:$80 sps:$4 sm:$0xff]  }
 0x5d9   : > { %v6785_v55 = vpop.eup %6784  ;;  %5262 = vmatprep.subr.bf16.mxu0 %v10546_v51  ;;  %v10554_v61 = vpack.c.bf16 %v6779_v24, %v6783_v38  ;;  %6810 = vpow2.f32 %v3834_v29  ;;  %v3264_v37 = vsub.f32 %v14309_v20, %v10023_v27  ;;  %v6443_v24 = vld [vmem:[#allocation3 + $0x1c] ss:$80 sps:$4 sm:$0xff]   ;;  %v3832_v29 = vmul.f32 1.442695, %v3290_v7  ;;  %v14315_v51 = vld [vmem:[#allocation270_spill] sm:$0xff] }
 0x5da   : > { %14306 = vst [vmem:[#allocation118_spill] sm:$0xff] %v10551_v62  ;;  %v6787_v21 = vpop.eup %6786  ;;  %6812 = vpow2.f32 %v3848_v9  ;;  %5314 = vmatpush1.bf16.xpose.msra.mxu1 %v10551_v62  ;;  %v14310_v9 = vld [vmem:[#allocation268_spill] sm:$0xff]  ;;  %v14311_v38 = vld [vmem:[#allocation269_spill] sm:$0xff]  ;;  %5190 = vmatprep.mubr.bf16.mxu0 %v6443_v24  ;;  %v3816_v48 = vmul.f32 1.442695, %v3282_v39  ;;  %v3273_v23 = vsub.f32 %v14315_v51, %v10036_v11 }
 0x5db   : > { %14307 = vst [vmem:[#allocation115_spill] sm:$0xff] %v10554_v61  ;;  %v6789_v4 = vpop.eup %6788  ;;  %5315 = vmatprep.subr.bf16.mxu1 %v10554_v61  ;;  %6814 = vpow2.f32 %v3818_v63  ;;  %v3272_v57 = vsub.f32 %v14310_v9, %v10036_v11  ;;  %v6446_v44 = vld [vmem:[#allocation3 + $0xc] ss:$104 sps:$4 sm:$0xff]   ;;  %v3274_v30 = vsub.f32 %v14311_v38, %v10036_v11  ;;  %v10566_v20 = vpack.c.bf16 %v6787_v21, %v6785_v55  ;;  %v14313_v63 = vld [vmem:[#allocation266_spill] sm:$0xff] }
 0x5dc   : > { %v6791_v3 = vpop.eup %6790  ;;  %6816 = vpow2.f32 %v3828_v15  ;;  %v3265_v61 = vsub.f32 %v14313_v63, %v10023_v27  ;;  %5191 = vmatmul.mubr.bf16.gmra.mxu0 %v6441_v13  ;;  %5243 = vmatprep.mubr.bf16.mxu1 %v6446_v44  ;;  %v3780_v9 = vmul.f32 1.442695, %v3264_v37  ;;  %v14317_v21 = vld [vmem:[#allocation267_spill] sm:$0xff]  ;;  %v6449_v38 = vld [vmem:[#allocation3 + $0x14] ss:$48 sps:$4 sm:$0xff]  }
 0x5dd   : > { %v6793_v19 = vpop.eup %6792  ;;  %14312 = vst [vmem:[#allocation119_spill] sm:$0xff] %v10566_v20  ;;  %6818 = vpow2.f32 %v3812_v25  ;;  %5244 = vmatmul.mubr.bf16.gmra.mxu1 %v6444_v12  ;;  %v3796_v39 = vmul.f32 1.442695, %v3272_v57  ;;  %v3267_v15 = vsub.f32 %v14317_v21, %v10023_v27  ;;  %v3800_v44 = vmul.f32 1.442695, %v3274_v30  ;;  %v14319_v37 = vld [vmem:[#allocation271_spill] sm:$0xff]  ;;  %5286 = vmatprep.mubr.bf16.mxu0 %v6449_v38 }
 0x5de   : > { %v6795_v26 = vpop.eup %6794  ;;  %v10570_v62 = vpack.c.bf16 %v6791_v3, %v6793_v19  ;;  %6820 = vpow2.f32 %v3832_v29  ;;  %v3275_v51 = vsub.f32 %v14319_v37, %v10036_v11  ;;  %v14320_v29 = vld [vmem:[#allocation265_spill] sm:$0xff]  ;;  %v3798_v19 = vmul.f32 1.442695, %v3273_v23 }
 0x5df   : > { %v6797_v7 = vpop.eup %6796  ;;  %6822 = vpow2.f32 %v3816_v48  ;;  %v3266_v57 = vsub.f32 %v14320_v29, %v10023_v27  ;;  %v14326_v29 = vld [vmem:[#allocation383_spill] sm:$0xff] }
 0x5e0   : > { %14314 = vst [vmem:[#allocation106_spill] sm:$0xff] %v10570_v62  ;;  %v6799_v24 = vpop.eup %6798  ;;  %5263 = vmatpush1.bf16.xpose.msra.mxu0 %v10566_v20  ;;  %v10575_v55 = vpack.c.bf16 %v6789_v4, %v6797_v7  ;;  %v3782_v4 = vmul.f32 1.442695, %v3265_v61  ;;  %6824 = vpow2.f32 %v3780_v9  ;;  %v3802_v11 = vmul.f32 1.442695, %v3275_v51 }
 0x5e1   : > { %v6801_v13 = vpop.eup %6800  ;;  %5264 = vmatprep.subr.bf16.mxu0 %v10570_v62  ;;  %v10580_v25 = vpack.c.bf16 %v6795_v26, %v6799_v24  ;;  %6826 = vpow2.f32 %v3796_v39  ;;  %v3786_v26 = vmul.f32 1.442695, %v3267_v15  ;;  %v3784_v7 = vmul.f32 1.442695, %v3266_v57  ;;  %v6452_v9 = vld [vmem:[#allocation3 + $0x4c] ss:$48 sps:$4 sm:$0xff]  }
 0x5e2   : > { %14316 = vst [vmem:[#allocation110_spill] sm:$0xff] %v10575_v55  ;;  %v6803_v3 = vpop.eup %6802  ;;  %5316 = vmatpush1.bf16.xpose.msra.mxu1 %v10575_v55  ;;  %6828 = vpow2.f32 %v3800_v44  ;;  %5339 = vmatprep.mubr.bf16.mxu1 %v6452_v9  ;;  %v3504_v57 = vsub.f32 %v14326_v29, %v10123_v1 }
 0x5e3   : > { %14318 = vst [vmem:[#allocation107_spill] sm:$0xff] %v10580_v25  ;;  %v6805_v12 = vpop.eup %6804  ;;  %5317 = vmatprep.subr.bf16.mxu1 %v10580_v25  ;;  %v10588_v24 = vpack.c.bf16 %v6803_v3, %v6801_v13  ;;  %6830 = vpow2.f32 %v3782_v4  ;;  %v10599_v13 = vpop.xlane.xlu0 %3105 }
 0x5e4   : > { %v6807_v30 = vpop.eup %6806  ;;  %6832 = vpow2.f32 %v3798_v19 }
 0x5e5   : > { %v6809_v63 = vpop.eup %6808  ;;  %14321 = vst [vmem:[#allocation111_spill] sm:$0xff] %v10588_v24  ;;  %6834 = vpow2.f32 %v3786_v26  ;;  %v14329_v26 = vld [vmem:[#allocation388_spill] sm:$0xff] }
 0x5e6   : > { %v6811_v48 = vpop.eup %6810  ;;  %v10590_v61 = vpack.c.bf16 %v6807_v30, %v6809_v63  ;;  %6836 = vpow2.f32 %v3802_v11  ;;  %v3514_v63 = vsub.f32 %v14329_v26, %v10125_v52 }
 0x5e7   : > { %v6813_v27 = vpop.eup %6812  ;;  %6838 = vpow2.f32 %v3784_v7  ;;  %v10613_v11 = vpop.xlane.xlu0 %3087 }
 0x5e8   : > { %14322 = vst [vmem:[#allocation109_spill] sm:$0xff] %v10590_v61  ;;  %v6815_v21 = vpop.eup %6814  ;;  %5265 = vmatpush1.bf16.xpose.msra.mxu0 %v10588_v24  ;;  %v10593_v23 = vpack.c.bf16 %v6805_v12, %v6813_v27  ;;  %v14327_v12 = vld [vmem:[#allocation387_spill] sm:$0xff]  ;;  %v14330_v27 = vld [vmem:[#allocation385_spill] sm:$0xff] }
 0x5e9   : > { %5266 = vmatprep.subr.bf16.mxu0 %v10590_v61  ;;  %v10596_v39 = vpack.c.bf16 %v6811_v48, %v6815_v21  ;;  %v6817_v15 = vpop.eup %6816  ;;  %v3512_v19 = vsub.f32 %v14327_v12, %v10125_v52  ;;  %v10615_v48 = vpop.xlane.xlu1 %3114  ;;  %v3505_v9 = vsub.f32 %v14330_v27, %v10123_v1  ;;  %v14332_v12 = vld [vmem:[#allocation386_spill] sm:$0xff]  ;;  %v14335_v27 = vld [vmem:[#allocation384_spill] sm:$0xff] }
 0x5ea   : > { %14323 = vst [vmem:[#allocation102_spill] sm:$0xff] %v10593_v23  ;;  %5318 = vmatpush1.bf16.xpose.msra.mxu1 %v10593_v23  ;;  %v6819_v44 = vpop.eup %6818  ;;  %v3507_v26 = vsub.f32 %v14332_v12, %v10123_v1  ;;  %v14334_v61 = vld [vmem:[#allocation390_spill] sm:$0xff]  ;;  %v3506_v25 = vsub.f32 %v14335_v27, %v10123_v1  ;;  %v14342_v12 = vld [vmem:[#allocation377_spill] sm:$0xff] }
 0x5eb   : > { %14324 = vst [vmem:[#allocation98_spill] sm:$0xff] %v10596_v39  ;;  %5319 = vmatprep.subr.bf16.mxu1 %v10596_v39  ;;  %v6821_v37 = vpop.eup %6820  ;;  %v10602_v51 = vpack.c.bf16 %v6817_v15, %v6819_v44  ;;  %v4260_v15 = vmul.f32 1.442695, %v3504_v57  ;;  %v14331_v44 = vld [vmem:[#allocation389_spill] sm:$0xff]  ;;  %v4276_v29 = vmul.f32 1.442695, %v3512_v19  ;;  %v10632_v19 = vpop.xlane.xlu0 %3069 }
 0x5ec   : > { %v6823_v3 = vpop.eup %6822  ;;  %v4280_v39 = vmul.f32 1.442695, %v3514_v63  ;;  %v4262_v55 = vmul.f32 1.442695, %v3505_v9  ;;  %v4266_v1 = vmul.f32 1.442695, %v3507_v26  ;;  %v3489_v26 = vsub.f32 %v14342_v12, %v10133_v17 }
 0x5ed   : > { %14325 = vst [vmem:[#allocation103_spill] sm:$0xff] %v10602_v51  ;;  %v6825_v4 = vpop.eup %6824  ;;  %v10609_v38 = vpack.c.bf16 %v6821_v37, %v6823_v3  ;;  %v3513_v37 = vsub.f32 %v14331_v44, %v10125_v52  ;;  %6840 = vpow2.f32 %v4260_v15  ;;  %v10634_v62 = vpop.xlane.xlu1 %3096  ;;  %v14346_v12 = vld [vmem:[#allocation382_spill] sm:$0xff] }
 0x5ee   : > { %v6827_v30 = vpop.eup %6826  ;;  %6842 = vpow2.f32 %v4276_v29  ;;  %v3499_v20 = vsub.f32 %v14346_v12, %v10145_v34 }
 0x5ef   : > { %14328 = vst [vmem:[#allocation105_spill] sm:$0xff] %v10609_v38  ;;  %v6829_v7 = vpop.eup %6828  ;;  %v10630_v57 = vpack.c.bf16 %v6827_v30, %v6825_v4  ;;  %6844 = vpow2.f32 %v4280_v39  ;;  %v4264_v4 = vmul.f32 1.442695, %v3506_v25  ;;  %v10644_v30 = vpop.xlane.xlu0 %3051  ;;  %v14340_v25 = vld [vmem:[#allocation379_spill] sm:$0xff] }
 0x5f0   : > { %5267 = vmatpush1.bf16.xpose.msra.mxu0 %v10602_v51  ;;  %v6831_v21 = vpop.eup %6830  ;;  %6846 = vpow2.f32 %v4262_v55  ;;  %v3496_v15 = vsub.f32 %v14340_v25, %v10145_v34 }
 0x5f1   : > { %v6833_v3 = vpop.eup %6832  ;;  %14336 = vst [vmem:[#allocation96_spill] sm:$0xff] %v10630_v57 }
 0x5f2   : > { %5320 = vmatpush1.bf16.xpose.msra.mxu1 %v10609_v38  ;;  %v6835_v51 = vpop.eup %6834  ;;  %v10624_v23 = vpack.c.bf16 %v6833_v3, %v6831_v21  ;;  %v3515_v38 = vsub.f32 %v14334_v61, %v10125_v52  ;;  %v4278_v21 = vmul.f32 1.442695, %v3513_v37  ;;  %v14341_v37 = vld [vmem:[#allocation380_spill] sm:$0xff] }
 0x5f3   : > { %v6837_v24 = vpop.eup %6836  ;;  %v10650_v9 = vpop.xlane.xlu0 %3033  ;;  %v3498_v3 = vsub.f32 %v14341_v37, %v10145_v34 }
 0x5f4   : > { %14333 = vst [vmem:[#allocation99_spill] sm:$0xff] %v10624_v23  ;;  %v6839_v44 = vpop.eup %6838  ;;  %5268 = vmatprep.subr.bf16.mxu0 %v10624_v23  ;;  %v10637_v63 = vpack.c.bf16 %v6837_v24, %v6835_v51  ;;  %v4282_v61 = vmul.f32 1.442695, %v3515_v38  ;;  %6848 = vpow2.f32 %v4278_v21  ;;  %v10646_v24 = vpop.xlane.xlu1 %3078  ;;  %v14339_v51 = vld [vmem:[#allocation375_spill] sm:$0xff]  ;;  %v14343_v21 = vld [vmem:[#allocation381_spill] sm:$0xff] }
 0x5f5   : > { %v10640_v52 = vpack.c.bf16 %v6829_v7, %v6839_v44  ;;  %6850 = vpow2.f32 %v4266_v1  ;;  %v3488_v7 = vsub.f32 %v14339_v51, %v10133_v17  ;;  %v3497_v1 = vsub.f32 %v14343_v21, %v10145_v34  ;;  %v14344_v51 = vld [vmem:[#allocation378_spill] sm:$0xff] }
 0x5f6   : > { %14337 = vst [vmem:[#allocation100_spill] sm:$0xff] %v10637_v63  ;;  %5321 = vmatprep.subr.bf16.mxu1 %v10637_v63  ;;  %6852 = vpow2.f32 %v4282_v61  ;;  %v4248_v25 = vmul.f32 1.442695, %v3498_v3  ;;  %v3490_v21 = vsub.f32 %v14347_v50, %v10133_v17 }
 0x5f7   : > { %14338 = vst [vmem:[#allocation101_spill] sm:$0xff] %v10640_v52  ;;  %6854 = vpow2.f32 %v4264_v4  ;;  %v4228_v44 = vmul.f32 1.442695, %v3488_v7  ;;  %v4244_v4 = vmul.f32 1.442695, %v3496_v15  ;;  %v10664_v63 = vpop.xlane.xlu0 %3015 }
 0x5f8   : > { %5269 = vmatpush1.bf16.xpose.msra.mxu0 %v10630_v57  ;;  %v10652_v39 = vpop.xlane.xlu1 %3060  ;;  %v4230_v15 = vmul.f32 1.442695, %v3489_v26  ;;  %v4232_v50 = vmul.f32 1.442695, %v3490_v21 }
 0x5f9   : > { %6856 = vpow2.f32 %v4228_v44 }
 0x5fa   : > { %5322 = vmatpush1.bf16.xpose.msra.mxu1 %v10640_v52  ;;  %v6841_v38 = vpop.eup %6840  ;;  %v3491_v52 = vsub.f32 %v14344_v51, %v10133_v17  ;;  %v4246_v51 = vmul.f32 1.442695, %v3497_v1  ;;  %6858 = vpow2.f32 %v4244_v4  ;;  %v4250_v17 = vmul.f32 1.442695, %v3499_v20  ;;  %v14354_v20 = vld [vmem:[#allocation360_spill] sm:$0xff]  ;;  %v14355_v4 = vld [vmem:[#allocation371_spill] sm:$0xff] }
 0x5fb   : > { %v6843_v55 = vpop.eup %6842  ;;  %6860 = vpow2.f32 %v4248_v25  ;;  %v3458_v1 = vsub.f32 %v14354_v20, %v10165_v35  ;;  %v3480_v25 = vsub.f32 %v14355_v4, %v10159_v47  ;;  %v14359_v20 = vld [vmem:[#allocation363_spill] sm:$0xff] }
 0x5fc   : > { %v6845_v29 = vpop.eup %6844  ;;  %v10666_v23 = vpop.xlane.xlu1 %3042  ;;  %v10674_v42 = vpack.c.bf16 %v6843_v55, %v6841_v38  ;;  %v4234_v34 = vmul.f32 1.442695, %v3491_v52  ;;  %6862 = vpow2.f32 %v4230_v15  ;;  %v14351_v38 = vld [vmem:[#allocation367_spill] sm:$0xff] }
 0x5fd   : > { %v6847_v27 = vpop.eup %6846  ;;  %v3472_v55 = vsub.f32 %v14351_v38, %v10147_v2  ;;  %6864 = vpow2.f32 %v4246_v51  ;;  %v14353_v52 = vld [vmem:[#allocation359_spill] sm:$0xff] }
 0x5fe   : > { %14348 = vst [vmem:[#allocation90_spill] sm:$0xff] %v10674_v42  ;;  %6866 = vpow2.f32 %v4234_v34  ;;  %v3456_v44 = vsub.f32 %v14353_v52, %v10165_v35  ;;  %v14357_v51 = vld [vmem:[#allocation351_spill] sm:$0xff] }
 0x5ff   : > { %6868 = vpow2.f32 %v4250_v17  ;;  %v3440_v34 = vsub.f32 %v14357_v51, %v10209_v58  ;;  %v4168_v17 = vmul.f32 1.442695, %v3458_v1 }
 0x600   : > { %v10688_v26 = vpop.xlane.xlu1 %3024  ;;  %6870 = vpow2.f32 %v4232_v50  ;;  %v4164_v15 = vmul.f32 1.442695, %v3456_v44  ;;  %v14358_v50 = vld [vmem:[#allocation352_spill] sm:$0xff] }
 0x601   : > { %v6849_v61 = vpop.eup %6848  ;;  %v3442_v52 = vsub.f32 %v14358_v50, %v10209_v58  ;;  %v14360_v44 = vld [vmem:[#allocation364_spill] sm:$0xff] }
 0x602   : > { %v6851_v57 = vpop.eup %6850  ;;  %v10668_v37 = vpack.c.bf16 %v6849_v61, %v6847_v27  ;;  %v4196_v61 = vmul.f32 1.442695, %v3472_v55  ;;  %v4212_v55 = vmul.f32 1.442695, %v3480_v25  ;;  %v14363_v25 = vld [vmem:[#allocation344_spill] sm:$0xff] }
 0x603   : > { %v6853_v7 = vpop.eup %6852 }
 0x604   : > { %14345 = vst [vmem:[#allocation94_spill] sm:$0xff] %v10668_v37  ;;  %v6855_v49 = vpop.eup %6854  ;;  %5270 = vmatprep.subr.bf16.mxu0 %v10668_v37  ;;  %v10677_v3 = vpack.c.bf16 %v6853_v7, %v6851_v57  ;;  %v10686_v57 = vpop.xlane.xlu0 %2997  ;;  %v14356_v7 = vld [vmem:[#allocation372_spill] sm:$0xff]  ;;  %6872 = vpow2.f32 %v4196_v61  ;;  %v4136_v61 = vmul.f32 1.442695, %v3442_v52  ;;  %v14366_v52 = vld [vmem:[#allocation335_spill] sm:$0xff] }
 0x605   : > { %5271 = vmatpush2.bf16.xpose.msra.mxu0 %v10674_v42  ;;  %v10680_v27 = vpack.c.bf16 %v6845_v29, %v6855_v49  ;;  %v14352_v49 = vld [vmem:[#allocation368_spill] sm:$0xff]  ;;  %v3482_v21 = vsub.f32 %v14356_v7, %v10159_v47  ;;  %v4132_v42 = vmul.f32 1.442695, %v3440_v34 }
 0x606   : > { %14349 = vst [vmem:[#allocation95_spill] sm:$0xff] %v10677_v3  ;;  %5323 = vmatprep.subr.bf16.mxu1 %v10677_v3  ;;  %v3474_v29 = vsub.f32 %v14352_v49, %v10147_v2  ;;  %v10704_v49 = vpop.xlane.xlu1 %3006  ;;  %v6857_v4 = vpop.eup %6856  ;;  %v14361_v3 = vld [vmem:[#allocation343_spill] sm:$0xff] }
 0x607   : > { %14350 = vst [vmem:[#allocation97_spill] sm:$0xff] %v10680_v27  ;;  %5324 = vmatpush2.bf16.xpose.msra.mxu1 %v10680_v27  ;;  %v4216_v7 = vmul.f32 1.442695, %v3482_v21  ;;  %v3466_v27 = vsub.f32 %v14360_v44, %v10175_v60  ;;  %v6859_v51 = vpop.eup %6858  ;;  %v3424_v1 = vsub.f32 %v14361_v3, %v10235_v14  ;;  %v14364_v21 = vld [vmem:[#allocation355_spill] sm:$0xff]  ;;  %v14365_v3 = vld [vmem:[#allocation356_spill] sm:$0xff] }
 0x608   : > { %v4200_v12 = vmul.f32 1.442695, %v3474_v29  ;;  %v10702_v38 = vpop.xlane.xlu0 %2979  ;;  %v3464_v29 = vsub.f32 %v14359_v20, %v10175_v60  ;;  %v6861_v50 = vpop.eup %6860  ;;  %v3426_v20 = vsub.f32 %v14363_v25, %v10235_v14  ;;  %v3448_v44 = vsub.f32 %v14364_v21, %v10204_v22 }
 0x609   : > { %v6863_v0 = vpop.eup %6862  ;;  %v4184_v34 = vmul.f32 1.442695, %v3466_v27  ;;  %v3450_v43 = vsub.f32 %v14365_v3, %v10204_v22  ;;  %v3408_v25 = vsub.f32 %v14366_v52, %v10271_v16  ;;  %v10728_v21 = vpack.c.bf16 %v6859_v51, %v6857_v4  ;;  %v14377_v52 = vld [vmem:[#allocation365_spill] sm:$0xff] }
 0x60a   : > { %6874 = vpow2.f32 %v4200_v12  ;;  %v4180_v12 = vmul.f32 1.442695, %v3464_v29  ;;  %v10720_v28 = vpop.xlane.xlu1 %2988  ;;  %v4104_v29 = vmul.f32 1.442695, %v3426_v20  ;;  %v4148_v10 = vmul.f32 1.442695, %v3448_v44 }
 0x60b   : > { %6876 = vpow2.f32 %v4164_v15  ;;  %v6865_v15 = vpop.eup %6864  ;;  %14368 = vst [vmem:[#allocation92_spill] sm:$0xff] %v10728_v21  ;;  %v4152_v4 = vmul.f32 1.442695, %v3450_v43  ;;  %v14375_v44 = vld [vmem:[#allocation374_spill] sm:$0xff]  ;;  %v14376_v43 = vld [vmem:[#allocation361_spill] sm:$0xff] }
 0x60c   : > { %v10714_v37 = vpop.xlane.xlu0 %3249  ;;  %6878 = vpow2.f32 %v4168_v17  ;;  %v6867_v56 = vpop.eup %6866  ;;  %v4100_v17 = vmul.f32 1.442695, %v3424_v1  ;;  %v10726_v5 = vpack.c.bf16 %v6865_v15, %v6863_v0  ;;  %v14372_v0 = vld [vmem:[#allocation373_spill] sm:$0xff] }
 0x60d   : > { %14362 = vst [vmem:[#allocation91_spill] sm:$0xff] %v10714_v37  ;;  %6880 = vpow2.f32 %v4212_v55  ;;  %v6869_v55 = vpop.eup %6868 }
 0x60e   : > { %6882 = vpow2.f32 %v4216_v7  ;;  %14367 = vst [vmem:[#allocation88_spill] sm:$0xff] %v10726_v5  ;;  %v3473_v7 = vsub.f32 %v14369_v32, %v10147_v2  ;;  %v6871_v27 = vpop.eup %6870  ;;  %5272 = vmatprep.subr.bf16.mxu0 %v10726_v5  ;;  %v10737_v1 = vpack.c.bf16 %v6869_v55, %v6867_v56  ;;  %v14374_v32 = vld [vmem:[#allocation370_spill] sm:$0xff]  ;;  %v3483_v56 = vsub.f32 %v14375_v44, %v10159_v47  ;;  %v14382_v44 = vld [vmem:[#allocation336_spill] sm:$0xff] }
 0x60f   : > { %6884 = vpow2.f32 %v4132_v42  ;;  %v10734_v42 = vpop.xlane.xlu1 %3258  ;;  %5273 = vmatpush2.bf16.xpose.msra.mxu0 %v10728_v21  ;;  %v10742_v51 = vpack.c.bf16 %v6861_v50, %v6871_v27  ;;  %v3475_v20 = vsub.f32 %v14374_v32, %v10147_v2  ;;  %v3465_v55 = vsub.f32 %v14377_v52, %v10175_v60 }
 0x610   : > { %6886 = vpow2.f32 %v4136_v61  ;;  %v10732_v3 = vpop.xlane.xlu0 %3231  ;;  %14371 = vst [vmem:[#allocation86_spill] sm:$0xff] %v10737_v1  ;;  %v3481_v61 = vsub.f32 %v14372_v0, %v10159_v47  ;;  %5325 = vmatprep.subr.bf16.mxu1 %v10737_v1  ;;  %v4198_v15 = vmul.f32 1.442695, %v3473_v7  ;;  %v4218_v0 = vmul.f32 1.442695, %v3483_v56 }
 0x611   : > { %6888 = vpow2.f32 %v4180_v12  ;;  %14370 = vst [vmem:[#allocation93_spill] sm:$0xff] %v10732_v3  ;;  %14373 = vst [vmem:[#allocation82_spill] sm:$0xff] %v10742_v51  ;;  %v4068_v12 = vmul.f32 1.442695, %v3408_v25  ;;  %5326 = vmatpush2.bf16.xpose.msra.mxu1 %v10742_v51  ;;  %v10754_v2 = vpop.eup %6872  ;;  %v14378_v25 = vld [vmem:[#allocation362_spill] sm:$0xff] }
 0x612   : > { %6890 = vpow2.f32 %v4184_v34  ;;  %v3457_v34 = vsub.f32 %v14376_v43, %v10165_v35  ;;  %v4214_v50 = vmul.f32 1.442695, %v3481_v61  ;;  %v3459_v27 = vsub.f32 %v14378_v25, %v10165_v35 }
 0x613   : > { %6892 = vpow2.f32 %v4100_v17  ;;  %v4202_v17 = vmul.f32 1.442695, %v3475_v20  ;;  %v10762_v7 = vpop.xlane.xlu1 %3240  ;;  %v4182_v35 = vmul.f32 1.442695, %v3465_v55  ;;  %v14386_v55 = vld [vmem:[#allocation347_spill] sm:$0xff] }
 0x614   : > { %6894 = vpow2.f32 %v4104_v29  ;;  %v10760_v29 = vpop.xlane.xlu0 %3213  ;;  %14380 = vst [vmem:[#allocation89_spill] sm:$0xff] %v10762_v7  ;;  %v4166_v20 = vmul.f32 1.442695, %v3457_v34  ;;  %v4170_v56 = vmul.f32 1.442695, %v3459_v27 }
 0x615   : > { %6896 = vpow2.f32 %v4148_v10  ;;  %14379 = vst [vmem:[#allocation87_spill] sm:$0xff] %v10760_v29  ;;  %v14381_v10 = vld [vmem:[#allocation366_spill] sm:$0xff] }
 0x616   : > { %6898 = vpow2.f32 %v4152_v4  ;;  %v3467_v61 = vsub.f32 %v14381_v10, %v10175_v60  ;;  %v3410_v4 = vsub.f32 %v14382_v44, %v10271_v16  ;;  %v14384_v60 = vld [vmem:[#allocation353_spill] sm:$0xff] }
 0x617   : > { %v10758_v47 = vpop.eup %6874  ;;  %6900 = vpow2.f32 %v4068_v12  ;;  %v14383_v12 = vld [vmem:[#allocation357_spill] sm:$0xff]  ;;  %v3441_v10 = vsub.f32 %v14384_v60, %v10209_v58  ;;  %v10790_v27 = vpop.xlane.xlu1 %3222 }
 0x618   : > { %v10766_v32 = vpop.eup %6876  ;;  %6902 = vpow2.f32 %v4198_v15  ;;  %v3449_v52 = vsub.f32 %v14383_v12, %v10204_v22  ;;  %v4186_v44 = vmul.f32 1.442695, %v3467_v61  ;;  %v14385_v15 = vld [vmem:[#allocation358_spill] sm:$0xff]  ;;  %v3432_v12 = vsub.f32 %v14386_v55, %v10233_v40  ;;  %14388 = vst [vmem:[#allocation84_spill] sm:$0xff] %v10790_v27 }
 0x619   : > { %v10770_v43 = vpop.eup %6878  ;;  %6904 = vpow2.f32 %v4214_v50  ;;  %v3451_v34 = vsub.f32 %v14385_v15, %v10204_v22  ;;  %v4072_v50 = vmul.f32 1.442695, %v3410_v4  ;;  %v14390_v22 = vld [vmem:[#allocation348_spill] sm:$0xff]  ;;  %v4134_v15 = vmul.f32 1.442695, %v3441_v10 }
 0x61a   : > { %v10774_v25 = vpop.eup %6880  ;;  %6906 = vpow2.f32 %v4202_v17  ;;  %v10788_v17 = vpop.xlane.xlu0 %3195  ;;  %v4150_v60 = vmul.f32 1.442695, %v3449_v52  ;;  %v3434_v4 = vsub.f32 %v14390_v22, %v10233_v40 }
 0x61b   : > { %v10778_v51 = vpop.eup %6882  ;;  %6908 = vpow2.f32 %v4218_v0  ;;  %14387 = vst [vmem:[#allocation83_spill] sm:$0xff] %v10788_v17  ;;  %v14389_v0 = vld [vmem:[#allocation354_spill] sm:$0xff]  ;;  %v4154_v54 = vmul.f32 1.442695, %v3451_v34 }
 0x61c   : > { %v10782_v21 = vpop.eup %6884  ;;  %6910 = vpow2.f32 %v4166_v20  ;;  %v3443_v61 = vsub.f32 %v14389_v0, %v10209_v58  ;;  %v14391_v20 = vld [vmem:[#allocation327_spill] sm:$0xff]  ;;  %v14392_v58 = vld [vmem:[#allocation328_spill] sm:$0xff]  ;;  %v4120_v18 = vmul.f32 1.442695, %v3434_v4 }
 0x61d   : > { %v10786_v1 = vpop.eup %6886  ;;  %6912 = vpow2.f32 %v4182_v35  ;;  %v3392_v33 = vsub.f32 %v14391_v20, %v10317_v46  ;;  %v4116_v35 = vmul.f32 1.442695, %v3432_v12  ;;  %v3394_v52 = vsub.f32 %v14392_v58, %v10317_v46  ;;  %v10818_v58 = vpop.xlane.xlu1 %3204  ;;  %v14398_v4 = vld [vmem:[#allocation339_spill] sm:$0xff] }
 0x61e   : > { %v10794_v5 = vpop.eup %6888  ;;  %6914 = vpow2.f32 %v4170_v56  ;;  %v4138_v22 = vmul.f32 1.442695, %v3443_v61  ;;  %v14393_v56 = vld [vmem:[#allocation349_spill] sm:$0xff]  ;;  %v10816_v12 = vpop.xlane.xlu0 %3177  ;;  %14396 = vst [vmem:[#allocation85_spill] sm:$0xff] %v10818_v58 }
 0x61f   : > { %v10798_v55 = vpop.eup %6890  ;;  %6916 = vpow2.f32 %v4186_v44  ;;  %v3433_v10 = vsub.f32 %v14393_v56, %v10233_v40  ;;  %v14394_v44 = vld [vmem:[#allocation345_spill] sm:$0xff]  ;;  %14395 = vst [vmem:[#allocation80_spill] sm:$0xff] %v10816_v12  ;;  %v4040_v56 = vmul.f32 1.442695, %v3394_v52 }
 0x620   : > { %v10802_v17 = vpop.eup %6892  ;;  %6918 = vpow2.f32 %v4072_v50  ;;  %v3425_v34 = vsub.f32 %v14394_v44, %v10235_v14  ;;  %v4036_v50 = vmul.f32 1.442695, %v3392_v33  ;;  %v14399_v33 = vld [vmem:[#allocation346_spill] sm:$0xff] }
 0x621   : > { %v10806_v0 = vpop.eup %6894  ;;  %6920 = vpow2.f32 %v4150_v60  ;;  %v14397_v60 = vld [vmem:[#allocation350_spill] sm:$0xff]  ;;  %v4118_v44 = vmul.f32 1.442695, %v3433_v10  ;;  %v3427_v3 = vsub.f32 %v14399_v33, %v10235_v14  ;;  %v14403_v10 = vld [vmem:[#allocation332_spill] sm:$0xff] }
 0x622   : > { %v10810_v41 = vpop.eup %6896  ;;  %6922 = vpow2.f32 %v4134_v15  ;;  %v3435_v61 = vsub.f32 %v14397_v60, %v10233_v40  ;;  %v3416_v15 = vsub.f32 %v14398_v4, %v10269_v31  ;;  %v4102_v7 = vmul.f32 1.442695, %v3425_v34  ;;  %v10840_v34 = vpop.xlane.xlu0 %3159 }
 0x623   : > { %v10814_v20 = vpop.eup %6898  ;;  %6924 = vpow2.f32 %v4154_v54  ;;  %v14400_v54 = vld [vmem:[#allocation340_spill] sm:$0xff]  ;;  %v3402_v14 = vsub.f32 %v14403_v10, %v10324_v36 }
 0x624   : > { %v10822_v29 = vpop.eup %6900  ;;  %6926 = vpow2.f32 %v4116_v35  ;;  %v3418_v58 = vsub.f32 %v14400_v54, %v10269_v31  ;;  %v14401_v35 = vld [vmem:[#allocation331_spill] sm:$0xff]  ;;  %v4122_v4 = vmul.f32 1.442695, %v3435_v61  ;;  %v14406_v61 = vld [vmem:[#allocation341_spill] sm:$0xff] }
 0x625   : > { %v6903_v27 = vpop.eup %6902  ;;  %6928 = vpow2.f32 %v4138_v22  ;;  %v3400_v52 = vsub.f32 %v14401_v35, %v10324_v36  ;;  %v4084_v22 = vmul.f32 1.442695, %v3416_v15 }
 0x626   : > { %v6905_v12 = vpop.eup %6904  ;;  %6930 = vpow2.f32 %v4120_v18  ;;  %v10838_v18 = vpack.c.bf16 %v10774_v25, %v10754_v2  ;;  %v4088_v54 = vmul.f32 1.442695, %v3418_v58  ;;  %v10852_v2 = vpack.c.bf16 %v10778_v51, %v10758_v47  ;;  %v14408_v25 = vld [vmem:[#allocation337_spill] sm:$0xff]  ;;  %v14411_v51 = vld [vmem:[#allocation192_spill] sm:$0xff] }
 0x627   : > { %v6907_v40 = vpop.eup %6906  ;;  %6932 = vpow2.f32 %v4036_v50  ;;  %v10832_v60 = vpack.c.bf16 %v6905_v12, %v6903_v27  ;;  %v10842_v50 = vpop.xlane.xlu1 %3186  ;;  %v4106_v12 = vmul.f32 1.442695, %v3427_v3  ;;  %v3409_v35 = vsub.f32 %v14408_v25, %v10271_v16 }
 0x628   : > { %v6909_v37 = vpop.eup %6908  ;;  %6934 = vpow2.f32 %v4040_v56  ;;  %14404 = vst [vmem:[#allocation72_spill] sm:$0xff] %v10838_v18  ;;  %v3417_v56 = vsub.f32 %v14406_v61, %v10269_v31  ;;  %14407 = vst [vmem:[#allocation77_spill] sm:$0xff] %v10852_v2  ;;  %v4056_v61 = vmul.f32 1.442695, %v3402_v14  ;;  %v3628_v47 = vsub.f32 %v14411_v51, %v10599_v13  ;;  %v14415_v51 = vld [vmem:[#allocation447_spill] sm:$0xff] }
 0x629   : > { %14402 = vst [vmem:[#allocation81_spill] sm:$0xff] %v10832_v60  ;;  %v6911_v33 = vpop.eup %6910  ;;  %5274 = vmatprep.subr.bf16.mxu0 %v10832_v60  ;;  %v10845_v27 = vpack.c.bf16 %v6909_v37, %v6907_v40  ;;  %6936 = vpow2.f32 %v4118_v44  ;;  %v4052_v37 = vmul.f32 1.442695, %v3400_v52  ;;  %v14410_v44 = vld [vmem:[#allocation342_spill] sm:$0xff]  ;;  %v4070_v25 = vmul.f32 1.442695, %v3409_v35 }
 0x62a   : > { %v6913_v15 = vpop.eup %6912  ;;  %5275 = vmatpush2.bf16.xpose.msra.mxu0 %v10838_v18  ;;  %6938 = vpow2.f32 %v4102_v7  ;;  %v3419_v58 = vsub.f32 %v14410_v44, %v10269_v31  ;;  %v10875_v18 = vpop.xlane.xlu0 %3141  ;;  %v10884_v35 = vpack.c.bf16 %v10794_v5, %v10766_v32  ;;  %v14422_v5 = vld [vmem:[#allocation329_spill] sm:$0xff] }
 0x62b   : > { %14405 = vst [vmem:[#allocation76_spill] sm:$0xff] %v10845_v27  ;;  %v6915_v10 = vpop.eup %6914  ;;  %5327 = vmatprep.subr.bf16.mxu1 %v10845_v27  ;;  %v10857_v3 = vpack.c.bf16 %v6913_v15, %v6911_v33  ;;  %6940 = vpow2.f32 %v4122_v4  ;;  %v4086_v33 = vmul.f32 1.442695, %v3417_v56  ;;  %v14413_v4 = vld [vmem:[#allocation338_spill] sm:$0xff]  ;;  %14416 = vst [vmem:[#allocation75_spill] sm:$0xff] %v10875_v18  ;;  %v3393_v32 = vsub.f32 %v14422_v5, %v10317_v46 }
 0x62c   : > { %v6917_v40 = vpop.eup %6916  ;;  %6942 = vpow2.f32 %v4084_v22  ;;  %5328 = vmatpush2.bf16.xpose.msra.mxu1 %v10852_v2  ;;  %v3411_v15 = vsub.f32 %v14413_v4, %v10271_v16  ;;  %v14414_v22 = vld [vmem:[#allocation193_spill] sm:$0xff]  ;;  %v3632_v2 = vsub.f32 %v14415_v51, %v10599_v13  ;;  %v4508_v16 = vmul.f32 1.442695, %v3628_v47  ;;  %14418 = vst [vmem:[#allocation79_spill] sm:$0xff] %v10884_v35 }
 0x62d   : > { %14409 = vst [vmem:[#allocation74_spill] sm:$0xff] %v10857_v3  ;;  %v10864_v7 = vpop.eup %6918  ;;  %5276 = vmatprep.subr.bf16.mxu0 %v10857_v3  ;;  %v10867_v52 = vpack.c.bf16 %v6917_v40, %v6915_v10  ;;  %6944 = vpow2.f32 %v4106_v12  ;;  %v3630_v14 = vsub.f32 %v14414_v22, %v10599_v13  ;;  %v10877_v10 = vpop.xlane.xlu1 %3168  ;;  %v4090_v12 = vmul.f32 1.442695, %v3419_v58  ;;  %v14420_v51 = vld [vmem:[#allocation333_spill] sm:$0xff] }
 0x62e   : > { %v6921_v31 = vpop.eup %6920  ;;  %6946 = vpow2.f32 %v4088_v54  ;;  %v14417_v54 = vld [vmem:[#allocation184_spill] sm:$0xff]  ;;  %v4074_v22 = vmul.f32 1.442695, %v3411_v15  ;;  %v14424_v15 = vld [vmem:[#allocation334_spill] sm:$0xff]  ;;  %v4038_v5 = vmul.f32 1.442695, %v3393_v32 }
 0x62f   : > { %14412 = vst [vmem:[#allocation78_spill] sm:$0xff] %v10867_v52  ;;  %v6923_v44 = vpop.eup %6922  ;;  %6948 = vpow2.f32 %v4052_v37  ;;  %5329 = vmatprep.subr.bf16.mxu1 %v10867_v52  ;;  %v3612_v40 = vsub.f32 %v14417_v54, %v10613_v11  ;;  %v3401_v52 = vsub.f32 %v14420_v51, %v10324_v36  ;;  %v4512_v3 = vmul.f32 1.442695, %v3630_v14 }
 0x630   : > { %v6925_v56 = vpop.eup %6924  ;;  %6950 = vpow2.f32 %v4056_v61  ;;  %v10888_v4 = vpack.c.bf16 %v6921_v31, %v6923_v44  ;;  %v10895_v61 = vpack.c.bf16 %v10798_v55, %v10770_v43  ;;  %v4516_v31 = vmul.f32 1.442695, %v3632_v2  ;;  %v14425_v55 = vld [vmem:[#allocation196_spill] sm:$0xff]  ;;  %v10913_v2 = vpop.xlane.xlu0 %3123 }
 0x631   : > { %v10886_v37 = vpop.eup %6926  ;;  %6952 = vpow2.f32 %v4086_v33  ;;  %v3403_v14 = vsub.f32 %v14424_v15, %v10324_v36  ;;  %v4476_v43 = vmul.f32 1.442695, %v3612_v40  ;;  %v10915_v51 = vpop.xlane.xlu1 %3150  ;;  %v14426_v36 = vld [vmem:[#allocation330_spill] sm:$0xff]  ;;  %v14427_v40 = vld [vmem:[#allocation197_spill] sm:$0xff] }
 0x632   : > { %14419 = vst [vmem:[#allocation73_spill] sm:$0xff] %v10888_v4  ;;  %v6929_v58 = vpop.eup %6928  ;;  %5277 = vmatpush2.bf16.xpose.msra.mxu0 %v10884_v35  ;;  %14421 = vst [vmem:[#allocation496_spill] sm:$0xff] %v10895_v61  ;;  %6954 = vpow2.f32 %v4070_v25  ;;  %v3636_v25 = vsub.f32 %v14425_v55, %v10615_v48  ;;  %v14428_v55 = vld [vmem:[#allocation188_spill] sm:$0xff] }
 0x633   : > { %v10899_v47 = vpop.eup %6930  ;;  %5278 = vmatprep.subr.bf16.mxu0 %v10888_v4  ;;  %v10902_v33 = vpack.c.bf16 %v6925_v56, %v6929_v58  ;;  %6956 = vpow2.f32 %v4090_v12  ;;  %v4054_v12 = vmul.f32 1.442695, %v3401_v52  ;;  %v3395_v56 = vsub.f32 %v14426_v36, %v10317_v46  ;;  %v14429_v52 = vld [vmem:[#allocation455_spill] sm:$0xff] }
 0x634   : > { %v10906_v44 = vpop.eup %6932  ;;  %6958 = vpow2.f32 %v4508_v16  ;;  %5330 = vmatpush2.bf16.xpose.msra.mxu1 %v10895_v61  ;;  %v3638_v58 = vsub.f32 %v14427_v40, %v10615_v48  ;;  %v3620_v61 = vsub.f32 %v14428_v55, %v10634_v62  ;;  %v4058_v4 = vmul.f32 1.442695, %v3403_v14 }
 0x635   : > { %14423 = vst [vmem:[#allocation320_spill] sm:$0xff] %v10902_v33  ;;  %v10911_v54 = vpop.eup %6934  ;;  %5331 = vmatprep.subr.bf16.mxu1 %v10902_v33  ;;  %6960 = vpow2.f32 %v4074_v22  ;;  %v4524_v33 = vmul.f32 1.442695, %v3636_v25  ;;  %v3648_v22 = vsub.f32 %v14429_v52, %v10913_v2  ;;  %v10928_v46 = vpack.c.bf16 %v10810_v41, %v10782_v21  ;;  %v14434_v41 = vld [vmem:[#allocation194_spill] sm:$0xff] }
 0x636   : > { %v6937_v16 = vpop.eup %6936  ;;  %6962 = vpow2.f32 %v4512_v3  ;;  %v4042_v32 = vmul.f32 1.442695, %v3395_v56  ;;  %v4528_v55 = vmul.f32 1.442695, %v3638_v58  ;;  %v3629_v21 = vsub.f32 %v14434_v41, %v10599_v13  ;;  %v14436_v58 = vld [vmem:[#allocation199_spill] sm:$0xff] }
 0x637   : > { %v6939_v15 = vpop.eup %6938  ;;  %6964 = vpow2.f32 %v4516_v31  ;;  %14430 = vst [vmem:[#allocation64_spill] sm:$0xff] %v10928_v46  ;;  %v14432_v31 = vld [vmem:[#allocation198_spill] sm:$0xff] }
 0x638   : > { %v6941_v35 = vpop.eup %6940  ;;  %6966 = vpow2.f32 %v4476_v43  ;;  %v10932_v36 = vpack.c.bf16 %v6937_v16, %v6939_v15  ;;  %v3637_v40 = vsub.f32 %v14432_v31, %v10615_v48  ;;  %v10939_v43 = vpack.c.bf16 %v10814_v20, %v10786_v1  ;;  %v14437_v1 = vld [vmem:[#allocation457_spill] sm:$0xff] }
 0x639   : > { %v10930_v3 = vpop.eup %6942  ;;  %6968 = vpow2.f32 %v4054_v12  ;;  %v4492_v16 = vmul.f32 1.442695, %v3620_v61  ;;  %v10945_v12 = vpop.xlane.xlu1 %3132  ;;  %v3639_v15 = vsub.f32 %v14436_v58, %v10615_v48  ;;  %v3649_v20 = vsub.f32 %v14437_v1, %v10913_v2 }
 0x63a   : > { %14431 = vst [vmem:[#allocation323_spill] sm:$0xff] %v10932_v36  ;;  %v6945_v14 = vpop.eup %6944  ;;  %5279 = vmatpush2.bf16.xpose.msra.mxu0 %v10928_v46  ;;  %14433 = vst [vmem:[#allocation324_spill] sm:$0xff] %v10939_v43  ;;  %6970 = vpow2.f32 %v4038_v5  ;;  %v4548_v5 = vmul.f32 1.442695, %v3648_v22  ;;  %v4510_v41 = vmul.f32 1.442695, %v3629_v21  ;;  %v3657_v22 = vsub.f32 %v14120_v59, %v10945_v12 }
 0x63b   : > { %v10943_v25 = vpop.eup %6946  ;;  %5280 = vmatprep.subr.bf16.mxu0 %v10932_v36  ;;  %v10948_v56 = vpack.c.bf16 %v6941_v35, %v6945_v14  ;;  %6972 = vpow2.f32 %v4058_v4  ;;  %v4526_v35 = vmul.f32 1.442695, %v3637_v40  ;;  %v14438_v4 = vld [vmem:[#allocation195_spill] sm:$0xff]  ;;  %v4530_v1 = vmul.f32 1.442695, %v3639_v15 }
 0x63c   : > { %v10952_v52 = vpop.eup %6948  ;;  %6974 = vpow2.f32 %v4524_v33  ;;  %5332 = vmatpush2.bf16.xpose.msra.mxu1 %v10939_v43  ;;  %v3631_v31 = vsub.f32 %v14438_v4, %v10599_v13  ;;  %v3656_v33 = vsub.f32 %v14098_v8, %v10945_v12  ;;  %v10970_v40 = vpack.c.bf16 %v10886_v37, %v10802_v17  ;;  %v14443_v17 = vld [vmem:[#allocation186_spill] sm:$0xff]  ;;  %v6450_v36 = vld [vmem:[#allocation3 + $0x48] ss:$48 sps:$4 sm:$0xff]  }
 0x63d   : > { %14435 = vst [vmem:[#allocation321_spill] sm:$0xff] %v10948_v56  ;;  %v10957_v61 = vpop.eup %6950  ;;  %5333 = vmatprep.subr.bf16.mxu1 %v10948_v56  ;;  %6976 = vpow2.f32 %v4042_v32  ;;  %v4550_v56 = vmul.f32 1.442695, %v3649_v20  ;;  %v3658_v32 = vsub.f32 %v14125_v45, %v10945_v12  ;;  %v10981_v45 = vpack.c.bf16 %v10899_v47, %v10806_v0 }
 0x63e   : > { %v6953_v14 = vpop.eup %6952  ;;  %6978 = vpow2.f32 %v4528_v55  ;;  %14439 = vst [vmem:[#allocation325_spill] sm:$0xff] %v10970_v40  ;;  %v4514_v21 = vmul.f32 1.442695, %v3631_v31  ;;  %v4564_v4 = vmul.f32 1.442695, %v3656_v33  ;;  %v3613_v37 = vsub.f32 %v14443_v17, %v10613_v11  ;;  %v14445_v31 = vld [vmem:[#allocation191_spill] sm:$0xff] }
 0x63f   : > { %v6955_v58 = vpop.eup %6954  ;;  %6980 = vpow2.f32 %v4492_v16  ;;  %v14441_v16 = vld [vmem:[#allocation190_spill] sm:$0xff]  ;;  %14442 = vst [vmem:[#allocation326_spill] sm:$0xff] %v10981_v45  ;;  %v3659_v0 = vsub.f32 %v14128_v53, %v10945_v12  ;;  %v4568_v47 = vmul.f32 1.442695, %v3658_v32  ;;  %v14447_v53 = vld [vmem:[#allocation185_spill] sm:$0xff]  ;;  %v14448_v17 = vld [vmem:[#allocation456_spill] sm:$0xff] }
 0x640   : > { %v6957_v43 = vpop.eup %6956  ;;  %6982 = vpow2.f32 %v4548_v5  ;;  %v10974_v8 = vpack.c.bf16 %v6953_v14, %v6955_v58  ;;  %v3621_v59 = vsub.f32 %v14441_v16, %v10634_v62  ;;  %v4566_v5 = vmul.f32 1.442695, %v3657_v22  ;;  %v14446_v58 = vld [vmem:[#allocation187_spill] sm:$0xff] }
 0x641   : > { %v10972_v55 = vpop.eup %6958  ;;  %6984 = vpow2.f32 %v4526_v35  ;;  %v3623_v14 = vsub.f32 %v14445_v31, %v10634_v62  ;;  %v3615_v22 = vsub.f32 %v14446_v58, %v10613_v11  ;;  %v3651_v16 = vsub.f32 %v14105_v6, %v10913_v2 }
 0x642   : > { %14440 = vst [vmem:[#allocation322_spill] sm:$0xff] %v10974_v8  ;;  %v6961_v15 = vpop.eup %6960  ;;  %5281 = vmatpush2.bf16.xpose.msra.mxu0 %v10970_v40  ;;  %6986 = vpow2.f32 %v4510_v41  ;;  %v3614_v32 = vsub.f32 %v14447_v53, %v10613_v11  ;;  %v3650_v31 = vsub.f32 %v14448_v17, %v10913_v2  ;;  %v4570_v58 = vmul.f32 1.442695, %v3659_v0  ;;  %v14452_v17 = vld [vmem:[#allocation182_spill] sm:$0xff]  ;;  %v14472_v40 = vld [vmem:[#allocation169_spill] sm:$0xff] }
 0x643   : > { %v10985_v20 = vpop.eup %6962  ;;  %5282 = vmatprep.subr.bf16.mxu0 %v10974_v8  ;;  %v10988_v35 = vpack.c.bf16 %v6957_v43, %v6961_v15  ;;  %6988 = vpow2.f32 %v4530_v1  ;;  %v4494_v43 = vmul.f32 1.442695, %v3621_v59  ;;  %v14449_v59 = vld [vmem:[#allocation189_spill] sm:$0xff]  ;;  %v11012_v6 = vpack.c.bf16 %v10930_v3, %v10822_v29  ;;  %v14454_v29 = vld [vmem:[#allocation178_spill] sm:$0xff] }
 0x644   : > { %v10992_v33 = vpop.eup %6964  ;;  %6990 = vpow2.f32 %v4550_v56  ;;  %5334 = vmatpush2.bf16.xpose.msra.mxu1 %v10981_v45  ;;  %v4478_v56 = vmul.f32 1.442695, %v3613_v37  ;;  %v3622_v45 = vsub.f32 %v14449_v59, %v10634_v62  ;;  %v4482_v53 = vmul.f32 1.442695, %v3615_v22  ;;  %v14456_v22 = vld [vmem:[#allocation183_spill] sm:$0xff] }
 0x645   : > { %14444 = vst [vmem:[#allocation61_spill] sm:$0xff] %v10988_v35  ;;  %v10997_v41 = vpop.eup %6966  ;;  %5335 = vmatprep.subr.bf16.mxu1 %v10988_v35  ;;  %6992 = vpow2.f32 %v4514_v21  ;;  %v4498_v35 = vmul.f32 1.442695, %v3623_v14  ;;  %14450 = vst [vmem:[#allocation503_spill] sm:$0xff] %v11012_v6  ;;  %v4554_v8 = vmul.f32 1.442695, %v3651_v16  ;;  %v11023_v0 = vpack.c.bf16 %v10943_v25, %v10864_v7 }
 0x646   : > { %v6969_v1 = vpop.eup %6968  ;;  %6994 = vpow2.f32 %v4564_v4  ;;  %v3597_v3 = vsub.f32 %v14454_v29, %v10632_v19  ;;  %v3607_v16 = vsub.f32 %v14456_v22, %v10646_v24  ;;  %v4496_v59 = vmul.f32 1.442695, %v3622_v45 }
 0x647   : > { %v6971_v15 = vpop.eup %6970  ;;  %6996 = vpow2.f32 %v4566_v5  ;;  %v3605_v5 = vsub.f32 %v14452_v17, %v10646_v24  ;;  %14453 = vst [vmem:[#allocation69_spill] sm:$0xff] %v11023_v0  ;;  %v4480_v45 = vmul.f32 1.442695, %v3614_v32 }
 0x648   : > { %v6973_v21 = vpop.eup %6972  ;;  %6998 = vpow2.f32 %v4568_v47  ;;  %v11016_v37 = vpack.c.bf16 %v6969_v1, %v6971_v15  ;;  %v4552_v1 = vmul.f32 1.442695, %v3650_v31 }
 0x649   : > { %v11014_v4 = vpop.eup %6974  ;;  %7000 = vpow2.f32 %v4494_v43  ;;  %v4462_v25 = vmul.f32 1.442695, %v3605_v5 }
 0x64a   : > { %14451 = vst [vmem:[#allocation312_spill] sm:$0xff] %v11016_v37  ;;  %v6977_v14 = vpop.eup %6976  ;;  %5283 = vmatpush2.bf16.xpose.msra.mxu0 %v11012_v6  ;;  %7002 = vpow2.f32 %v4478_v56  ;;  %v14457_v56 = vld [vmem:[#allocation179_spill] sm:$0xff] }
 0x64b   : > { %v11027_v47 = vpop.eup %6978  ;;  %5284 = vmatprep.subr.bf16.mxu0 %v11016_v37  ;;  %v11030_v43 = vpack.c.bf16 %v6973_v21, %v6977_v14  ;;  %7004 = vpow2.f32 %v4498_v35  ;;  %v3599_v31 = vsub.f32 %v14457_v56, %v10632_v19  ;;  %v14458_v35 = vld [vmem:[#allocation176_spill] sm:$0xff]  ;;  %v4446_v14 = vmul.f32 1.442695, %v3597_v3  ;;  %v14461_v56 = vld [vmem:[#allocation181_spill] sm:$0xff] }
 0x64c   : > { %v11034_v15 = vpop.eup %6980  ;;  %7006 = vpow2.f32 %v4570_v58  ;;  %5336 = vmatpush2.bf16.xpose.msra.mxu1 %v11023_v0  ;;  %v3596_v17 = vsub.f32 %v14458_v35, %v10632_v19  ;;  %v14459_v58 = vld [vmem:[#allocation180_spill] sm:$0xff]  ;;  %v4466_v0 = vmul.f32 1.442695, %v3607_v16  ;;  %v11052_v35 = vpack.c.bf16 %v10952_v52, %v10906_v44  ;;  %v14466_v44 = vld [vmem:[#allocation170_spill] sm:$0xff] }
 0x64d   : > { %14455 = vst [vmem:[#allocation316_spill] sm:$0xff] %v11030_v43  ;;  %v11037_v7 = vpop.eup %6982  ;;  %5337 = vmatprep.subr.bf16.mxu1 %v11030_v43  ;;  %7008 = vpow2.f32 %v4482_v53  ;;  %v3604_v22 = vsub.f32 %v14459_v58, %v10646_v24  ;;  %v14460_v53 = vld [vmem:[#allocation177_spill] sm:$0xff]  ;;  %v3606_v43 = vsub.f32 %v14461_v56, %v10646_v24  ;;  %v4450_v3 = vmul.f32 1.442695, %v3599_v31  ;;  %v14468_v31 = vld [vmem:[#allocation175_spill] sm:$0xff]  ;;  %v14469_v56 = vld [vmem:[#allocation168_spill] sm:$0xff] }
 0x64e   : > { %v6985_v21 = vpop.eup %6984  ;;  %7010 = vpow2.f32 %v4554_v8  ;;  %v3598_v5 = vsub.f32 %v14460_v53, %v10632_v19  ;;  %14462 = vst [vmem:[#allocation317_spill] sm:$0xff] %v11052_v35  ;;  %v4444_v6 = vmul.f32 1.442695, %v3596_v17  ;;  %v3581_v52 = vsub.f32 %v14466_v44, %v10644_v30  ;;  %v5067_v44 = vld [vmem:[#allocation3 + $0x38] sm:$0xff] }
 0x64f   : > { %v6987_v29 = vpop.eup %6986  ;;  %7012 = vpow2.f32 %v4552_v1  ;;  %v14464_v1 = vld [vmem:[#allocation174_spill] sm:$0xff]  ;;  %v3591_v17 = vsub.f32 %v14468_v31, %v10652_v39 }
 0x650   : > { %v6989_v37 = vpop.eup %6988  ;;  %7014 = vpow2.f32 %v4496_v59  ;;  %v11056_v32 = vpack.c.bf16 %v6985_v21, %v6987_v29  ;;  %v3589_v16 = vsub.f32 %v14464_v1, %v10652_v39  ;;  %v11063_v59 = vpack.c.bf16 %v10957_v61, %v10911_v54 }
 0x651   : > { %v11054_v8 = vpop.eup %6990  ;;  %7016 = vpow2.f32 %v4462_v25  ;;  %v4460_v21 = vmul.f32 1.442695, %v3604_v22  ;;  %v3580_v54 = vsub.f32 %v14469_v56, %v10644_v30  ;;  %v4464_v61 = vmul.f32 1.442695, %v3606_v43  ;;  %v6447_v22 = vld [vmem:[#allocation3 + $0x10] ss:$48 sps:$4 sm:$0xff]  }
 0x652   : > { %14463 = vst [vmem:[#allocation314_spill] sm:$0xff] %v11056_v32  ;;  %v6993_v58 = vpop.eup %6992  ;;  %5285 = vmatpush2.bf16.xpose.msra.mxu0 %v11052_v35  ;;  %14465 = vst [vmem:[#allocation318_spill] sm:$0xff] %v11063_v59  ;;  %7018 = vpow2.f32 %v4446_v14  ;;  %v4430_v1 = vmul.f32 1.442695, %v3589_v16  ;;  %v4414_v43 = vmul.f32 1.442695, %v3581_v52 }
 0x653   : > { %v6995_v53 = vpop.eup %6994  ;;  %5360 = vmatprep.subr.bf16.mxu0 %v11056_v32  ;;  %v11068_v25 = vpack.c.bf16 %v6989_v37, %v6993_v58  ;;  %7020 = vpow2.f32 %v4466_v0  ;;  %v14470_v37 = vld [vmem:[#allocation171_spill] sm:$0xff]  ;;  %v5063_v58 = vld [vmem:[#allocation3 + $0x58] sm:$0xff]  ;;  %v14471_v32 = vld [vmem:[#allocation172_spill] sm:$0xff]  ;;  %v4412_v27 = vmul.f32 1.442695, %v3580_v54  ;;  %v11097_v54 = vpack.c.bf16 %v11027_v47, %v10985_v20 }
 0x654   : > { %v6997_v29 = vpop.eup %6996  ;;  %7022 = vpow2.f32 %v4480_v45  ;;  %5338 = vmatpush2.bf16.xpose.msra.mxu1 %v11063_v59  ;;  %v3583_v0 = vsub.f32 %v14470_v37, %v10644_v30  ;;  %v4448_v45 = vmul.f32 1.442695, %v3598_v5  ;;  %v3588_v56 = vsub.f32 %v14471_v32, %v10652_v39  ;;  %v6455_v35 = vld [vmem:[#allocation3 + $0x34] ss:$-16 sps:$4 sm:$0xff]  }
 0x655   : > { %14467 = vst [vmem:[#allocation315_spill] sm:$0xff] %v11068_v25  ;;  %v6999_v14 = vpop.eup %6998  ;;  %5413 = vmatprep.subr.bf16.mxu1 %v11068_v25  ;;  %7024 = vpow2.f32 %v4450_v3  ;;  %v3582_v25 = vsub.f32 %v14472_v40, %v10644_v30  ;;  %v14473_v3 = vld [vmem:[#allocation173_spill] sm:$0xff]  ;;  %v4434_v37 = vmul.f32 1.442695, %v3591_v17  ;;  %v11088_v5 = vcombine.high %v5063_v58, %v5067_v44  ;;  %14478 = vst [vmem:[#allocation305_spill] sm:$0xff] %v11097_v54 }
 0x656   : > { %v7001_v31 = vpop.eup %7000  ;;  %7026 = vpow2.f32 %v4444_v6  ;;  %v3590_v16 = vsub.f32 %v14473_v3, %v10652_v39  ;;  %v11086_v6 = vpack.c.bf16 %v11014_v4, %v10972_v55  ;;  %v4418_v40 = vmul.f32 1.442695, %v3583_v0  ;;  %v14479_v55 = vld [vmem:[#allocation162_spill] sm:$0xff] }
 0x657   : > { %v7003_v59 = vpop.eup %7002  ;;  %7028 = vpow2.f32 %v4460_v21  ;;  %14475 = vst [vmem:[#allocation313_spill] sm:$0xff] %v11088_v5  ;;  %v14477_v21 = vld [vmem:[#allocation166_spill] sm:$0xff]  ;;  %v4428_v17 = vmul.f32 1.442695, %v3588_v56  ;;  %v3565_v4 = vsub.f32 %v14479_v55, %v10650_v9  ;;  %v11109_v20 = vpack.c.bf16 %v6997_v29, %v11054_v8  ;;  %v14487_v29 = vld [vmem:[#allocation160_spill] sm:$0xff] }
 0x658   : > { %v7005_v46 = vpop.eup %7004  ;;  %7030 = vpow2.f32 %v4464_v61  ;;  %14474 = vst [vmem:[#allocation319_spill] sm:$0xff] %v11086_v6  ;;  %v11090_v52 = vpack.c.bf16 %v7001_v31, %v7003_v59  ;;  %v3573_v3 = vsub.f32 %v14477_v21, %v10666_v23  ;;  %v4432_v61 = vmul.f32 1.442695, %v3590_v16  ;;  %v6453_v56 = vld [vmem:[#allocation3 + $0x30] ss:$-16 sps:$4 sm:$0xff]  }
 0x659   : > { %v7007_v32 = vpop.eup %7006  ;;  %5287 = vmatmul.mubr.bf16.vlgmr.msra.gmra.mxu0 %v6447_v22  ;;  %7032 = vpow2.f32 %v4430_v1  ;;  %v14481_v1 = vld [vmem:[#allocation167_spill] sm:$0xff]  ;;  %14482 = vst [vmem:[#allocation308_spill] sm:$0xff] %v11109_v20  ;;  %v4416_v8 = vmul.f32 1.442695, %v3582_v25 }
 0x65a   : > { %14476 = vst [vmem:[#allocation304_spill] sm:$0xff] %v11090_v52  ;;  %v7009_v60 = vpop.eup %7008  ;;  %5361 = vmatpush1.bf16.xpose.msra.mxu0 %v11086_v6  ;;  %7034 = vpow2.f32 %v4414_v43  ;;  %5296 = vmatprep.mubr.bf16.mxu0 %v6455_v35  ;;  %v3575_v0 = vsub.f32 %v14481_v1, %v10666_v23  ;;  %v14485_v35 = vld [vmem:[#allocation163_spill] sm:$0xff]  ;;  %v11133_v1 = vpack.c.bf16 %v11034_v15, %v10997_v41 }
 0x65b   : > { %v7011_v59 = vpop.eup %7010  ;;  %5340 = vmatmul.mubr.bf16.vlgmr.msra.gmra.mxu1 %v6450_v36  ;;  %5362 = vmatprep.subr.bf16.mxu0 %v11090_v52  ;;  %v11102_v22 = vpack.c.bf16 %v7005_v46, %v7009_v60  ;;  %7036 = vpow2.f32 %v4434_v37  ;;  %v11114_v36 = vpack.c.bf16 %v6995_v53, %v11037_v7  ;;  %v4398_v46 = vmul.f32 1.442695, %v3573_v3  ;;  %v14488_v53 = vld [vmem:[#allocation164_spill] sm:$0xff]  ;;  %v7488_v15 = vld [vmem:[#allocation3 + $0x2c] ss:$56 sps:$4 sm:$0xff]  }
 0x65c   : > { %v7013_v31 = vpop.eup %7012  ;;  %7038 = vpow2.f32 %v4448_v45  ;;  %5414 = vmatpush1.bf16.xpose.msra.mxu1 %v11097_v54  ;;  %5349 = vmatprep.mubr.bf16.mxu1 %v11088_v5  ;;  %v11111_v47 = vpack.c.bf16 %v7007_v32, %v7011_v59  ;;  %v3567_v45 = vsub.f32 %v14485_v35, %v10650_v9  ;;  %v3564_v37 = vsub.f32 %v14487_v29, %v10650_v9  ;;  %v14490_v59 = vld [vmem:[#allocation161_spill] sm:$0xff]  ;;  %v14496_v29 = vld [vmem:[#allocation154_spill] sm:$0xff] }
 0x65d   : > { %14480 = vst [vmem:[#allocation296_spill] sm:$0xff] %v11102_v22  ;;  %14484 = vst [vmem:[#allocation300_spill] sm:$0xff] %v11114_v36  ;;  %v7015_v60 = vpop.eup %7014  ;;  %5415 = vmatprep.subr.bf16.mxu1 %v11102_v22  ;;  %7040 = vpow2.f32 %v4418_v40  ;;  %v11119_v43 = vpack.c.bf16 %v6999_v14, %v7013_v31  ;;  %v4382_v32 = vmul.f32 1.442695, %v3565_v4  ;;  %v3572_v21 = vsub.f32 %v14488_v53, %v10666_v23  ;;  %v14571_v36 = vld [vmem:[#allocation85_spill] sm:$0xff] }
 0x65e   : > { %14483 = vst [vmem:[#allocation309_spill] sm:$0xff] %v11111_v47  ;;  %v7017_v16 = vpop.eup %7016  ;;  %7042 = vpow2.f32 %v4412_v27  ;;  %v4402_v40 = vmul.f32 1.442695, %v3575_v0  ;;  %v11125_v3 = vcombine.low %v5063_v58, %v5067_v44  ;;  %v3566_v14 = vsub.f32 %v14490_v59, %v10650_v9  ;;  %v14491_v27 = vld [vmem:[#allocation165_spill] sm:$0xff]  ;;  %14492 = vst [vmem:[#allocation307_spill] sm:$0xff] %v11133_v1  ;;  %v14494_v58 = vld [vmem:[#allocation158_spill] sm:$0xff] }
 0x65f   : > { %14486 = vst [vmem:[#allocation306_spill] sm:$0xff] %v11119_v43  ;;  %v7019_v7 = vpop.eup %7018  ;;  %7044 = vpow2.f32 %v4428_v17  ;;  %v3574_v25 = vsub.f32 %v14491_v27, %v10666_v23  ;;  %v4386_v31 = vmul.f32 1.442695, %v3567_v45  ;;  %v3557_v44 = vsub.f32 %v14494_v58, %v10688_v26  ;;  %v14498_v45 = vld [vmem:[#allocation159_spill] sm:$0xff]  ;;  %v14500_v27 = vld [vmem:[#allocation152_spill] sm:$0xff] }
 0x660   : > { %14489 = vst [vmem:[#allocation310_spill] sm:$0xff] %v11125_v3  ;;  %v7021_v55 = vpop.eup %7020  ;;  %7046 = vpow2.f32 %v4432_v61  ;;  %v11135_v17 = vpack.c.bf16 %v7017_v16, %v7019_v7  ;;  %v4380_v35 = vmul.f32 1.442695, %v3564_v37  ;;  %v3549_v41 = vsub.f32 %v14496_v29, %v10664_v63 }
 0x661   : > { %v7023_v4 = vpop.eup %7022  ;;  %7048 = vpow2.f32 %v4398_v46  ;;  %5297 = vmatmul.mubr.bf16.gmra.mxu0 %v6453_v56  ;;  %v4396_v7 = vmul.f32 1.442695, %v3572_v21  ;;  %v3559_v56 = vsub.f32 %v14498_v45, %v10688_v26  ;;  %v4400_v37 = vmul.f32 1.442695, %v3574_v25 }
 0x662   : > { %14493 = vst [vmem:[#allocation311_spill] sm:$0xff] %v11135_v17  ;;  %v7025_v0 = vpop.eup %7024  ;;  %5363 = vmatpush1.bf16.xpose.msra.mxu0 %v11133_v1  ;;  %v11140_v61 = vpack.c.bf16 %v7015_v60, %v7023_v4  ;;  %7050 = vpow2.f32 %v4382_v32  ;;  %5392 = vmatprep.mubr.bf16.mxu0 %v7488_v15  ;;  %v7489_v32 = vld [vmem:[#allocation3 + $0x54] ss:$-80 sps:$4 sm:$0xff]   ;;  %v4366_v21 = vmul.f32 1.442695, %v3557_v44  ;;  %v3548_v4 = vsub.f32 %v14500_v27, %v10664_v63 }
 0x663   : > { %v7027_v16 = vpop.eup %7026  ;;  %5364 = vmatprep.subr.bf16.mxu0 %v11135_v17  ;;  %v11145_v46 = vpack.c.bf16 %v7021_v55, %v7025_v0  ;;  %7052 = vpow2.f32 %v4402_v40  ;;  %5350 = vmatmul.mubr.bf16.gmra.mxu1 %v11125_v3  ;;  %v14499_v55 = vld [vmem:[#allocation155_spill] sm:$0xff]  ;;  %v4350_v58 = vmul.f32 1.442695, %v3549_v41  ;;  %v4384_v25 = vmul.f32 1.442695, %v3566_v14  ;;  %v14501_v0 = vld [vmem:[#allocation156_spill] sm:$0xff] }
 0x664   : > { %14495 = vst [vmem:[#allocation298_spill] sm:$0xff] %v11140_v61  ;;  %v7029_v60 = vpop.eup %7028  ;;  %7054 = vpow2.f32 %v4416_v8  ;;  %5416 = vmatpush1.bf16.xpose.msra.mxu1 %v11140_v61  ;;  %5445 = vmatprep.mubr.bf16.mxu1 %v7489_v32  ;;  %v3551_v40 = vsub.f32 %v14499_v55, %v10664_v63  ;;  %v3556_v29 = vsub.f32 %v14501_v0, %v10688_v26  ;;  %v4370_v15 = vmul.f32 1.442695, %v3559_v56  ;;  %v14503_v32 = vld [vmem:[#allocation157_spill] sm:$0xff]  ;;  %v14506_v41 = vld [vmem:[#allocation150_spill] sm:$0xff] }
 0x665   : > { %14497 = vst [vmem:[#allocation302_spill] sm:$0xff] %v11145_v46  ;;  %v7031_v53 = vpop.eup %7030  ;;  %5417 = vmatprep.subr.bf16.mxu1 %v11145_v46  ;;  %7056 = vpow2.f32 %v4386_v31  ;;  %v14502_v31 = vld [vmem:[#allocation153_spill] sm:$0xff]  ;;  %v3558_v55 = vsub.f32 %v14503_v32, %v10688_v26  ;;  %v4348_v56 = vmul.f32 1.442695, %v3548_v4  ;;  %v14547_v1 = vld [vmem:[#allocation250_spill] sm:$0xff] }
 0x666   : > { %v7033_v59 = vpop.eup %7032  ;;  %7058 = vpow2.f32 %v4380_v35  ;;  %v3550_v44 = vsub.f32 %v14502_v31, %v10664_v63  ;;  %v11162_v35 = vpack.c.bf16 %v7029_v60, %v7027_v16  ;;  %v4354_v14 = vmul.f32 1.442695, %v3551_v40 }
 0x667   : > { %v7035_v8 = vpop.eup %7034  ;;  %7060 = vpow2.f32 %v4396_v7  ;;  %v3541_v7 = vsub.f32 %v14506_v41, %v10704_v49  ;;  %v4364_v60 = vmul.f32 1.442695, %v3556_v29  ;;  %v4368_v4 = vmul.f32 1.442695, %v3558_v55 }
 0x668   : > { %v7037_v45 = vpop.eup %7036  ;;  %7062 = vpow2.f32 %v4400_v37  ;;  %14504 = vst [vmem:[#allocation299_spill] sm:$0xff] %v11162_v35  ;;  %v11164_v27 = vpack.c.bf16 %v7033_v59, %v7035_v8  ;;  %v14508_v37 = vld [vmem:[#allocation146_spill] sm:$0xff] }
 0x669   : > { %v7039_v46 = vpop.eup %7038  ;;  %7064 = vpow2.f32 %v4366_v21  ;;  %v3533_v31 = vsub.f32 %v14508_v37, %v10686_v57  ;;  %v14510_v21 = vld [vmem:[#allocation151_spill] sm:$0xff]  ;;  %v4352_v37 = vmul.f32 1.442695, %v3550_v44 }
 0x66a   : > { %14505 = vst [vmem:[#allocation303_spill] sm:$0xff] %v11164_v27  ;;  %v7041_v0 = vpop.eup %7040  ;;  %5365 = vmatpush1.bf16.xpose.msra.mxu0 %v11162_v35  ;;  %v11169_v61 = vpack.c.bf16 %v7031_v53, %v7039_v46  ;;  %7066 = vpow2.f32 %v4350_v58  ;;  %v3543_v40 = vsub.f32 %v14510_v21, %v10704_v49  ;;  %v4334_v53 = vmul.f32 1.442695, %v3541_v7  ;;  %v14511_v58 = vld [vmem:[#allocation147_spill] sm:$0xff] }
 0x66b   : > { %v7043_v16 = vpop.eup %7042  ;;  %5366 = vmatprep.subr.bf16.mxu0 %v11164_v27  ;;  %v11174_v59 = vpack.c.bf16 %v7037_v45, %v7041_v0  ;;  %7068 = vpow2.f32 %v4370_v15  ;;  %v3535_v29 = vsub.f32 %v14511_v58, %v10686_v57  ;;  %v14512_v15 = vld [vmem:[#allocation144_spill] sm:$0xff]  ;;  %v4318_v41 = vmul.f32 1.442695, %v3533_v31  ;;  %v14515_v58 = vld [vmem:[#allocation149_spill] sm:$0xff]  ;;  %v14518_v31 = vld [vmem:[#allocation142_spill] sm:$0xff] }
 0x66c   : > { %14507 = vst [vmem:[#allocation301_spill] sm:$0xff] %v11169_v61  ;;  %v7045_v8 = vpop.eup %7044  ;;  %7070 = vpow2.f32 %v4384_v25  ;;  %5418 = vmatpush1.bf16.xpose.msra.mxu1 %v11169_v61  ;;  %v3532_v45 = vsub.f32 %v14512_v15, %v10686_v57  ;;  %v14513_v25 = vld [vmem:[#allocation148_spill] sm:$0xff]  ;;  %v4338_v21 = vmul.f32 1.442695, %v3543_v40 }
 0x66d   : > { %14509 = vst [vmem:[#allocation294_spill] sm:$0xff] %v11174_v59  ;;  %v7047_v46 = vpop.eup %7046  ;;  %5419 = vmatprep.subr.bf16.mxu1 %v11174_v59  ;;  %7072 = vpow2.f32 %v4354_v14  ;;  %v3540_v55 = vsub.f32 %v14513_v25, %v10704_v49  ;;  %v14514_v14 = vld [vmem:[#allocation145_spill] sm:$0xff]  ;;  %v3542_v59 = vsub.f32 %v14515_v58, %v10704_v49  ;;  %v4322_v44 = vmul.f32 1.442695, %v3535_v29 }
 0x66e   : > { %v7049_v32 = vpop.eup %7048  ;;  %7074 = vpow2.f32 %v4348_v56  ;;  %v3534_v7 = vsub.f32 %v14514_v14, %v10686_v57  ;;  %v11190_v56 = vpack.c.bf16 %v7045_v8, %v7043_v16  ;;  %v4316_v40 = vmul.f32 1.442695, %v3532_v45 }
 0x66f   : > { %v7051_v0 = vpop.eup %7050  ;;  %7076 = vpow2.f32 %v4364_v60  ;;  %v3525_v60 = vsub.f32 %v14518_v31, %v10720_v28  ;;  %v4332_v8 = vmul.f32 1.442695, %v3540_v55  ;;  %v4336_v45 = vmul.f32 1.442695, %v3542_v59  ;;  %v14525_v59 = vld [vmem:[#allocation140_spill] sm:$0xff] }
 0x670   : > { %v7053_v61 = vpop.eup %7052  ;;  %7078 = vpow2.f32 %v4368_v4  ;;  %14516 = vst [vmem:[#allocation290_spill] sm:$0xff] %v11190_v56  ;;  %v11192_v15 = vpack.c.bf16 %v7049_v32, %v7051_v0  ;;  %v14520_v4 = vld [vmem:[#allocation138_spill] sm:$0xff] }
 0x671   : > { %v7055_v27 = vpop.eup %7054  ;;  %7080 = vpow2.f32 %v4334_v53  ;;  %v3517_v14 = vsub.f32 %v14520_v4, %v10702_v38  ;;  %v14522_v53 = vld [vmem:[#allocation143_spill] sm:$0xff]  ;;  %v4320_v4 = vmul.f32 1.442695, %v3534_v7 }
 0x672   : > { %14517 = vst [vmem:[#allocation295_spill] sm:$0xff] %v11192_v15  ;;  %v7057_v25 = vpop.eup %7056  ;;  %5367 = vmatpush1.bf16.xpose.msra.mxu0 %v11190_v56  ;;  %v11197_v35 = vpack.c.bf16 %v7047_v46, %v7055_v27  ;;  %7082 = vpow2.f32 %v4318_v41  ;;  %v3527_v29 = vsub.f32 %v14522_v53, %v10720_v28  ;;  %v4302_v46 = vmul.f32 1.442695, %v3525_v60  ;;  %v14523_v41 = vld [vmem:[#allocation139_spill] sm:$0xff] }
 0x673   : > { %v7059_v16 = vpop.eup %7058  ;;  %5368 = vmatprep.subr.bf16.mxu0 %v11192_v15  ;;  %v11202_v32 = vpack.c.bf16 %v7053_v61, %v7057_v25  ;;  %7084 = vpow2.f32 %v4338_v21  ;;  %v3519_v55 = vsub.f32 %v14523_v41, %v10702_v38  ;;  %v14524_v61 = vld [vmem:[#allocation136_spill] sm:$0xff]  ;;  %v4286_v31 = vmul.f32 1.442695, %v3517_v14  ;;  %v14527_v41 = vld [vmem:[#allocation141_spill] sm:$0xff]  ;;  %v14530_v14 = vld [vmem:[#allocation262_spill] sm:$0xff] }
 0x674   : > { %14519 = vst [vmem:[#allocation297_spill] sm:$0xff] %v11197_v35  ;;  %v7061_v0 = vpop.eup %7060  ;;  %7086 = vpow2.f32 %v4352_v37  ;;  %5420 = vmatpush1.bf16.xpose.msra.mxu1 %v11197_v35  ;;  %v3516_v21 = vsub.f32 %v14524_v61, %v10702_v38  ;;  %v3524_v37 = vsub.f32 %v14525_v59, %v10720_v28  ;;  %v4306_v53 = vmul.f32 1.442695, %v3527_v29 }
 0x675   : > { %14521 = vst [vmem:[#allocation291_spill] sm:$0xff] %v11202_v32  ;;  %v7063_v27 = vpop.eup %7062  ;;  %5421 = vmatprep.subr.bf16.mxu1 %v11202_v32  ;;  %7088 = vpow2.f32 %v4322_v44  ;;  %v14526_v44 = vld [vmem:[#allocation137_spill] sm:$0xff]  ;;  %v3526_v32 = vsub.f32 %v14527_v41, %v10720_v28  ;;  %v4290_v7 = vmul.f32 1.442695, %v3519_v55 }
 0x676   : > { %v7065_v58 = vpop.eup %7064  ;;  %7090 = vpow2.f32 %v4316_v40  ;;  %v3518_v60 = vsub.f32 %v14526_v44, %v10702_v38  ;;  %v11218_v40 = vpack.c.bf16 %v7061_v0, %v7059_v16  ;;  %v4284_v29 = vmul.f32 1.442695, %v3516_v21  ;;  %v14533_v44 = vld [vmem:[#allocation258_spill] sm:$0xff] }
 0x677   : > { %v7067_v25 = vpop.eup %7066  ;;  %7092 = vpow2.f32 %v4332_v8  ;;  %v3765_v8 = vsub.f32 %v14530_v14, %v10734_v42  ;;  %v4300_v0 = vmul.f32 1.442695, %v3524_v37  ;;  %v4304_v21 = vmul.f32 1.442695, %v3526_v32  ;;  %v14538_v32 = vld [vmem:[#allocation260_spill] sm:$0xff] }
 0x678   : > { %v7069_v35 = vpop.eup %7068  ;;  %7094 = vpow2.f32 %v4336_v45  ;;  %14528 = vst [vmem:[#allocation288_spill] sm:$0xff] %v11218_v40  ;;  %v11220_v61 = vpack.c.bf16 %v7065_v58, %v7067_v25  ;;  %v14532_v45 = vld [vmem:[#allocation91_spill] sm:$0xff] }
 0x679   : > { %v7071_v15 = vpop.eup %7070  ;;  %7096 = vpow2.f32 %v4302_v46  ;;  %v3757_v41 = vsub.f32 %v14533_v44, %v14532_v45  ;;  %v14535_v46 = vld [vmem:[#allocation263_spill] sm:$0xff] }
 0x67a   : > { %14529 = vst [vmem:[#allocation292_spill] sm:$0xff] %v11220_v61  ;;  %v7073_v59 = vpop.eup %7072  ;;  %5369 = vmatpush1.bf16.xpose.msra.mxu0 %v11218_v40  ;;  %v11225_v56 = vpack.c.bf16 %v7063_v27, %v7071_v15  ;;  %7098 = vpow2.f32 %v4286_v31  ;;  %v3767_v55 = vsub.f32 %v14535_v46, %v10734_v42  ;;  %v4782_v27 = vmul.f32 1.442695, %v3765_v8  ;;  %v14536_v31 = vld [vmem:[#allocation259_spill] sm:$0xff] }
 0x67b   : > { %v7075_v16 = vpop.eup %7074  ;;  %5370 = vmatprep.subr.bf16.mxu0 %v11220_v61  ;;  %v11230_v58 = vpack.c.bf16 %v7069_v35, %v7073_v59  ;;  %7100 = vpow2.f32 %v4306_v53  ;;  %v3759_v37 = vsub.f32 %v14536_v31, %v14532_v45  ;;  %v14537_v35 = vld [vmem:[#allocation256_spill] sm:$0xff]  ;;  %v4766_v59 = vmul.f32 1.442695, %v3757_v41  ;;  %v14540_v31 = vld [vmem:[#allocation261_spill] sm:$0xff] }
 0x67c   : > { %14531 = vst [vmem:[#allocation293_spill] sm:$0xff] %v11225_v56  ;;  %v7077_v25 = vpop.eup %7076  ;;  %7102 = vpow2.f32 %v4320_v4  ;;  %5422 = vmatpush1.bf16.xpose.msra.mxu1 %v11225_v56  ;;  %v3756_v53 = vsub.f32 %v14537_v35, %v14532_v45  ;;  %v4288_v46 = vmul.f32 1.442695, %v3518_v60  ;;  %v3764_v4 = vsub.f32 %v14538_v32, %v10734_v42  ;;  %v14543_v41 = vld [vmem:[#allocation89_spill] sm:$0xff] }
 0x67d   : > { %14534 = vst [vmem:[#allocation286_spill] sm:$0xff] %v11230_v58  ;;  %v7079_v15 = vpop.eup %7078  ;;  %5423 = vmatprep.subr.bf16.mxu1 %v11230_v58  ;;  %7104 = vpow2.f32 %v4290_v7  ;;  %v4786_v56 = vmul.f32 1.442695, %v3767_v55  ;;  %v14539_v7 = vld [vmem:[#allocation257_spill] sm:$0xff]  ;;  %v3766_v58 = vsub.f32 %v14540_v31, %v10734_v42  ;;  %v4770_v60 = vmul.f32 1.442695, %v3759_v37 }
 0x67e   : > { %v7081_v14 = vpop.eup %7080  ;;  %7106 = vpow2.f32 %v4284_v29  ;;  %v3758_v8 = vsub.f32 %v14539_v7, %v14532_v45  ;;  %v11246_v29 = vpack.c.bf16 %v7077_v25, %v7075_v16  ;;  %v4764_v55 = vmul.f32 1.442695, %v3756_v53  ;;  %v14546_v7 = vld [vmem:[#allocation93_spill] sm:$0xff]  ;;  %v14550_v53 = vld [vmem:[#allocation248_spill] sm:$0xff] }
 0x67f   : > { %v7083_v44 = vpop.eup %7082  ;;  %7108 = vpow2.f32 %v4300_v0  ;;  %v14544_v0 = vld [vmem:[#allocation254_spill] sm:$0xff]  ;;  %v3741_v31 = vsub.f32 %v14547_v1, %v14546_v7  ;;  %v4780_v25 = vmul.f32 1.442695, %v3764_v4 }
 0x680   : > { %v7085_v61 = vpop.eup %7084  ;;  %7110 = vpow2.f32 %v4304_v21  ;;  %14541 = vst [vmem:[#allocation282_spill] sm:$0xff] %v11246_v29  ;;  %v11248_v35 = vpack.c.bf16 %v7081_v14, %v7083_v44  ;;  %v3749_v17 = vsub.f32 %v14544_v0, %v14543_v41  ;;  %v4768_v0 = vmul.f32 1.442695, %v3758_v8 }
 0x681   : > { %v7087_v40 = vpop.eup %7086  ;;  %7112 = vpow2.f32 %v4782_v27  ;;  %v14549_v27 = vld [vmem:[#allocation255_spill] sm:$0xff] }
 0x682   : > { %14542 = vst [vmem:[#allocation287_spill] sm:$0xff] %v11248_v35  ;;  %v7089_v32 = vpop.eup %7088  ;;  %5371 = vmatpush1.bf16.xpose.msra.mxu0 %v11246_v29  ;;  %v11253_v21 = vpack.c.bf16 %v7079_v15, %v7087_v40  ;;  %7114 = vpow2.f32 %v4766_v59  ;;  %v3751_v37 = vsub.f32 %v14549_v27, %v14543_v41  ;;  %v3740_v40 = vsub.f32 %v14550_v53, %v14546_v7 }
 0x683   : > { %v7091_v16 = vpop.eup %7090  ;;  %5372 = vmatprep.subr.bf16.mxu0 %v11248_v35  ;;  %v11258_v14 = vpack.c.bf16 %v7085_v61, %v7089_v32  ;;  %7116 = vpow2.f32 %v4786_v56  ;;  %v4784_v15 = vmul.f32 1.442695, %v3766_v58  ;;  %v4750_v1 = vmul.f32 1.442695, %v3749_v17  ;;  %v14551_v61 = vld [vmem:[#allocation251_spill] sm:$0xff]  ;;  %v14553_v58 = vld [vmem:[#allocation252_spill] sm:$0xff] }
 0x684   : > { %14545 = vst [vmem:[#allocation289_spill] sm:$0xff] %v11253_v21  ;;  %v7093_v44 = vpop.eup %7092  ;;  %7118 = vpow2.f32 %v4288_v46  ;;  %5424 = vmatpush1.bf16.xpose.msra.mxu1 %v11253_v21  ;;  %v3743_v4 = vsub.f32 %v14551_v61, %v14546_v7  ;;  %v4734_v32 = vmul.f32 1.442695, %v3741_v31  ;;  %v14552_v46 = vld [vmem:[#allocation249_spill] sm:$0xff]  ;;  %v3748_v53 = vsub.f32 %v14553_v58, %v14543_v41  ;;  %v14559_v58 = vld [vmem:[#allocation87_spill] sm:$0xff] }
 0x685   : > { %14548 = vst [vmem:[#allocation283_spill] sm:$0xff] %v11258_v14  ;;  %v7095_v59 = vpop.eup %7094  ;;  %5425 = vmatprep.subr.bf16.mxu1 %v11258_v14  ;;  %7120 = vpow2.f32 %v4770_v60  ;;  %v3742_v35 = vsub.f32 %v14552_v46, %v14546_v7  ;;  %v4754_v21 = vmul.f32 1.442695, %v3751_v37  ;;  %v4732_v14 = vmul.f32 1.442695, %v3740_v40  ;;  %v14554_v17 = vld [vmem:[#allocation253_spill] sm:$0xff] }
 0x686   : > { %v7097_v56 = vpop.eup %7096  ;;  %7122 = vpow2.f32 %v4764_v55  ;;  %v3750_v60 = vsub.f32 %v14554_v17, %v14543_v41  ;;  %v11274_v61 = vpack.c.bf16 %v7093_v44, %v7091_v16  ;;  %v5182_v55 = vpop.f32.mrf.mxu0  ;;  %v4738_v22 = vmul.f32 1.442695, %v3743_v4  ;;  %v14557_v46 = vld [vmem:[#allocation84_spill] sm:$0xff]  ;;  %v14562_v16 = vld [vmem:[#allocation242_spill] sm:$0xff]  ;;  %v14564_v4 = vld [vmem:[#allocation247_spill] sm:$0xff] }
 0x687   : > { %v7099_v27 = vpop.eup %7098  ;;  %7124 = vpow2.f32 %v4780_v25  ;;  %v14558_v25 = vld [vmem:[#allocation246_spill] sm:$0xff]  ;;  %v14560_v37 = vld [vmem:[#allocation240_spill] sm:$0xff]  ;;  %v3725_v44 = vsub.f32 %v14562_v16, %v14559_v58 }
 0x688   : > { %v7101_v29 = vpop.eup %7100  ;;  %7126 = vpow2.f32 %v4784_v15  ;;  %14555 = vst [vmem:[#allocation280_spill] sm:$0xff] %v11274_v61  ;;  %v11276_v31 = vpack.c.bf16 %v7097_v56, %v7099_v27  ;;  %v3733_v54 = vsub.f32 %v14558_v25, %v14557_v46  ;;  %v3724_v6 = vsub.f32 %v14560_v37, %v14559_v58  ;;  %v5235_v37 = vpop.f32.mrf.mxu1 }
 0x689   : > { %v7103_v8 = vpop.eup %7102  ;;  %7128 = vpow2.f32 %v4750_v1  ;;  %v4748_v56 = vmul.f32 1.442695, %v3748_v53  ;;  %v3735_v27 = vsub.f32 %v14564_v4, %v14557_v46  ;;  %v4752_v25 = vmul.f32 1.442695, %v3750_v60  ;;  %v14567_v4 = vld [vmem:[#allocation244_spill] sm:$0xff] }
 0x68a   : > { %14556 = vst [vmem:[#allocation284_spill] sm:$0xff] %v11276_v31  ;;  %v7105_v52 = vpop.eup %7104  ;;  %5373 = vmatpush1.bf16.xpose.msra.mxu0 %v11274_v61  ;;  %v11283_v40 = vpack.c.bf16 %v7095_v59, %v7103_v8  ;;  %7130 = vpow2.f32 %v4734_v32  ;;  %v14565_v59 = vld [vmem:[#allocation243_spill] sm:$0xff]  ;;  %v5184_v8 = vpop.f32.mrf.mxu0  ;;  %v4736_v53 = vmul.f32 1.442695, %v3742_v35  ;;  %v4700_v5 = vmul.f32 1.442695, %v3724_v6 }
 0x68b   : > { %v7107_v15 = vpop.eup %7106  ;;  %5374 = vmatprep.subr.bf16.mxu0 %v11276_v31  ;;  %v11288_v1 = vpack.c.bf16 %v7101_v29, %v7105_v52  ;;  %7132 = vpow2.f32 %v4754_v21  ;;  %v3727_v32 = vsub.f32 %v14565_v59, %v14559_v58  ;;  %v4718_v52 = vmul.f32 1.442695, %v3733_v54  ;;  %v5237_v61 = vpop.f32.mrf.mxu1  ;;  %v14572_v6 = vld [vmem:[#allocation238_spill] sm:$0xff] }
 0x68c   : > { %14561 = vst [vmem:[#allocation285_spill] sm:$0xff] %v11283_v40  ;;  %v7109_v17 = vpop.eup %7108  ;;  %7134 = vpow2.f32 %v4768_v0  ;;  %5426 = vmatpush1.bf16.xpose.msra.mxu1 %v11283_v40  ;;  %v11296_v29 = vadd.f32 %v5235_v37, %v5182_v55  ;;  %v14566_v0 = vld [vmem:[#allocation241_spill] sm:$0xff]  ;;  %v3732_v40 = vsub.f32 %v14567_v4, %v14557_v46  ;;  %v4702_v31 = vmul.f32 1.442695, %v3725_v44  ;;  %v5186_v59 = vpop.f32.mrf.mxu0 }
 0x68d   : > { %14563 = vst [vmem:[#allocation278_spill] sm:$0xff] %v11288_v1  ;;  %v7111_v16 = vpop.eup %7110  ;;  %5427 = vmatprep.subr.bf16.mxu1 %v11288_v1  ;;  %7136 = vpow2.f32 %v4738_v22  ;;  %v3726_v60 = vsub.f32 %v14566_v0, %v14559_v58  ;;  %v4722_v35 = vmul.f32 1.442695, %v3735_v27  ;;  %v11302_v1 = vadd.f32 %v5237_v61, %v5184_v8  ;;  %v14568_v22 = vld [vmem:[#allocation245_spill] sm:$0xff]  ;;  %v5239_v43 = vpop.f32.mrf.mxu1 }
 0x68e   : > { %v7113_v21 = vpop.eup %7112  ;;  %7138 = vpow2.f32 %v4732_v14  ;;  %v3734_v14 = vsub.f32 %v14568_v22, %v14557_v46  ;;  %v11306_v55 = vpack.c.bf16 %v7109_v17, %v7107_v15  ;;  %v4706_v37 = vmul.f32 1.442695, %v3727_v32  ;;  %v5188_v0 = vpop.f32.mrf.mxu0  ;;  %v14574_v15 = vld [vmem:[#allocation83_spill] sm:$0xff]  ;;  %v14575_v17 = vld [vmem:[#allocation234_spill] sm:$0xff] }
 0x68f   : > { %v7115_v3 = vpop.eup %7114  ;;  %7140 = vpow2.f32 %v4748_v56  ;;  %v3717_v56 = vsub.f32 %v14572_v6, %v14571_v36  ;;  %v11312_v27 = vadd.f32 %v5239_v43, %v5186_v59  ;;  %v4716_v8 = vmul.f32 1.442695, %v3732_v40  ;;  %v5241_v47 = vpop.f32.mrf.mxu1  ;;  %v14577_v43 = vld [vmem:[#allocation239_spill] sm:$0xff] }
 0x690   : > { %v7117_v54 = vpop.eup %7116  ;;  %7142 = vpow2.f32 %v4752_v25  ;;  %14569 = vst [vmem:[#allocation274_spill] sm:$0xff] %v11306_v55  ;;  %v11308_v44 = vpack.c.bf16 %v7113_v21, %v7115_v3  ;;  %v3709_v32 = vsub.f32 %v14575_v17, %v14574_v15  ;;  %v3719_v21 = vsub.f32 %v14577_v43, %v14571_v36 }
 0x691   : > { %v7119_v4 = vpop.eup %7118  ;;  %7144 = vpow2.f32 %v4718_v52  ;;  %v11324_v40 = vadd.f32 %v5241_v47, %v5188_v0  ;;  %v4704_v47 = vmul.f32 1.442695, %v3726_v60 }
 0x692   : > { %14570 = vst [vmem:[#allocation279_spill] sm:$0xff] %v11308_v44  ;;  %v7121_v61 = vpop.eup %7120  ;;  %5375 = vmatpush1.bf16.xpose.msra.mxu0 %v11306_v55  ;;  %v11315_v25 = vpack.c.bf16 %v7111_v16, %v7119_v4  ;;  %7146 = vpow2.f32 %v4702_v31  ;;  %v4720_v16 = vmul.f32 1.442695, %v3734_v14  ;;  %v14579_v31 = vld [vmem:[#allocation235_spill] sm:$0xff]  ;;  %v4670_v0 = vmul.f32 1.442695, %v3709_v32 }
 0x693   : > { %v7123_v3 = vpop.eup %7122  ;;  %5376 = vmatprep.subr.bf16.mxu0 %v11308_v44  ;;  %v11320_v52 = vpack.c.bf16 %v7117_v54, %v7121_v61  ;;  %7148 = vpow2.f32 %v4722_v35  ;;  %14578 = vst [vmem:[#allocation276_spill] sm:$0xff] %v11324_v40  ;;  %v3711_v4 = vsub.f32 %v14579_v31, %v14574_v15  ;;  %v4686_v35 = vmul.f32 1.442695, %v3717_v56  ;;  %v14581_v31 = vld [vmem:[#allocation236_spill] sm:$0xff]  ;;  %v14583_v56 = vld [vmem:[#allocation237_spill] sm:$0xff] }
 0x694   : > { %14573 = vst [vmem:[#allocation281_spill] sm:$0xff] %v11315_v25  ;;  %v7125_v59 = vpop.eup %7124  ;;  %7150 = vpow2.f32 %v4736_v53  ;;  %5428 = vmatpush1.bf16.xpose.msra.mxu1 %v11315_v25  ;;  %v14580_v53 = vld [vmem:[#allocation232_spill] sm:$0xff]  ;;  %v3716_v44 = vsub.f32 %v14581_v31, %v14571_v36  ;;  %v4690_v20 = vmul.f32 1.442695, %v3719_v21 }
 0x695   : > { %14576 = vst [vmem:[#allocation275_spill] sm:$0xff] %v11320_v52  ;;  %v7127_v55 = vpop.eup %7126  ;;  %5429 = vmatprep.subr.bf16.mxu1 %v11320_v52  ;;  %7152 = vpow2.f32 %v4706_v37  ;;  %v3708_v14 = vsub.f32 %v14580_v53, %v14574_v15  ;;  %v4674_v60 = vmul.f32 1.442695, %v3711_v4 }
 0x696   : > { %v7129_v61 = vpop.eup %7128  ;;  %7154 = vpow2.f32 %v4700_v5  ;;  %v11340_v5 = vpack.c.bf16 %v7125_v59, %v7123_v3  ;;  %v14589_v3 = vld [vmem:[#allocation80_spill] sm:$0xff]  ;;  %v14590_v59 = vld [vmem:[#allocation226_spill] sm:$0xff] }
 0x697   : > { %v7131_v25 = vpop.eup %7130  ;;  %7156 = vpow2.f32 %v4716_v8  ;;  %v14586_v8 = vld [vmem:[#allocation230_spill] sm:$0xff]  ;;  %v3693_v4 = vsub.f32 %v14590_v59, %v14589_v3 }
 0x698   : > { %v7133_v37 = vpop.eup %7132  ;;  %7158 = vpow2.f32 %v4720_v16  ;;  %14584 = vst [vmem:[#allocation277_spill] sm:$0xff] %v11340_v5  ;;  %v11342_v52 = vpack.c.bf16 %v7129_v61, %v7131_v25  ;;  %v3701_v31 = vsub.f32 %v14586_v8, %v10842_v50  ;;  %v14595_v8 = vld [vmem:[#allocation224_spill] sm:$0xff] }
 0x699   : > { %v7135_v32 = vpop.eup %7134  ;;  %7160 = vpow2.f32 %v4686_v35  ;;  %v14592_v35 = vld [vmem:[#allocation231_spill] sm:$0xff] }
 0x69a   : > { %14585 = vst [vmem:[#allocation273_spill] sm:$0xff] %v11342_v52  ;;  %5377 = vmatpush2.bf16.xpose.msra.mxu0 %v11340_v5  ;;  %v11349_v16 = vpack.c.bf16 %v7127_v55, %v7135_v32  ;;  %7162 = vpow2.f32 %v4670_v0  ;;  %v3703_v61 = vsub.f32 %v14592_v35, %v10842_v50 }
 0x69b   : > { %5378 = vmatprep.subr.bf16.mxu0 %v11342_v52  ;;  %7164 = vpow2.f32 %v4690_v20 }
 0x69c   : > { %v5192_v22 = vpop.f32.mrf.mxu0  ;;  %14588 = vst [vmem:[#allocation268_spill] sm:$0xff] %v11349_v16  ;;  %7166 = vpow2.f32 %v4704_v47  ;;  %5430 = vmatpush2.bf16.xpose.msra.mxu1 %v11349_v16  ;;  %v4638_v47 = vmul.f32 1.442695, %v3693_v4  ;;  %v14600_v4 = vld [vmem:[#allocation222_spill] sm:$0xff] }
 0x69d   : > { %v5245_v17 = vpop.f32.mrf.mxu1 }
 0x69e   : > { %v5194_v6 = vpop.f32.mrf.mxu0  ;;  %v11330_v54 = vadd.f32 %v5245_v17, %v5192_v22  ;;  %v3718_v22 = vsub.f32 %v14583_v56, %v14571_v36 }
 0x69f   : > { %v5247_v43 = vpop.f32.mrf.mxu1 }
 0x6a0   : > { %v11336_v40 = vadd.f32 %v5247_v43, %v5194_v6  ;;  %v5196_v17 = vpop.f32.mrf.mxu0  ;;  %v7137_v6 = vpop.eup %7136  ;;  %v4668_v43 = vmul.f32 1.442695, %v3708_v14  ;;  %v14593_v14 = vld [vmem:[#allocation233_spill] sm:$0xff]  ;;  %7168 = vpow2.f32 %v4674_v60 }
 0x6a1   : > { %v5249_v53 = vpop.f32.mrf.mxu1  ;;  %v7139_v56 = vpop.eup %7138  ;;  %v11354_v25 = vpack.c.bf16 %v7133_v37, %v7137_v6  ;;  %v3710_v55 = vsub.f32 %v14593_v14, %v14574_v15  ;;  %v14594_v37 = vld [vmem:[#allocation227_spill] sm:$0xff]  ;;  %v3692_v6 = vsub.f32 %v14595_v8, %v14589_v3  ;;  %v4658_v14 = vmul.f32 1.442695, %v3703_v61  ;;  %v14597_v60 = vld [vmem:[#allocation229_spill] sm:$0xff] }
 0x6a2   : > { %14582 = vst [vmem:[#allocation272_spill] sm:$0xff] %v11336_v40  ;;  %v11346_v21 = vadd.f32 %v5249_v53, %v5196_v17  ;;  %v4684_v40 = vmul.f32 1.442695, %v3716_v44  ;;  %v7141_v17 = vpop.eup %7140  ;;  %v4688_v53 = vmul.f32 1.442695, %v3718_v22  ;;  %v3695_v32 = vsub.f32 %v14594_v37, %v14589_v3  ;;  %v14596_v22 = vld [vmem:[#allocation228_spill] sm:$0xff] }
 0x6a3   : > { %14591 = vst [vmem:[#allocation269_spill] sm:$0xff] %v11354_v25  ;;  %v7143_v0 = vpop.eup %7142  ;;  %5431 = vmatprep.subr.bf16.mxu1 %v11354_v25  ;;  %v4654_v44 = vmul.f32 1.442695, %v3701_v31  ;;  %7170 = vpow2.f32 %v4668_v43  ;;  %v3700_v35 = vsub.f32 %v14596_v22, %v10842_v50  ;;  %v4672_v52 = vmul.f32 1.442695, %v3710_v55  ;;  %v14602_v55 = vld [vmem:[#allocation218_spill] sm:$0xff] }
 0x6a4   : > { %14587 = vst [vmem:[#allocation264_spill] sm:$0xff] %v11346_v21  ;;  %v7145_v20 = vpop.eup %7144  ;;  %7172 = vpow2.f32 %v4684_v40  ;;  %v3702_v31 = vsub.f32 %v14597_v60, %v10842_v50  ;;  %v11370_v25 = vpack.c.bf16 %v7141_v17, %v7139_v56  ;;  %v4642_v8 = vmul.f32 1.442695, %v3695_v32  ;;  %v14607_v60 = vld [vmem:[#allocation216_spill] sm:$0xff] }
 0x6a5   : > { %v7147_v59 = vpop.eup %7146  ;;  %7174 = vpow2.f32 %v4688_v53  ;;  %v3685_v40 = vsub.f32 %v14600_v4, %v10877_v10  ;;  %v4636_v21 = vmul.f32 1.442695, %v3692_v6  ;;  %v3677_v53 = vsub.f32 %v14602_v55, %v10840_v34  ;;  %v14605_v6 = vld [vmem:[#allocation225_spill] sm:$0xff] }
 0x6a6   : > { %v7149_v16 = vpop.eup %7148  ;;  %14598 = vst [vmem:[#allocation266_spill] sm:$0xff] %v11370_v25  ;;  %v11372_v43 = vpack.c.bf16 %v7145_v20, %v7147_v59  ;;  %7176 = vpow2.f32 %v4654_v44  ;;  %5379 = vmatpush2.bf16.xpose.msra.mxu0 %v11370_v25  ;;  %v4652_v17 = vmul.f32 1.442695, %v3700_v35  ;;  %v14604_v44 = vld [vmem:[#allocation223_spill] sm:$0xff]  ;;  %v4656_v22 = vmul.f32 1.442695, %v3702_v31 }
 0x6a7   : > { %v7151_v37 = vpop.eup %7150  ;;  %7178 = vpow2.f32 %v4638_v47  ;;  %v3687_v32 = vsub.f32 %v14604_v44, %v10877_v10  ;;  %v4622_v35 = vmul.f32 1.442695, %v3685_v40  ;;  %v14608_v31 = vld [vmem:[#allocation220_spill] sm:$0xff] }
 0x6a8   : > { %14599 = vst [vmem:[#allocation270_spill] sm:$0xff] %v11372_v43  ;;  %v7153_v5 = vpop.eup %7152  ;;  %v11377_v61 = vpack.c.bf16 %v7143_v0, %v7151_v37  ;;  %5380 = vmatprep.subr.bf16.mxu0 %v11372_v43  ;;  %7180 = vpow2.f32 %v4658_v14  ;;  %v3694_v0 = vsub.f32 %v14605_v6, %v14589_v3  ;;  %v3676_v37 = vsub.f32 %v14607_v60, %v10840_v34 }
 0x6a9   : > { %v7155_v56 = vpop.eup %7154  ;;  %v11382_v20 = vpack.c.bf16 %v7149_v16, %v7153_v5  ;;  %7182 = vpow2.f32 %v4672_v52  ;;  %v14606_v5 = vld [vmem:[#allocation219_spill] sm:$0xff]  ;;  %v4606_v52 = vmul.f32 1.442695, %v3677_v53  ;;  %v3684_v55 = vsub.f32 %v14608_v31, %v10877_v10  ;;  %v14612_v53 = vld [vmem:[#allocation214_spill] sm:$0xff] }
 0x6aa   : > { %14601 = vst [vmem:[#allocation267_spill] sm:$0xff] %v11377_v61  ;;  %v7157_v59 = vpop.eup %7156  ;;  %5432 = vmatpush2.bf16.xpose.msra.mxu1 %v11377_v61  ;;  %7184 = vpow2.f32 %v4642_v8  ;;  %v3679_v16 = vsub.f32 %v14606_v5, %v10840_v34  ;;  %v4626_v44 = vmul.f32 1.442695, %v3687_v32  ;;  %v4640_v61 = vmul.f32 1.442695, %v3694_v0  ;;  %v14609_v8 = vld [vmem:[#allocation221_spill] sm:$0xff] }
 0x6ab   : > { %14603 = vst [vmem:[#allocation271_spill] sm:$0xff] %v11382_v20  ;;  %v7159_v47 = vpop.eup %7158  ;;  %5433 = vmatprep.subr.bf16.mxu1 %v11382_v20  ;;  %7186 = vpow2.f32 %v4636_v21  ;;  %v3686_v40 = vsub.f32 %v14609_v8, %v10877_v10  ;;  %v11398_v20 = vpack.c.bf16 %v7157_v59, %v7155_v56  ;;  %v4604_v25 = vmul.f32 1.442695, %v3676_v37  ;;  %v14614_v0 = vld [vmem:[#allocation210_spill] sm:$0xff]  ;;  %v14617_v37 = vld [vmem:[#allocation217_spill] sm:$0xff]  ;;  %v14619_v8 = vld [vmem:[#allocation208_spill] sm:$0xff] }
 0x6ac   : > { %v7161_v14 = vpop.eup %7160  ;;  %7188 = vpow2.f32 %v4652_v17  ;;  %v4610_v60 = vmul.f32 1.442695, %v3679_v16  ;;  %v3669_v17 = vsub.f32 %v14612_v53, %v10915_v51  ;;  %v4620_v59 = vmul.f32 1.442695, %v3684_v55 }
 0x6ad   : > { %v7163_v4 = vpop.eup %7162  ;;  %7190 = vpow2.f32 %v4656_v22  ;;  %14610 = vst [vmem:[#allocation265_spill] sm:$0xff] %v11398_v20  ;;  %v3661_v22 = vsub.f32 %v14614_v0, %v10875_v18  ;;  %v4624_v31 = vmul.f32 1.442695, %v3686_v40  ;;  %v14620_v40 = vld [vmem:[#allocation202_spill] sm:$0xff] }
 0x6ae   : > { %v7165_v6 = vpop.eup %7164  ;;  %v11400_v21 = vpack.c.bf16 %v7161_v14, %v7163_v4  ;;  %7192 = vpow2.f32 %v4622_v35  ;;  %5381 = vmatpush2.bf16.xpose.msra.mxu0 %v11398_v20  ;;  %v14616_v35 = vld [vmem:[#allocation215_spill] sm:$0xff]  ;;  %v4590_v55 = vmul.f32 1.442695, %v3669_v17  ;;  %v3645_v0 = vsub.f32 %v14620_v40, %v10913_v2 }
 0x6af   : > { %v7167_v5 = vpop.eup %7166  ;;  %7194 = vpow2.f32 %v4606_v52  ;;  %v3671_v16 = vsub.f32 %v14616_v35, %v10915_v51 }
 0x6b0   : > { %14611 = vst [vmem:[#allocation383_spill] sm:$0xff] %v11400_v21  ;;  %v7169_v43 = vpop.eup %7168  ;;  %v11405_v32 = vpack.c.bf16 %v7159_v47, %v7167_v5  ;;  %5382 = vmatprep.subr.bf16.mxu0 %v11400_v21  ;;  %7196 = vpow2.f32 %v4626_v44  ;;  %v3678_v47 = vsub.f32 %v14617_v37, %v10840_v34  ;;  %v3660_v5 = vsub.f32 %v14619_v8, %v10875_v18 }
 0x6b1   : > { %v7171_v56 = vpop.eup %7170  ;;  %v11410_v14 = vpack.c.bf16 %v7165_v6, %v7169_v43  ;;  %7198 = vpow2.f32 %v4640_v61  ;;  %v14618_v43 = vld [vmem:[#allocation211_spill] sm:$0xff]  ;;  %v4574_v61 = vmul.f32 1.442695, %v3661_v22  ;;  %v4594_v35 = vmul.f32 1.442695, %v3671_v16  ;;  %v14625_v16 = vld [vmem:[#allocation213_spill] sm:$0xff] }
 0x6b2   : > { %14613 = vst [vmem:[#allocation387_spill] sm:$0xff] %v11405_v32  ;;  %v7173_v4 = vpop.eup %7172  ;;  %5434 = vmatpush2.bf16.xpose.msra.mxu1 %v11405_v32  ;;  %7200 = vpow2.f32 %v4610_v60  ;;  %v3663_v6 = vsub.f32 %v14618_v43, %v10875_v18  ;;  %v4608_v32 = vmul.f32 1.442695, %v3678_v47  ;;  %v14621_v60 = vld [vmem:[#allocation212_spill] sm:$0xff]  ;;  %v4572_v20 = vmul.f32 1.442695, %v3660_v5 }
 0x6b3   : > { %14615 = vst [vmem:[#allocation388_spill] sm:$0xff] %v11410_v14  ;;  %v7175_v52 = vpop.eup %7174  ;;  %5435 = vmatprep.subr.bf16.mxu1 %v11410_v14  ;;  %7202 = vpow2.f32 %v4604_v25  ;;  %v3668_v17 = vsub.f32 %v14621_v60, %v10915_v51  ;;  %v11426_v14 = vpack.c.bf16 %v7173_v4, %v7171_v56  ;;  %v14623_v25 = vld [vmem:[#allocation206_spill] sm:$0xff]  ;;  %v3670_v40 = vsub.f32 %v14625_v16, %v10915_v51  ;;  %v14632_v16 = vld [vmem:[#allocation448_spill] sm:$0xff] }
 0x6b4   : > { %v7177_v44 = vpop.eup %7176  ;;  %7204 = vpow2.f32 %v4620_v59  ;;  %v3653_v21 = vsub.f32 %v14623_v25, %v10945_v12  ;;  %v4578_v22 = vmul.f32 1.442695, %v3663_v6  ;;  %v4542_v4 = vmul.f32 1.442695, %v3645_v0  ;;  %v14629_v6 = vld [vmem:[#allocation209_spill] sm:$0xff] }
 0x6b5   : > { %v7179_v53 = vpop.eup %7178  ;;  %7206 = vpow2.f32 %v4624_v31  ;;  %14622 = vst [vmem:[#allocation385_spill] sm:$0xff] %v11426_v14  ;;  %v14627_v31 = vld [vmem:[#allocation207_spill] sm:$0xff]  ;;  %v3662_v5 = vsub.f32 %v14629_v6, %v10875_v18 }
 0x6b6   : > { %v7181_v37 = vpop.eup %7180  ;;  %v11430_v8 = vpack.c.bf16 %v7177_v44, %v7179_v53  ;;  %7208 = vpow2.f32 %v4590_v55  ;;  %5383 = vmatpush2.bf16.xpose.msra.mxu0 %v11426_v14  ;;  %v3655_v60 = vsub.f32 %v14627_v31, %v10945_v12  ;;  %v4588_v53 = vmul.f32 1.442695, %v3668_v17  ;;  %v14633_v31 = vld [vmem:[#allocation204_spill] sm:$0xff] }
 0x6b7   : > { %v7183_v43 = vpop.eup %7182  ;;  %7210 = vpow2.f32 %v4574_v61  ;;  %v14630_v61 = vld [vmem:[#allocation203_spill] sm:$0xff]  ;;  %v3634_v17 = vsub.f32 %v14632_v16, %v10599_v13  ;;  %v3652_v6 = vsub.f32 %v14633_v31, %v10945_v12  ;;  %v14635_v16 = vld [vmem:[#allocation453_spill] sm:$0xff] }
 0x6b8   : > { %14624 = vst [vmem:[#allocation389_spill] sm:$0xff] %v11430_v8  ;;  %v7185_v59 = vpop.eup %7184  ;;  %v11435_v47 = vpack.c.bf16 %v7175_v52, %v7183_v43  ;;  %5384 = vmatprep.subr.bf16.mxu0 %v11430_v8  ;;  %7212 = vpow2.f32 %v4594_v35  ;;  %v3647_v0 = vsub.f32 %v14630_v61, %v10913_v2  ;;  %v4558_v43 = vmul.f32 1.442695, %v3653_v21  ;;  %v14631_v35 = vld [vmem:[#allocation200_spill] sm:$0xff] }
 0x6b9   : > { %v7187_v56 = vpop.eup %7186  ;;  %v11440_v44 = vpack.c.bf16 %v7181_v37, %v7185_v59  ;;  %7214 = vpow2.f32 %v4608_v32  ;;  %v3644_v37 = vsub.f32 %v14631_v35, %v10913_v2  ;;  %v4592_v32 = vmul.f32 1.442695, %v3670_v40 }
 0x6ba   : > { %14626 = vst [vmem:[#allocation386_spill] sm:$0xff] %v11435_v47  ;;  %v7189_v55 = vpop.eup %7188  ;;  %5436 = vmatpush2.bf16.xpose.msra.mxu1 %v11435_v47  ;;  %7216 = vpow2.f32 %v4578_v22  ;;  %v4562_v47 = vmul.f32 1.442695, %v3655_v60  ;;  %v4576_v21 = vmul.f32 1.442695, %v3662_v5  ;;  %v14634_v22 = vld [vmem:[#allocation205_spill] sm:$0xff] }
 0x6bb   : > { %14628 = vst [vmem:[#allocation390_spill] sm:$0xff] %v11440_v44  ;;  %v7191_v52 = vpop.eup %7190  ;;  %5437 = vmatprep.subr.bf16.mxu1 %v11440_v44  ;;  %7218 = vpow2.f32 %v4572_v20  ;;  %v3654_v44 = vsub.f32 %v14634_v22, %v10945_v12  ;;  %v11456_v20 = vpack.c.bf16 %v7189_v55, %v7187_v56  ;;  %v4546_v35 = vmul.f32 1.442695, %v3647_v0  ;;  %v14636_v5 = vld [vmem:[#allocation449_spill] sm:$0xff]  ;;  %v14638_v0 = vld [vmem:[#allocation454_spill] sm:$0xff] }
 0x6bc   : > { %v7193_v25 = vpop.eup %7192  ;;  %7220 = vpow2.f32 %v4542_v4  ;;  %v3641_v4 = vsub.f32 %v14635_v16, %v10615_v48  ;;  %v4540_v18 = vmul.f32 1.442695, %v3644_v37  ;;  %v3633_v12 = vsub.f32 %v14636_v5, %v10599_v13  ;;  %v14639_v37 = vld [vmem:[#allocation201_spill] sm:$0xff] }
 0x6bd   : > { %v7195_v59 = vpop.eup %7194  ;;  %7222 = vpow2.f32 %v4588_v53  ;;  %v4556_v55 = vmul.f32 1.442695, %v3652_v6  ;;  %v4520_v6 = vmul.f32 1.442695, %v3634_v17 }
 0x6be   : > { %v7197_v61 = vpop.eup %7196  ;;  %7224 = vpow2.f32 %v4558_v43  ;;  %v11458_v40 = vpack.c.bf16 %v7193_v25, %v7195_v59  ;;  %5385 = vmatpush2.bf16.xpose.msra.mxu0 %v11456_v20  ;;  %v3643_v43 = vsub.f32 %v14638_v0, %v10615_v48  ;;  %v14640_v59 = vld [vmem:[#allocation450_spill] sm:$0xff]  ;;  %v14643_v0 = vld [vmem:[#allocation452_spill] sm:$0xff] }
 0x6bf   : > { %v7199_v8 = vpop.eup %7198  ;;  %7226 = vpow2.f32 %v4592_v32  ;;  %v3646_v32 = vsub.f32 %v14639_v37, %v10913_v2  ;;  %v14642_v2 = vld [vmem:[#allocation451_spill] sm:$0xff] }
 0x6c0   : > { %v7201_v14 = vpop.eup %7200  ;;  %v11463_v60 = vpack.c.bf16 %v7191_v52, %v7199_v8  ;;  %7228 = vpow2.f32 %v4562_v47  ;;  %5386 = vmatprep.subr.bf16.mxu0 %v11458_v40  ;;  %v4560_v8 = vmul.f32 1.442695, %v3654_v44  ;;  %v4534_v47 = vmul.f32 1.442695, %v3641_v4 }
 0x6c1   : > { %v7203_v56 = vpop.eup %7202  ;;  %v11468_v53 = vpack.c.bf16 %v7197_v61, %v7201_v14  ;;  %7230 = vpow2.f32 %v4576_v21  ;;  %v3635_v14 = vsub.f32 %v14640_v59, %v10599_v13  ;;  %v4518_v61 = vmul.f32 1.442695, %v3633_v12  ;;  %v14641_v21 = vld [vmem:[#allocation439_spill] sm:$0xff]  ;;  %v14644_v59 = vld [vmem:[#allocation445_spill] sm:$0xff] }
 0x6c2   : > { %v7205_v25 = vpop.eup %7204  ;;  %5438 = vmatpush2.bf16.xpose.msra.mxu1 %v11463_v60  ;;  %7232 = vpow2.f32 %v4546_v35  ;;  %v3616_v16 = vsub.f32 %v14641_v21, %v10613_v11  ;;  %v3640_v44 = vsub.f32 %v14642_v2, %v10615_v48  ;;  %v4538_v5 = vmul.f32 1.442695, %v3643_v43 }
 0x6c3   : > { %14637 = vst [vmem:[#allocation384_spill] sm:$0xff] %v11468_v53  ;;  %v7207_v52 = vpop.eup %7206  ;;  %5439 = vmatprep.subr.bf16.mxu1 %v11468_v53  ;;  %7234 = vpow2.f32 %v4540_v18  ;;  %v3642_v4 = vsub.f32 %v14643_v0, %v10615_v48  ;;  %v4544_v37 = vmul.f32 1.442695, %v3646_v32  ;;  %v11484_v13 = vpack.c.bf16 %v7205_v25, %v7203_v56  ;;  %v14646_v48 = vld [vmem:[#allocation441_spill] sm:$0xff] }
 0x6c4   : > { %v7209_v31 = vpop.eup %7208  ;;  %7236 = vpow2.f32 %v4556_v55  ;;  %v4522_v12 = vmul.f32 1.442695, %v3635_v14  ;;  %v3625_v21 = vsub.f32 %v14644_v59, %v10634_v62  ;;  %v14645_v55 = vld [vmem:[#allocation440_spill] sm:$0xff]  ;;  %v3617_v56 = vsub.f32 %v14646_v48, %v10613_v11 }
 0x6c5   : > { %v7211_v22 = vpop.eup %7210  ;;  %7238 = vpow2.f32 %v4560_v8  ;;  %v3618_v43 = vsub.f32 %v14645_v55, %v10613_v11  ;;  %v4532_v32 = vmul.f32 1.442695, %v3640_v44  ;;  %v14649_v44 = vld [vmem:[#allocation442_spill] sm:$0xff] }
 0x6c6   : > { %v7213_v35 = vpop.eup %7212  ;;  %v11486_v18 = vpack.c.bf16 %v7209_v31, %v7211_v22  ;;  %7240 = vpow2.f32 %v4534_v47  ;;  %5387 = vmatpush2.bf16.xpose.msra.mxu0 %v11484_v13  ;;  %v14648_v47 = vld [vmem:[#allocation446_spill] sm:$0xff]  ;;  %v4536_v22 = vmul.f32 1.442695, %v3642_v4  ;;  %v3619_v0 = vsub.f32 %v14649_v44, %v10613_v11  ;;  %v14650_v4 = vld [vmem:[#allocation443_spill] sm:$0xff] }
 0x6c7   : > { %v7215_v17 = vpop.eup %7214  ;;  %7242 = vpow2.f32 %v4518_v61  ;;  %v3627_v14 = vsub.f32 %v14648_v47, %v10634_v62  ;;  %v4502_v61 = vmul.f32 1.442695, %v3625_v21  ;;  %v4488_v59 = vmul.f32 1.442695, %v3618_v43  ;;  %v14651_v47 = vld [vmem:[#allocation431_spill] sm:$0xff]  ;;  %v14652_v21 = vld [vmem:[#allocation444_spill] sm:$0xff] }
 0x6c8   : > { %v7217_v53 = vpop.eup %7216  ;;  %v11493_v2 = vpack.c.bf16 %v7207_v52, %v7215_v17  ;;  %5388 = vmatprep.subr.bf16.mxu0 %v11486_v18  ;;  %7244 = vpow2.f32 %v4538_v5  ;;  %v4486_v5 = vmul.f32 1.442695, %v3617_v56  ;;  %v4490_v43 = vmul.f32 1.442695, %v3619_v0  ;;  %v14653_v56 = vld [vmem:[#allocation437_spill] sm:$0xff]  ;;  %v14658_v0 = vld [vmem:[#allocation438_spill] sm:$0xff] }
 0x6c9   : > { %v7219_v25 = vpop.eup %7218  ;;  %v11498_v8 = vpack.c.bf16 %v7213_v35, %v7217_v53  ;;  %7246 = vpow2.f32 %v4544_v37  ;;  %v4484_v53 = vmul.f32 1.442695, %v3616_v16  ;;  %v3624_v37 = vsub.f32 %v14650_v4, %v10634_v62 }
 0x6ca   : > { %v7221_v31 = vpop.eup %7220  ;;  %5440 = vmatpush2.bf16.xpose.msra.mxu1 %v11493_v2  ;;  %7248 = vpow2.f32 %v4522_v12  ;;  %v4506_v55 = vmul.f32 1.442695, %v3627_v14  ;;  %v3600_v12 = vsub.f32 %v14651_v47, %v10632_v19  ;;  %v14654_v14 = vld [vmem:[#allocation432_spill] sm:$0xff] }
 0x6cb   : > { %14647 = vst [vmem:[#allocation375_spill] sm:$0xff] %v11498_v8  ;;  %v7223_v52 = vpop.eup %7222  ;;  %5441 = vmatprep.subr.bf16.mxu1 %v11498_v8  ;;  %7250 = vpow2.f32 %v4520_v6  ;;  %v3626_v8 = vsub.f32 %v14652_v21, %v10634_v62  ;;  %v14656_v62 = vld [vmem:[#allocation433_spill] sm:$0xff] }
 0x6cc   : > { %v7225_v17 = vpop.eup %7224  ;;  %7252 = vpow2.f32 %v4532_v32  ;;  %v11512_v11 = vpack.c.bf16 %v7223_v52, %v7219_v25  ;;  %v3609_v32 = vsub.f32 %v14653_v56, %v10646_v24  ;;  %v3601_v25 = vsub.f32 %v14656_v62, %v10632_v19 }
 0x6cd   : > { %v7227_v35 = vpop.eup %7226  ;;  %7254 = vpow2.f32 %v4536_v22  ;;  %v11514_v16 = vpack.c.bf16 %v7225_v17, %v7221_v31  ;;  %v3602_v22 = vsub.f32 %v14654_v14, %v10632_v19  ;;  %v4500_v31 = vmul.f32 1.442695, %v3624_v37  ;;  %v14659_v37 = vld [vmem:[#allocation434_spill] sm:$0xff] }
 0x6ce   : > { %v7229_v48 = vpop.eup %7228  ;;  %7256 = vpow2.f32 %v4502_v61  ;;  %5389 = vmatpush2.bf16.xpose.msra.mxu0 %v11512_v11  ;;  %v3611_v17 = vsub.f32 %v14658_v0, %v10646_v24  ;;  %v4504_v21 = vmul.f32 1.442695, %v3626_v8 }
 0x6cf   : > { %v7231_v6 = vpop.eup %7230  ;;  %7258 = vpow2.f32 %v4486_v5  ;;  %5390 = vmatprep.subr.bf16.mxu0 %v11514_v16  ;;  %v4470_v5 = vmul.f32 1.442695, %v3609_v32  ;;  %v4456_v14 = vmul.f32 1.442695, %v3602_v22  ;;  %v14662_v32 = vld [vmem:[#allocation436_spill] sm:$0xff] }
 0x6d0   : > { %v7233_v44 = vpop.eup %7232  ;;  %v11521_v4 = vpack.c.bf16 %v7227_v35, %v7231_v6  ;;  %7260 = vpow2.f32 %v4506_v55  ;;  %v3603_v6 = vsub.f32 %v14659_v37, %v10632_v19  ;;  %v4454_v55 = vmul.f32 1.442695, %v3601_v25  ;;  %v14663_v25 = vld [vmem:[#allocation429_spill] sm:$0xff] }
 0x6d1   : > { %v7235_v52 = vpop.eup %7234  ;;  %v11526_v61 = vpack.c.bf16 %v7229_v48, %v7233_v44  ;;  %7262 = vpow2.f32 %v4484_v53  ;;  %v4452_v48 = vmul.f32 1.442695, %v3600_v12  ;;  %v14660_v53 = vld [vmem:[#allocation435_spill] sm:$0xff]  ;;  %v4474_v62 = vmul.f32 1.442695, %v3611_v17  ;;  %v14664_v17 = vld [vmem:[#allocation424_spill] sm:$0xff] }
 0x6d2   : > { %14655 = vst [vmem:[#allocation379_spill] sm:$0xff] %v11521_v4  ;;  %v7237_v47 = vpop.eup %7236  ;;  %5442 = vmatpush2.bf16.xpose.msra.mxu1 %v11521_v4  ;;  %7264 = vpow2.f32 %v4490_v43  ;;  %v3608_v8 = vsub.f32 %v14660_v53, %v10646_v24  ;;  %v3610_v4 = vsub.f32 %v14662_v32, %v10646_v24  ;;  %v4458_v22 = vmul.f32 1.442695, %v3603_v6  ;;  %v14666_v24 = vld [vmem:[#allocation425_spill] sm:$0xff]  ;;  %v14668_v6 = vld [vmem:[#allocation430_spill] sm:$0xff] }
 0x6d3   : > { %14657 = vst [vmem:[#allocation380_spill] sm:$0xff] %v11526_v61  ;;  %v7239_v35 = vpop.eup %7238  ;;  %5443 = vmatprep.subr.bf16.mxu1 %v11526_v61  ;;  %7266 = vpow2.f32 %v4488_v59  ;;  %v14661_v61 = vld [vmem:[#allocation423_spill] sm:$0xff]  ;;  %v11540_v19 = vpack.c.bf16 %v7237_v47, %v7235_v52  ;;  %v3585_v52 = vsub.f32 %v14666_v24, %v10644_v30 }
 0x6d4   : > { %v7241_v56 = vpop.eup %7240  ;;  %7268 = vpow2.f32 %v4500_v31  ;;  %v3584_v43 = vsub.f32 %v14661_v61, %v10644_v30  ;;  %v3593_v31 = vsub.f32 %v14663_v25, %v10652_v39  ;;  %v4472_v32 = vmul.f32 1.442695, %v3610_v4 }
 0x6d5   : > { %v7243_v44 = vpop.eup %7242  ;;  %7270 = vpow2.f32 %v4504_v21  ;;  %v3586_v21 = vsub.f32 %v14664_v17, %v10644_v30 }
 0x6d6   : > { %v7245_v0 = vpop.eup %7244  ;;  %v11542_v12 = vpack.c.bf16 %v7241_v56, %v7243_v44  ;;  %7272 = vpow2.f32 %v4470_v5  ;;  %5391 = vmatpush2.bf16.xpose.msra.mxu0 %v11540_v19  ;;  %v4468_v56 = vmul.f32 1.442695, %v3608_v8  ;;  %v3595_v44 = vsub.f32 %v14668_v6, %v10652_v39  ;;  %v14669_v8 = vld [vmem:[#allocation426_spill] sm:$0xff] }
 0x6d7   : > { %v7247_v59 = vpop.eup %7246  ;;  %7274 = vpow2.f32 %v4454_v55  ;;  %v4438_v55 = vmul.f32 1.442695, %v3593_v31  ;;  %v4424_v17 = vmul.f32 1.442695, %v3586_v21  ;;  %v14672_v31 = vld [vmem:[#allocation428_spill] sm:$0xff] }
 0x6d8   : > { %v7249_v37 = vpop.eup %7248  ;;  %v11549_v61 = vpack.c.bf16 %v7239_v35, %v7247_v59  ;;  %5466 = vmatprep.subr.bf16.mxu0 %v11542_v12  ;;  %7276 = vpow2.f32 %v4474_v62  ;;  %v3587_v59 = vsub.f32 %v14669_v8, %v10644_v30  ;;  %v4422_v62 = vmul.f32 1.442695, %v3585_v52  ;;  %v14674_v8 = vld [vmem:[#allocation416_spill] sm:$0xff] }
 0x6d9   : > { %v7251_v47 = vpop.eup %7250  ;;  %v11554_v5 = vpack.c.bf16 %v7245_v0, %v7249_v37  ;;  %7278 = vpow2.f32 %v4452_v48  ;;  %v4420_v0 = vmul.f32 1.442695, %v3584_v43  ;;  %v14670_v48 = vld [vmem:[#allocation427_spill] sm:$0xff]  ;;  %v4442_v24 = vmul.f32 1.442695, %v3595_v44 }
 0x6da   : > { %14665 = vst [vmem:[#allocation377_spill] sm:$0xff] %v11549_v61  ;;  %v7253_v53 = vpop.eup %7252  ;;  %5444 = vmatpush2.bf16.xpose.msra.mxu1 %v11549_v61  ;;  %7280 = vpow2.f32 %v4458_v22  ;;  %v3592_v4 = vsub.f32 %v14670_v48, %v10652_v39  ;;  %v3594_v61 = vsub.f32 %v14672_v31, %v10652_v39  ;;  %v7490_v43 = vld [vmem:[#allocation3 + $0x28] ss:$56 sps:$4 sm:$0xff]   ;;  %v4426_v52 = vmul.f32 1.442695, %v3587_v59 }
 0x6db   : > { %14667 = vst [vmem:[#allocation381_spill] sm:$0xff] %v11554_v5  ;;  %v7255_v35 = vpop.eup %7254  ;;  %5519 = vmatprep.subr.bf16.mxu1 %v11554_v5  ;;  %7282 = vpow2.f32 %v4456_v14  ;;  %v14671_v5 = vld [vmem:[#allocation415_spill] sm:$0xff]  ;;  %v11569_v30 = vpack.c.bf16 %v7253_v53, %v10992_v33  ;;  %v14676_v33 = vld [vmem:[#allocation417_spill] sm:$0xff]  ;;  %v7492_v59 = vld [vmem:[#allocation3 + $0x50] ss:$-80 sps:$4 sm:$0xff]  }
 0x6dc   : > { %v7257_v25 = vpop.eup %7256  ;;  %7284 = vpow2.f32 %v4468_v56  ;;  %v3568_v22 = vsub.f32 %v14671_v5, %v10650_v9  ;;  %v14673_v56 = vld [vmem:[#allocation421_spill] sm:$0xff]  ;;  %v3570_v5 = vsub.f32 %v14674_v8, %v10650_v9  ;;  %v11578_v39 = vpack.c.bf16 %v7255_v35, %v7251_v47  ;;  %v14678_v31 = vld [vmem:[#allocation422_spill] sm:$0xff] }
 0x6dd   : > { %v7259_v37 = vpop.eup %7258  ;;  %7286 = vpow2.f32 %v4472_v32  ;;  %5393 = vmatmul.mubr.bf16.vlgmr.msra.gmra.mxu0 %v7490_v43  ;;  %v3577_v44 = vsub.f32 %v14673_v56, %v10666_v23  ;;  %v3569_v53 = vsub.f32 %v14676_v33, %v10650_v9  ;;  %v7491_v48 = vld [vmem:[#allocation3 + $0x1c] ss:$80 sps:$4 sm:$0xff]   ;;  %v3579_v43 = vsub.f32 %v14678_v31, %v10666_v23  ;;  %v14679_v8 = vld [vmem:[#allocation418_spill] sm:$0xff] }
 0x6de   : > { %v7261_v6 = vpop.eup %7260  ;;  %v11571_v21 = vpack.c.bf16 %v7257_v25, %v7259_v37  ;;  %7288 = vpow2.f32 %v4438_v55  ;;  %5467 = vmatpush1.bf16.xpose.msra.mxu0 %v11569_v30  ;;  %14675 = vst [vmem:[#allocation378_spill] sm:$0xff] %v11578_v39  ;;  %5402 = vmatprep.mubr.bf16.mxu0 %v7491_v48  ;;  %v4436_v55 = vmul.f32 1.442695, %v3592_v4  ;;  %v4440_v35 = vmul.f32 1.442695, %v3594_v61  ;;  %v14680_v61 = vld [vmem:[#allocation419_spill] sm:$0xff] }
 0x6df   : > { %v7263_v14 = vpop.eup %7262  ;;  %7290 = vpow2.f32 %v4422_v62  ;;  %v7493_v62 = vld [vmem:[#allocation3 + $0xc] ss:$104 sps:$4 sm:$0xff]   ;;  %v4406_v4 = vmul.f32 1.442695, %v3577_v44  ;;  %v4390_v33 = vmul.f32 1.442695, %v3569_v53 }
 0x6e0   : > { %v7265_v32 = vpop.eup %7264  ;;  %5468 = vmatprep.subr.bf16.mxu0 %v11571_v21  ;;  %7292 = vpow2.f32 %v4442_v24  ;;  %v4388_v24 = vmul.f32 1.442695, %v3568_v22  ;;  %v4410_v31 = vmul.f32 1.442695, %v3579_v43  ;;  %v14682_v44 = vld [vmem:[#allocation420_spill] sm:$0xff]  ;;  %v14683_v53 = vld [vmem:[#allocation413_spill] sm:$0xff] }
 0x6e1   : > { %v7267_v25 = vpop.eup %7266  ;;  %5446 = vmatmul.mubr.bf16.vlgmr.msra.gmra.mxu1 %v7492_v59  ;;  %v11583_v37 = vpack.c.bf16 %v7261_v6, %v7265_v32  ;;  %7294 = vpow2.f32 %v4420_v0  ;;  %v3571_v6 = vsub.f32 %v14679_v8, %v10650_v9  ;;  %v4392_v59 = vmul.f32 1.442695, %v3570_v5  ;;  %v7494_v8 = vld [vmem:[#allocation3 + $0x18] ss:$80 sps:$4 sm:$0xff]  }
 0x6e2   : > { %v7269_v47 = vpop.eup %7268  ;;  %5520 = vmatpush1.bf16.xpose.msra.mxu1 %v11578_v39  ;;  %5455 = vmatprep.mubr.bf16.mxu1 %v7493_v62  ;;  %7296 = vpow2.f32 %v4426_v52  ;;  %v3576_v0 = vsub.f32 %v14680_v61, %v10666_v23  ;;  %v3578_v39 = vsub.f32 %v14682_v44, %v10666_v23  ;;  %v14686_v23 = vld [vmem:[#allocation409_spill] sm:$0xff] }
 0x6e3   : > { %14677 = vst [vmem:[#allocation382_spill] sm:$0xff] %v11583_v37  ;;  %v7271_v56 = vpop.eup %7270  ;;  %5521 = vmatprep.subr.bf16.mxu1 %v11583_v37  ;;  %7298 = vpow2.f32 %v4424_v17  ;;  %v14681_v37 = vld [vmem:[#allocation407_spill] sm:$0xff]  ;;  %v11597_v9 = vpack.c.bf16 %v7269_v47, %v7263_v14  ;;  %v4394_v5 = vmul.f32 1.442695, %v3571_v6  ;;  %v3553_v14 = vsub.f32 %v14686_v23, %v10664_v63  ;;  %v7495_v47 = vld [vmem:[#allocation3 + $0x14] ss:$48 sps:$4 sm:$0xff]  }
 0x6e4   : > { %v7273_v32 = vpop.eup %7272  ;;  %7300 = vpow2.f32 %v4436_v55  ;;  %v3552_v52 = vsub.f32 %v14681_v37, %v10664_v63  ;;  %v3561_v55 = vsub.f32 %v14683_v53, %v10688_v26  ;;  %v11606_v37 = vpack.c.bf16 %v7271_v56, %v7267_v25  ;;  %v7496_v53 = vld [vmem:[#allocation3 + $0x8] ss:$104 sps:$4 sm:$0xff]  }
 0x6e5   : > { %v7275_v48 = vpop.eup %7274  ;;  %7302 = vpow2.f32 %v4440_v35  ;;  %5403 = vmatmul.mubr.bf16.gmra.mxu0 %v7494_v8  ;;  %v14684_v35 = vld [vmem:[#allocation408_spill] sm:$0xff]  ;;  %v4404_v6 = vmul.f32 1.442695, %v3576_v0  ;;  %v4408_v56 = vmul.f32 1.442695, %v3578_v39  ;;  %v14690_v39 = vld [vmem:[#allocation411_spill] sm:$0xff] }
 0x6e6   : > { %v7277_v62 = vpop.eup %7276  ;;  %v11599_v22 = vpack.c.bf16 %v7273_v32, %v7275_v48  ;;  %7304 = vpow2.f32 %v4406_v4  ;;  %v3554_v61 = vsub.f32 %v14684_v35, %v10664_v63  ;;  %5469 = vmatpush1.bf16.xpose.msra.mxu0 %v11597_v9  ;;  %14685 = vst [vmem:[#allocation376_spill] sm:$0xff] %v11606_v37  ;;  %5498 = vmatprep.mubr.bf16.mxu0 %v7495_v47  ;;  %v14688_v48 = vld [vmem:[#allocation414_spill] sm:$0xff]  ;;  %v4374_v0 = vmul.f32 1.442695, %v3561_v55  ;;  %v14692_v55 = vld [vmem:[#allocation412_spill] sm:$0xff] }
 0x6e7   : > { %v7279_v17 = vpop.eup %7278  ;;  %7306 = vpow2.f32 %v4390_v33  ;;  %v3563_v44 = vsub.f32 %v14688_v48, %v10688_v26  ;;  %v7497_v33 = vld [vmem:[#allocation3 + $0x4c] ss:$48 sps:$4 sm:$0xff]   ;;  %v4356_v35 = vmul.f32 1.442695, %v3552_v52  ;;  %v4358_v23 = vmul.f32 1.442695, %v3553_v14 }
 0x6e8   : > { %v7281_v43 = vpop.eup %7280  ;;  %5470 = vmatprep.subr.bf16.mxu0 %v11599_v22  ;;  %7308 = vpow2.f32 %v4410_v31  ;;  %v4360_v48 = vmul.f32 1.442695, %v3554_v61  ;;  %v14693_v14 = vld [vmem:[#allocation405_spill] sm:$0xff] }
 0x6e9   : > { %v7283_v4 = vpop.eup %7282  ;;  %v11611_v32 = vpack.c.bf16 %v7277_v62, %v7281_v43  ;;  %5456 = vmatmul.mubr.bf16.gmra.mxu1 %v7496_v53  ;;  %7310 = vpow2.f32 %v4388_v24  ;;  %v14689_v62 = vld [vmem:[#allocation410_spill] sm:$0xff]  ;;  %v3560_v24 = vsub.f32 %v14690_v39, %v10688_v26  ;;  %v4378_v53 = vmul.f32 1.442695, %v3563_v44  ;;  %v14694_v44 = vld [vmem:[#allocation400_spill] sm:$0xff] }
 0x6ea   : > { %v7285_v25 = vpop.eup %7284  ;;  %5522 = vmatpush1.bf16.xpose.msra.mxu1 %v11606_v37  ;;  %5551 = vmatprep.mubr.bf16.mxu1 %v7497_v33  ;;  %7312 = vpow2.f32 %v4394_v5  ;;  %v3555_v31 = vsub.f32 %v14689_v62, %v10664_v63  ;;  %v3562_v37 = vsub.f32 %v14692_v55, %v10688_v26  ;;  %v14696_v26 = vld [vmem:[#allocation401_spill] sm:$0xff] }
 0x6eb   : > { %14687 = vst [vmem:[#allocation367_spill] sm:$0xff] %v11611_v32  ;;  %v7287_v8 = vpop.eup %7286  ;;  %5523 = vmatprep.subr.bf16.mxu1 %v11611_v32  ;;  %7314 = vpow2.f32 %v4392_v59  ;;  %v14691_v32 = vld [vmem:[#allocation399_spill] sm:$0xff]  ;;  %v11625_v63 = vpack.c.bf16 %v7285_v25, %v7279_v17  ;;  %v3537_v17 = vsub.f32 %v14696_v26, %v10686_v57 }
 0x6ec   : > { %v7289_v43 = vpop.eup %7288  ;;  %7316 = vpow2.f32 %v4404_v6  ;;  %v3536_v5 = vsub.f32 %v14691_v32, %v10686_v57  ;;  %v4362_v61 = vmul.f32 1.442695, %v3555_v31  ;;  %v3545_v6 = vsub.f32 %v14693_v14, %v10704_v49  ;;  %v14698_v31 = vld [vmem:[#allocation406_spill] sm:$0xff] }
 0x6ed   : > { %v7291_v47 = vpop.eup %7290  ;;  %7318 = vpow2.f32 %v4408_v56  ;;  %v3538_v56 = vsub.f32 %v14694_v44, %v10686_v57  ;;  %v11634_v32 = vpack.c.bf16 %v7287_v8, %v7283_v4  ;;  %v4376_v55 = vmul.f32 1.442695, %v3562_v37 }
 0x6ee   : > { %v7293_v33 = vpop.eup %7292  ;;  %v11627_v52 = vpack.c.bf16 %v7289_v43, %v7291_v47  ;;  %7320 = vpow2.f32 %v4374_v0  ;;  %5471 = vmatpush1.bf16.xpose.msra.mxu0 %v11625_v63  ;;  %v4372_v43 = vmul.f32 1.442695, %v3560_v24  ;;  %v3547_v47 = vsub.f32 %v14698_v31, %v10704_v49 }
 0x6ef   : > { %v7295_v59 = vpop.eup %7294  ;;  %14695 = vst [vmem:[#allocation368_spill] sm:$0xff] %v11634_v32  ;;  %7322 = vpow2.f32 %v4358_v23  ;;  %v4342_v8 = vmul.f32 1.442695, %v3545_v6  ;;  %v14699_v23 = vld [vmem:[#allocation402_spill] sm:$0xff]  ;;  %v4328_v44 = vmul.f32 1.442695, %v3538_v56 }
 0x6f0   : > { %v7297_v62 = vpop.eup %7296  ;;  %5472 = vmatprep.subr.bf16.mxu0 %v11627_v52  ;;  %7324 = vpow2.f32 %v4378_v53  ;;  %v3539_v24 = vsub.f32 %v14699_v23, %v10686_v57  ;;  %v4326_v53 = vmul.f32 1.442695, %v3537_v17  ;;  %v4346_v26 = vmul.f32 1.442695, %v3547_v47  ;;  %v14702_v6 = vld [vmem:[#allocation404_spill] sm:$0xff]  ;;  %v14704_v17 = vld [vmem:[#allocation397_spill] sm:$0xff] }
 0x6f1   : > { %v7299_v25 = vpop.eup %7298  ;;  %v11639_v0 = vpack.c.bf16 %v7293_v33, %v7297_v62  ;;  %7326 = vpow2.f32 %v4356_v35  ;;  %v4324_v33 = vmul.f32 1.442695, %v3536_v5  ;;  %v14700_v35 = vld [vmem:[#allocation403_spill] sm:$0xff]  ;;  %v14705_v47 = vld [vmem:[#allocation392_spill] sm:$0xff] }
 0x6f2   : > { %v7301_v39 = vpop.eup %7300  ;;  %5524 = vmatpush1.bf16.xpose.msra.mxu1 %v11634_v32  ;;  %7328 = vpow2.f32 %v4362_v61  ;;  %v3544_v37 = vsub.f32 %v14700_v35, %v10704_v49  ;;  %v3546_v32 = vsub.f32 %v14702_v6, %v10704_v49  ;;  %v4330_v56 = vmul.f32 1.442695, %v3539_v24  ;;  %v14707_v49 = vld [vmem:[#allocation393_spill] sm:$0xff]  ;;  %v14709_v24 = vld [vmem:[#allocation398_spill] sm:$0xff] }
 0x6f3   : > { %14697 = vst [vmem:[#allocation359_spill] sm:$0xff] %v11639_v0  ;;  %v7303_v4 = vpop.eup %7302  ;;  %5525 = vmatprep.subr.bf16.mxu1 %v11639_v0  ;;  %7330 = vpow2.f32 %v4360_v48  ;;  %v14701_v0 = vld [vmem:[#allocation391_spill] sm:$0xff]  ;;  %v11653_v57 = vpack.c.bf16 %v7301_v39, %v7295_v59  ;;  %v3521_v59 = vsub.f32 %v14707_v49, %v10702_v38 }
 0x6f4   : > { %v7305_v14 = vpop.eup %7304  ;;  %7332 = vpow2.f32 %v4372_v43  ;;  %v3520_v61 = vsub.f32 %v14701_v0, %v10702_v38  ;;  %v3529_v43 = vsub.f32 %v14704_v17, %v10720_v28  ;;  %v11662_v0 = vpack.c.bf16 %v7303_v4, %v7299_v25  ;;  %v14710_v25 = vld [vmem:[#allocation395_spill] sm:$0xff] }
 0x6f5   : > { %v7307_v62 = vpop.eup %7306  ;;  %7334 = vpow2.f32 %v4376_v55  ;;  %v3522_v55 = vsub.f32 %v14705_v47, %v10702_v38  ;;  %v4344_v6 = vmul.f32 1.442695, %v3546_v32  ;;  %v3528_v4 = vsub.f32 %v14710_v25, %v10720_v28  ;;  %v14712_v25 = vld [vmem:[#allocation396_spill] sm:$0xff] }
 0x6f6   : > { %v7309_v31 = vpop.eup %7308  ;;  %v11655_v5 = vpack.c.bf16 %v7305_v14, %v7307_v62  ;;  %7336 = vpow2.f32 %v4342_v8  ;;  %5473 = vmatpush1.bf16.xpose.msra.mxu0 %v11653_v57  ;;  %14706 = vst [vmem:[#allocation371_spill] sm:$0xff] %v11662_v0  ;;  %v4340_v14 = vmul.f32 1.442695, %v3544_v37  ;;  %v3531_v62 = vsub.f32 %v14709_v24, %v10720_v28 }
 0x6f7   : > { %v7311_v48 = vpop.eup %7310  ;;  %7338 = vpow2.f32 %v4326_v53  ;;  %v4310_v37 = vmul.f32 1.442695, %v3529_v43  ;;  %v4292_v49 = vmul.f32 1.442695, %v3520_v61 }
 0x6f8   : > { %14703 = vst [vmem:[#allocation360_spill] sm:$0xff] %v11655_v5  ;;  %v7313_v23 = vpop.eup %7312  ;;  %5474 = vmatprep.subr.bf16.mxu0 %v11655_v5  ;;  %7340 = vpow2.f32 %v4346_v26  ;;  %v4314_v32 = vmul.f32 1.442695, %v3531_v62  ;;  %v4308_v5 = vmul.f32 1.442695, %v3528_v4 }
 0x6f9   : > { %v7315_v39 = vpop.eup %7314  ;;  %v11667_v8 = vpack.c.bf16 %v7309_v31, %v7313_v23  ;;  %7342 = vpow2.f32 %v4324_v33  ;;  %v14711_v31 = vld [vmem:[#allocation394_spill] sm:$0xff]  ;;  %v4294_v23 = vmul.f32 1.442695, %v3521_v59  ;;  %v4296_v33 = vmul.f32 1.442695, %v3522_v55 }
 0x6fa   : > { %v7317_v35 = vpop.eup %7316  ;;  %5526 = vmatpush1.bf16.xpose.msra.mxu1 %v11662_v0  ;;  %7344 = vpow2.f32 %v4330_v56  ;;  %v3523_v17 = vsub.f32 %v14711_v31, %v10702_v38  ;;  %v3530_v0 = vsub.f32 %v14712_v25, %v10720_v28  ;;  %v14714_v55 = vld [vmem:[#allocation66_spill] sm:$0xff]  ;;  %v14715_v28 = vld [vmem:[#allocation67_spill] sm:$0xff] }
 0x6fb   : > { %14708 = vst [vmem:[#allocation372_spill] sm:$0xff] %v11667_v8  ;;  %v7319_v53 = vpop.eup %7318  ;;  %5527 = vmatprep.subr.bf16.mxu1 %v11667_v8  ;;  %7346 = vpow2.f32 %v4328_v44  ;;  %v11679_v8 = vpack.c.bf16 %v7317_v35, %v7311_v48  ;;  %v14713_v44 = vld [vmem:[#allocation39_spill] sm:$0xff]  ;;  %v3761_v48 = vsub.f32 %v14715_v28, %v14532_v45  ;;  %v14718_v31 = vld [vmem:[#allocation62_spill] sm:$0xff] }
 0x6fc   : > { %v7321_v26 = vpop.eup %7320  ;;  %7348 = vpow2.f32 %v4340_v14  ;;  %v4298_v38 = vmul.f32 1.442695, %v3523_v17  ;;  %v3769_v59 = vsub.f32 %v14713_v44, %v10734_v42  ;;  %v3760_v14 = vsub.f32 %v14714_v55, %v14532_v45 }
 0x6fd   : > { %v7323_v47 = vpop.eup %7322  ;;  %7350 = vpow2.f32 %v4344_v6  ;;  %v11688_v62 = vpack.c.bf16 %v7319_v53, %v7315_v39  ;;  %v14716_v6 = vld [vmem:[#allocation71_spill] sm:$0xff]  ;;  %v3771_v17 = vsub.f32 %v14718_v31, %v10734_v42  ;;  %v4312_v39 = vmul.f32 1.442695, %v3530_v0  ;;  %v14721_v31 = vld [vmem:[#allocation505_spill] sm:$0xff] }
 0x6fe   : > { %v7325_v24 = vpop.eup %7324  ;;  %v11681_v43 = vpack.c.bf16 %v7321_v26, %v7323_v47  ;;  %7352 = vpow2.f32 %v4310_v37  ;;  %5475 = vmatpush1.bf16.xpose.msra.mxu0 %v11679_v8  ;;  %v3762_v4 = vsub.f32 %v14716_v6, %v14532_v45  ;;  %v14719_v47 = vld [vmem:[#allocation60_spill] sm:$0xff] }
 0x6ff   : > { %v7327_v56 = vpop.eup %7326  ;;  %7354 = vpow2.f32 %v4294_v23  ;;  %v4790_v23 = vmul.f32 1.442695, %v3769_v59  ;;  %v3763_v25 = vsub.f32 %v14719_v47, %v14532_v45  ;;  %v4794_v28 = vmul.f32 1.442695, %v3771_v17  ;;  %v14722_v59 = vld [vmem:[#allocation40_spill] sm:$0xff]  ;;  %v14724_v17 = vld [vmem:[#allocation55_spill] sm:$0xff] }
 0x700   : > { %v7329_v61 = vpop.eup %7328  ;;  %5476 = vmatprep.subr.bf16.mxu0 %v11681_v43  ;;  %7356 = vpow2.f32 %v4314_v32  ;;  %v4774_v32 = vmul.f32 1.442695, %v3761_v48  ;;  %v4776_v55 = vmul.f32 1.442695, %v3762_v4  ;;  %v14723_v48 = vld [vmem:[#allocation47_spill] sm:$0xff] }
 0x701   : > { %v7331_v35 = vpop.eup %7330  ;;  %v11695_v37 = vpack.c.bf16 %v7325_v24, %v7329_v61  ;;  %7358 = vpow2.f32 %v4292_v49  ;;  %v4772_v24 = vmul.f32 1.442695, %v3760_v14  ;;  %v14720_v49 = vld [vmem:[#allocation59_spill] sm:$0xff]  ;;  %v3753_v4 = vsub.f32 %v14723_v48, %v14543_v41 }
 0x702   : > { %v7333_v26 = vpop.eup %7332  ;;  %5528 = vmatpush1.bf16.xpose.msra.mxu1 %v11688_v62  ;;  %7360 = vpow2.f32 %v4298_v38  ;;  %v3768_v0 = vsub.f32 %v14720_v49, %v10734_v42  ;;  %v3744_v38 = vsub.f32 %v14721_v31, %v14546_v7 }
 0x703   : > { %14717 = vst [vmem:[#allocation351_spill] sm:$0xff] %v11695_v37  ;;  %v7335_v53 = vpop.eup %7334  ;;  %5529 = vmatprep.subr.bf16.mxu1 %v11695_v37  ;;  %7362 = vpow2.f32 %v4296_v33  ;;  %v3770_v37 = vsub.f32 %v14722_v59, %v10734_v42  ;;  %v11709_v45 = vpack.c.bf16 %v7333_v26, %v7327_v56  ;;  %v14726_v42 = vld [vmem:[#allocation509_spill] sm:$0xff] }
 0x704   : > { %v7337_v44 = vpop.eup %7336  ;;  %7364 = vpow2.f32 %v4308_v5  ;;  %v4778_v5 = vmul.f32 1.442695, %v3763_v25  ;;  %v11718_v49 = vpack.c.bf16 %v7335_v53, %v7331_v35  ;;  %v3745_v56 = vsub.f32 %v14726_v42, %v14546_v7  ;;  %v14728_v25 = vld [vmem:[#allocation70_spill] sm:$0xff] }
 0x705   : > { %v7339_v61 = vpop.eup %7338  ;;  %7366 = vpow2.f32 %v4312_v39  ;;  %v3746_v39 = vsub.f32 %v14724_v17, %v14546_v7  ;;  %v4792_v59 = vmul.f32 1.442695, %v3770_v37  ;;  %v4758_v53 = vmul.f32 1.442695, %v3753_v4  ;;  %v14732_v4 = vld [vmem:[#allocation48_spill] sm:$0xff] }
 0x706   : > { %v7341_v6 = vpop.eup %7340  ;;  %v11711_v14 = vpack.c.bf16 %v7337_v44, %v7339_v61  ;;  %7368 = vpow2.f32 %v4790_v23  ;;  %5477 = vmatpush1.bf16.xpose.msra.mxu0 %v11709_v45  ;;  %14725 = vst [vmem:[#allocation352_spill] sm:$0xff] %v11718_v49  ;;  %v4788_v44 = vmul.f32 1.442695, %v3768_v0  ;;  %v3755_v61 = vsub.f32 %v14728_v25, %v14543_v41 }
 0x707   : > { %v7343_v33 = vpop.eup %7342  ;;  %7370 = vpow2.f32 %v4774_v32  ;;  %v14729_v32 = vld [vmem:[#allocation56_spill] sm:$0xff]  ;;  %v4744_v17 = vmul.f32 1.442695, %v3746_v39 }
 0x708   : > { %v7345_v47 = vpop.eup %7344  ;;  %5478 = vmatprep.subr.bf16.mxu0 %v11711_v14  ;;  %7372 = vpow2.f32 %v4794_v28  ;;  %v3747_v0 = vsub.f32 %v14729_v32, %v14546_v7  ;;  %v4742_v28 = vmul.f32 1.442695, %v3745_v56  ;;  %v4762_v42 = vmul.f32 1.442695, %v3755_v61  ;;  %v14733_v56 = vld [vmem:[#allocation504_spill] sm:$0xff]  ;;  %v14734_v61 = vld [vmem:[#allocation495_spill] sm:$0xff] }
 0x709   : > { %v7347_v26 = vpop.eup %7346  ;;  %v11723_v23 = vpack.c.bf16 %v7341_v6, %v7345_v47  ;;  %7374 = vpow2.f32 %v4772_v24  ;;  %v4740_v6 = vmul.f32 1.442695, %v3744_v38  ;;  %v14730_v24 = vld [vmem:[#allocation68_spill] sm:$0xff] }
 0x70a   : > { %v7349_v31 = vpop.eup %7348  ;;  %5530 = vmatpush1.bf16.xpose.msra.mxu1 %v11718_v49  ;;  %7376 = vpow2.f32 %v4778_v5  ;;  %v3752_v37 = vsub.f32 %v14730_v24, %v14543_v41  ;;  %v3754_v49 = vsub.f32 %v14732_v4, %v14543_v41  ;;  %v4746_v39 = vmul.f32 1.442695, %v3747_v0  ;;  %v14736_v41 = vld [vmem:[#allocation499_spill] sm:$0xff] }
 0x70b   : > { %14727 = vst [vmem:[#allocation363_spill] sm:$0xff] %v11723_v23  ;;  %v7351_v35 = vpop.eup %7350  ;;  %5531 = vmatprep.subr.bf16.mxu1 %v11723_v23  ;;  %7378 = vpow2.f32 %v4776_v55  ;;  %v14731_v23 = vld [vmem:[#allocation497_spill] sm:$0xff]  ;;  %v11737_v7 = vpack.c.bf16 %v7349_v31, %v7343_v33  ;;  %v3729_v33 = vsub.f32 %v14736_v41, %v14559_v58  ;;  %v14738_v0 = vld [vmem:[#allocation507_spill] sm:$0xff] }
 0x70c   : > { %v7353_v48 = vpop.eup %7352  ;;  %7380 = vpow2.f32 %v4788_v44  ;;  %v3728_v5 = vsub.f32 %v14731_v23, %v14559_v58  ;;  %v3737_v44 = vsub.f32 %v14733_v56, %v14557_v46  ;;  %v11746_v23 = vpack.c.bf16 %v7351_v35, %v7347_v26 }
 0x70d   : > { %v7355_v47 = vpop.eup %7354  ;;  %7382 = vpow2.f32 %v4792_v59  ;;  %v3730_v59 = vsub.f32 %v14734_v61, %v14559_v58  ;;  %v4760_v4 = vmul.f32 1.442695, %v3754_v49 }
 0x70e   : > { %v7357_v25 = vpop.eup %7356  ;;  %v11739_v38 = vpack.c.bf16 %v7353_v48, %v7355_v47  ;;  %7384 = vpow2.f32 %v4758_v53  ;;  %5479 = vmatpush1.bf16.xpose.msra.mxu0 %v11737_v7  ;;  %14735 = vst [vmem:[#allocation364_spill] sm:$0xff] %v11746_v23  ;;  %v4756_v48 = vmul.f32 1.442695, %v3752_v37  ;;  %v3739_v47 = vsub.f32 %v14738_v0, %v14557_v46 }
 0x70f   : > { %v7359_v55 = vpop.eup %7358  ;;  %7386 = vpow2.f32 %v4742_v28  ;;  %v4726_v35 = vmul.f32 1.442695, %v3737_v44  ;;  %v14739_v28 = vld [vmem:[#allocation498_spill] sm:$0xff]  ;;  %v4712_v61 = vmul.f32 1.442695, %v3730_v59  ;;  %v14742_v44 = vld [vmem:[#allocation501_spill] sm:$0xff] }
 0x710   : > { %v7361_v32 = vpop.eup %7360  ;;  %5480 = vmatprep.subr.bf16.mxu0 %v11739_v38  ;;  %7388 = vpow2.f32 %v4762_v42  ;;  %v3731_v37 = vsub.f32 %v14739_v28, %v14559_v58  ;;  %v4710_v42 = vmul.f32 1.442695, %v3729_v33  ;;  %v4730_v41 = vmul.f32 1.442695, %v3739_v47  ;;  %v14744_v33 = vld [vmem:[#allocation494_spill] sm:$0xff]  ;;  %v14745_v47 = vld [vmem:[#allocation487_spill] sm:$0xff] }
 0x711   : > { %v7363_v31 = vpop.eup %7362  ;;  %v11751_v53 = vpack.c.bf16 %v7357_v25, %v7361_v32  ;;  %7390 = vpow2.f32 %v4740_v6  ;;  %v4708_v25 = vmul.f32 1.442695, %v3728_v5  ;;  %v14740_v6 = vld [vmem:[#allocation500_spill] sm:$0xff] }
 0x712   : > { %v7365_v24 = vpop.eup %7364  ;;  %5532 = vmatpush1.bf16.xpose.msra.mxu1 %v11746_v23  ;;  %7392 = vpow2.f32 %v4746_v39  ;;  %v3736_v49 = vsub.f32 %v14740_v6, %v14557_v46  ;;  %v3738_v23 = vsub.f32 %v14742_v44, %v14557_v46  ;;  %v4714_v59 = vmul.f32 1.442695, %v3731_v37  ;;  %v14747_v46 = vld [vmem:[#allocation490_spill] sm:$0xff]  ;;  %v14749_v37 = vld [vmem:[#allocation493_spill] sm:$0xff] }
 0x713   : > { %14737 = vst [vmem:[#allocation343_spill] sm:$0xff] %v11751_v53  ;;  %v7367_v26 = vpop.eup %7366  ;;  %5533 = vmatprep.subr.bf16.mxu1 %v11751_v53  ;;  %7394 = vpow2.f32 %v4744_v17  ;;  %v14741_v53 = vld [vmem:[#allocation488_spill] sm:$0xff]  ;;  %v11765_v58 = vpack.c.bf16 %v7365_v24, %v7359_v55  ;;  %v3713_v55 = vsub.f32 %v14747_v46, %v14574_v15 }
 0x714   : > { %v7369_v56 = vpop.eup %7368  ;;  %7396 = vpow2.f32 %v4756_v48  ;;  %v3712_v39 = vsub.f32 %v14741_v53, %v14574_v15  ;;  %v3721_v48 = vsub.f32 %v14744_v33, %v14571_v36  ;;  %v11774_v53 = vpack.c.bf16 %v7367_v26, %v7363_v31  ;;  %v14750_v31 = vld [vmem:[#allocation492_spill] sm:$0xff] }
 0x715   : > { %v7371_v32 = vpop.eup %7370  ;;  %7398 = vpow2.f32 %v4760_v4  ;;  %v3714_v4 = vsub.f32 %v14745_v47, %v14574_v15  ;;  %v4728_v44 = vmul.f32 1.442695, %v3738_v23  ;;  %v3720_v26 = vsub.f32 %v14750_v31, %v14571_v36  ;;  %v14752_v23 = vld [vmem:[#allocation491_spill] sm:$0xff]  ;;  %v11793_v31 = vpop.f32.mrf.mxu0 }
 0x716   : > { %v7373_v0 = vpop.eup %7372  ;;  %v11767_v5 = vpack.c.bf16 %v7369_v56, %v7371_v32  ;;  %7400 = vpow2.f32 %v4726_v35  ;;  %5481 = vmatpush1.bf16.xpose.msra.mxu0 %v11765_v58  ;;  %14746 = vst [vmem:[#allocation355_spill] sm:$0xff] %v11774_v53  ;;  %v4724_v56 = vmul.f32 1.442695, %v3736_v49  ;;  %v3723_v32 = vsub.f32 %v14749_v37, %v14571_v36  ;;  %14753 = vst [vmem:[#allocation335_spill] sm:$0xff] %v11793_v31 }
 0x717   : > { %v7375_v17 = vpop.eup %7374  ;;  %7402 = vpow2.f32 %v4710_v42  ;;  %v4694_v49 = vmul.f32 1.442695, %v3721_v48  ;;  %v4678_v47 = vmul.f32 1.442695, %v3713_v55  ;;  %v3722_v37 = vsub.f32 %v14752_v23, %v14571_v36  ;;  %v14758_v36 = vld [vmem:[#allocation486_spill] sm:$0xff] }
 0x718   : > { %14743 = vst [vmem:[#allocation344_spill] sm:$0xff] %v11767_v5  ;;  %v7377_v28 = vpop.eup %7376  ;;  %5482 = vmatprep.subr.bf16.mxu0 %v11767_v5  ;;  %7404 = vpow2.f32 %v4730_v41  ;;  %v3705_v23 = vsub.f32 %v14758_v36, %v10842_v50 }
 0x719   : > { %v7379_v24 = vpop.eup %7378  ;;  %v11779_v35 = vpack.c.bf16 %v7373_v0, %v7377_v28  ;;  %7406 = vpow2.f32 %v4708_v25  ;;  %v14751_v0 = vld [vmem:[#allocation489_spill] sm:$0xff]  ;;  %v4676_v28 = vmul.f32 1.442695, %v3712_v39  ;;  %v11789_v25 = vmul.f32 1.442695, %v3714_v4  ;;  %v11799_v39 = vpop.f32.mrf.mxu1 }
 0x71a   : > { %v7381_v6 = vpop.eup %7380  ;;  %5534 = vmatpush1.bf16.xpose.msra.mxu1 %v11774_v53  ;;  %7408 = vpow2.f32 %v4714_v59  ;;  %v3715_v33 = vsub.f32 %v14751_v0, %v14574_v15  ;;  %v4698_v53 = vmul.f32 1.442695, %v3723_v32  ;;  %v14754_v59 = vld [vmem:[#allocation480_spill] sm:$0xff]  ;;  %v4692_v15 = vmul.f32 1.442695, %v3720_v26  ;;  %14756 = vst [vmem:[#allocation373_spill] sm:$0xff] %v11799_v39  ;;  %v5288_v4 = vpop.f32.mrf.mxu0 }
 0x71b   : > { %14748 = vst [vmem:[#allocation356_spill] sm:$0xff] %v11779_v35  ;;  %v7383_v42 = vpop.eup %7382  ;;  %5535 = vmatprep.subr.bf16.mxu1 %v11779_v35  ;;  %7410 = vpow2.f32 %v4712_v61  ;;  %v3696_v48 = vsub.f32 %v14754_v59, %v14589_v3  ;;  %v11797_v0 = vpack.c.bf16 %v7381_v6, %v7375_v17  ;;  %v14760_v17 = vld [vmem:[#allocation482_spill] sm:$0xff]  ;;  %v4696_v39 = vmul.f32 1.442695, %v3722_v37 }
 0x71c   : > { %v7385_v41 = vpop.eup %7384  ;;  %7412 = vpow2.f32 %v4724_v56  ;;  %v4682_v56 = vmul.f32 1.442695, %v3715_v33  ;;  %v11807_v59 = vpack.c.bf16 %v7383_v42, %v7379_v24  ;;  %v3697_v6 = vsub.f32 %v14760_v17, %v14589_v3  ;;  %v14762_v33 = vld [vmem:[#allocation485_spill] sm:$0xff]  ;;  %v14765_v17 = vld [vmem:[#allocation479_spill] sm:$0xff] }
 0x71d   : > { %v7387_v46 = vpop.eup %7386  ;;  %7414 = vpow2.f32 %v4728_v44  ;;  %14755 = vst [vmem:[#allocation369_spill] sm:$0xff] %v11797_v0  ;;  %v5289_v44 = vadd.f32 %v5288_v4, %v11296_v29  ;;  %v3707_v29 = vsub.f32 %v14762_v33, %v10842_v50 }
 0x71e   : > { %v7389_v35 = vpop.eup %7388  ;;  %v11801_v55 = vpack.c.bf16 %v7385_v41, %v7387_v46  ;;  %7416 = vpow2.f32 %v4694_v49  ;;  %5483 = vmatpush2.bf16.xpose.msra.mxu0 %v11797_v0  ;;  %14759 = vst [vmem:[#allocation374_spill] sm:$0xff] %v11807_v59  ;;  %v5290_v41 = vpop.f32.mrf.mxu0 }
 0x71f   : > { %v7391_v61 = vpop.eup %7390  ;;  %7418 = vpow2.f32 %v4678_v47  ;;  %v5341_v46 = vpop.f32.mrf.mxu1  ;;  %v5291_v24 = vadd.f32 %v5290_v41, %v11302_v1  ;;  %v14764_v47 = vld [vmem:[#allocation481_spill] sm:$0xff]  ;;  %v4646_v41 = vmul.f32 1.442695, %v3697_v6 }
 0x720   : > { %14757 = vst [vmem:[#allocation370_spill] sm:$0xff] %v11801_v55  ;;  %v7393_v32 = vpop.eup %7392  ;;  %5484 = vmatprep.subr.bf16.mxu0 %v11801_v55  ;;  %7420 = vpow2.f32 %v4698_v53  ;;  %v11818_v42 = vadd.f32 %v5341_v46, %v5289_v44  ;;  %v3699_v37 = vsub.f32 %v14764_v47, %v14589_v3  ;;  %v5292_v53 = vpop.f32.mrf.mxu0  ;;  %v14767_v47 = vld [vmem:[#allocation484_spill] sm:$0xff]  ;;  %v4666_v55 = vmul.f32 1.442695, %v3707_v29 }
 0x721   : > { %v7395_v26 = vpop.eup %7394  ;;  %v11812_v49 = vpack.c.bf16 %v7389_v35, %v7393_v32  ;;  %7422 = vpow2.f32 %v4676_v28  ;;  %v4644_v32 = vmul.f32 1.442695, %v3696_v48  ;;  %v5343_v33 = vpop.f32.mrf.mxu1  ;;  %v4662_v28 = vmul.f32 1.442695, %v3705_v23  ;;  %v14768_v48 = vld [vmem:[#allocation483_spill] sm:$0xff]  ;;  %v14769_v23 = vld [vmem:[#allocation276_spill] sm:$0xff] }
 0x722   : > { %v7397_v4 = vpop.eup %7396  ;;  %5536 = vmatpush2.bf16.xpose.msra.mxu1 %v11807_v59  ;;  %14763 = vst [vmem:[#allocation365_spill] sm:$0xff] %v11818_v42  ;;  %7424 = vpow2.f32 %v4682_v56  ;;  %v5293_v1 = vadd.f32 %v5292_v53, %v11312_v27  ;;  %v11826_v44 = vadd.f32 %v5343_v33, %v5291_v24  ;;  %v3704_v42 = vsub.f32 %v14767_v47, %v10842_v50  ;;  %v14770_v33 = vld [vmem:[#allocation474_spill] sm:$0xff] }
 0x723   : > { %14761 = vst [vmem:[#allocation361_spill] sm:$0xff] %v11812_v49  ;;  %v7399_v36 = vpop.eup %7398  ;;  %5537 = vmatprep.subr.bf16.mxu1 %v11812_v49  ;;  %7426 = vpow2.f32 %v4692_v15  ;;  %v3706_v35 = vsub.f32 %v14768_v48, %v10842_v50  ;;  %v5294_v49 = vpop.f32.mrf.mxu0  ;;  %v11835_v27 = vpack.c.bf16 %v7397_v4, %v7391_v61  ;;  %v4650_v24 = vmul.f32 1.442695, %v3699_v37  ;;  %v14771_v50 = vld [vmem:[#allocation478_spill] sm:$0xff]  ;;  %v14773_v37 = vld [vmem:[#allocation477_spill] sm:$0xff] }
 0x724   : > { %v7401_v31 = vpop.eup %7400  ;;  %14766 = vst [vmem:[#allocation362_spill] sm:$0xff] %v11826_v44  ;;  %7428 = vpow2.f32 %v4696_v39  ;;  %v5345_v59 = vpop.f32.mrf.mxu1  ;;  %v5295_v0 = vadd.f32 %v5294_v49, %v14769_v23  ;;  %v3681_v47 = vsub.f32 %v14770_v33, %v10840_v34  ;;  %v3689_v48 = vsub.f32 %v14771_v50, %v10877_v10  ;;  %v14777_v23 = vld [vmem:[#allocation473_spill] sm:$0xff] }
 0x725   : > { %v7403_v46 = vpop.eup %7402  ;;  %v11833_v15 = vadd.f32 %v5345_v59, %v5293_v1  ;;  %7430 = vpow2.f32 %v4662_v28  ;;  %v5298_v29 = vpop.f32.mrf.mxu0  ;;  %v11846_v61 = vpack.c.bf16 %v7399_v36, %v7395_v26  ;;  %v4660_v49 = vmul.f32 1.442695, %v3704_v42  ;;  %v14774_v36 = vld [vmem:[#allocation272_spill] sm:$0xff] }
 0x726   : > { %v7405_v56 = vpop.eup %7404  ;;  %v5347_v53 = vpop.f32.mrf.mxu1  ;;  %v11837_v39 = vpack.c.bf16 %v7401_v31, %v7403_v46  ;;  %5485 = vmatpush2.bf16.xpose.msra.mxu0 %v11835_v27  ;;  %7432 = vpow2.f32 %v4646_v41  ;;  %v5299_v59 = vadd.f32 %v5298_v29, %v11330_v54  ;;  %v3691_v28 = vsub.f32 %v14773_v37, %v10877_v10  ;;  %v14778_v29 = vld [vmem:[#allocation264_spill] sm:$0xff] }
 0x727   : > { %v7407_v6 = vpop.eup %7406  ;;  %v11843_v5 = vadd.f32 %v5347_v53, %v5295_v0  ;;  %7434 = vpow2.f32 %v4666_v55  ;;  %v5300_v1 = vpop.f32.mrf.mxu0  ;;  %v4664_v26 = vmul.f32 1.442695, %v3706_v35  ;;  %v4630_v55 = vmul.f32 1.442695, %v3689_v48 }
 0x728   : > { %v7409_v44 = vpop.eup %7408  ;;  %5486 = vmatprep.subr.bf16.mxu0 %v11837_v39  ;;  %v5351_v0 = vpop.f32.mrf.mxu1  ;;  %7436 = vpow2.f32 %v11789_v25  ;;  %v5301_v54 = vadd.f32 %v5300_v1, %v14774_v36  ;;  %v3683_v53 = vsub.f32 %v14777_v23, %v10840_v34  ;;  %v4614_v50 = vmul.f32 1.442695, %v3681_v47 }
 0x729   : > { %14772 = vst [vmem:[#allocation366_spill] sm:$0xff] %v11843_v5  ;;  %v7411_v31 = vpop.eup %7410  ;;  %v11850_v4 = vpack.c.bf16 %v7405_v56, %v7409_v44  ;;  %v11857_v41 = vadd.f32 %v5351_v0, %v5299_v59  ;;  %v14776_v44 = vld [vmem:[#allocation472_spill] sm:$0xff]  ;;  %7438 = vpow2.f32 %v4650_v24  ;;  %v5302_v33 = vpop.f32.mrf.mxu0  ;;  %v14779_v0 = vsub.f32 %v14765_v17, %v14589_v3  ;;  %v14782_v17 = vld [vmem:[#allocation470_spill] sm:$0xff] }
 0x72a   : > { %v7413_v46 = vpop.eup %7412  ;;  %5538 = vmatpush2.bf16.xpose.msra.mxu1 %v11846_v61  ;;  %v3680_v56 = vsub.f32 %v14776_v44, %v10840_v34  ;;  %v5353_v25 = vpop.f32.mrf.mxu1  ;;  %7440 = vpow2.f32 %v4644_v32  ;;  %v5303_v37 = vadd.f32 %v5302_v33, %v14778_v29  ;;  %v14780_v24 = vld [vmem:[#allocation476_spill] sm:$0xff]  ;;  %v4634_v44 = vmul.f32 1.442695, %v3691_v28  ;;  %v14781_v32 = vld [vmem:[#allocation475_spill] sm:$0xff] }
 0x72b   : > { %14775 = vst [vmem:[#allocation336_spill] sm:$0xff] %v11857_v41  ;;  %v7415_v42 = vpop.eup %7414  ;;  %5539 = vmatprep.subr.bf16.mxu1 %v11850_v4  ;;  %v11865_v59 = vadd.f32 %v5353_v25, %v5301_v54  ;;  %v4648_v36 = vmul.f32 1.442695, %v14779_v0  ;;  %7442 = vpow2.f32 %v4660_v49  ;;  %v3688_v48 = vsub.f32 %v14780_v24, %v10877_v10  ;;  %v14787_v24 = vld [vmem:[#allocation465_spill] sm:$0xff] }
 0x72c   : > { %v7417_v35 = vpop.eup %7416  ;;  %v5355_v23 = vpop.f32.mrf.mxu1  ;;  %7444 = vpow2.f32 %v4664_v26  ;;  %v3690_v47 = vsub.f32 %v14781_v32, %v10877_v10  ;;  %v11874_v41 = vpack.c.bf16 %v7413_v46, %v7407_v6  ;;  %v4618_v3 = vmul.f32 1.442695, %v3683_v53  ;;  %v14783_v10 = vld [vmem:[#allocation75_spill] sm:$0xff]  ;;  %v14784_v6 = vld [vmem:[#allocation466_spill] sm:$0xff] }
 0x72d   : > { %v7419_v1 = vpop.eup %7418  ;;  %v11876_v54 = vadd.f32 %v5355_v23, %v5303_v37  ;;  %7446 = vpow2.f32 %v4630_v55  ;;  %v3673_v49 = vsub.f32 %v14782_v17, %v10915_v51  ;;  %v4612_v28 = vmul.f32 1.442695, %v3680_v56  ;;  %v14785_v55 = vld [vmem:[#allocation469_spill] sm:$0xff]  ;;  %v14786_v56 = vld [vmem:[#allocation471_spill] sm:$0xff] }
 0x72e   : > { %v7421_v5 = vpop.eup %7420  ;;  %v11878_v25 = vpack.c.bf16 %v7417_v35, %v7419_v1  ;;  %5487 = vmatpush2.bf16.xpose.msra.mxu0 %v11874_v41  ;;  %v11883_v26 = vpack.c.bf16 %v7415_v42, %v7411_v31  ;;  %7448 = vpow2.f32 %v4614_v50  ;;  %v3665_v46 = vsub.f32 %v14784_v6, %v14783_v10 }
 0x72f   : > { %v7423_v33 = vpop.eup %7422  ;;  %v4628_v0 = vmul.f32 1.442695, %v3688_v48  ;;  %7450 = vpow2.f32 %v4634_v44  ;;  %v3675_v53 = vsub.f32 %v14785_v55, %v10915_v51  ;;  %v3682_v31 = vsub.f32 %v14786_v56, %v10840_v34  ;;  %v14788_v34 = vld [vmem:[#allocation468_spill] sm:$0xff] }
 0x730   : > { %v7425_v29 = vpop.eup %7424  ;;  %5488 = vmatprep.subr.bf16.mxu0 %v11878_v25  ;;  %7452 = vpow2.f32 %v4648_v36  ;;  %v4632_v42 = vmul.f32 1.442695, %v3690_v47  ;;  %v4598_v50 = vmul.f32 1.442695, %v3673_v49  ;;  %v4582_v44 = vmul.f32 1.442695, %v3665_v46 }
 0x731   : > { %v7427_v37 = vpop.eup %7426  ;;  %v11888_v35 = vpack.c.bf16 %v7421_v5, %v7425_v29  ;;  %7454 = vpow2.f32 %v4618_v3  ;;  %v3667_v5 = vsub.f32 %v14787_v24, %v14783_v10  ;;  %v4602_v32 = vmul.f32 1.442695, %v3675_v53  ;;  %v14789_v3 = vld [vmem:[#allocation463_spill] sm:$0xff] }
 0x732   : > { %v7429_v1 = vpop.eup %7428  ;;  %5540 = vmatpush2.bf16.xpose.msra.mxu1 %v11883_v26  ;;  %7456 = vpow2.f32 %v4612_v28  ;;  %v4616_v17 = vmul.f32 1.442695, %v3682_v31  ;;  %v3672_v47 = vsub.f32 %v14788_v34, %v10915_v51  ;;  %v11900_v29 = vpack.c.bf16 %v7427_v37, %v7423_v33 }
 0x733   : > { %5541 = vmatprep.subr.bf16.mxu1 %v11888_v35  ;;  %v7431_v48 = vpop.eup %7430  ;;  %7458 = vpow2.f32 %v4628_v0  ;;  %v3664_v49 = vsub.f32 %v14789_v3, %v14783_v10  ;;  %v4586_v28 = vmul.f32 1.442695, %v3667_v5  ;;  %v14790_v0 = vld [vmem:[#allocation467_spill] sm:$0xff] }
 0x734   : > { %v7433_v23 = vpop.eup %7432  ;;  %7460 = vpow2.f32 %v4632_v42  ;;  %v3674_v53 = vsub.f32 %v14790_v0, %v10915_v51  ;;  %v14793_v42 = vld [vmem:[#allocation464_spill] sm:$0xff]  ;;  %v4596_v24 = vmul.f32 1.442695, %v3672_v47 }
 0x735   : > { %v7435_v36 = vpop.eup %7434  ;;  %v11904_v55 = vpack.c.bf16 %v7431_v48, %v7433_v23  ;;  %7462 = vpow2.f32 %v4598_v50  ;;  %v3666_v50 = vsub.f32 %v14793_v42, %v14783_v10  ;;  %v4580_v5 = vmul.f32 1.442695, %v3664_v49 }
 0x736   : > { %v7437_v6 = vpop.eup %7436  ;;  %5489 = vmatpush2.bf16.xpose.msra.mxu0 %v11900_v29  ;;  %7464 = vpow2.f32 %v4582_v44  ;;  %v4600_v48 = vmul.f32 1.442695, %v3674_v53 }
 0x737   : > { %v7439_v46 = vpop.eup %7438  ;;  %v11909_v56 = vpack.c.bf16 %v7429_v1, %v7437_v6  ;;  %5490 = vmatprep.subr.bf16.mxu0 %v11904_v55  ;;  %7466 = vpow2.f32 %v4602_v32 }
 0x738   : > { %v7441_v31 = vpop.eup %7440  ;;  %v11912_v33 = vpack.c.bf16 %v7435_v36, %v7439_v46  ;;  %7468 = vpow2.f32 %v4616_v17  ;;  %v4584_v36 = vmul.f32 1.442695, %v3666_v50 }
 0x739   : > { %14791 = vst [vmem:[#allocation357_spill] sm:$0xff] %v11909_v56  ;;  %v7443_v37 = vpop.eup %7442  ;;  %7470 = vpow2.f32 %v4586_v28 }
 0x73a   : > { %14792 = vst [vmem:[#allocation353_spill] sm:$0xff] %v11912_v33  ;;  %5542 = vmatpush2.bf16.xpose.msra.mxu1 %v11909_v56  ;;  %v7445_v51 = vpop.eup %7444  ;;  %7472 = vpow2.f32 %v4596_v24  ;;  %v11918_v32 = vpack.c.bf16 %v7443_v37, %v7441_v31 }
 0x73b   : > { %5543 = vmatprep.subr.bf16.mxu1 %v11912_v33  ;;  %v7447_v1 = vpop.eup %7446  ;;  %7474 = vpow2.f32 %v4580_v5 }
 0x73c   : > { %v7449_v44 = vpop.eup %7448  ;;  %14794 = vst [vmem:[#allocation358_spill] sm:$0xff] %v11918_v32  ;;  %7476 = vpow2.f32 %v4600_v48 }
 0x73d   : > { %v7451_v23 = vpop.eup %7450  ;;  %v11920_v34 = vpack.c.bf16 %v7447_v1, %v7449_v44  ;;  %7478 = vpow2.f32 %v4584_v36 }
 0x73e   : > { %v7453_v17 = vpop.eup %7452  ;;  %5491 = vmatpush2.bf16.xpose.msra.mxu0 %v11918_v32 }
 0x73f   : > { %14795 = vst [vmem:[#allocation347_spill] sm:$0xff] %v11920_v34  ;;  %v7455_v10 = vpop.eup %7454  ;;  %v11923_v47 = vpack.c.bf16 %v7445_v51, %v7453_v17  ;;  %5492 = vmatprep.subr.bf16.mxu0 %v11920_v34  ;;  %v14804_v17 = vld [vmem:[#allocation308_spill] sm:$0xff] }
 0x740   : > { %v7457_v6 = vpop.eup %7456  ;;  %v11926_v3 = vpack.c.bf16 %v7451_v23, %v7455_v10  ;;  %v14805_v10 = vld [vmem:[#allocation309_spill] sm:$0xff] }
 0x741   : > { %14796 = vst [vmem:[#allocation354_spill] sm:$0xff] %v11923_v47  ;;  %v7459_v49 = vpop.eup %7458 }
 0x742   : > { %14797 = vst [vmem:[#allocation348_spill] sm:$0xff] %v11926_v3  ;;  %5544 = vmatpush2.bf16.xpose.msra.mxu1 %v11923_v47  ;;  %v7461_v28 = vpop.eup %7460  ;;  %v11930_v31 = vpack.c.bf16 %v7459_v49, %v7457_v6  ;;  %v14806_v6 = vld [vmem:[#allocation300_spill] sm:$0xff]  ;;  %v14807_v49 = vld [vmem:[#allocation57_spill] sm:$0xff] }
 0x743   : > { %5545 = vmatprep.subr.bf16.mxu1 %v11926_v3  ;;  %v7463_v46 = vpop.eup %7462 }
 0x744   : > { %v7465_v0 = vpop.eup %7464  ;;  %14798 = vst [vmem:[#allocation327_spill] sm:$0xff] %v11930_v31 }
 0x745   : > { %v7467_v53 = vpop.eup %7466  ;;  %v11932_v42 = vpack.c.bf16 %v7463_v46, %v7465_v0  ;;  %v14809_v46 = vld [vmem:[#allocation43_spill] sm:$0xff]  ;;  %v7498_v0 = vld [vmem:[#allocation3 + $0x10] ss:$48 sps:$4 sm:$0xff]  }
 0x746   : > { %v7469_v37 = vpop.eup %7468  ;;  %5493 = vmatpush2.bf16.xpose.msra.mxu0 %v11930_v31 }
 0x747   : > { %14799 = vst [vmem:[#allocation328_spill] sm:$0xff] %v11932_v42  ;;  %v7471_v50 = vpop.eup %7470  ;;  %v11935_v24 = vpack.c.bf16 %v7461_v28, %v7469_v37  ;;  %5494 = vmatprep.subr.bf16.mxu0 %v11932_v42  ;;  %v14808_v28 = vld [vmem:[#allocation306_spill] sm:$0xff]  ;;  %v14849_v42 = vld [vmem:[#allocation20_spill] sm:$0xff] }
 0x748   : > { %v11938_v51 = vpack.c.bf16 %v7467_v53, %v7471_v50  ;;  %v7473_v5 = vpop.eup %7472  ;;  %v14810_v53 = vld [vmem:[#allocation51_spill] sm:$0xff]  ;;  %v7499_v37 = vld [vmem:[#allocation3 + $0x34] ss:$-16 sps:$4 sm:$0xff]  }
 0x749   : > { %14800 = vst [vmem:[#allocation349_spill] sm:$0xff] %v11935_v24  ;;  %v7475_v1 = vpop.eup %7474  ;;  %v7500_v50 = vld [vmem:[#allocation3 + $0x48] ss:$48 sps:$4 sm:$0xff]  }
 0x74a   : > { %14801 = vst [vmem:[#allocation345_spill] sm:$0xff] %v11938_v51  ;;  %5546 = vmatpush2.bf16.xpose.msra.mxu1 %v11935_v24  ;;  %v7477_v48 = vpop.eup %7476  ;;  %v11942_v44 = vpack.c.bf16 %v7473_v5, %v7475_v1  ;;  %v14811_v5 = vld [vmem:[#allocation58_spill] sm:$0xff]  ;;  %v14812_v1 = vld [vmem:[#allocation52_spill] sm:$0xff] }
 0x74b   : > { %5547 = vmatprep.subr.bf16.mxu1 %v11938_v51  ;;  %v7479_v23 = vpop.eup %7478  ;;  %v14848_v24 = vld [vmem:[#allocation506_spill] sm:$0xff] }
 0x74c   : > { %14802 = vst [vmem:[#allocation350_spill] sm:$0xff] %v11942_v44  ;;  %v11945_v36 = vpack.c.bf16 %v7477_v48, %v7479_v23  ;;  %v14813_v48 = vld [vmem:[#allocation313_spill] sm:$0xff]  ;;  %v14814_v23 = vld [vmem:[#allocation63_spill] sm:$0xff] }
 0x74e   : > { %5495 = vmatpush2.bf16.xpose.msra.mxu0 %v11942_v44  ;;  %14803 = vst [vmem:[#allocation339_spill] sm:$0xff] %v11945_v36 }
 0x74f   : > { %5496 = vmatprep.subr.bf16.mxu0 %v14804_v17 }
 0x752   : > { %5548 = vmatpush2.bf16.xpose.msra.mxu1 %v11945_v36 }
 0x753   : > { %5549 = vmatprep.subr.bf16.mxu1 %v14805_v10 }
 0x756   : > { %5497 = vmatpush2.bf16.xpose.msra.mxu0 %v14806_v6 }
 0x757   : > { %5572 = vmatprep.subr.bf16.mxu0 %v14807_v49  ;;  %v7501_v49 = vld [vmem:[#allocation3 + $0x30] ss:$-16 sps:$4 sm:$0xff]  }
 0x75a   : > { %5550 = vmatpush2.bf16.xpose.msra.mxu1 %v14808_v28  ;;  %v14815_v28 = vld [vmem:[#allocation31_spill] sm:$0xff] }
 0x75b   : > { %5613 = vmatprep.subr.bf16.mxu1 %v14809_v46  ;;  %v13156_v46 = vmov 1065369472  }
 0x75d   : > { %5499 = vmatmul.mubr.bf16.vlgmr.msra.gmra.mxu0 %v7498_v0  ;;  %v14816_v0 = vld [vmem:[#allocation49_spill] sm:$0xff] }
 0x75e   : > { %5573 = vmatpush1.bf16.xpose.msra.mxu0 %v14810_v53  ;;  %5508 = vmatprep.mubr.bf16.mxu0 %v7499_v37  ;;  %v14817_v53 = vld [vmem:[#allocation310_spill] sm:$0xff]  ;;  %v14818_v37 = vld [vmem:[#allocation44_spill] sm:$0xff] }
 0x75f   : > { %5574 = vmatprep.subr.bf16.mxu0 %v14811_v5  ;;  %v14820_v5 = vld [vmem:[#allocation53_spill] sm:$0xff] }
 0x761   : > { %5552 = vmatmul.mubr.bf16.vlgmr.msra.gmra.mxu1 %v7500_v50  ;;  %v14819_v50 = vld [vmem:[#allocation50_spill] sm:$0xff] }
 0x762   : > { %5614 = vmatpush1.bf16.xpose.msra.mxu1 %v14812_v1  ;;  %5561 = vmatprep.mubr.bf16.mxu1 %v14813_v48  ;;  %v14821_v1 = vld [vmem:[#allocation41_spill] sm:$0xff]  ;;  %v14822_v48 = vld [vmem:[#allocation54_spill] sm:$0xff] }
 0x763   : > { %5615 = vmatprep.subr.bf16.mxu1 %v14814_v23  ;;  %v14824_v23 = vld [vmem:[#allocation42_spill] sm:$0xff] }
 0x765   : > { %5509 = vmatmul.mubr.bf16.gmra.mxu0 %v7501_v49  ;;  %v14825_v49 = vld [vmem:[#allocation46_spill] sm:$0xff] }
 0x766   : > { %5575 = vmatpush1.bf16.xpose.msra.mxu0 %v14815_v28  ;;  %5604 = vmatprep.mubr.bf16.mxu0 %v13156_v46  ;;  %v14823_v28 = vld [vmem:[#allocation45_spill] sm:$0xff] }
 0x767   : > { %5576 = vmatprep.subr.bf16.mxu0 %v14816_v0  ;;  %v14826_v0 = vld [vmem:[#allocation510_spill] sm:$0xff] }
 0x769   : > { %5562 = vmatmul.mubr.bf16.gmra.mxu1 %v14817_v53  ;;  %v14827_v53 = vld [vmem:[#allocation37_spill] sm:$0xff] }
 0x76a   : > { %5616 = vmatpush1.bf16.xpose.msra.mxu1 %v14818_v37  ;;  %5645 = vmatprep.mubr.bf16.mxu1 %v13156_v46  ;;  %v14828_v37 = vld [vmem:[#allocation33_spill] sm:$0xff]  ;;  %v14829_v46 = vld [vmem:[#allocation38_spill] sm:$0xff] }
 0x76b   : > { %5617 = vmatprep.subr.bf16.mxu1 %v14819_v50  ;;  %v14830_v50 = vld [vmem:[#allocation32_spill] sm:$0xff] }
 0x76e   : > { %5577 = vmatpush1.bf16.xpose.msra.mxu0 %v14820_v5  ;;  %v14831_v5 = vld [vmem:[#allocation34_spill] sm:$0xff] }
 0x76f   : > { %5578 = vmatprep.subr.bf16.mxu0 %v14821_v1  ;;  %v14832_v1 = vld [vmem:[#allocation35_spill] sm:$0xff] }
 0x772   : > { %5618 = vmatpush1.bf16.xpose.msra.mxu1 %v14822_v48  ;;  %v14833_v48 = vld [vmem:[#allocation36_spill] sm:$0xff] }
 0x773   : > { %5619 = vmatprep.subr.bf16.mxu1 %v14823_v28  ;;  %v14834_v28 = vld [vmem:[#allocation29_spill] sm:$0xff] }
 0x776   : > { %5579 = vmatpush1.bf16.xpose.msra.mxu0 %v14824_v23  ;;  %v14835_v23 = vld [vmem:[#allocation25_spill] sm:$0xff] }
 0x777   : > { %5580 = vmatprep.subr.bf16.mxu0 %v14825_v49  ;;  %v14836_v49 = vld [vmem:[#allocation30_spill] sm:$0xff] }
 0x77a   : > { %5620 = vmatpush1.bf16.xpose.msra.mxu1 %v14826_v0  ;;  %v14837_v0 = vld [vmem:[#allocation508_spill] sm:$0xff] }
 0x77b   : > { %5621 = vmatprep.subr.bf16.mxu1 %v14827_v53  ;;  %v14838_v53 = vld [vmem:[#allocation26_spill] sm:$0xff] }
 0x77e   : > { %5581 = vmatpush1.bf16.xpose.msra.mxu0 %v14828_v37  ;;  %v14839_v37 = vld [vmem:[#allocation27_spill] sm:$0xff] }
 0x77f   : > { %5582 = vmatprep.subr.bf16.mxu0 %v14829_v46  ;;  %v14840_v46 = vld [vmem:[#allocation23_spill] sm:$0xff] }
 0x782   : > { %5622 = vmatpush1.bf16.xpose.msra.mxu1 %v14830_v50  ;;  %v14841_v50 = vld [vmem:[#allocation21_spill] sm:$0xff] }
 0x783   : > { %5623 = vmatprep.subr.bf16.mxu1 %v14831_v5  ;;  %v14842_v5 = vld [vmem:[#allocation24_spill] sm:$0xff] }
 0x786   : > { %5583 = vmatpush1.bf16.xpose.msra.mxu0 %v14832_v1  ;;  %v14843_v1 = vld [vmem:[#allocation22_spill] sm:$0xff] }
 0x787   : > { %5584 = vmatprep.subr.bf16.mxu0 %v14833_v48  ;;  %v11990_v48 = vpop.f32.mrf.mxu0 }
 0x78a   : > { %5624 = vmatpush1.bf16.xpose.msra.mxu1 %v14834_v28  ;;  %v11992_v28 = vpop.f32.mrf.mxu1 }
 0x78b   : > { %5625 = vmatprep.subr.bf16.mxu1 %v14835_v23 }
 0x78e   : > { %5585 = vmatpush1.bf16.xpose.msra.mxu0 %v14836_v49  ;;  %v14844_v49 = vld [vmem:[#allocation28_spill] sm:$0xff] }
 0x78f   : > { %5586 = vmatprep.subr.bf16.mxu0 %v14837_v0  ;;  %v14845_v0 = vld [vmem:[#allocation18_spill] sm:$0xff] }
 0x792   : > { %5626 = vmatpush1.bf16.xpose.msra.mxu1 %v14838_v53 }
 0x793   : > { %5627 = vmatprep.subr.bf16.mxu1 %v14839_v37  ;;  %v14846_v37 = vld [vmem:[#allocation17_spill] sm:$0xff] }
 0x796   : > { %5587 = vmatpush1.bf16.xpose.msra.mxu0 %v14840_v46 }
 0x797   : > { %5588 = vmatprep.subr.bf16.mxu0 %v14841_v50  ;;  %v14847_v50 = vld [vmem:[#allocation19_spill] sm:$0xff] }
 0x79a   : > { %5628 = vmatpush1.bf16.xpose.msra.mxu1 %v14842_v5 }
 0x79b   : > { %5629 = vmatprep.subr.bf16.mxu1 %v14843_v1 }
 0x79d   : > { %v5394_v23 = vpop.f32.mrf.mxu0 }
 0x79e   : > { %5589 = vmatpush2.bf16.xpose.msra.mxu0 %v14844_v49 }
 0x79f   : > { %5590 = vmatprep.subr.bf16.mxu0 %v14845_v0  ;;  %v5396_v53 = vpop.f32.mrf.mxu0 }
 0x7a1   : > { %v5447_v6 = vpop.f32.mrf.mxu1  ;;  %v5398_v5 = vpop.f32.mrf.mxu0 }
 0x7a2   : > { %5630 = vmatpush2.bf16.xpose.msra.mxu1 %v14846_v37  ;;  %v11997_v46 = vadd.f32 %v5447_v6, %v5394_v23  ;;  %v14850_v37 = vld [vmem:[#allocation15_spill] sm:$0xff] }
 0x7a3   : > { %5631 = vmatprep.subr.bf16.mxu1 %v14847_v50  ;;  %v5449_v10 = vpop.f32.mrf.mxu1  ;;  %v5400_v36 = vpop.f32.mrf.mxu0 }
 0x7a4   : > { %v12000_v1 = vadd.f32 %v5449_v10, %v5396_v53  ;;  %v14851_v10 = vld [vmem:[#allocation65_spill] sm:$0xff] }
 0x7a5   : > { %v5451_v17 = vpop.f32.mrf.mxu1  ;;  %v5404_v51 = vpop.f32.mrf.mxu0 }
 0x7a6   : > { %v12002_v44 = vadd.f32 %v5451_v17, %v5398_v5  ;;  %5591 = vmatpush2.bf16.xpose.msra.mxu0 %v14848_v24  ;;  %v14852_v24 = vld [vmem:[#allocation16_spill] sm:$0xff] }
 0x7a7   : > { %v5453_v49 = vpop.f32.mrf.mxu1  ;;  %5592 = vmatprep.subr.bf16.mxu0 %v14849_v42  ;;  %v5406_v6 = vpop.f32.mrf.mxu0  ;;  %v14854_v42 = vld [vmem:[#allocation7_spill] sm:$0xff] }
 0x7a8   : > { %v12005_v0 = vadd.f32 %v5453_v49, %v5400_v36  ;;  %v14853_v36 = vld [vmem:[#allocation459_spill] sm:$0xff]  ;;  %v14855_v49 = vld [vmem:[#allocation502_spill] sm:$0xff] }
 0x7a9   : > { %v5457_v23 = vpop.f32.mrf.mxu1  ;;  %v5408_v17 = vpop.f32.mrf.mxu0 }
 0x7aa   : > { %5632 = vmatpush2.bf16.xpose.msra.mxu1 %v14850_v37  ;;  %v12009_v50 = vadd.f32 %v5457_v23, %v5404_v51  ;;  %v14856_v37 = vld [vmem:[#allocation11_spill] sm:$0xff]  ;;  %v14857_v51 = vld [vmem:[#allocation458_spill] sm:$0xff]  ;;  %v14858_v23 = vld [vmem:[#allocation12_spill] sm:$0xff] }
 0x7ab   : > { %5633 = vmatprep.subr.bf16.mxu1 %v14851_v10  ;;  %v5459_v53 = vpop.f32.mrf.mxu1  ;;  %v14860_v10 = vld [vmem:[#allocation13_spill] sm:$0xff] }
 0x7ac   : > { %v12012_v31 = vadd.f32 %v5459_v53, %v5406_v6  ;;  %v14859_v6 = vld [vmem:[#allocation9_spill] sm:$0xff]  ;;  %v14861_v53 = vld [vmem:[#allocation10_spill] sm:$0xff] }
 0x7ad   : > { %v5461_v5 = vpop.f32.mrf.mxu1 }
 0x7ae   : > { %v12014_v3 = vadd.f32 %v5461_v5, %v5408_v17  ;;  %5593 = vmatpush2.bf16.xpose.msra.mxu0 %v14852_v24  ;;  %v14862_v17 = vld [vmem:[#allocation14_spill] sm:$0xff]  ;;  %v14863_v5 = vld [vmem:[#allocation8_spill] sm:$0xff]  ;;  %v14864_v24 = vld [vmem:[#allocation461_spill] sm:$0xff] }
 0x7af   : > { %5594 = vmatprep.subr.bf16.mxu0 %v14853_v36  ;;  %v14865_v36 = vld [vmem:[#allocation460_spill] sm:$0xff] }
 0x7b2   : > { %5634 = vmatpush2.bf16.xpose.msra.mxu1 %v14854_v42  ;;  %v14866_v42 = vld [vmem:[#allocation462_spill] sm:$0xff] }
 0x7b3   : > { %5635 = vmatprep.subr.bf16.mxu1 %v14855_v49  ;;  %v14867_v49 = vld [vmem:[#allocation128_spill] sm:$0xff] }
 0x7b6   : > { %5595 = vmatpush2.bf16.xpose.msra.mxu0 %v14856_v37  ;;  %v14868_v37 = vld [vmem:[#allocation129_spill] sm:$0xff] }
 0x7b7   : > { %5596 = vmatprep.subr.bf16.mxu0 %v14857_v51  ;;  %v14869_v51 = vld [vmem:[#allocation133_spill] sm:$0xff] }
 0x7ba   : > { %5636 = vmatpush2.bf16.xpose.msra.mxu1 %v14858_v23  ;;  %v14870_v23 = vld [vmem:[#allocation132_spill] sm:$0xff] }
 0x7bb   : > { %5637 = vmatprep.subr.bf16.mxu1 %v14859_v6  ;;  %v14871_v6 = vld [vmem:[#allocation134_spill] sm:$0xff] }
 0x7be   : > { %5597 = vmatpush2.bf16.xpose.msra.mxu0 %v14860_v10  ;;  %v14872_v10 = vld [vmem:[#allocation130_spill] sm:$0xff] }
 0x7bf   : > { %5598 = vmatprep.subr.bf16.mxu0 %v14861_v53  ;;  %v14873_v53 = vld [vmem:[#allocation135_spill] sm:$0xff] }
 0x7c2   : > { %5638 = vmatpush2.bf16.xpose.msra.mxu1 %v14862_v17  ;;  %v14874_v17 = vld [vmem:[#allocation131_spill] sm:$0xff] }
 0x7c3   : > { %5639 = vmatprep.subr.bf16.mxu1 %v14863_v5  ;;  %v14875_v5 = vld [vmem:[#allocation121_spill] sm:$0xff] }
 0x7c6   : > { %5599 = vmatpush2.bf16.xpose.msra.mxu0 %v14864_v24  ;;  %v14876_v24 = vmov 1065369472  }
 0x7c7   : > { %5600 = vmatprep.subr.bf16.mxu0 %v14865_v36  ;;  %v14877_v36 = vld [vmem:[#allocation120_spill] sm:$0xff] }
 0x7ca   : > { %5640 = vmatpush2.bf16.xpose.msra.mxu1 %v14866_v42  ;;  %v14878_v42 = vld [vmem:[#allocation113_spill] sm:$0xff] }
 0x7cb   : > { %5641 = vmatprep.subr.bf16.mxu1 %v14867_v49  ;;  %v14879_v49 = vld [vmem:[#allocation112_spill] sm:$0xff] }
 0x7ce   : > { %5601 = vmatpush2.bf16.xpose.msra.mxu0 %v14868_v37  ;;  %v14880_v37 = vld [vmem:[#allocation125_spill] sm:$0xff] }
 0x7cf   : > { %5602 = vmatprep.subr.bf16.mxu0 %v14869_v51  ;;  %v14881_v51 = vld [vmem:[#allocation124_spill] sm:$0xff] }
 0x7d2   : > { %5642 = vmatpush2.bf16.xpose.msra.mxu1 %v14870_v23  ;;  %v14882_v23 = vld [vmem:[#allocation126_spill] sm:$0xff] }
 0x7d3   : > { %5643 = vmatprep.subr.bf16.mxu1 %v14871_v6  ;;  %v14883_v6 = vld [vmem:[#allocation122_spill] sm:$0xff] }
 0x7d6   : > { %5603 = vmatpush2.bf16.xpose.msra.mxu0 %v14872_v10  ;;  %v14884_v10 = vld [vmem:[#allocation127_spill] sm:$0xff] }
 0x7d7   : > { %5654 = vmatprep.subr.bf16.mxu0 %v14873_v53  ;;  %v14885_v53 = vld [vmem:[#allocation123_spill] sm:$0xff] }
 0x7da   : > { %5644 = vmatpush2.bf16.xpose.msra.mxu1 %v14874_v17  ;;  %v14886_v17 = vld [vmem:[#allocation116_spill] sm:$0xff] }
 0x7db   : > { %5695 = vmatprep.subr.bf16.mxu1 %v14875_v5  ;;  %v14887_v5 = vld [vmem:[#allocation104_spill] sm:$0xff] }
 0x7dd   : > { %5605 = vmatmul.mubr.bf16.vlgmr.msra.gmra.mxu0 %v14876_v24 }
 0x7de   : > { %5655 = vmatpush1.bf16.xpose.msra.mxu0 %v14877_v36  ;;  %5686 = vmatprep.mubr.bf16.mxu0 %v14876_v24  ;;  %v14888_v36 = vld [vmem:[#allocation117_spill] sm:$0xff] }
 0x7df   : > { %5656 = vmatprep.subr.bf16.mxu0 %v14878_v42  ;;  %v14889_v42 = vld [vmem:[#allocation108_spill] sm:$0xff] }
 0x7e1   : > { %5646 = vmatmul.mubr.bf16.vlgmr.msra.gmra.mxu1 %v14876_v24 }
 0x7e2   : > { %5696 = vmatpush1.bf16.xpose.msra.mxu1 %v14879_v49  ;;  %5727 = vmatprep.mubr.bf16.mxu1 %v14876_v24  ;;  %v14890_v49 = vld [vmem:[#allocation114_spill] sm:$0xff] }
 0x7e3   : > { %5697 = vmatprep.subr.bf16.mxu1 %v14880_v37  ;;  %v14891_v37 = vld [vmem:[#allocation118_spill] sm:$0xff] }
 0x7e6   : > { %5657 = vmatpush1.bf16.xpose.msra.mxu0 %v14881_v51  ;;  %v14892_v51 = vld [vmem:[#allocation115_spill] sm:$0xff] }
 0x7e7   : > { %5658 = vmatprep.subr.bf16.mxu0 %v14882_v23  ;;  %v14893_v23 = vld [vmem:[#allocation119_spill] sm:$0xff] }
 0x7ea   : > { %5698 = vmatpush1.bf16.xpose.msra.mxu1 %v14883_v6  ;;  %v14894_v6 = vld [vmem:[#allocation106_spill] sm:$0xff] }
 0x7eb   : > { %5699 = vmatprep.subr.bf16.mxu1 %v14884_v10  ;;  %v14895_v10 = vld [vmem:[#allocation110_spill] sm:$0xff] }
 0x7ee   : > { %5659 = vmatpush1.bf16.xpose.msra.mxu0 %v14885_v53  ;;  %v14896_v53 = vld [vmem:[#allocation107_spill] sm:$0xff] }
 0x7ef   : > { %5660 = vmatprep.subr.bf16.mxu0 %v14886_v17  ;;  %v14897_v17 = vld [vmem:[#allocation111_spill] sm:$0xff] }
 0x7f2   : > { %5700 = vmatpush1.bf16.xpose.msra.mxu1 %v14887_v5  ;;  %v14898_v5 = vld [vmem:[#allocation109_spill] sm:$0xff] }
 0x7f3   : > { %5701 = vmatprep.subr.bf16.mxu1 %v14888_v36  ;;  %v14899_v36 = vld [vmem:[#allocation102_spill] sm:$0xff] }
 0x7f6   : > { %5661 = vmatpush1.bf16.xpose.msra.mxu0 %v14889_v42  ;;  %v14900_v42 = vld [vmem:[#allocation98_spill] sm:$0xff] }
 0x7f7   : > { %5662 = vmatprep.subr.bf16.mxu0 %v14890_v49  ;;  %v14901_v49 = vld [vmem:[#allocation103_spill] sm:$0xff] }
 0x7fa   : > { %5702 = vmatpush1.bf16.xpose.msra.mxu1 %v14891_v37  ;;  %v14902_v37 = vld [vmem:[#allocation99_spill] sm:$0xff] }
 0x7fb   : > { %5703 = vmatprep.subr.bf16.mxu1 %v14892_v51  ;;  %v14903_v51 = vld [vmem:[#allocation105_spill] sm:$0xff] }
 0x7fe   : > { %5663 = vmatpush1.bf16.xpose.msra.mxu0 %v14893_v23  ;;  %v14904_v23 = vld [vmem:[#allocation100_spill] sm:$0xff] }
 0x7ff   : > { %5664 = vmatprep.subr.bf16.mxu0 %v14894_v6  ;;  %v14905_v6 = vld [vmem:[#allocation96_spill] sm:$0xff] }
 0x802   : > { %5704 = vmatpush1.bf16.xpose.msra.mxu1 %v14895_v10  ;;  %v14906_v10 = vld [vmem:[#allocation94_spill] sm:$0xff] }
 0x803   : > { %5705 = vmatprep.subr.bf16.mxu1 %v14896_v53  ;;  %v14907_v53 = vld [vmem:[#allocation101_spill] sm:$0xff] }
 0x806   : > { %5665 = vmatpush1.bf16.xpose.msra.mxu0 %v14897_v17  ;;  %v14908_v17 = vld [vmem:[#allocation95_spill] sm:$0xff] }
 0x807   : > { %5666 = vmatprep.subr.bf16.mxu0 %v14898_v5  ;;  %v12076_v5 = vpop.f32.mrf.mxu0 }
 0x808   : > { %14909 = vst [vmem:[#allocation346_spill] sm:$0xff] %v12076_v5 }
 0x80a   : > { %5706 = vmatpush1.bf16.xpose.msra.mxu1 %v14899_v36  ;;  %v12078_v36 = vpop.f32.mrf.mxu1 }
 0x80b   : > { %5707 = vmatprep.subr.bf16.mxu1 %v14900_v42  ;;  %14910 = vst [vmem:[#allocation340_spill] sm:$0xff] %v12078_v36 }
 0x80e   : > { %5667 = vmatpush1.bf16.xpose.msra.mxu0 %v14901_v49 }
 0x80f   : > { %5668 = vmatprep.subr.bf16.mxu0 %v14902_v37  ;;  %v14911_v37 = vld [vmem:[#allocation90_spill] sm:$0xff] }
 0x812   : > { %5708 = vmatpush1.bf16.xpose.msra.mxu1 %v14903_v51 }
 0x813   : > { %5709 = vmatprep.subr.bf16.mxu1 %v14904_v23  ;;  %v14912_v23 = vld [vmem:[#allocation88_spill] sm:$0xff] }
 0x816   : > { %5669 = vmatpush1.bf16.xpose.msra.mxu0 %v14905_v6  ;;  %v14913_v6 = vld [vmem:[#allocation97_spill] sm:$0xff] }
 0x817   : > { %5670 = vmatprep.subr.bf16.mxu0 %v14906_v10 }
 0x81a   : > { %5710 = vmatpush1.bf16.xpose.msra.mxu1 %v14907_v53 }
 0x81b   : > { %5711 = vmatprep.subr.bf16.mxu1 %v14908_v17  ;;  %v14914_v17 = vld [vmem:[#allocation86_spill] sm:$0xff] }
 0x81d   : > { %v5500_v42 = vpop.f32.mrf.mxu0 }
 0x81e   : > { %v5501_v49 = vadd.f32 %v5500_v42, %v11997_v46  ;;  %5671 = vmatpush2.bf16.xpose.msra.mxu0 %v14911_v37 }
 0x81f   : > { %v5502_v51 = vpop.f32.mrf.mxu0  ;;  %5672 = vmatprep.subr.bf16.mxu0 %v14912_v23 }
 0x820   : > { %v5503_v10 = vadd.f32 %v5502_v51, %v12000_v1 }
 0x821   : > { %v5553_v47 = vpop.f32.mrf.mxu1  ;;  %v5504_v5 = vpop.f32.mrf.mxu0 }
 0x822   : > { %5712 = vmatpush2.bf16.xpose.msra.mxu1 %v14913_v6  ;;  %v12085_v53 = vadd.f32 %v5553_v47, %v5501_v49  ;;  %v5505_v36 = vadd.f32 %v5504_v5, %v12002_v44  ;;  %v14916_v47 = vld [vmem:[#allocation92_spill] sm:$0xff]  ;;  %v14917_v49 = vld [vmem:[#allocation81_spill] sm:$0xff] }
 0x823   : > { %5713 = vmatprep.subr.bf16.mxu1 %v14914_v17  ;;  %v5555_v34 = vpop.f32.mrf.mxu1  ;;  %v5506_v46 = vpop.f32.mrf.mxu0 }
 0x824   : > { %v12089_v32 = vadd.f32 %v5555_v34, %v5503_v10  ;;  %v5507_v37 = vadd.f32 %v5506_v46, %v12005_v0  ;;  %v14918_v34 = vld [vmem:[#allocation82_spill] sm:$0xff]  ;;  %v14919_v0 = vld [vmem:[#allocation76_spill] sm:$0xff] }
 0x825   : > { %v5557_v42 = vpop.f32.mrf.mxu1  ;;  %v5510_v6 = vpop.f32.mrf.mxu0 }
 0x826   : > { %v12092_v33 = vadd.f32 %v5557_v42, %v5505_v36  ;;  %5673 = vmatpush2.bf16.xpose.msra.mxu0 %v14916_v47  ;;  %v5511_v1 = vadd.f32 %v5510_v6, %v12009_v50  ;;  %v14922_v6 = vld [vmem:[#allocation74_spill] sm:$0xff]  ;;  %v14923_v47 = vld [vmem:[#allocation77_spill] sm:$0xff] }
 0x827   : > { %v5559_v23 = vpop.f32.mrf.mxu1  ;;  %5674 = vmatprep.subr.bf16.mxu0 %v14917_v49  ;;  %v5512_v51 = vpop.f32.mrf.mxu0  ;;  %v14926_v49 = vld [vmem:[#allocation73_spill] sm:$0xff] }
 0x828   : > { %v12094_v56 = vadd.f32 %v5559_v23, %v5507_v37  ;;  %v5513_v5 = vadd.f32 %v5512_v51, %v12012_v31  ;;  %v14921_v23 = vld [vmem:[#allocation72_spill] sm:$0xff]  ;;  %v14924_v31 = vld [vmem:[#allocation78_spill] sm:$0xff] }
 0x829   : > { %v5563_v44 = vpop.f32.mrf.mxu1  ;;  %v5514_v36 = vpop.f32.mrf.mxu0  ;;  %v14927_v51 = vld [vmem:[#allocation496_spill] sm:$0xff] }
 0x82a   : > { %14915 = vst [vmem:[#allocation331_spill] sm:$0xff] %v12094_v56  ;;  %5714 = vmatpush2.bf16.xpose.msra.mxu1 %v14918_v34  ;;  %v12101_v10 = vadd.f32 %v5563_v44, %v5511_v1  ;;  %v5515_v46 = vadd.f32 %v5514_v36, %v12014_v3  ;;  %v14925_v1 = vld [vmem:[#allocation79_spill] sm:$0xff]  ;;  %v14928_v3 = vld [vmem:[#allocation320_spill] sm:$0xff]  ;;  %v14933_v36 = vld [vmem:[#allocation325_spill] sm:$0xff] }
 0x82b   : > { %5715 = vmatprep.subr.bf16.mxu1 %v14919_v0  ;;  %v5565_v17 = vpop.f32.mrf.mxu1  ;;  %v14929_v44 = vld [vmem:[#allocation64_spill] sm:$0xff]  ;;  %v14930_v34 = vld [vmem:[#allocation323_spill] sm:$0xff]  ;;  %v14932_v0 = vld [vmem:[#allocation321_spill] sm:$0xff] }
 0x82c   : > { %v12105_v42 = vadd.f32 %v5565_v17, %v5513_v5  ;;  %v14931_v5 = vld [vmem:[#allocation324_spill] sm:$0xff]  ;;  %v14934_v17 = vld [vmem:[#allocation322_spill] sm:$0xff]  ;;  %v14984_v56 = vld [vmem:[#allocation271_spill] sm:$0xff] }
 0x82d   : > { %v5567_v37 = vpop.f32.mrf.mxu1 }
 0x82e   : > { %14920 = vst [vmem:[#allocation332_spill] sm:$0xff] %v12105_v42  ;;  %v12107_v50 = vadd.f32 %v5567_v37, %v5515_v46  ;;  %5675 = vmatpush2.bf16.xpose.msra.mxu0 %v14921_v23  ;;  %v14935_v46 = vld [vmem:[#allocation326_spill] sm:$0xff]  ;;  %v14936_v37 = vld [vmem:[#allocation61_spill] sm:$0xff]  ;;  %v14937_v23 = vld [vmem:[#allocation503_spill] sm:$0xff] }
 0x82f   : > { %5676 = vmatprep.subr.bf16.mxu0 %v14922_v6  ;;  %v14938_v6 = vld [vmem:[#allocation312_spill] sm:$0xff]  ;;  %v14981_v42 = vld [vmem:[#allocation266_spill] sm:$0xff] }
 0x832   : > { %5716 = vmatpush2.bf16.xpose.msra.mxu1 %v14923_v47  ;;  %v14939_v47 = vld [vmem:[#allocation69_spill] sm:$0xff] }
 0x833   : > { %5717 = vmatprep.subr.bf16.mxu1 %v14924_v31  ;;  %v14940_v31 = vld [vmem:[#allocation316_spill] sm:$0xff] }
 0x836   : > { %5677 = vmatpush2.bf16.xpose.msra.mxu0 %v14925_v1  ;;  %v14941_v1 = vld [vmem:[#allocation317_spill] sm:$0xff] }
 0x837   : > { %5678 = vmatprep.subr.bf16.mxu0 %v14926_v49  ;;  %v14942_v49 = vld [vmem:[#allocation314_spill] sm:$0xff] }
 0x83a   : > { %5718 = vmatpush2.bf16.xpose.msra.mxu1 %v14927_v51  ;;  %v14943_v51 = vld [vmem:[#allocation318_spill] sm:$0xff] }
 0x83b   : > { %5719 = vmatprep.subr.bf16.mxu1 %v14928_v3  ;;  %v14944_v3 = vld [vmem:[#allocation315_spill] sm:$0xff] }
 0x83e   : > { %5679 = vmatpush2.bf16.xpose.msra.mxu0 %v14929_v44  ;;  %v14945_v44 = vld [vmem:[#allocation319_spill] sm:$0xff] }
 0x83f   : > { %5680 = vmatprep.subr.bf16.mxu0 %v14930_v34  ;;  %v14946_v34 = vld [vmem:[#allocation304_spill] sm:$0xff] }
 0x842   : > { %5720 = vmatpush2.bf16.xpose.msra.mxu1 %v14931_v5  ;;  %v14947_v5 = vld [vmem:[#allocation305_spill] sm:$0xff] }
 0x843   : > { %5721 = vmatprep.subr.bf16.mxu1 %v14932_v0  ;;  %v14948_v0 = vld [vmem:[#allocation296_spill] sm:$0xff] }
 0x846   : > { %5681 = vmatpush2.bf16.xpose.msra.mxu0 %v14933_v36  ;;  %v14949_v36 = vld [vmem:[#allocation307_spill] sm:$0xff] }
 0x847   : > { %5682 = vmatprep.subr.bf16.mxu0 %v14934_v17  ;;  %v14950_v17 = vld [vmem:[#allocation311_spill] sm:$0xff] }
 0x84a   : > { %5722 = vmatpush2.bf16.xpose.msra.mxu1 %v14935_v46  ;;  %v14951_v46 = vld [vmem:[#allocation298_spill] sm:$0xff] }
 0x84b   : > { %5723 = vmatprep.subr.bf16.mxu1 %v14936_v37  ;;  %v14952_v37 = vld [vmem:[#allocation302_spill] sm:$0xff] }
 0x84e   : > { %5683 = vmatpush2.bf16.xpose.msra.mxu0 %v14937_v23  ;;  %v14953_v23 = vld [vmem:[#allocation299_spill] sm:$0xff] }
 0x84f   : > { %5684 = vmatprep.subr.bf16.mxu0 %v14938_v6  ;;  %v14954_v6 = vld [vmem:[#allocation303_spill] sm:$0xff] }
 0x852   : > { %5724 = vmatpush2.bf16.xpose.msra.mxu1 %v14939_v47  ;;  %v14955_v47 = vld [vmem:[#allocation301_spill] sm:$0xff] }
 0x853   : > { %5725 = vmatprep.subr.bf16.mxu1 %v14940_v31  ;;  %v14956_v31 = vld [vmem:[#allocation294_spill] sm:$0xff] }
 0x856   : > { %5685 = vmatpush2.bf16.xpose.msra.mxu0 %v14941_v1  ;;  %v14957_v1 = vld [vmem:[#allocation290_spill] sm:$0xff] }
 0x857   : > { %5736 = vmatprep.subr.bf16.mxu0 %v14942_v49  ;;  %v14958_v49 = vld [vmem:[#allocation295_spill] sm:$0xff] }
 0x85a   : > { %5726 = vmatpush2.bf16.xpose.msra.mxu1 %v14943_v51  ;;  %v14959_v51 = vld [vmem:[#allocation297_spill] sm:$0xff] }
 0x85b   : > { %5777 = vmatprep.subr.bf16.mxu1 %v14944_v3  ;;  %v14960_v3 = vld [vmem:[#allocation291_spill] sm:$0xff] }
 0x85d   : > { %5687 = vmatmul.mubr.bf16.vlgmr.msra.gmra.mxu0 %v14876_v24 }
 0x85e   : > { %5737 = vmatpush1.bf16.xpose.msra.mxu0 %v14945_v44  ;;  %5768 = vmatprep.mubr.bf16.mxu0 %v14876_v24  ;;  %v14961_v44 = vld [vmem:[#allocation288_spill] sm:$0xff] }
 0x85f   : > { %5738 = vmatprep.subr.bf16.mxu0 %v14946_v34  ;;  %v14962_v34 = vld [vmem:[#allocation292_spill] sm:$0xff] }
 0x861   : > { %5728 = vmatmul.mubr.bf16.vlgmr.msra.gmra.mxu1 %v14876_v24 }
 0x862   : > { %5778 = vmatpush1.bf16.xpose.msra.mxu1 %v14947_v5  ;;  %5809 = vmatprep.mubr.bf16.mxu1 %v14876_v24  ;;  %v14963_v5 = vld [vmem:[#allocation293_spill] sm:$0xff] }
 0x863   : > { %5779 = vmatprep.subr.bf16.mxu1 %v14948_v0  ;;  %v14964_v0 = vld [vmem:[#allocation286_spill] sm:$0xff] }
 0x866   : > { %5739 = vmatpush1.bf16.xpose.msra.mxu0 %v14949_v36  ;;  %v14965_v36 = vld [vmem:[#allocation282_spill] sm:$0xff] }
 0x867   : > { %5740 = vmatprep.subr.bf16.mxu0 %v14950_v17  ;;  %v14966_v17 = vld [vmem:[#allocation287_spill] sm:$0xff] }
 0x86a   : > { %5780 = vmatpush1.bf16.xpose.msra.mxu1 %v14951_v46  ;;  %v14967_v46 = vld [vmem:[#allocation289_spill] sm:$0xff] }
 0x86b   : > { %5781 = vmatprep.subr.bf16.mxu1 %v14952_v37  ;;  %v14968_v37 = vld [vmem:[#allocation283_spill] sm:$0xff] }
 0x86e   : > { %5741 = vmatpush1.bf16.xpose.msra.mxu0 %v14953_v23  ;;  %v14969_v23 = vld [vmem:[#allocation280_spill] sm:$0xff] }
 0x86f   : > { %5742 = vmatprep.subr.bf16.mxu0 %v14954_v6  ;;  %v14970_v6 = vld [vmem:[#allocation284_spill] sm:$0xff] }
 0x872   : > { %5782 = vmatpush1.bf16.xpose.msra.mxu1 %v14955_v47  ;;  %v14971_v47 = vld [vmem:[#allocation285_spill] sm:$0xff] }
 0x873   : > { %5783 = vmatprep.subr.bf16.mxu1 %v14956_v31  ;;  %v14972_v31 = vld [vmem:[#allocation278_spill] sm:$0xff] }
 0x876   : > { %5743 = vmatpush1.bf16.xpose.msra.mxu0 %v14957_v1  ;;  %v14973_v1 = vld [vmem:[#allocation274_spill] sm:$0xff] }
 0x877   : > { %5744 = vmatprep.subr.bf16.mxu0 %v14958_v49  ;;  %v14974_v49 = vld [vmem:[#allocation279_spill] sm:$0xff] }
 0x87a   : > { %5784 = vmatpush1.bf16.xpose.msra.mxu1 %v14959_v51  ;;  %v14975_v51 = vld [vmem:[#allocation281_spill] sm:$0xff] }
 0x87b   : > { %5785 = vmatprep.subr.bf16.mxu1 %v14960_v3  ;;  %v14976_v3 = vld [vmem:[#allocation275_spill] sm:$0xff] }
 0x87e   : > { %5745 = vmatpush1.bf16.xpose.msra.mxu0 %v14961_v44  ;;  %v12169_v44 = vpop.f32.mrf.mxu0 }
 0x87f   : > { %5746 = vmatprep.subr.bf16.mxu0 %v14962_v34  ;;  %v12171_v34 = vpop.f32.mrf.mxu1 }
 0x882   : > { %5786 = vmatpush1.bf16.xpose.msra.mxu1 %v14963_v5 }
 0x883   : > { %5787 = vmatprep.subr.bf16.mxu1 %v14964_v0  ;;  %v14977_v0 = vld [vmem:[#allocation277_spill] sm:$0xff] }
 0x886   : > { %5747 = vmatpush1.bf16.xpose.msra.mxu0 %v14965_v36  ;;  %v14978_v36 = vld [vmem:[#allocation273_spill] sm:$0xff] }
 0x887   : > { %5748 = vmatprep.subr.bf16.mxu0 %v14966_v17 }
 0x88a   : > { %5788 = vmatpush1.bf16.xpose.msra.mxu1 %v14967_v46 }
 0x88b   : > { %5789 = vmatprep.subr.bf16.mxu1 %v14968_v37  ;;  %v14979_v37 = vld [vmem:[#allocation268_spill] sm:$0xff] }
 0x88e   : > { %5749 = vmatpush1.bf16.xpose.msra.mxu0 %v14969_v23 }
 0x88f   : > { %5750 = vmatprep.subr.bf16.mxu0 %v14970_v6  ;;  %v14980_v6 = vld [vmem:[#allocation269_spill] sm:$0xff] }
 0x892   : > { %5790 = vmatpush1.bf16.xpose.msra.mxu1 %v14971_v47 }
 0x893   : > { %5791 = vmatprep.subr.bf16.mxu1 %v14972_v31 }
 0x896   : > { %5751 = vmatpush1.bf16.xpose.msra.mxu0 %v14973_v1 }
 0x897   : > { %5752 = vmatprep.subr.bf16.mxu0 %v14974_v49 }
 0x89a   : > { %5792 = vmatpush1.bf16.xpose.msra.mxu1 %v14975_v51 }
 0x89b   : > { %5793 = vmatprep.subr.bf16.mxu1 %v14976_v3 }
 0x89d   : > { %v5606_v5 = vpop.f32.mrf.mxu0 }
 0x89e   : > { %5753 = vmatpush2.bf16.xpose.msra.mxu0 %v14977_v0  ;;  %v14982_v0 = vld [vmem:[#allocation270_spill] sm:$0xff] }
 0x89f   : > { %5754 = vmatprep.subr.bf16.mxu0 %v14978_v36  ;;  %v5608_v17 = vpop.f32.mrf.mxu0  ;;  %v14983_v36 = vld [vmem:[#allocation267_spill] sm:$0xff] }
 0x8a1   : > { %v5647_v46 = vpop.f32.mrf.mxu1  ;;  %v5610_v47 = vpop.f32.mrf.mxu0 }
 0x8a2   : > { %5794 = vmatpush2.bf16.xpose.msra.mxu1 %v14979_v37  ;;  %v12176_v23 = vadd.f32 %v5647_v46, %v5606_v5  ;;  %v14985_v37 = vld [vmem:[#allocation265_spill] sm:$0xff]  ;;  %v14986_v5 = vld [vmem:[#allocation383_spill] sm:$0xff] }
 0x8a3   : > { %5795 = vmatprep.subr.bf16.mxu1 %v14980_v6  ;;  %v5649_v31 = vpop.f32.mrf.mxu1  ;;  %v5611_v49 = vpop.f32.mrf.mxu0  ;;  %v14987_v46 = vld [vmem:[#allocation387_spill] sm:$0xff]  ;;  %v14988_v6 = vld [vmem:[#allocation388_spill] sm:$0xff]  ;;  %v14990_v47 = vld [vmem:[#allocation389_spill] sm:$0xff] }
 0x8a4   : > { %v12179_v1 = vadd.f32 %v5649_v31, %v5608_v17  ;;  %v14989_v17 = vld [vmem:[#allocation385_spill] sm:$0xff]  ;;  %v14991_v31 = vld [vmem:[#allocation386_spill] sm:$0xff]  ;;  %v14994_v49 = vld [vmem:[#allocation375_spill] sm:$0xff] }
 0x8a5   : > { %v5651_v51 = vpop.f32.mrf.mxu1 }
 0x8a6   : > { %5755 = vmatpush2.bf16.xpose.msra.mxu0 %v14981_v42  ;;  %v14992_v42 = vld [vmem:[#allocation390_spill] sm:$0xff]  ;;  %v14995_v51 = vld [vmem:[#allocation379_spill] sm:$0xff] }
 0x8a7   : > { %v5652_v3 = vpop.f32.mrf.mxu1  ;;  %5756 = vmatprep.subr.bf16.mxu0 %v14982_v0 }
 0x8a8   : > { %v15016_v3 = vld [vmem:[#allocation369_spill] sm:$0xff] }
 0x8aa   : > { %5796 = vmatpush2.bf16.xpose.msra.mxu1 %v14983_v36  ;;  %v15018_v36 = vld [vmem:[#allocation374_spill] sm:$0xff] }
 0x8ab   : > { %5797 = vmatprep.subr.bf16.mxu1 %v14984_v56  ;;  %v14993_v56 = vld [vmem:[#allocation384_spill] sm:$0xff] }
 0x8ae   : > { %5757 = vmatpush2.bf16.xpose.msra.mxu0 %v14985_v37 }
 0x8af   : > { %5758 = vmatprep.subr.bf16.mxu0 %v14986_v5  ;;  %v15019_v5 = vld [vmem:[#allocation361_spill] sm:$0xff] }
 0x8b2   : > { %5798 = vmatpush2.bf16.xpose.msra.mxu1 %v14987_v46 }
 0x8b3   : > { %5799 = vmatprep.subr.bf16.mxu1 %v14988_v6 }
 0x8b6   : > { %5759 = vmatpush2.bf16.xpose.msra.mxu0 %v14989_v17 }
 0x8b7   : > { %5760 = vmatprep.subr.bf16.mxu0 %v14990_v47 }
 0x8ba   : > { %5800 = vmatpush2.bf16.xpose.msra.mxu1 %v14991_v31 }
 0x8bb   : > { %5801 = vmatprep.subr.bf16.mxu1 %v14992_v42 }
 0x8be   : > { %5761 = vmatpush2.bf16.xpose.msra.mxu0 %v11456_v20  ;;  %v14996_v20 = vld [vmem:[#allocation380_spill] sm:$0xff] }
 0x8bf   : > { %5762 = vmatprep.subr.bf16.mxu0 %v11458_v40  ;;  %v14997_v40 = vld [vmem:[#allocation377_spill] sm:$0xff] }
 0x8c2   : > { %5802 = vmatpush2.bf16.xpose.msra.mxu1 %v11463_v60  ;;  %v14998_v60 = vld [vmem:[#allocation381_spill] sm:$0xff] }
 0x8c3   : > { %5803 = vmatprep.subr.bf16.mxu1 %v14993_v56  ;;  %v15021_v56 = vld [vmem:[#allocation335_spill] sm:$0xff] }
 0x8c6   : > { %5763 = vmatpush2.bf16.xpose.msra.mxu0 %v11484_v13  ;;  %v14999_v13 = vld [vmem:[#allocation378_spill] sm:$0xff] }
 0x8c7   : > { %5764 = vmatprep.subr.bf16.mxu0 %v11486_v18  ;;  %v15000_v18 = vld [vmem:[#allocation382_spill] sm:$0xff] }
 0x8ca   : > { %5804 = vmatpush2.bf16.xpose.msra.mxu1 %v11493_v2  ;;  %v15001_v2 = vld [vmem:[#allocation376_spill] sm:$0xff] }
 0x8cb   : > { %5805 = vmatprep.subr.bf16.mxu1 %v14994_v49  ;;  %v15022_v49 = vld [vmem:[#allocation373_spill] sm:$0xff] }
 0x8ce   : > { %5765 = vmatpush2.bf16.xpose.msra.mxu0 %v11512_v11  ;;  %v15002_v11 = vld [vmem:[#allocation367_spill] sm:$0xff] }
 0x8cf   : > { %5766 = vmatprep.subr.bf16.mxu0 %v11514_v16  ;;  %v15003_v16 = vld [vmem:[#allocation368_spill] sm:$0xff] }
 0x8d2   : > { %5806 = vmatpush2.bf16.xpose.msra.mxu1 %v14995_v51  ;;  %v5252_v51 = vadd.f32 %v15022_v49, %v15021_v56  ;;  %v15032_v56 = vld [vmem:[#allocation348_spill] sm:$0xff]  ;;  %v15033_v49 = vld [vmem:[#allocation327_spill] sm:$0xff] }
 0x8d3   : > { %5807 = vmatprep.subr.bf16.mxu1 %v14996_v20 }
 0x8d6   : > { %5767 = vmatpush2.bf16.xpose.msra.mxu0 %v11540_v19  ;;  %v15004_v19 = vld [vmem:[#allocation359_spill] sm:$0xff] }
 0x8d7   : > { %5818 = vmatprep.subr.bf16.mxu0 %v11542_v12  ;;  %v15005_v12 = vld [vmem:[#allocation360_spill] sm:$0xff] }
 0x8da   : > { %5808 = vmatpush2.bf16.xpose.msra.mxu1 %v14997_v40 }
 0x8db   : > { %5859 = vmatprep.subr.bf16.mxu1 %v14998_v60  ;;  %v7503_v60 = vld [vmem:[%s7727_s11 + $0x60] sm:$0xff] }
 0x8dd   : > { %5769 = vmatmul.mubr.bf16.vlgmr.msra.gmra.mxu0 %v14876_v24 }
 0x8de   : > { %5819 = vmatpush1.bf16.xpose.msra.mxu0 %v11569_v30  ;;  %5850 = vmatprep.mubr.bf16.mxu0 %v14876_v24  ;;  %v15006_v30 = vld [vmem:[#allocation371_spill] sm:$0xff] }
 0x8df   : > { %5820 = vmatprep.subr.bf16.mxu0 %v11571_v21  ;;  %v15007_v21 = vld [vmem:[#allocation372_spill] sm:$0xff] }
 0x8e1   : > { %5810 = vmatmul.mubr.bf16.vlgmr.msra.gmra.mxu1 %v14876_v24 }
 0x8e2   : > { %5860 = vmatpush1.bf16.xpose.msra.mxu1 %v14999_v13  ;;  %5891 = vmatprep.mubr.bf16.mxu1 %v14876_v24 }
 0x8e3   : > { %5861 = vmatprep.subr.bf16.mxu1 %v15000_v18 }
 0x8e6   : > { %5821 = vmatpush1.bf16.xpose.msra.mxu0 %v11597_v9  ;;  %v15008_v9 = vld [vmem:[#allocation351_spill] sm:$0xff] }
 0x8e7   : > { %5822 = vmatprep.subr.bf16.mxu0 %v11599_v22  ;;  %v15009_v22 = vld [vmem:[#allocation352_spill] sm:$0xff] }
 0x8ea   : > { %5862 = vmatpush1.bf16.xpose.msra.mxu1 %v15001_v2  ;;  %v5967_v2 = vunpack.c.h.bf16 %v7503_v60 }
 0x8eb   : > { %5863 = vmatprep.subr.bf16.mxu1 %v15002_v11  ;;  %v7504_v11 = vld [vmem:[%s7727_s11] sm:$0xff] }
 0x8ee   : > { %5823 = vmatpush1.bf16.xpose.msra.mxu0 %v11625_v63  ;;  %v15010_v63 = vld [vmem:[#allocation363_spill] sm:$0xff] }
 0x8ef   : > { %5824 = vmatprep.subr.bf16.mxu0 %v11627_v52  ;;  %v15011_v52 = vld [vmem:[#allocation364_spill] sm:$0xff] }
 0x8f2   : > { %5864 = vmatpush1.bf16.xpose.msra.mxu1 %v15003_v16  ;;  %v5954_v16 = vunpack.c.l.bf16 %v7504_v11 }
 0x8f3   : > { %5865 = vmatprep.subr.bf16.mxu1 %v15004_v19  ;;  %v7505_v19 = vld [vmem:[%s7727_s11 + $0x20] sm:$0xff] }
 0x8f6   : > { %5825 = vmatpush1.bf16.xpose.msra.mxu0 %v11653_v57  ;;  %v15012_v57 = vld [vmem:[#allocation343_spill] sm:$0xff] }
 0x8f7   : > { %5826 = vmatprep.subr.bf16.mxu0 %v15005_v12  ;;  %v12269_v12 = vstv %s5904_s14 }
 0x8fa   : > { %5866 = vmatpush1.bf16.xpose.msra.mxu1 %v15006_v30 }
 0x8fb   : > { %5867 = vmatprep.subr.bf16.mxu1 %v15007_v21  ;;  %v15024_v21 = vld [vmem:[#allocation336_spill] sm:$0xff] }
 0x8fe   : > { %5827 = vmatpush1.bf16.xpose.msra.mxu0 %v11679_v8  ;;  %v15013_v8 = vld [vmem:[#allocation344_spill] sm:$0xff] }
 0x8ff   : > { %5828 = vmatprep.subr.bf16.mxu0 %v11681_v43  ;;  %v15014_v43 = vld [vmem:[#allocation355_spill] sm:$0xff] }
 0x902   : > { %5868 = vmatpush1.bf16.xpose.msra.mxu1 %v11688_v62  ;;  %v15015_v62 = vld [vmem:[#allocation356_spill] sm:$0xff] }
 0x903   : > { %5869 = vmatprep.subr.bf16.mxu1 %v15008_v9 }
 0x906   : > { %5829 = vmatpush1.bf16.xpose.msra.mxu0 %v11709_v45 }
 0x907   : > { %5830 = vmatprep.subr.bf16.mxu0 %v11711_v14 }
 0x90a   : > { %5870 = vmatpush1.bf16.xpose.msra.mxu1 %v15009_v22 }
 0x90b   : > { %5871 = vmatprep.subr.bf16.mxu1 %v15010_v63  ;;  %v5955_v63 = vunpack.c.h.bf16 %v7504_v11 }
 0x90e   : > { %5831 = vmatpush1.bf16.xpose.msra.mxu0 %v11737_v7 }
 0x90f   : > { %5832 = vmatprep.subr.bf16.mxu0 %v11739_v38  ;;  %v15017_v38 = vld [vmem:[#allocation370_spill] sm:$0xff] }
 0x912   : > { %5872 = vmatpush1.bf16.xpose.msra.mxu1 %v15011_v52 }
 0x913   : > { %5873 = vmatprep.subr.bf16.mxu1 %v15012_v57 }
 0x916   : > { %5833 = vmatpush1.bf16.xpose.msra.mxu0 %v11765_v58 }
 0x917   : > { %5834 = vmatprep.subr.bf16.mxu0 %v15013_v8 }
 0x91a   : > { %5874 = vmatpush1.bf16.xpose.msra.mxu1 %v15014_v43 }
 0x91b   : > { %5875 = vmatprep.subr.bf16.mxu1 %v15015_v62 }
 0x91d   : > { %v5688_v45 = vpop.f32.mrf.mxu0 }
 0x91e   : > { %v5689_v14 = vadd.f32 %v5688_v45, %v12176_v23  ;;  %5835 = vmatpush2.bf16.xpose.msra.mxu0 %v15016_v3 }
 0x91f   : > { %v5690_v7 = vpop.f32.mrf.mxu0  ;;  %5836 = vmatprep.subr.bf16.mxu0 %v15017_v38 }
 0x920   : > { %v5691_v37 = vadd.f32 %v5690_v7, %v12179_v1  ;;  %v15020_v1 = vld [vmem:[#allocation6_spill] sm:$0xff] }
 0x921   : > { %v5729_v0 = vpop.f32.mrf.mxu1  ;;  %v5692_v6 = vpop.f32.mrf.mxu0  ;;  %v12256_v42 = vsub.s32 0, %v15020_v1  ;;  %v15030_v1 = vld [vmem:[#allocation347_spill] sm:$0xff] }
 0x922   : > { %5876 = vmatpush2.bf16.xpose.msra.mxu1 %v15018_v36  ;;  %v5730_v58 = vadd.f32 %v5729_v0, %v5689_v14  ;;  %v15026_v14 = vld [vmem:[#allocation366_spill] sm:$0xff] }
 0x923   : > { %5877 = vmatprep.subr.bf16.mxu1 %v15019_v5  ;;  %v5731_v46 = vpop.f32.mrf.mxu1  ;;  %v5693_v47 = vpop.f32.mrf.mxu0 }
 0x924   : > { %7480 = vrcp.f32 %v5730_v58  ;;  %v5732_v17 = vadd.f32 %v5731_v46, %v5691_v37 }
 0x925   : > { %v5733_v23 = vpop.f32.mrf.mxu1 }
 0x926   : > { %7482 = vrcp.f32 %v5732_v17  ;;  %5837 = vmatpush2.bf16.xpose.msra.mxu0 %v11835_v27  ;;  %v5305_v27 = vadd.f32 %v11990_v48, %v5252_v51  ;;  %v15028_v23 = vld [vmem:[#allocation353_spill] sm:$0xff]  ;;  %v15034_v51 = vld [vmem:[#allocation328_spill] sm:$0xff] }
 0x927   : > { %v5734_v31 = vpop.f32.mrf.mxu1  ;;  %5838 = vmatprep.subr.bf16.mxu0 %v11837_v39  ;;  %v7502_v39 = vld [vmem:[%s7727_s11 + $0x40] sm:$0xff] }
 0x928   : > { %v5963_v40 = vunpack.c.h.bf16 %v7502_v39  ;;  %v5358_v52 = vadd.f32 %v11992_v28, %v5305_v27  ;;  %v15029_v31 = vld [vmem:[#allocation358_spill] sm:$0xff]  ;;  %v15036_v27 = vld [vmem:[#allocation345_spill] sm:$0xff] }
 0x92a   : > { %5878 = vmatpush2.bf16.xpose.msra.mxu1 %v11846_v61  ;;  %v5962_v61 = vunpack.c.l.bf16 %v7502_v39  ;;  %v15037_v39 = vld [vmem:[#allocation350_spill] sm:$0xff] }
 0x92b   : > { %5879 = vmatprep.subr.bf16.mxu1 %v11850_v4  ;;  %v5966_v4 = vunpack.c.l.bf16 %v7503_v60  ;;  %v15040_v60 = vld [vmem:[#allocation309_spill] sm:$0xff] }
 0x92e   : > { %5839 = vmatpush2.bf16.xpose.msra.mxu0 %v11874_v41  ;;  %v5958_v41 = vunpack.c.l.bf16 %v7505_v19 }
 0x92f   : > { %5840 = vmatprep.subr.bf16.mxu0 %v11878_v25  ;;  %v15023_v25 = vld [vmem:[#allocation365_spill] sm:$0xff] }
 0x931   : > { %v7481_v20 = vpop.eup %7480 }
 0x932   : > { %v5908_v13 = vrot.slane %v7481_v20, %v12256_v42  ;;  %5880 = vmatpush2.bf16.xpose.msra.mxu1 %v11883_v26  ;;  %v5959_v26 = vunpack.c.h.bf16 %v7505_v19  ;;  %v15035_v20 = vld [vmem:[#allocation349_spill] sm:$0xff] }
 0x933   : > { %v7483_v18 = vpop.eup %7482  ;;  %5881 = vmatprep.subr.bf16.mxu1 %v11888_v35 }
 0x934   : > { %v5921_v48 = vmul.f32 %v5908_v13, %v15023_v25  ;;  %v5925_v30 = vmul.f32 %v5908_v13, %v11833_v15  ;;  %v5929_v9 = vmul.f32 %v5908_v13, %v15024_v21  ;;  %v5933_v22 = vmul.f32 %v5908_v13, %v11876_v54  ;;  %v15025_v15 = vld [vmem:[#allocation362_spill] sm:$0xff] }
 0x935   : > { %v5912_v57 = vrot.slane %v7483_v18, %v12256_v42  ;;  %v15042_v13 = vld [vmem:[#allocation306_spill] sm:$0xff] }
 0x936   : > { %v5938_v8 = vmul.f32 %v12269_v12, %v5921_v48  ;;  %v5942_v43 = vmul.f32 %v12269_v12, %v5925_v30  ;;  %v5946_v35 = vmul.f32 %v12269_v12, %v5929_v9  ;;  %v5950_v62 = vmul.f32 %v12269_v12, %v5933_v22  ;;  %5841 = vmatpush2.bf16.xpose.msra.mxu0 %v11900_v29 }
 0x937   : > { %v5922_v45 = vmul.f32 %v5912_v57, %v15025_v15  ;;  %v5926_v54 = vmul.f32 %v5912_v57, %v15026_v14  ;;  %v5930_v28 = vmul.f32 %v5912_v57, %v11865_v59  ;;  %v5934_v3 = vmul.f32 %v5912_v57, %v5358_v52  ;;  %5842 = vmatprep.subr.bf16.mxu0 %v11904_v55  ;;  %v15027_v59 = vld [vmem:[#allocation357_spill] sm:$0xff]  ;;  %v15031_v55 = vld [vmem:[#allocation354_spill] sm:$0xff]  ;;  %v15044_v14 = vld [vmem:[#allocation340_spill] sm:$0xff] }
 0x938   : > { %v5970_v7 = vadd.f32 %v5954_v16, %v5938_v8  ;;  %v5974_v0 = vadd.f32 %v5958_v41, %v5942_v43  ;;  %v5978_v38 = vadd.f32 %v5962_v61, %v5946_v35  ;;  %v5982_v36 = vadd.f32 %v5966_v4, %v5950_v62  ;;  %v15038_v61 = vld [vmem:[#allocation308_spill] sm:$0xff] }
 0x939   : > { %v5939_v37 = vmul.f32 %v12269_v12, %v5922_v45  ;;  %v5943_v58 = vmul.f32 %v12269_v12, %v5926_v54  ;;  %v5947_v5 = vmul.f32 %v12269_v12, %v5930_v28  ;;  %v5951_v46 = vmul.f32 %v12269_v12, %v5934_v3  ;;  %v15041_v4 = vld [vmem:[#allocation300_spill] sm:$0xff]  ;;  %v15043_v45 = vld [vmem:[#allocation346_spill] sm:$0xff] }
 0x93a   : > { %5986 = vst [vmem:[%s7671_s17] sm:$0xff] %v5970_v7  ;;  %5990 = vst [vmem:[%s7671_s17 + $0x20] sm:$0xff] %v5974_v0  ;;  %5882 = vmatpush2.bf16.xpose.msra.mxu1 %v15027_v59  ;;  %v5464_v54 = vadd.f32 %v15044_v14, %v15043_v45  ;;  %v7506_v7 = vld [vmem:[%s7727_s11 + $0x48] sm:$0xff] }
 0x93b   : > { %5994 = vst [vmem:[%s7671_s17 + $0x40] sm:$0xff] %v5978_v38  ;;  %5998 = vst [vmem:[%s7671_s17 + $0x60] sm:$0xff] %v5982_v36  ;;  %v5971_v29 = vadd.f32 %v5955_v63, %v5939_v37  ;;  %v5975_v6 = vadd.f32 %v5959_v26, %v5943_v58  ;;  %v5979_v17 = vadd.f32 %v5963_v40, %v5947_v5  ;;  %5883 = vmatprep.subr.bf16.mxu1 %v15028_v23  ;;  %v15039_v40 = vld [vmem:[#allocation339_spill] sm:$0xff]  ;;  %v7507_v58 = vld [vmem:[%s7727_s11 + $0x68] sm:$0xff] }
 0x93c   : > { %v5983_v47 = vadd.f32 %v5967_v2, %v5951_v46  ;;  %v5517_v3 = vadd.f32 %v12169_v44, %v5464_v54  ;;  %v5964_v0 = vunpack.c.l.bf16 %v7506_v7  ;;  %v5965_v38 = vunpack.c.h.bf16 %v7506_v7  ;;  %v7508_v59 = vld [vmem:[%s7727_s11 + $0x8] sm:$0xff] }
 0x93d   : > { %5987 = vst [vmem:[%s7671_s17 + $0x8] sm:$0xff] %v5971_v29  ;;  %5991 = vst [vmem:[%s7671_s17 + $0x28] sm:$0xff] %v5975_v6  ;;  %v5968_v5 = vunpack.c.l.bf16 %v7507_v58  ;;  %v5969_v46 = vunpack.c.h.bf16 %v7507_v58  ;;  %v5956_v29 = vunpack.c.l.bf16 %v7508_v59  ;;  %v7509_v6 = vld [vmem:[%s7727_s11 + $0x28] sm:$0xff] }
 0x93e   : > { %5995 = vst [vmem:[%s7671_s17 + $0x48] sm:$0xff] %v5979_v17  ;;  %5999 = vst [vmem:[%s7671_s17 + $0x68] sm:$0xff] %v5983_v47  ;;  %5843 = vmatpush2.bf16.xpose.msra.mxu0 %v15029_v31  ;;  %v5960_v17 = vunpack.c.l.bf16 %v7509_v6 }
 0x93f   : > { %5844 = vmatprep.subr.bf16.mxu0 %v15030_v1  ;;  %v5957_v1 = vunpack.c.h.bf16 %v7508_v59 }
 0x942   : > { %5884 = vmatpush2.bf16.xpose.msra.mxu1 %v15031_v55  ;;  %v5961_v55 = vunpack.c.h.bf16 %v7509_v6 }
 0x943   : > { %5885 = vmatprep.subr.bf16.mxu1 %v15032_v56  ;;  %v5570_v56 = vadd.f32 %v12171_v34, %v5517_v3 }
 0x946   : > { %5845 = vmatpush2.bf16.xpose.msra.mxu0 %v15033_v49 }
 0x947   : > { %5846 = vmatprep.subr.bf16.mxu0 %v15034_v51 }
 0x94a   : > { %5886 = vmatpush2.bf16.xpose.msra.mxu1 %v15035_v20 }
 0x94b   : > { %5887 = vmatprep.subr.bf16.mxu1 %v15036_v27 }
 0x94e   : > { %5847 = vmatpush2.bf16.xpose.msra.mxu0 %v15037_v39  ;;  %v15046_v39 = vld [vmem:[#allocation332_spill] sm:$0xff] }
 0x94f   : > { %5848 = vmatprep.subr.bf16.mxu0 %v15038_v61 }
 0x952   : > { %5888 = vmatpush2.bf16.xpose.msra.mxu1 %v15039_v40 }
 0x953   : > { %5889 = vmatprep.subr.bf16.mxu1 %v15040_v60 }
 0x956   : > { %5849 = vmatpush2.bf16.xpose.msra.mxu0 %v15041_v4 }
 0x95a   : > { %5890 = vmatpush2.bf16.xpose.msra.mxu1 %v15042_v13 }
 0x95d   : > { %5851 = vmatmul.mubr.bf16.vlgmr.msra.gmra.mxu0 %v14876_v24 }
 0x961   : > { %5892 = vmatmul.mubr.bf16.vlgmr.msra.gmra.mxu1 %v14876_v24 }
 0x99d   : > { %v5770_v18 = vpop.f32.mrf.mxu0 }
 0x99f   : > { %v5772_v2 = vpop.f32.mrf.mxu0 }
 0x9a1   : > { %v5811_v11 = vpop.f32.mrf.mxu1  ;;  %v5774_v19 = vpop.f32.mrf.mxu0 }
 0x9a2   : > { %v5812_v16 = vadd.f32 %v5811_v11, %v5770_v18 }
 0x9a3   : > { %v5813_v41 = vpop.f32.mrf.mxu1  ;;  %v5775_v48 = vpop.f32.mrf.mxu0 }
 0x9a4   : > { %v5814_v25 = vadd.f32 %v5813_v41, %v5772_v2 }
 0x9a5   : > { %v5815_v30 = vpop.f32.mrf.mxu1 }
 0x9a7   : > { %v5816_v21 = vpop.f32.mrf.mxu1 }
 0x9a8   : > { %v6034_v21 = vld [vmem:[%s7671_s17 + $0x20] sm:$0xff] (%p7650_p5) }
 0x9a9   : > { %6035 = vst [vmem:[%s6013_s28 + $0x40] sm:$0xff] (%p7650_p5), %v6034_v21 }
 0xa1d   : > { %v5852_v9 = vpop.f32.mrf.mxu0 }
 0xa1e   : > { %v5853_v22 = vadd.f32 %v5852_v9, %v5812_v16  ;;  %v6036_v9 = vld [vmem:[%s7671_s17 + $0x28] sm:$0xff] (%p7650_p5) }
 0xa1f   : > { %v5854_v63 = vpop.f32.mrf.mxu0  ;;  %6037 = vst [vmem:[%s6013_s28 + $0x48] sm:$0xff] (%p7650_p5), %v6036_v9 }
 0xa20   : > { %v5855_v52 = vadd.f32 %v5854_v63, %v5814_v25  ;;  %v6028_v25 = vld [vmem:[%s7671_s17 + $0x8] sm:$0xff] (%p7650_p5) }
 0xa21   : > { %v5893_v26 = vpop.f32.mrf.mxu1  ;;  %v5856_v24 = vpop.f32.mrf.mxu0  ;;  %6029 = vst [vmem:[%s6013_s28 + $0x8] sm:$0xff] (%p7650_p5), %v6028_v25 }
 0xa22   : > { %v5894_v57 = vadd.f32 %v5893_v26, %v5853_v22  ;;  %v6042_v26 = vld [vmem:[%s7671_s17 + $0x40] sm:$0xff] (%p7650_p5) }
 0xa23   : > { %v5895_v8 = vpop.f32.mrf.mxu1  ;;  %v5857_v35 = vpop.f32.mrf.mxu0  ;;  %6043 = vst [vmem:[%s6013_s28 + $0x80] sm:$0xff] (%p7650_p5), %v6042_v26  ;;  %v6050_v24 = vld [vmem:[%s7671_s17 + $0x60] sm:$0xff] (%p7650_p5) }
 0xa24   : > { %7484 = vrcp.f32 %v5894_v57  ;;  %v5896_v43 = vadd.f32 %v5895_v8, %v5855_v52  ;;  %v6044_v52 = vld [vmem:[%s7671_s17 + $0x48] sm:$0xff] (%p7650_p5)  ;;  %6051 = vst [vmem:[%s6013_s28 + $0xc0] sm:$0xff] (%p7650_p5), %v6050_v24 }
 0xa25   : > { %v5897_v62 = vpop.f32.mrf.mxu1  ;;  %6045 = vst [vmem:[%s6013_s28 + $0x88] sm:$0xff] (%p7650_p5), %v6044_v52 }
 0xa26   : > { %7486 = vrcp.f32 %v5896_v43  ;;  %v6052_v43 = vld [vmem:[%s7671_s17 + $0x68] sm:$0xff] (%p7650_p5) }
 0xa27   : > { %v5898_v15 = vpop.f32.mrf.mxu1  ;;  %6053 = vst [vmem:[%s6013_s28 + $0xc8] sm:$0xff] (%p7650_p5), %v6052_v43 }
 0xa31   : > { %v7485_v28 = vpop.eup %7484 }
 0xa32   : > { %v5916_v36 = vrot.slane %v7485_v28, %v12256_v42 }
 0xa33   : > { %v7487_v37 = vpop.eup %7486 }
 0xa34   : > { %v5923_v47 = vmul.f32 %v5916_v36, %v12085_v53  ;;  %v5927_v23 = vmul.f32 %v5916_v36, %v12092_v33  ;;  %v5931_v31 = vmul.f32 %v5916_v36, %v12101_v10  ;;  %v5935_v44 = vmul.f32 %v5916_v36, %v12107_v50  ;;  %v15045_v50 = vld [vmem:[#allocation331_spill] sm:$0xff] }
 0xa35   : > { %v5920_v49 = vrot.slane %v7487_v37, %v12256_v42 }
 0xa36   : > { %v5940_v51 = vmul.f32 %v12269_v12, %v5923_v47  ;;  %v5944_v20 = vmul.f32 %v12269_v12, %v5927_v23  ;;  %v5948_v53 = vmul.f32 %v12269_v12, %v5931_v31  ;;  %v5952_v33 = vmul.f32 %v12269_v12, %v5935_v44 }
 0xa37   : > { %v5924_v10 = vmul.f32 %v5920_v49, %v12089_v32  ;;  %v5928_v27 = vmul.f32 %v5920_v49, %v15045_v50  ;;  %v5932_v34 = vmul.f32 %v5920_v49, %v15046_v39  ;;  %v5936_v61 = vmul.f32 %v5920_v49, %v5570_v56 }
 0xa38   : > { %v5972_v42 = vadd.f32 %v5956_v29, %v5940_v51  ;;  %v5976_v40 = vadd.f32 %v5960_v17, %v5944_v20  ;;  %v5980_v60 = vadd.f32 %v5964_v0, %v5948_v53  ;;  %v5984_v4 = vadd.f32 %v5968_v5, %v5952_v33 }
 0xa39   : > { %v5941_v13 = vmul.f32 %v12269_v12, %v5924_v10  ;;  %v5945_v18 = vmul.f32 %v12269_v12, %v5928_v27  ;;  %v5949_v2 = vmul.f32 %v12269_v12, %v5932_v34  ;;  %v5953_v32 = vmul.f32 %v12269_v12, %v5936_v61  ;;  %v6026_v12 = vld [vmem:[%s7671_s17] sm:$0xff] (%p7650_p5) }
 0xa3a   : > { %5988 = vst [vmem:[%s7671_s17 + $0x10] sm:$0xff] %v5972_v42  ;;  %5992 = vst [vmem:[%s7671_s17 + $0x30] sm:$0xff] %v5976_v40  ;;  %6008 = sbr.rel (!%p7650_p5) target bundleno = 2633 (0xa49), region = 48 }
 0xa3b   : > { %5996 = vst [vmem:[%s7671_s17 + $0x50] sm:$0xff] %v5980_v60  ;;  %6000 = vst [vmem:[%s7671_s17 + $0x70] sm:$0xff] %v5984_v4  ;;  %v5973_v11 = vadd.f32 %v5957_v1, %v5941_v13  ;;  %v5977_v16 = vadd.f32 %v5961_v55, %v5945_v18  ;;  %v5981_v19 = vadd.f32 %v5965_v38, %v5949_v2 }
 0xa3c   : > { %v5985_v41 = vadd.f32 %v5969_v46, %v5953_v32  ;;  %6027 = vst [vmem:[%s6013_s28] sm:$0xff] (%p7650_p5), %v6026_v12 }
 0xa3d   : > { %5989 = vst [vmem:[%s7671_s17 + $0x18] sm:$0xff] %v5973_v11  ;;  %5993 = vst [vmem:[%s7671_s17 + $0x38] sm:$0xff] %v5977_v16 }
 0xa3e   : > { %5997 = vst [vmem:[%s7671_s17 + $0x58] sm:$0xff] %v5981_v19  ;;  %6001 = vst [vmem:[%s7671_s17 + $0x78] sm:$0xff] %v5985_v41 }
 0xa41   : > { %v6030_v48 = vld [vmem:[%s7671_s17 + $0x10] sm:$0xff] }
 0xa42   : > { %v6038_v22 = vld [vmem:[%s7671_s17 + $0x30] sm:$0xff]  ;;  %6031 = vst [vmem:[%s6013_s28 + $0x10] sm:$0xff] %v6030_v48 }
 0xa43   : > { %v6046_v57 = vld [vmem:[%s7671_s17 + $0x50] sm:$0xff]  ;;  %6039 = vst [vmem:[%s6013_s28 + $0x50] sm:$0xff] %v6038_v22 }
 0xa44   : > { %v6032_v30 = vld [vmem:[%s7671_s17 + $0x18] sm:$0xff]  ;;  %6047 = vst [vmem:[%s6013_s28 + $0x90] sm:$0xff] %v6046_v57  ;;  %v6054_v35 = vld [vmem:[%s7671_s17 + $0x70] sm:$0xff] }
 0xa45   : > { %v6040_v63 = vld [vmem:[%s7671_s17 + $0x38] sm:$0xff]  ;;  %6033 = vst [vmem:[%s6013_s28 + $0x18] sm:$0xff] %v6032_v30  ;;  %6055 = vst [vmem:[%s6013_s28 + $0xd0] sm:$0xff] %v6054_v35 }
 0xa46   : > { %v6048_v8 = vld [vmem:[%s7671_s17 + $0x58] sm:$0xff]  ;;  %6041 = vst [vmem:[%s6013_s28 + $0x58] sm:$0xff] %v6040_v63 }
 0xa47   : > { %6049 = vst [vmem:[%s6013_s28 + $0x98] sm:$0xff] %v6048_v8  ;;  %v6056_v62 = vld [vmem:[%s7671_s17 + $0x78] sm:$0xff] }
 0xa48   : > { %6057 = vst [vmem:[%s6013_s28 + $0xd8] sm:$0xff] %v6056_v62 }
 0xa49 PF: > { %s16_s26 = sadd.s32 1, %s7564_s26   ;;  %s15047_s20 = smov %s7544_s21 }
 0xa4a   : > { %p13_p11 = scmp.ge.s32.totalorder %s16_s26, 6   ;;  %s15048_s21 = smov %s7661_s9 }
 0xa4b   : > { %s15049_s22 = smov %s7556_s24  ;;  %s15050_s23 = smov %s7560_s25 }
 0xa4c   : > { %s15051_s24 = smov %s15054_s4  ;;  %s15052_s25 = smov %s15058_s27 }
 0xa4d   :  { %15 = sbr.rel (!%p13_p11) target bundleno = 6 (0x6), region = 98 }

</bundles_post_ra>
